<compile_context>
chip_gen: v6e
topology: v6e:2x2x1
jax: 0.10.0
libtpu: 0.0.40
codegen_flags: <defaults>
</compile_context>

<pallas_src>
import jax
import jax.numpy as jnp
from jax import lax
from jax.experimental import pallas as pl
from jax.experimental.pallas import tpu as pltpu


# ----------------------------------------------------------------------------
# Conv(3x3, pad=1) + bias + ReLU + MaxPool(2,2) as a single K-folded GEMM kernel
# ----------------------------------------------------------------------------
def _conv_gemm_relu_pool_kernel(p_ref, w_ref, b_ref, o_ref, r_scr):
    # p_ref : (NB*H*W, 9*Cin) bf16   im2col patch rows (n-major, then h, then w)
    # w_ref : (9*Cin, Cout)   bf16   conv weights with (ky,kx,cin) folded into K
    # b_ref : (1, Cout)       f32
    # o_ref : (NB, Ho, Wo, Cout) f32 pooled output
    # r_scr : (NB, Ho, W, Cout)  f32 row-pooled intermediate (strided col reads)
    NB, Ho, W, Cout = r_scr.shape
    Wo = W // 2

    # Conv = one K-deep MXU matmul (f32 accumulate), then bias + ReLU in registers.
    y = jnp.dot(p_ref[...], w_ref[...], preferred_element_type=jnp.float32)
    y = jnp.maximum(y + b_ref[...], 0.0)                     # (NB*H*W, Cout)

    # 2x2/2 max pool.
    # Row (H) pooling: split the row dim (leading-dim reshape, layout-preserving
    # since W is a multiple of 8) and take the max -- stays in registers.
    y = y.reshape(NB, Ho, 2, W, Cout)
    r_scr[...] = jnp.maximum(y[:, :, 0], y[:, :, 1])         # (NB, Ho, W, Cout)
    # Column (W) pooling: stride-2 sublane reads from the scratch ref, single
    # lane-dense store of the final result.
    o_ref[...] = jnp.maximum(r_scr[:, :, pl.ds(0, Wo, 2), :],
                             r_scr[:, :, pl.ds(1, Wo, 2), :])


def _im2col_3x3(x):
    # x: (N, H, W, C) f32 -> (N*H*W, 9*C) bf16; rows ordered (n, h, w),
    # columns ordered (ky, kx, c) to match w_hwio.reshape(9*C, Cout).
    N, H, W, C = x.shape
    xp = jnp.pad(x, ((0, 0), (1, 1), (1, 1), (0, 0)))
    cols = [xp[:, ky:ky + H, kx:kx + W, :] for ky in range(3) for kx in range(3)]
    p = jnp.concatenate(cols, axis=-1)                       # (N, H, W, 9*C)
    return p.reshape(N * H * W, 9 * C).astype(jnp.bfloat16)


def conv3x3_relu_pool(x, w_hwio, b, *, nb):
    # x: (N, H, W, Cin) f32 ; w_hwio: (3,3,Cin,Cout) ; returns (N, H//2, W//2, Cout) f32
    N, H, W, Cin = x.shape
    Cout = w_hwio.shape[-1]
    Ho, Wo = H // 2, W // 2
    K9 = 9 * Cin
    rows = nb * H * W

    patches = _im2col_3x3(x)                                 # (N*H*W, K9) bf16
    wm = w_hwio.reshape(K9, Cout).astype(jnp.bfloat16)
    b2 = b.reshape(1, Cout).astype(jnp.float32)

    return pl.pallas_call(
        _conv_gemm_relu_pool_kernel,
        out_shape=jax.ShapeDtypeStruct((N, Ho, Wo, Cout), jnp.float32),
        grid_spec=pltpu.PrefetchScalarGridSpec(
            num_scalar_prefetch=0,
            grid=(N // nb,),
            in_specs=[
                pl.BlockSpec((rows, K9), lambda i: (i, 0)),
                pl.BlockSpec((K9, Cout), lambda i: (0, 0)),
                pl.BlockSpec((1, Cout), lambda i: (0, 0)),
            ],
            out_specs=pl.BlockSpec((nb, Ho, Wo, Cout), lambda i: (i, 0, 0, 0)),
            scratch_shapes=[pltpu.VMEM((nb, Ho, W, Cout), jnp.float32)],
        ),
        compiler_params=pltpu.CompilerParams(
            dimension_semantics=("parallel",)),
    )(patches, wm, b2)


# ----------------------------------------------------------------------------
# fc1 + ReLU + fc2 fused kernel (bf16 MXU operands, lane-dense padded output)
# ----------------------------------------------------------------------------
def _mlp_kernel(x_ref, w1_ref, b1_ref, w2_ref, b2_ref, o_ref):
    x = x_ref[...].astype(jnp.bfloat16)
    h = jnp.dot(x, w1_ref[...], preferred_element_type=jnp.float32)
    h = jnp.maximum(h + b1_ref[...], 0.0)
    o_ref[...] = (jnp.dot(h.astype(jnp.bfloat16), w2_ref[...],
                          preferred_element_type=jnp.float32) + b2_ref[...])


def mlp(x, w1, b1, w2, b2):
    # x: (N, D) f32 ; w1: (D, Hd) bf16 ; w2: (Hd, Op) bf16 (Op lane-padded) ; b*: f32
    N, D = x.shape
    Hd = w1.shape[1]
    Op = w2.shape[1]
    # Split the batch across grid steps only when the sub-block stays (8,128)-legal
    # (feeds both v7x TensorCores for larger batches).
    nb = N // 2 if (N % 2 == 0 and (N // 2) % 8 == 0) else N
    return pl.pallas_call(
        _mlp_kernel,
        out_shape=jax.ShapeDtypeStruct((N, Op), jnp.float32),
        grid_spec=pltpu.PrefetchScalarGridSpec(
            num_scalar_prefetch=0,
            grid=(N // nb,),
            in_specs=[
                pl.BlockSpec((nb, D), lambda i: (i, 0)),
                pl.BlockSpec((D, Hd), lambda i: (0, 0)),
                pl.BlockSpec((1, Hd), lambda i: (0, 0)),
                pl.BlockSpec((Hd, Op), lambda i: (0, 0)),
                pl.BlockSpec((1, Op), lambda i: (0, 0)),
            ],
            out_specs=pl.BlockSpec((nb, Op), lambda i: (i, 0)),
        ),
        compiler_params=pltpu.CompilerParams(
            dimension_semantics=("parallel",)),
    )(x, w1, b1.reshape(1, -1).astype(jnp.float32),
      w2, b2.reshape(1, -1).astype(jnp.float32))


# ----------------------------------------------------------------------------
# Full forward (Pallas kernels + thin JAX glue for im2col / layout prep)
# ----------------------------------------------------------------------------
FC_O_PAD = 128   # lane-dense fc2 output width (sliced back to 10 outside)


@jax.jit
def cifar_cnn_forward(x_nchw, params):
    N = x_nchw.shape[0]
    nb = N // 2 if (N % 2 == 0 and N >= 2) else N            # >=2 parallel grid steps

    x = jnp.transpose(x_nchw, (0, 2, 3, 1)).astype(jnp.float32)    # NCHW -> NHWC
    x = conv3x3_relu_pool(x, params["cw1"], params["cb1"], nb=nb)  # (N,16,16, 32)
    x = conv3x3_relu_pool(x, params["cw2"], params["cb2"], nb=nb)  # (N, 8, 8, 64)
    x = conv3x3_relu_pool(x, params["cw3"], params["cb3"], nb=nb)  # (N, 4, 4,128)

    # torch flattens in (C, H, W) order; instead of transposing the activation,
    # permute fc1's rows once so a plain (H, W, C) flatten is equivalent.
    _, Hl, Wl, Cl = x.shape
    x = x.reshape(N, Hl * Wl * Cl)                                  # HWC flatten (free)
    D1, Hd = params["fw1"].shape
    fw1_hwc = (params["fw1"].reshape(Cl, Hl * Wl, Hd)
               .transpose(1, 0, 2).reshape(D1, Hd))

    nout = params["fw2"].shape[1]
    fw2_p = jnp.pad(params["fw2"], ((0, 0), (0, FC_O_PAD - nout)))
    fb2_p = jnp.pad(params["fb2"], ((0, FC_O_PAD - nout),))

    out = mlp(x, fw1_hwc.astype(jnp.bfloat16), params["fb1"],
              fw2_p.astype(jnp.bfloat16), fb2_p)
    return out[:, :nout]


# ----------------------------------------------------------------------------
# Pure-JAX f32 reference (torch semantics) for correctness checking
# ----------------------------------------------------------------------------
def reference_forward(x_nchw, params):
    x = jnp.transpose(x_nchw, (0, 2, 3, 1)).astype(jnp.float32)
    for w, b in ((params["cw1"], params["cb1"]),
                 (params["cw2"], params["cb2"]),
                 (params["cw3"], params["cb3"])):
        x = lax.conv_general_dilated(
            x, w, window_strides=(1, 1), padding="SAME",
            dimension_numbers=("NHWC", "HWIO", "NHWC")) + b
        x = jnp.maximum(x, 0.0)
        x = lax.reduce_window(x, -jnp.inf, lax.max,
                              (1, 2, 2, 1), (1, 2, 2, 1), "VALID")
    x = jnp.transpose(x, (0, 3, 1, 2)).reshape(x.shape[0], -1)      # CHW flatten
    x = jnp.maximum(x @ params["fw1"] + params["fb1"], 0.0)
    return x @ params["fw2"] + params["fb2"]


# ----------------------------------------------------------------------------
# Deterministic synthetic parameters (shapes follow CifarCNN.__init__)
# ----------------------------------------------------------------------------
def init_params(key):
    ks = jax.random.split(key, 10)

    def conv_w(k, shape):   # HWIO
        fan_in = shape[0] * shape[1] * shape[2]
        return jax.random.normal(k, shape, jnp.float32) / jnp.sqrt(fan_in)

    def lin_w(k, shape):    # (in, out)
        return jax.random.normal(k, shape, jnp.float32) / jnp.sqrt(shape[0])

    def bias(k, n):
        return 0.01 * jax.random.normal(k, (n,), jnp.float32)

    return {
        "cw1": conv_w(ks[0], (3, 3, 3, 32)),     "cb1": bias(ks[1], 32),
        "cw2": conv_w(ks[2], (3, 3, 32, 64)),    "cb2": bias(ks[3], 64),
        "cw3": conv_w(ks[4], (3, 3, 64, 128)),   "cb3": bias(ks[5], 128),
        "fw1": lin_w(ks[6], (128 * 4 * 4, 256)), "fb1": bias(ks[7], 256),
        "fw2": lin_w(ks[8], (256, 10)),          "fb2": bias(ks[9], 10),
    }


if __name__ == "__main__":
    key = jax.random.PRNGKey(0)
    k_x, k_p = jax.random.split(key)

    # CIFAR-style input: the architecture requires 32x32 spatial (fc1 = 128*4*4).
    # Batch 8 so every conv kernel runs 2 parallel grid steps (v7x: both TCs busy).
    x = jax.random.normal(k_x, (8, 3, 32, 32), jnp.float32)          # NCHW, like PyTorch
    params = init_params(k_p)

    out = jax.block_until_ready(cifar_cnn_forward(x, params))        # (8, 10)

    ref = jax.block_until_ready(reference_forward(x, params))
    max_err = float(jnp.max(jnp.abs(out - ref)))
    assert out.shape == (8, 10), out.shape
    # bf16 MXU operands (f32 accumulate) vs pure-f32 reference -> loose tolerance.
    assert max_err < 5e-2, f"mismatch vs reference: {max_err}"

    print("KERNEL_OK")
</pallas_src>

<mosaic_0001>
module attributes {stable_mosaic.version = 11 : i64} {
  func.func @_conv_gemm_relu_pool_kernel(%arg0: i32, %arg1: memref<4096x27xbf16, #tpu.memory_space<vmem>>, %arg2: memref<27x32xbf16, #tpu.memory_space<vmem>>, %arg3: memref<1x32xf32, #tpu.memory_space<vmem>>, %arg4: memref<4x16x16x32xf32, #tpu.memory_space<vmem>>, %arg5: memref<4x16x32x32xf32, #tpu.memory_space<vmem>>) attributes {dimension_semantics = [#tpu.dimension_semantics<parallel>], iteration_bounds = array<i64: 2>, scalar_prefetch = 0 : i64, scratch_operands = 1 : i64, tpu.core_type = #tpu.core_type<tc>, window_params = [{transform_indices = @transform_0, window_bounds = array<i64: 4096, 27>}, {pipeline_mode = #tpu.pipeline_mode<synchronous>, transform_indices = @transform_1, window_bounds = array<i64: 27, 32>}, {pipeline_mode = #tpu.pipeline_mode<synchronous>, transform_indices = @transform_2, window_bounds = array<i64: 1, 32>}, {transform_indices = @transform_3, window_bounds = array<i64: 4, 16, 16, 32>}]} {
    %c0 = arith.constant 0 : index
    %c0_0 = arith.constant 0 : index
    %0 = vector.load %arg1[%c0, %c0_0] : memref<4096x27xbf16, #tpu.memory_space<vmem>>, vector<4096x27xbf16>
    %c0_1 = arith.constant 0 : index
    %c0_2 = arith.constant 0 : index
    %1 = vector.load %arg2[%c0_1, %c0_2] : memref<27x32xbf16, #tpu.memory_space<vmem>>, vector<27x32xbf16>
    %cst = arith.constant dense<0.000000e+00> : vector<4096x32xf32>
    %2 = tpu.matmul %0, %1, %cst {dimension_numbers = #tpu.dot_dimension_numbers<[1], [0], [0], [1], [0, 0, 1, 1], [], []>} : vector<4096x27xbf16>, vector<27x32xbf16>, vector<4096x32xf32> -> vector<4096x32xf32>
    %c0_3 = arith.constant 0 : index
    %c0_4 = arith.constant 0 : index
    %3 = vector.load %arg3[%c0_3, %c0_4] : memref<1x32xf32, #tpu.memory_space<vmem>>, vector<1x32xf32>
    %4 = vector.broadcast %3 : vector<1x32xf32> to vector<4096x32xf32>
    %5 = arith.addf %2, %4 : vector<4096x32xf32>
    %cst_5 = arith.constant 0.000000e+00 : f32
    %6 = vector.broadcast %cst_5 : f32 to vector<4096x32xf32>
    %7 = arith.maximumf %5, %6 : vector<4096x32xf32>
    %8 = vector.shape_cast %7 : vector<4096x32xf32> to vector<4x16x2x32x32xf32>
    %9 = vector.extract_strided_slice %8 {offsets = [0, 0, 0, 0, 0], sizes = [4, 16, 1, 32, 32], strides = [1, 1, 1, 1, 1]} : vector<4x16x2x32x32xf32> to vector<4x16x1x32x32xf32>
    %10 = vector.shape_cast %9 : vector<4x16x1x32x32xf32> to vector<4x16x32x32xf32>
    %11 = vector.extract_strided_slice %8 {offsets = [0, 0, 1, 0, 0], sizes = [4, 16, 1, 32, 32], strides = [1, 1, 1, 1, 1]} : vector<4x16x2x32x32xf32> to vector<4x16x1x32x32xf32>
    %12 = vector.shape_cast %11 : vector<4x16x1x32x32xf32> to vector<4x16x32x32xf32>
    %13 = arith.maximumf %10, %12 : vector<4x16x32x32xf32>
    %c0_6 = arith.constant 0 : index
    %c0_7 = arith.constant 0 : index
    %c0_8 = arith.constant 0 : index
    %c0_9 = arith.constant 0 : index
    %14 = vector.load %arg5[%c0_6, %c0_7, %c0_8, %c0_9] : memref<4x16x32x32xf32, #tpu.memory_space<vmem>>, vector<4x16x32x32xf32>
    tpu.vector_store %arg5[%c0_6, %c0_7, %c0_8, %c0_9], %13 {strides = array<i32>} : memref<4x16x32x32xf32, #tpu.memory_space<vmem>>, vector<4x16x32x32xf32>,
    %c0_10 = arith.constant 0 : index
    %c0_11 = arith.constant 0 : index
    %c0_12 = arith.constant 0 : index
    %c0_13 = arith.constant 0 : index
    %15 = tpu.strided_load %arg5[%c0_10, %c0_11, %c0_12, %c0_13] {strides = array<i32: 1, 1, 2, 1>} : memref<4x16x32x32xf32, #tpu.memory_space<vmem>>, vector<4x16x16x32xf32>
    %c0_14 = arith.constant 0 : index
    %c0_15 = arith.constant 0 : index
    %c1 = arith.constant 1 : index
    %c0_16 = arith.constant 0 : index
    %16 = tpu.strided_load %arg5[%c0_14, %c0_15, %c1, %c0_16] {strides = array<i32: 1, 1, 2, 1>} : memref<4x16x32x32xf32, #tpu.memory_space<vmem>>, vector<4x16x16x32xf32>
    %17 = arith.maximumf %15, %16 : vector<4x16x16x32xf32>
    %c0_17 = arith.constant 0 : index
    %c0_18 = arith.constant 0 : index
    %c0_19 = arith.constant 0 : index
    %c0_20 = arith.constant 0 : index
    %18 = vector.load %arg4[%c0_17, %c0_18, %c0_19, %c0_20] : memref<4x16x16x32xf32, #tpu.memory_space<vmem>>, vector<4x16x16x32xf32>
    tpu.vector_store %arg4[%c0_17, %c0_18, %c0_19, %c0_20], %17 {strides = array<i32>} : memref<4x16x16x32xf32, #tpu.memory_space<vmem>>, vector<4x16x16x32xf32>,
    return
  }
  func.func @transform_0(%arg0: i32) -> (i32, i32) {
    %c0_i32 = arith.constant 0 : i32
    %c0_i32_0 = arith.constant 0 : i32
    return %arg0, %c0_i32 : i32, i32
  }
  func.func @transform_1(%arg0: i32) -> (i32, i32) {
    %c0_i32 = arith.constant 0 : i32
    %c0_i32_0 = arith.constant 0 : i32
    %c0_i32_1 = arith.constant 0 : i32
    return %c0_i32, %c0_i32_0 : i32, i32
  }
  func.func @transform_2(%arg0: i32) -> (i32, i32) {
    %c0_i32 = arith.constant 0 : i32
    %c0_i32_0 = arith.constant 0 : i32
    %c0_i32_1 = arith.constant 0 : i32
    return %c0_i32, %c0_i32_0 : i32, i32
  }
  func.func @transform_3(%arg0: i32) -> (i32, i32, i32, i32) {
    %c0_i32 = arith.constant 0 : i32
    %c0_i32_0 = arith.constant 0 : i32
    %c0_i32_1 = arith.constant 0 : i32
    %c0_i32_2 = arith.constant 0 : i32
    return %arg0, %c0_i32, %c0_i32_0, %c0_i32_1 : i32, i32, i32, i32
  }
}

module attributes {stable_mosaic.version = 11 : i64} {
  func.func @_conv_gemm_relu_pool_kernel(%arg0: i32, %arg1: memref<1024x288xbf16, #tpu.memory_space<vmem>>, %arg2: memref<288x64xbf16, #tpu.memory_space<vmem>>, %arg3: memref<1x64xf32, #tpu.memory_space<vmem>>, %arg4: memref<4x8x8x64xf32, #tpu.memory_space<vmem>>, %arg5: memref<4x8x16x64xf32, #tpu.memory_space<vmem>>) attributes {dimension_semantics = [#tpu.dimension_semantics<parallel>], iteration_bounds = array<i64: 2>, scalar_prefetch = 0 : i64, scratch_operands = 1 : i64, tpu.core_type = #tpu.core_type<tc>, window_params = [{transform_indices = @transform_0, window_bounds = array<i64: 1024, 288>}, {pipeline_mode = #tpu.pipeline_mode<synchronous>, transform_indices = @transform_1, window_bounds = array<i64: 288, 64>}, {pipeline_mode = #tpu.pipeline_mode<synchronous>, transform_indices = @transform_2, window_bounds = array<i64: 1, 64>}, {transform_indices = @transform_3, window_bounds = array<i64: 4, 8, 8, 64>}]} {
    %c0 = arith.constant 0 : index
    %c0_0 = arith.constant 0 : index
    %0 = vector.load %arg1[%c0, %c0_0] : memref<1024x288xbf16, #tpu.memory_space<vmem>>, vector<1024x288xbf16>
    %c0_1 = arith.constant 0 : index
    %c0_2 = arith.constant 0 : index
    %1 = vector.load %arg2[%c0_1, %c0_2] : memref<288x64xbf16, #tpu.memory_space<vmem>>, vector<288x64xbf16>
    %cst = arith.constant dense<0.000000e+00> : vector<1024x64xf32>
    %2 = tpu.matmul %0, %1, %cst {dimension_numbers = #tpu.dot_dimension_numbers<[1], [0], [0], [1], [0, 0, 1, 1], [], []>} : vector<1024x288xbf16>, vector<288x64xbf16>, vector<1024x64xf32> -> vector<1024x64xf32>
    %c0_3 = arith.constant 0 : index
    %c0_4 = arith.constant 0 : index
    %3 = vector.load %arg3[%c0_3, %c0_4] : memref<1x64xf32, #tpu.memory_space<vmem>>, vector<1x64xf32>
    %4 = vector.broadcast %3 : vector<1x64xf32> to vector<1024x64xf32>
    %5 = arith.addf %2, %4 : vector<1024x64xf32>
    %cst_5 = arith.constant 0.000000e+00 : f32
    %6 = vector.broadcast %cst_5 : f32 to vector<1024x64xf32>
    %7 = arith.maximumf %5, %6 : vector<1024x64xf32>
    %8 = vector.shape_cast %7 : vector<1024x64xf32> to vector<4x8x2x16x64xf32>
    %9 = vector.extract_strided_slice %8 {offsets = [0, 0, 0, 0, 0], sizes = [4, 8, 1, 16, 64], strides = [1, 1, 1, 1, 1]} : vector<4x8x2x16x64xf32> to vector<4x8x1x16x64xf32>
    %10 = vector.shape_cast %9 : vector<4x8x1x16x64xf32> to vector<4x8x16x64xf32>
    %11 = vector.extract_strided_slice %8 {offsets = [0, 0, 1, 0, 0], sizes = [4, 8, 1, 16, 64], strides = [1, 1, 1, 1, 1]} : vector<4x8x2x16x64xf32> to vector<4x8x1x16x64xf32>
    %12 = vector.shape_cast %11 : vector<4x8x1x16x64xf32> to vector<4x8x16x64xf32>
    %13 = arith.maximumf %10, %12 : vector<4x8x16x64xf32>
    %c0_6 = arith.constant 0 : index
    %c0_7 = arith.constant 0 : index
    %c0_8 = arith.constant 0 : index
    %c0_9 = arith.constant 0 : index
    %14 = vector.load %arg5[%c0_6, %c0_7, %c0_8, %c0_9] : memref<4x8x16x64xf32, #tpu.memory_space<vmem>>, vector<4x8x16x64xf32>
    tpu.vector_store %arg5[%c0_6, %c0_7, %c0_8, %c0_9], %13 {strides = array<i32>} : memref<4x8x16x64xf32, #tpu.memory_space<vmem>>, vector<4x8x16x64xf32>,
    %c0_10 = arith.constant 0 : index
    %c0_11 = arith.constant 0 : index
    %c0_12 = arith.constant 0 : index
    %c0_13 = arith.constant 0 : index
    %15 = tpu.strided_load %arg5[%c0_10, %c0_11, %c0_12, %c0_13] {strides = array<i32: 1, 1, 2, 1>} : memref<4x8x16x64xf32, #tpu.memory_space<vmem>>, vector<4x8x8x64xf32>
    %c0_14 = arith.constant 0 : index
    %c0_15 = arith.constant 0 : index
    %c1 = arith.constant 1 : index
    %c0_16 = arith.constant 0 : index
    %16 = tpu.strided_load %arg5[%c0_14, %c0_15, %c1, %c0_16] {strides = array<i32: 1, 1, 2, 1>} : memref<4x8x16x64xf32, #tpu.memory_space<vmem>>, vector<4x8x8x64xf32>
    %17 = arith.maximumf %15, %16 : vector<4x8x8x64xf32>
    %c0_17 = arith.constant 0 : index
    %c0_18 = arith.constant 0 : index
    %c0_19 = arith.constant 0 : index
    %c0_20 = arith.constant 0 : index
    %18 = vector.load %arg4[%c0_17, %c0_18, %c0_19, %c0_20] : memref<4x8x8x64xf32, #tpu.memory_space<vmem>>, vector<4x8x8x64xf32>
    tpu.vector_store %arg4[%c0_17, %c0_18, %c0_19, %c0_20], %17 {strides = array<i32>} : memref<4x8x8x64xf32, #tpu.memory_space<vmem>>, vector<4x8x8x64xf32>,
    return
  }
  func.func @transform_0(%arg0: i32) -> (i32, i32) {
    %c0_i32 = arith.constant 0 : i32
    %c0_i32_0 = arith.constant 0 : i32
    return %arg0, %c0_i32 : i32, i32
  }
  func.func @transform_1(%arg0: i32) -> (i32, i32) {
    %c0_i32 = arith.constant 0 : i32
    %c0_i32_0 = arith.constant 0 : i32
    %c0_i32_1 = arith.constant 0 : i32
    return %c0_i32, %c0_i32_0 : i32, i32
  }
  func.func @transform_2(%arg0: i32) -> (i32, i32) {
    %c0_i32 = arith.constant 0 : i32
    %c0_i32_0 = arith.constant 0 : i32
    %c0_i32_1 = arith.constant 0 : i32
    return %c0_i32, %c0_i32_0 : i32, i32
  }
  func.func @transform_3(%arg0: i32) -> (i32, i32, i32, i32) {
    %c0_i32 = arith.constant 0 : i32
    %c0_i32_0 = arith.constant 0 : i32
    %c0_i32_1 = arith.constant 0 : i32
    %c0_i32_2 = arith.constant 0 : i32
    return %arg0, %c0_i32, %c0_i32_0, %c0_i32_1 : i32, i32, i32, i32
  }
}

module attributes {stable_mosaic.version = 11 : i64} {
  func.func @_conv_gemm_relu_pool_kernel(%arg0: i32, %arg1: memref<256x576xbf16, #tpu.memory_space<vmem>>, %arg2: memref<576x128xbf16, #tpu.memory_space<vmem>>, %arg3: memref<1x128xf32, #tpu.memory_space<vmem>>, %arg4: memref<4x4x4x128xf32, #tpu.memory_space<vmem>>, %arg5: memref<4x4x8x128xf32, #tpu.memory_space<vmem>>) attributes {dimension_semantics = [#tpu.dimension_semantics<parallel>], iteration_bounds = array<i64: 2>, scalar_prefetch = 0 : i64, scratch_operands = 1 : i64, tpu.core_type = #tpu.core_type<tc>, window_params = [{transform_indices = @transform_0, window_bounds = array<i64: 256, 576>}, {pipeline_mode = #tpu.pipeline_mode<synchronous>, transform_indices = @transform_1, window_bounds = array<i64: 576, 128>}, {pipeline_mode = #tpu.pipeline_mode<synchronous>, transform_indices = @transform_2, window_bounds = array<i64: 1, 128>}, {transform_indices = @transform_3, window_bounds = array<i64: 4, 4, 4, 128>}]} {
    %c0 = arith.constant 0 : index
    %c0_0 = arith.constant 0 : index
    %0 = vector.load %arg1[%c0, %c0_0] : memref<256x576xbf16, #tpu.memory_space<vmem>>, vector<256x576xbf16>
    %c0_1 = arith.constant 0 : index
    %c0_2 = arith.constant 0 : index
    %1 = vector.load %arg2[%c0_1, %c0_2] : memref<576x128xbf16, #tpu.memory_space<vmem>>, vector<576x128xbf16>
    %cst = arith.constant dense<0.000000e+00> : vector<256x128xf32>
    %2 = tpu.matmul %0, %1, %cst {dimension_numbers = #tpu.dot_dimension_numbers<[1], [0], [0], [1], [0, 0, 1, 1], [], []>} : vector<256x576xbf16>, vector<576x128xbf16>, vector<256x128xf32> -> vector<256x128xf32>
    %c0_3 = arith.constant 0 : index
    %c0_4 = arith.constant 0 : index
    %3 = vector.load %arg3[%c0_3, %c0_4] : memref<1x128xf32, #tpu.memory_space<vmem>>, vector<1x128xf32>
    %4 = vector.broadcast %3 : vector<1x128xf32> to vector<256x128xf32>
    %5 = arith.addf %2, %4 : vector<256x128xf32>
    %cst_5 = arith.constant 0.000000e+00 : f32
    %6 = vector.broadcast %cst_5 : f32 to vector<256x128xf32>
    %7 = arith.maximumf %5, %6 : vector<256x128xf32>
    %8 = vector.shape_cast %7 : vector<256x128xf32> to vector<4x4x2x8x128xf32>
    %9 = vector.extract_strided_slice %8 {offsets = [0, 0, 0, 0, 0], sizes = [4, 4, 1, 8, 128], strides = [1, 1, 1, 1, 1]} : vector<4x4x2x8x128xf32> to vector<4x4x1x8x128xf32>
    %10 = vector.shape_cast %9 : vector<4x4x1x8x128xf32> to vector<4x4x8x128xf32>
    %11 = vector.extract_strided_slice %8 {offsets = [0, 0, 1, 0, 0], sizes = [4, 4, 1, 8, 128], strides = [1, 1, 1, 1, 1]} : vector<4x4x2x8x128xf32> to vector<4x4x1x8x128xf32>
    %12 = vector.shape_cast %11 : vector<4x4x1x8x128xf32> to vector<4x4x8x128xf32>
    %13 = arith.maximumf %10, %12 : vector<4x4x8x128xf32>
    %c0_6 = arith.constant 0 : index
    %c0_7 = arith.constant 0 : index
    %c0_8 = arith.constant 0 : index
    %c0_9 = arith.constant 0 : index
    %14 = vector.load %arg5[%c0_6, %c0_7, %c0_8, %c0_9] : memref<4x4x8x128xf32, #tpu.memory_space<vmem>>, vector<4x4x8x128xf32>
    tpu.vector_store %arg5[%c0_6, %c0_7, %c0_8, %c0_9], %13 {strides = array<i32>} : memref<4x4x8x128xf32, #tpu.memory_space<vmem>>, vector<4x4x8x128xf32>,
    %c0_10 = arith.constant 0 : index
    %c0_11 = arith.constant 0 : index
    %c0_12 = arith.constant 0 : index
    %c0_13 = arith.constant 0 : index
    %15 = tpu.strided_load %arg5[%c0_10, %c0_11, %c0_12, %c0_13] {strides = array<i32: 1, 1, 2, 1>} : memref<4x4x8x128xf32, #tpu.memory_space<vmem>>, vector<4x4x4x128xf32>
    %c0_14 = arith.constant 0 : index
    %c0_15 = arith.constant 0 : index
    %c1 = arith.constant 1 : index
    %c0_16 = arith.constant 0 : index
    %16 = tpu.strided_load %arg5[%c0_14, %c0_15, %c1, %c0_16] {strides = array<i32: 1, 1, 2, 1>} : memref<4x4x8x128xf32, #tpu.memory_space<vmem>>, vector<4x4x4x128xf32>
    %17 = arith.maximumf %15, %16 : vector<4x4x4x128xf32>
    %c0_17 = arith.constant 0 : index
    %c0_18 = arith.constant 0 : index
    %c0_19 = arith.constant 0 : index
    %c0_20 = arith.constant 0 : index
    %18 = vector.load %arg4[%c0_17, %c0_18, %c0_19, %c0_20] : memref<4x4x4x128xf32, #tpu.memory_space<vmem>>, vector<4x4x4x128xf32>
    tpu.vector_store %arg4[%c0_17, %c0_18, %c0_19, %c0_20], %17 {strides = array<i32>} : memref<4x4x4x128xf32, #tpu.memory_space<vmem>>, vector<4x4x4x128xf32>,
    return
  }
  func.func @transform_0(%arg0: i32) -> (i32, i32) {
    %c0_i32 = arith.constant 0 : i32
    %c0_i32_0 = arith.constant 0 : i32
    return %arg0, %c0_i32 : i32, i32
  }
  func.func @transform_1(%arg0: i32) -> (i32, i32) {
    %c0_i32 = arith.constant 0 : i32
    %c0_i32_0 = arith.constant 0 : i32
    %c0_i32_1 = arith.constant 0 : i32
    return %c0_i32, %c0_i32_0 : i32, i32
  }
  func.func @transform_2(%arg0: i32) -> (i32, i32) {
    %c0_i32 = arith.constant 0 : i32
    %c0_i32_0 = arith.constant 0 : i32
    %c0_i32_1 = arith.constant 0 : i32
    return %c0_i32, %c0_i32_0 : i32, i32
  }
  func.func @transform_3(%arg0: i32) -> (i32, i32, i32, i32) {
    %c0_i32 = arith.constant 0 : i32
    %c0_i32_0 = arith.constant 0 : i32
    %c0_i32_1 = arith.constant 0 : i32
    %c0_i32_2 = arith.constant 0 : i32
    return %arg0, %c0_i32, %c0_i32_0, %c0_i32_1 : i32, i32, i32, i32
  }
}

module attributes {stable_mosaic.version = 11 : i64} {
  func.func @_mlp_kernel(%arg0: i32, %arg1: memref<8x2048xf32, #tpu.memory_space<vmem>>, %arg2: memref<2048x256xbf16, #tpu.memory_space<vmem>>, %arg3: memref<1x256xf32, #tpu.memory_space<vmem>>, %arg4: memref<256x128xbf16, #tpu.memory_space<vmem>>, %arg5: memref<1x128xf32, #tpu.memory_space<vmem>>, %arg6: memref<8x128xf32, #tpu.memory_space<vmem>>) attributes {dimension_semantics = [#tpu.dimension_semantics<parallel>], iteration_bounds = array<i64: 1>, scalar_prefetch = 0 : i64, scratch_operands = 0 : i64, tpu.core_type = #tpu.core_type<tc>, window_params = [{transform_indices = @transform_0, window_bounds = array<i64: 8, 2048>}, {pipeline_mode = #tpu.pipeline_mode<synchronous>, transform_indices = @transform_1, window_bounds = array<i64: 2048, 256>}, {pipeline_mode = #tpu.pipeline_mode<synchronous>, transform_indices = @transform_2, window_bounds = array<i64: 1, 256>}, {pipeline_mode = #tpu.pipeline_mode<synchronous>, transform_indices = @transform_3, window_bounds = array<i64: 256, 128>}, {pipeline_mode = #tpu.pipeline_mode<synchronous>, transform_indices = @transform_4, window_bounds = array<i64: 1, 128>}, {transform_indices = @transform_5, window_bounds = array<i64: 8, 128>}]} {
    %c0 = arith.constant 0 : index
    %c0_0 = arith.constant 0 : index
    %0 = vector.load %arg1[%c0, %c0_0] : memref<8x2048xf32, #tpu.memory_space<vmem>>, vector<8x2048xf32>
    %1 = arith.truncf %0 : vector<8x2048xf32> to vector<8x2048xbf16>
    %c0_1 = arith.constant 0 : index
    %c0_2 = arith.constant 0 : index
    %2 = vector.load %arg2[%c0_1, %c0_2] : memref<2048x256xbf16, #tpu.memory_space<vmem>>, vector<2048x256xbf16>
    %cst = arith.constant dense<0.000000e+00> : vector<8x256xf32>
    %3 = tpu.matmul %1, %2, %cst {dimension_numbers = #tpu.dot_dimension_numbers<[1], [0], [0], [1], [0, 0, 1, 1], [], []>} : vector<8x2048xbf16>, vector<2048x256xbf16>, vector<8x256xf32> -> vector<8x256xf32>
    %c0_3 = arith.constant 0 : index
    %c0_4 = arith.constant 0 : index
    %4 = vector.load %arg3[%c0_3, %c0_4] : memref<1x256xf32, #tpu.memory_space<vmem>>, vector<1x256xf32>
    %5 = vector.broadcast %4 : vector<1x256xf32> to vector<8x256xf32>
    %6 = arith.addf %3, %5 : vector<8x256xf32>
    %cst_5 = arith.constant 0.000000e+00 : f32
    %7 = vector.broadcast %cst_5 : f32 to vector<8x256xf32>
    %8 = arith.maximumf %6, %7 : vector<8x256xf32>
    %9 = arith.truncf %8 : vector<8x256xf32> to vector<8x256xbf16>
    %c0_6 = arith.constant 0 : index
    %c0_7 = arith.constant 0 : index
    %10 = vector.load %arg4[%c0_6, %c0_7] : memref<256x128xbf16, #tpu.memory_space<vmem>>, vector<256x128xbf16>
    %cst_8 = arith.constant dense<0.000000e+00> : vector<8x128xf32>
    %11 = tpu.matmul %9, %10, %cst_8 {dimension_numbers = #tpu.dot_dimension_numbers<[1], [0], [0], [1], [0, 0, 1, 1], [], []>} : vector<8x256xbf16>, vector<256x128xbf16>, vector<8x128xf32> -> vector<8x128xf32>
    %c0_9 = arith.constant 0 : index
    %c0_10 = arith.constant 0 : index
    %12 = vector.load %arg5[%c0_9, %c0_10] : memref<1x128xf32, #tpu.memory_space<vmem>>, vector<1x128xf32>
    %13 = vector.broadcast %12 : vector<1x128xf32> to vector<8x128xf32>
    %14 = arith.addf %11, %13 : vector<8x128xf32>
    %c0_11 = arith.constant 0 : index
    %c0_12 = arith.constant 0 : index
    %15 = vector.load %arg6[%c0_11, %c0_12] : memref<8x128xf32, #tpu.memory_space<vmem>>, vector<8x128xf32>
    tpu.vector_store %arg6[%c0_11, %c0_12], %14 {strides = array<i32>} : memref<8x128xf32, #tpu.memory_space<vmem>>, vector<8x128xf32>,
    return
  }
  func.func @transform_0(%arg0: i32) -> (i32, i32) {
    %c0_i32 = arith.constant 0 : i32
    %c0_i32_0 = arith.constant 0 : i32
    return %arg0, %c0_i32 : i32, i32
  }
  func.func @transform_1(%arg0: i32) -> (i32, i32) {
    %c0_i32 = arith.constant 0 : i32
    %c0_i32_0 = arith.constant 0 : i32
    %c0_i32_1 = arith.constant 0 : i32
    return %c0_i32, %c0_i32_0 : i32, i32
  }
  func.func @transform_2(%arg0: i32) -> (i32, i32) {
    %c0_i32 = arith.constant 0 : i32
    %c0_i32_0 = arith.constant 0 : i32
    %c0_i32_1 = arith.constant 0 : i32
    return %c0_i32, %c0_i32_0 : i32, i32
  }
  func.func @transform_3(%arg0: i32) -> (i32, i32) {
    %c0_i32 = arith.constant 0 : i32
    %c0_i32_0 = arith.constant 0 : i32
    %c0_i32_1 = arith.constant 0 : i32
    return %c0_i32, %c0_i32_0 : i32, i32
  }
  func.func @transform_4(%arg0: i32) -> (i32, i32) {
    %c0_i32 = arith.constant 0 : i32
    %c0_i32_0 = arith.constant 0 : i32
    %c0_i32_1 = arith.constant 0 : i32
    return %c0_i32, %c0_i32_0 : i32, i32
  }
  func.func @transform_5(%arg0: i32) -> (i32, i32) {
    %c0_i32 = arith.constant 0 : i32
    %c0_i32_0 = arith.constant 0 : i32
    return %arg0, %c0_i32 : i32, i32
  }
}

</mosaic_0001>

<bundles_post_ra>
// kernel: cifar_cnn_forward.4
= control target key start
LH: loop header
LB: loop body
LE: loop exit
PB: predicated region body
PF: predicated region fallthrough
CT: control target
= control target key end

     0   :  { %s8305_s12 = smov 0   ;;  %s10140_s0 = inlined_call_operand.vmem [shape: bf16[8192,27], index: 0, kind: input, shape index: {}]   ;;  %s10141_s1 = inlined_call_operand.vmem [shape: bf16[27,32], index: 1, kind: input, shape index: {}]   ;;  %s10142_s2 = inlined_call_operand.vmem [shape: f32[1,32], index: 2, kind: input, shape index: {}]   ;;  %s10143_s3 = inlined_call_operand.vmem [shape: f32[8,16,16,32], index: 3, kind: output, shape index: {}]  }
   0x1 LB: > { %s6698_s13 = sadd.s32 4294967295, %s8282_s12   ;;  %p6702_p0 = scmp.ge.s32.totalorder %s8282_s12, 1  ;;  %s8282_s12 = sphi %s8305_s12, %s13_s12  }
   0x2   : > { %p138_p1 = scmp.lt.s32.totalorder %s8282_s12, 3 }
   0x4   : > { %p139_p2 = pnand %p6702_p0, %p138_p1 }
   0x5   : > { %s6703_s16 = sshll.u32 (!%p139_p2), %s6698_s13, 9  ;;  %s8551_s25 = sshll.u32 (!%p139_p2), %s6698_s13, 2 }
   0x6   : > { %142 = sbr.rel (%p139_p2) target bundleno = 745 (0x2e9), region = 32  ;;  %p164_p3 = scmp.lt.s32.totalorder (!%p139_p2), %s6703_s16, 1023 }
   0x7   : > { %p170_p4 = scmp.lt.s32.totalorder (!%p139_p2), %s8551_s25, 7 }
   0xb   : > { %v8013_v0 = vld [vmem:[%s10141_s1 + $0x8] sm:$0x3f]   ;;  %vm2760_vm0 = vcmask 1044480   ;;  %vm2761_vm1 = vcmask 1045504   ;;  %v8284_v1 = vmov 65535   ;;  %v8014_v5 = vld [vmem:[%s10141_s1] sm:$0xff]  }
   0xc   : > { %v2762_v2 = vsel %vm2760_vm0, 4294967295, %v8284_v1  ;;  %s10145_s16 = smov (!%p164_p3, %s6703_s16), 1023  ;;  %vm1991_vm2 = vcmask 220160   ;;  %vm5616_vm3 = vcmask 261120   ;;  %s10147_s25 = smov (!%p170_p4, %s8551_s25), 7 }
   0xd   : > { %v2763_v3 = vsel %vm2761_vm1, %v2762_v2, 0  ;;  %s6704_s19 = sshll.u32 %s10145_s16, 2  ;;  %s7225_s26 = sshll.u32 %s10147_s25, 8 }
   0xe   : > { %v2765_v4 = vand.u32 %v8013_v0, %v2763_v3  ;;  %s8324_s22 = scalar_lea.vmem %s10140_s0, %s6704_s19  ;;  %s8620_s29 = scalar_lea.vmem %s10143_s3, %s7225_s26 }
   0xf   : > { %v8015_v6 = vld [vmem:[%s8324_s22] sm:$0xff]   ;;  %v8017_v8 = vld [vmem:[%s8324_s22 + $0x8] sm:$0xff]   ;;  %v8019_v10 = vld [vmem:[%s8324_s22 + $0x10] sm:$0xff]  }
  0x10   : > { %7484 = vmatprep.subr.bf16.mxu0 %v2765_v4  ;;  %8000 = vmatprep.subr.bf16.mxu1 %v2765_v4  ;;  %v8016_v7 = vld [vmem:[%s8324_s22 + $0x400] sm:$0xff]   ;;  %v8018_v9 = vld [vmem:[%s8324_s22 + $0x408] sm:$0xff]   ;;  %v8020_v11 = vld [vmem:[%s8324_s22 + $0x410] sm:$0xff]  }
  0x11   : > { %7485 = vmatpush3.bf16.msra.mxu0 %v2765_v4  ;;  %8002 = vmatpush3.bf16.msra.mxu1 %v2765_v4  ;;  %v8021_v12 = vld [vmem:[%s8324_s22 + $0x18] sm:$0xff]   ;;  %v8023_v14 = vld [vmem:[%s8324_s22 + $0x20] sm:$0xff]   ;;  %v8025_v16 = vld [vmem:[%s8324_s22 + $0x28] sm:$0xff]  }
  0x12   : > { %7486 = vmatprep.subr.bf16.mxu0 %v8014_v5  ;;  %8001 = vmatprep.subr.bf16.mxu1 %v8014_v5  ;;  %v8022_v13 = vld [vmem:[%s8324_s22 + $0x418] sm:$0xff]   ;;  %v8024_v15 = vld [vmem:[%s8324_s22 + $0x420] sm:$0xff]   ;;  %v8026_v17 = vld [vmem:[%s8324_s22 + $0x428] sm:$0xff]  }
  0x13   : > { %7488 = vmatprep.mubr.msk.bf16.mxu0 %vm1991_vm2, %v8015_v6  ;;  %7744 = vmatprep.mubr.msk.bf16.mxu1 %vm1991_vm2, %v8016_v7  ;;  %v8027_v18 = vld [vmem:[%s8324_s22 + $0x30] sm:$0xff]   ;;  %v8029_v20 = vld [vmem:[%s8324_s22 + $0x38] sm:$0xff]   ;;  %v8031_v22 = vld [vmem:[%s8324_s22 + $0x40] sm:$0xff]  }
  0x14   : > { %v8028_v19 = vld [vmem:[%s8324_s22 + $0x430] sm:$0xff]   ;;  %v8030_v21 = vld [vmem:[%s8324_s22 + $0x438] sm:$0xff]   ;;  %v8032_v23 = vld [vmem:[%s8324_s22 + $0x440] sm:$0xff]  }
  0x15   : > { %7487 = vmatpush3.bf16.msra.mxu0 %v8014_v5  ;;  %8003 = vmatpush3.bf16.msra.mxu1 %v8014_v5  ;;  %v8033_v24 = vld [vmem:[%s8324_s22 + $0x48] sm:$0xff]   ;;  %v8035_v26 = vld [vmem:[%s8324_s22 + $0x50] sm:$0xff]   ;;  %v8037_v28 = vld [vmem:[%s8324_s22 + $0x58] sm:$0xff]  }
  0x16   : > { %v8034_v25 = vld [vmem:[%s8324_s22 + $0x448] sm:$0xff]   ;;  %v8036_v27 = vld [vmem:[%s8324_s22 + $0x450] sm:$0xff]   ;;  %v8038_v29 = vld [vmem:[%s8324_s22 + $0x458] sm:$0xff]  }
  0x17   : > { %v8039_v30 = vld [vmem:[%s8324_s22 + $0x60] sm:$0xff]   ;;  %v8041_v32 = vld [vmem:[%s8324_s22 + $0x68] sm:$0xff]   ;;  %v8043_v34 = vld [vmem:[%s8324_s22 + $0x70] sm:$0xff]  }
  0x18   : > { %7489 = vmatmul.mubr.msk.bf16.vlgmr.msra.gmra.mxu0 %vm1991_vm2, %v8017_v8  ;;  %7745 = vmatmul.mubr.msk.bf16.vlgmr.msra.gmra.mxu1 %vm1991_vm2, %v8018_v9  ;;  %v8040_v31 = vld [vmem:[%s8324_s22 + $0x460] sm:$0xff]   ;;  %v8042_v33 = vld [vmem:[%s8324_s22 + $0x468] sm:$0xff]   ;;  %v8044_v35 = vld [vmem:[%s8324_s22 + $0x470] sm:$0xff]  }
  0x19   : > { %7492 = vmatprep.mubr.msk.bf16.mxu0 %vm1991_vm2, %v8019_v10  ;;  %7748 = vmatprep.mubr.msk.bf16.mxu1 %vm1991_vm2, %v8020_v11  ;;  %v8045_v36 = vld [vmem:[%s8324_s22 + $0x78] sm:$0xff]   ;;  %v8047_v38 = vld [vmem:[%s8324_s22 + $0x80] sm:$0xff]   ;;  %v8049_v40 = vld [vmem:[%s8324_s22 + $0x88] sm:$0xff]  }
  0x1a   : > { %v8046_v37 = vld [vmem:[%s8324_s22 + $0x478] sm:$0xff]   ;;  %v8048_v39 = vld [vmem:[%s8324_s22 + $0x480] sm:$0xff]   ;;  %v8050_v41 = vld [vmem:[%s8324_s22 + $0x488] sm:$0xff]  }
  0x1b   : > { %v8051_v42 = vld [vmem:[%s8324_s22 + $0x90] sm:$0xff]   ;;  %v8053_v44 = vld [vmem:[%s8324_s22 + $0x98] sm:$0xff]   ;;  %v8055_v46 = vld [vmem:[%s8324_s22 + $0xa0] sm:$0xff]  }
  0x1c   : > { %v8052_v43 = vld [vmem:[%s8324_s22 + $0x490] sm:$0xff]   ;;  %v8054_v45 = vld [vmem:[%s8324_s22 + $0x498] sm:$0xff]   ;;  %v8056_v47 = vld [vmem:[%s8324_s22 + $0x4a0] sm:$0xff]  }
  0x1d   : > { %v8057_v48 = vld [vmem:[%s8324_s22 + $0xa8] sm:$0xff]   ;;  %v8059_v50 = vld [vmem:[%s8324_s22 + $0xb0] sm:$0xff]   ;;  %v8061_v52 = vld [vmem:[%s8324_s22 + $0xb8] sm:$0xff]  }
  0x1e   : > { %v8058_v49 = vld [vmem:[%s8324_s22 + $0x4a8] sm:$0xff]   ;;  %v8060_v51 = vld [vmem:[%s8324_s22 + $0x4b0] sm:$0xff]   ;;  %v8062_v53 = vld [vmem:[%s8324_s22 + $0x4b8] sm:$0xff]  }
  0x1f   : > { %v8063_v54 = vld [vmem:[%s8324_s22 + $0xc0] sm:$0xff]   ;;  %v8065_v56 = vld [vmem:[%s8324_s22 + $0xc8] sm:$0xff]   ;;  %v8067_v58 = vld [vmem:[%s8324_s22 + $0xd0] sm:$0xff]  }
  0x20   : > { %7493 = vmatmul.mubr.msk.bf16.gmra.mxu0 %vm1991_vm2, %v8021_v12  ;;  %7749 = vmatmul.mubr.msk.bf16.gmra.mxu1 %vm1991_vm2, %v8022_v13  ;;  %v8064_v55 = vld [vmem:[%s8324_s22 + $0x4c0] sm:$0xff]   ;;  %v8066_v57 = vld [vmem:[%s8324_s22 + $0x4c8] sm:$0xff]   ;;  %v8068_v59 = vld [vmem:[%s8324_s22 + $0x4d0] sm:$0xff]  }
  0x21   : > { %7496 = vmatprep.mubr.msk.bf16.mxu0 %vm1991_vm2, %v8023_v14  ;;  %7752 = vmatprep.mubr.msk.bf16.mxu1 %vm1991_vm2, %v8024_v15  ;;  %v8069_v60 = vld [vmem:[%s8324_s22 + $0xd8] sm:$0xff]   ;;  %v8071_v62 = vld [vmem:[%s8324_s22 + $0xe0] sm:$0xff]   ;;  %v8073_v0 = vld [vmem:[%s8324_s22 + $0xe8] sm:$0xff]  }
  0x22   : > { %v8070_v61 = vld [vmem:[%s8324_s22 + $0x4d8] sm:$0xff]   ;;  %v8072_v63 = vld [vmem:[%s8324_s22 + $0x4e0] sm:$0xff]   ;;  %v8074_v1 = vld [vmem:[%s8324_s22 + $0x4e8] sm:$0xff]  }
  0x23   : > { %v8075_v2 = vld [vmem:[%s8324_s22 + $0xf0] sm:$0xff]   ;;  %v8077_v4 = vld [vmem:[%s8324_s22 + $0xf8] sm:$0xff]   ;;  %v8079_v6 = vld [vmem:[%s8324_s22 + $0x100] sm:$0xff]  }
  0x24   : > { %v8076_v3 = vld [vmem:[%s8324_s22 + $0x4f0] sm:$0xff]   ;;  %v8078_v5 = vld [vmem:[%s8324_s22 + $0x4f8] sm:$0xff]   ;;  %v8080_v7 = vld [vmem:[%s8324_s22 + $0x500] sm:$0xff]  }
  0x25   : > { %v8081_v8 = vld [vmem:[%s8324_s22 + $0x108] sm:$0xff]   ;;  %v8083_v10 = vld [vmem:[%s8324_s22 + $0x110] sm:$0xff]   ;;  %v8085_v12 = vld [vmem:[%s8324_s22 + $0x118] sm:$0xff]  }
  0x26   : > { %v8082_v9 = vld [vmem:[%s8324_s22 + $0x508] sm:$0xff]   ;;  %v8084_v11 = vld [vmem:[%s8324_s22 + $0x510] sm:$0xff]   ;;  %v8086_v13 = vld [vmem:[%s8324_s22 + $0x518] sm:$0xff]  }
  0x27   : > { %v8087_v14 = vld [vmem:[%s8324_s22 + $0x120] sm:$0xff]  }
  0x28   : > { %7497 = vmatmul.mubr.msk.bf16.gmra.mxu0 %vm1991_vm2, %v8025_v16  ;;  %7753 = vmatmul.mubr.msk.bf16.gmra.mxu1 %vm1991_vm2, %v8026_v17  ;;  %v8088_v15 = vld [vmem:[%s8324_s22 + $0x520] sm:$0xff]   ;;  %v8089_v16 = vld [vmem:[%s8324_s22 + $0x128] sm:$0xff]  }
  0x29   : > { %7500 = vmatprep.mubr.msk.bf16.mxu0 %vm1991_vm2, %v8027_v18  ;;  %7756 = vmatprep.mubr.msk.bf16.mxu1 %vm1991_vm2, %v8028_v19  ;;  %v8090_v17 = vld [vmem:[%s8324_s22 + $0x528] sm:$0xff]   ;;  %v8091_v18 = vld [vmem:[%s8324_s22 + $0x130] sm:$0xff]  }
  0x2a   : > { %v8092_v19 = vld [vmem:[%s8324_s22 + $0x530] sm:$0xff]  }
  0x30   : > { %7501 = vmatmul.mubr.msk.bf16.gmra.mxu0 %vm1991_vm2, %v8029_v20  ;;  %7757 = vmatmul.mubr.msk.bf16.gmra.mxu1 %vm1991_vm2, %v8030_v21  ;;  %v8093_v20 = vld [vmem:[%s8324_s22 + $0x138] sm:$0xff]  }
  0x31   : > { %7504 = vmatprep.mubr.msk.bf16.mxu0 %vm1991_vm2, %v8031_v22  ;;  %7760 = vmatprep.mubr.msk.bf16.mxu1 %vm1991_vm2, %v8032_v23  ;;  %v8094_v21 = vld [vmem:[%s8324_s22 + $0x538] sm:$0xff]   ;;  %v8095_v22 = vld [vmem:[%s8324_s22 + $0x140] sm:$0xff]  }
  0x32   : > { %v8096_v23 = vld [vmem:[%s8324_s22 + $0x540] sm:$0xff]  }
  0x38   : > { %7505 = vmatmul.mubr.msk.bf16.gmra.mxu0 %vm1991_vm2, %v8033_v24  ;;  %7761 = vmatmul.mubr.msk.bf16.gmra.mxu1 %vm1991_vm2, %v8034_v25  ;;  %v8097_v24 = vld [vmem:[%s8324_s22 + $0x148] sm:$0xff]  }
  0x39   : > { %7508 = vmatprep.mubr.msk.bf16.mxu0 %vm1991_vm2, %v8035_v26  ;;  %7764 = vmatprep.mubr.msk.bf16.mxu1 %vm1991_vm2, %v8036_v27  ;;  %v8098_v25 = vld [vmem:[%s8324_s22 + $0x548] sm:$0xff]   ;;  %v8099_v26 = vld [vmem:[%s8324_s22 + $0x150] sm:$0xff]  }
  0x3a   : > { %v8100_v27 = vld [vmem:[%s8324_s22 + $0x550] sm:$0xff]  }
  0x40   : > { %7509 = vmatmul.mubr.msk.bf16.gmra.mxu0 %vm1991_vm2, %v8037_v28  ;;  %7765 = vmatmul.mubr.msk.bf16.gmra.mxu1 %vm1991_vm2, %v8038_v29  ;;  %v8101_v28 = vld [vmem:[%s8324_s22 + $0x158] sm:$0xff]  }
  0x41   : > { %7512 = vmatprep.mubr.msk.bf16.mxu0 %vm1991_vm2, %v8039_v30  ;;  %7768 = vmatprep.mubr.msk.bf16.mxu1 %vm1991_vm2, %v8040_v31  ;;  %v8102_v29 = vld [vmem:[%s8324_s22 + $0x558] sm:$0xff]   ;;  %v8103_v30 = vld [vmem:[%s8324_s22 + $0x160] sm:$0xff]  }
  0x42   : > { %v8104_v31 = vld [vmem:[%s8324_s22 + $0x560] sm:$0xff]  }
  0x48   : > { %7513 = vmatmul.mubr.msk.bf16.gmra.mxu0 %vm1991_vm2, %v8041_v32  ;;  %7769 = vmatmul.mubr.msk.bf16.gmra.mxu1 %vm1991_vm2, %v8042_v33  ;;  %v8105_v32 = vld [vmem:[%s8324_s22 + $0x168] sm:$0xff]  }
  0x49   : > { %7516 = vmatprep.mubr.msk.bf16.mxu0 %vm1991_vm2, %v8043_v34  ;;  %7772 = vmatprep.mubr.msk.bf16.mxu1 %vm1991_vm2, %v8044_v35  ;;  %v8106_v33 = vld [vmem:[%s8324_s22 + $0x568] sm:$0xff]   ;;  %v8107_v34 = vld [vmem:[%s8324_s22 + $0x170] sm:$0xff]  }
  0x4a   : > { %v8108_v35 = vld [vmem:[%s8324_s22 + $0x570] sm:$0xff]  }
  0x50   : > { %7517 = vmatmul.mubr.msk.bf16.gmra.mxu0 %vm1991_vm2, %v8045_v36  ;;  %7773 = vmatmul.mubr.msk.bf16.gmra.mxu1 %vm1991_vm2, %v8046_v37  ;;  %v8109_v36 = vld [vmem:[%s8324_s22 + $0x178] sm:$0xff]  }
  0x51   : > { %7520 = vmatprep.mubr.msk.bf16.mxu0 %vm1991_vm2, %v8047_v38  ;;  %7776 = vmatprep.mubr.msk.bf16.mxu1 %vm1991_vm2, %v8048_v39  ;;  %v8110_v37 = vld [vmem:[%s8324_s22 + $0x578] sm:$0xff]   ;;  %v8111_v38 = vld [vmem:[%s8324_s22 + $0x180] sm:$0xff]  }
  0x52   : > { %v8112_v39 = vld [vmem:[%s8324_s22 + $0x580] sm:$0xff]  }
  0x58   : > { %7521 = vmatmul.mubr.msk.bf16.gmra.mxu0 %vm1991_vm2, %v8049_v40  ;;  %7777 = vmatmul.mubr.msk.bf16.gmra.mxu1 %vm1991_vm2, %v8050_v41  ;;  %v8113_v40 = vld [vmem:[%s8324_s22 + $0x188] sm:$0xff]  }
  0x59   : > { %7524 = vmatprep.mubr.msk.bf16.mxu0 %vm1991_vm2, %v8051_v42  ;;  %7780 = vmatprep.mubr.msk.bf16.mxu1 %vm1991_vm2, %v8052_v43  ;;  %v8114_v41 = vld [vmem:[%s8324_s22 + $0x588] sm:$0xff]   ;;  %v8115_v42 = vld [vmem:[%s8324_s22 + $0x190] sm:$0xff]  }
  0x5a   : > { %v8116_v43 = vld [vmem:[%s8324_s22 + $0x590] sm:$0xff]  }
  0x60   : > { %7525 = vmatmul.mubr.msk.bf16.gmra.mxu0 %vm1991_vm2, %v8053_v44  ;;  %7781 = vmatmul.mubr.msk.bf16.gmra.mxu1 %vm1991_vm2, %v8054_v45  ;;  %v8529_v45 = vld [vmem:[%s10142_s2] ss:$0 sm:$0xff] }
  0x61   : > { %7528 = vmatprep.mubr.msk.bf16.mxu0 %vm1991_vm2, %v8055_v46  ;;  %7784 = vmatprep.mubr.msk.bf16.mxu1 %vm1991_vm2, %v8056_v47 }
  0x68   : > { %7529 = vmatmul.mubr.msk.bf16.gmra.mxu0 %vm1991_vm2, %v8057_v48  ;;  %7785 = vmatmul.mubr.msk.bf16.gmra.mxu1 %vm1991_vm2, %v8058_v49  ;;  %v8117_v49 = vld [vmem:[%s8324_s22 + $0x198] sm:$0xff]  }
  0x69   : > { %7532 = vmatprep.mubr.msk.bf16.mxu0 %vm1991_vm2, %v8059_v50  ;;  %7788 = vmatprep.mubr.msk.bf16.mxu1 %vm1991_vm2, %v8060_v51  ;;  %v8118_v50 = vld [vmem:[%s8324_s22 + $0x598] sm:$0xff]   ;;  %v8119_v51 = vld [vmem:[%s8324_s22 + $0x1a0] sm:$0xff]  }
  0x70   : > { %7533 = vmatmul.mubr.msk.bf16.gmra.mxu0 %vm1991_vm2, %v8061_v52  ;;  %7789 = vmatmul.mubr.msk.bf16.gmra.mxu1 %vm1991_vm2, %v8062_v53 }
  0x71   : > { %7536 = vmatprep.mubr.msk.bf16.mxu0 %vm1991_vm2, %v8063_v54  ;;  %7792 = vmatprep.mubr.msk.bf16.mxu1 %vm1991_vm2, %v8064_v55 }
  0x78   : > { %7537 = vmatmul.mubr.msk.bf16.gmra.mxu0 %vm1991_vm2, %v8065_v56  ;;  %7793 = vmatmul.mubr.msk.bf16.gmra.mxu1 %vm1991_vm2, %v8066_v57 }
  0x79   : > { %7540 = vmatprep.mubr.msk.bf16.mxu0 %vm1991_vm2, %v8067_v58  ;;  %7796 = vmatprep.mubr.msk.bf16.mxu1 %vm1991_vm2, %v8068_v59 }
  0x80   : > { %7541 = vmatmul.mubr.msk.bf16.gmra.mxu0 %vm1991_vm2, %v8069_v60  ;;  %7797 = vmatmul.mubr.msk.bf16.gmra.mxu1 %vm1991_vm2, %v8070_v61  ;;  %v8120_v60 = vld [vmem:[%s8324_s22 + $0x5a0] sm:$0xff]  }
  0x81   : > { %7544 = vmatprep.mubr.msk.bf16.mxu0 %vm1991_vm2, %v8071_v62  ;;  %7800 = vmatprep.mubr.msk.bf16.mxu1 %vm1991_vm2, %v8072_v63 }
  0x88   : > { %7545 = vmatmul.mubr.msk.bf16.gmra.mxu0 %vm1991_vm2, %v8073_v0  ;;  %7801 = vmatmul.mubr.msk.bf16.gmra.mxu1 %vm1991_vm2, %v8074_v1 }
  0x89   : > { %7548 = vmatprep.mubr.msk.bf16.mxu0 %vm1991_vm2, %v8075_v2  ;;  %7804 = vmatprep.mubr.msk.bf16.mxu1 %vm1991_vm2, %v8076_v3 }
  0x90   : > { %7549 = vmatmul.mubr.msk.bf16.gmra.mxu0 %vm1991_vm2, %v8077_v4  ;;  %7805 = vmatmul.mubr.msk.bf16.gmra.mxu1 %vm1991_vm2, %v8078_v5 }
  0x91   : > { %7552 = vmatprep.mubr.msk.bf16.mxu0 %vm1991_vm2, %v8079_v6  ;;  %7808 = vmatprep.mubr.msk.bf16.mxu1 %vm1991_vm2, %v8080_v7 }
  0x98   : > { %7553 = vmatmul.mubr.msk.bf16.gmra.mxu0 %vm1991_vm2, %v8081_v8  ;;  %7809 = vmatmul.mubr.msk.bf16.gmra.mxu1 %vm1991_vm2, %v8082_v9 }
  0x99   : > { %7556 = vmatprep.mubr.msk.bf16.mxu0 %vm1991_vm2, %v8083_v10  ;;  %7812 = vmatprep.mubr.msk.bf16.mxu1 %vm1991_vm2, %v8084_v11  ;;  %v8121_v11 = vld [vmem:[%s8324_s22 + $0x1a8] sm:$0xff]  }
  0xa0   : > { %7557 = vmatmul.mubr.msk.bf16.gmra.mxu0 %vm1991_vm2, %v8085_v12  ;;  %7813 = vmatmul.mubr.msk.bf16.gmra.mxu1 %vm1991_vm2, %v8086_v13  ;;  %v8122_v12 = vld [vmem:[%s8324_s22 + $0x5a8] sm:$0xff]  }
  0xa1   : > { %7560 = vmatprep.mubr.msk.bf16.mxu0 %vm1991_vm2, %v8087_v14  ;;  %7816 = vmatprep.mubr.msk.bf16.mxu1 %vm1991_vm2, %v8088_v15 }
  0xa8   : > { %7561 = vmatmul.mubr.msk.bf16.gmra.mxu0 %vm1991_vm2, %v8089_v16  ;;  %7817 = vmatmul.mubr.msk.bf16.gmra.mxu1 %vm1991_vm2, %v8090_v17  ;;  %v8123_v17 = vld [vmem:[%s8324_s22 + $0x1b0] sm:$0xff]  }
  0xa9   : > { %7564 = vmatprep.mubr.msk.bf16.mxu0 %vm1991_vm2, %v8091_v18  ;;  %7820 = vmatprep.mubr.msk.bf16.mxu1 %vm1991_vm2, %v8092_v19  ;;  %v8124_v18 = vld [vmem:[%s8324_s22 + $0x5b0] sm:$0xff]  }
  0xb0   : > { %7565 = vmatmul.mubr.msk.bf16.gmra.mxu0 %vm1991_vm2, %v8093_v20  ;;  %7821 = vmatmul.mubr.msk.bf16.gmra.mxu1 %vm1991_vm2, %v8094_v21 }
  0xb1   : > { %7568 = vmatprep.mubr.msk.bf16.mxu0 %vm1991_vm2, %v8095_v22  ;;  %7824 = vmatprep.mubr.msk.bf16.mxu1 %vm1991_vm2, %v8096_v23 }
  0xb8   : > { %7569 = vmatmul.mubr.msk.bf16.gmra.mxu0 %vm1991_vm2, %v8097_v24  ;;  %7825 = vmatmul.mubr.msk.bf16.gmra.mxu1 %vm1991_vm2, %v8098_v25 }
  0xb9   : > { %7572 = vmatprep.mubr.msk.bf16.mxu0 %vm1991_vm2, %v8099_v26  ;;  %7828 = vmatprep.mubr.msk.bf16.mxu1 %vm1991_vm2, %v8100_v27 }
  0xc0   : > { %7573 = vmatmul.mubr.msk.bf16.gmra.mxu0 %vm1991_vm2, %v8101_v28  ;;  %7829 = vmatmul.mubr.msk.bf16.gmra.mxu1 %vm1991_vm2, %v8102_v29 }
  0xc1   : > { %7576 = vmatprep.mubr.msk.bf16.mxu0 %vm1991_vm2, %v8103_v30  ;;  %7832 = vmatprep.mubr.msk.bf16.mxu1 %vm1991_vm2, %v8104_v31 }
  0xc8   : > { %7577 = vmatmul.mubr.msk.bf16.gmra.mxu0 %vm1991_vm2, %v8105_v32  ;;  %7833 = vmatmul.mubr.msk.bf16.gmra.mxu1 %vm1991_vm2, %v8106_v33 }
  0xc9   : > { %7580 = vmatprep.mubr.msk.bf16.mxu0 %vm1991_vm2, %v8107_v34  ;;  %7836 = vmatprep.mubr.msk.bf16.mxu1 %vm1991_vm2, %v8108_v35 }
  0xd0   : > { %7581 = vmatmul.mubr.msk.bf16.gmra.mxu0 %vm1991_vm2, %v8109_v36  ;;  %7837 = vmatmul.mubr.msk.bf16.gmra.mxu1 %vm1991_vm2, %v8110_v37 }
  0xd1   : > { %7584 = vmatprep.mubr.msk.bf16.mxu0 %vm1991_vm2, %v8111_v38  ;;  %7840 = vmatprep.mubr.msk.bf16.mxu1 %vm1991_vm2, %v8112_v39 }
  0xd8   : > { %v7490_v44 = vpop.f32.mrf.mxu0  ;;  %7585 = vmatmul.mubr.msk.bf16.gmra.mxu0 %vm1991_vm2, %v8113_v40  ;;  %v7746_v46 = vpop.f32.mrf.mxu1  ;;  %7841 = vmatmul.mubr.msk.bf16.gmra.mxu1 %vm1991_vm2, %v8114_v41 }
  0xd9   : > { %7588 = vmatprep.mubr.msk.bf16.mxu0 %vm1991_vm2, %v8115_v42  ;;  %7844 = vmatprep.mubr.msk.bf16.mxu1 %vm1991_vm2, %v8116_v43  ;;  %v2810_v52 = vadd.f32 %v7490_v44, %v8529_v45  ;;  %v3834_v53 = vadd.f32 %v7746_v46, %v8529_v45 }
  0xda   : > { %v2801_v47 = vpop.f32.mrf.mxu0  ;;  %v3825_v48 = vpop.f32.mrf.mxu1 }
  0xdb   : > { %v2802_v54 = vadd.f32 %v8529_v45, %v2801_v47  ;;  %v3826_v55 = vadd.f32 %v8529_v45, %v3825_v48  ;;  %v4850_v63 = vmax.f32 %v2810_v52, 0.0  ;;  %v5106_v0 = vmax.f32 %v3834_v53, 0.0  ;;  %v8125_v48 = vld [vmem:[%s8324_s22 + $0x1b8] sm:$0xff]   ;;  %v8127_v52 = vld [vmem:[%s8324_s22 + $0x1c0] sm:$0xff]  }
  0xdc   : > { %v7491_v56 = vpop.f32.mrf.mxu0  ;;  %v7747_v57 = vpop.f32.mrf.mxu1  ;;  %v8128_v53 = vld [vmem:[%s8324_s22 + $0x5c0] sm:$0xff]  }
  0xdd   : > { %v8543_v58 = vadd.f32 %v7491_v56, %v8529_v45  ;;  %v8546_v59 = vadd.f32 %v7747_v57, %v8529_v45  ;;  %v4848_v1 = vmax.f32 %v2802_v54, 0.0  ;;  %v5104_v2 = vmax.f32 %v3826_v55, 0.0 }
  0xde   : > { %v2804_v61 = vpop.f32.mrf.mxu0  ;;  %v3828_v62 = vpop.f32.mrf.mxu1 }
  0xdf   : > { %v4851_v5 = vmax.f32 %v8543_v58, 0.0  ;;  %v5107_v6 = vmax.f32 %v8546_v59, 0.0  ;;  %v2805_v19 = vadd.f32 %v8529_v45, %v2804_v61  ;;  %v3829_v20 = vadd.f32 %v8529_v45, %v3828_v62 }
  0xe0   : > { %v7494_v3 = vpop.f32.mrf.mxu0  ;;  %7589 = vmatmul.mubr.msk.bf16.gmra.mxu0 %vm1991_vm2, %v8117_v49  ;;  %v7750_v4 = vpop.f32.mrf.mxu1  ;;  %7845 = vmatmul.mubr.msk.bf16.gmra.mxu1 %vm1991_vm2, %v8118_v50  ;;  %v8126_v49 = vld [vmem:[%s8324_s22 + $0x5b8] sm:$0xff]  }
  0xe1   : > { %v2826_v7 = vadd.f32 %v7494_v3, %v8529_v45  ;;  %v3850_v8 = vadd.f32 %v7750_v4, %v8529_v45  ;;  %7592 = vmatprep.mubr.msk.bf16.mxu0 %vm1991_vm2, %v8119_v51  ;;  %7848 = vmatprep.mubr.msk.bf16.mxu1 %vm1991_vm2, %v8120_v60  ;;  %v4849_v35 = vmax.f32 %v2805_v19, 0.0  ;;  %v5105_v36 = vmax.f32 %v3829_v20, 0.0 }
  0xe2   : > { %v2817_v9 = vpop.f32.mrf.mxu0  ;;  %v3841_v10 = vpop.f32.mrf.mxu1 }
  0xe3   : > { %v4854_v13 = vmax.f32 %v2826_v7, 0.0  ;;  %v5110_v14 = vmax.f32 %v3850_v8, 0.0  ;;  %v2818_v15 = vadd.f32 %v8529_v45, %v2817_v9  ;;  %v3842_v16 = vadd.f32 %v8529_v45, %v3841_v10  ;;  %v8129_v9 = vld [vmem:[%s8324_s22 + $0x1c8] sm:$0xff]  }
  0xe4   : > { %v7495_v21 = vpop.f32.mrf.mxu0  ;;  %v7751_v22 = vpop.f32.mrf.mxu1  ;;  %v8130_v10 = vld [vmem:[%s8324_s22 + $0x5c8] sm:$0xff]  }
  0xe5   : > { %v5362_v23 = vmax.f32 %v4850_v63, %v4854_v13  ;;  %v5490_v24 = vmax.f32 %v5106_v0, %v5110_v14  ;;  %v4852_v25 = vmax.f32 %v2818_v15, 0.0  ;;  %v5108_v26 = vmax.f32 %v3842_v16, 0.0 }
  0xe6   : > { %v2829_v27 = vadd.f32 %v7495_v21, %v8529_v45  ;;  %v3853_v28 = vadd.f32 %v7751_v22, %v8529_v45  ;;  %v2820_v29 = vpop.f32.mrf.mxu0  ;;  %v3844_v30 = vpop.f32.mrf.mxu1 }
  0xe7   : > { %5619 = vst.msk [vmem:[#allocation2 + $0x10] sm:$0xff] %vm5616_vm3, %v5362_v23  ;;  %5747 = vst.msk [vmem:[#allocation2 + $0x410] sm:$0xff] %vm5616_vm3, %v5490_v24  ;;  %v5360_v31 = vmax.f32 %v4848_v1, %v4852_v25  ;;  %v5488_v32 = vmax.f32 %v5104_v2, %v5108_v26  ;;  %v2821_v33 = vadd.f32 %v8529_v45, %v2820_v29  ;;  %v8132_v29 = vld [vmem:[%s8324_s22 + $0x5d0] sm:$0xff]  }
  0xe8   : > { %v3845_v34 = vadd.f32 %v8529_v45, %v3844_v30  ;;  %v4855_v37 = vmax.f32 %v2829_v27, 0.0  ;;  %v5111_v38 = vmax.f32 %v3853_v28, 0.0  ;;  %v7498_v39 = vpop.f32.mrf.mxu0  ;;  %7593 = vmatmul.mubr.msk.bf16.gmra.mxu0 %vm1991_vm2, %v8121_v11  ;;  %v7754_v40 = vpop.f32.mrf.mxu1  ;;  %7849 = vmatmul.mubr.msk.bf16.gmra.mxu1 %vm1991_vm2, %v8122_v12  ;;  %v8131_v28 = vld [vmem:[%s8324_s22 + $0x1d0] sm:$0xff]  }
  0xe9   : > { %5617 = vst.msk [vmem:[#allocation2] sm:$0xff] %vm5616_vm3, %v5360_v31  ;;  %5745 = vst.msk [vmem:[#allocation2 + $0x400] sm:$0xff] %vm5616_vm3, %v5488_v32  ;;  %v4853_v41 = vmax.f32 %v2821_v33, 0.0  ;;  %7596 = vmatprep.mubr.msk.bf16.mxu0 %vm1991_vm2, %v8123_v17  ;;  %7852 = vmatprep.mubr.msk.bf16.mxu1 %vm1991_vm2, %v8124_v18  ;;  %v2842_v54 = vadd.f32 %v7498_v39, %v8529_v45  ;;  %v3866_v57 = vadd.f32 %v7754_v40, %v8529_v45 }
  0xea   : > { %v5109_v42 = vmax.f32 %v3845_v34, 0.0  ;;  %v5363_v43 = vmax.f32 %v4851_v5, %v4855_v37  ;;  %v5491_v44 = vmax.f32 %v5107_v6, %v5111_v38  ;;  %v2833_v46 = vpop.f32.mrf.mxu0  ;;  %v3857_v47 = vpop.f32.mrf.mxu1 }
  0xeb   : > { %v5361_v50 = vmax.f32 %v4849_v35, %v4853_v41  ;;  %v2834_v60 = vadd.f32 %v8529_v45, %v2833_v46  ;;  %v3858_v61 = vadd.f32 %v8529_v45, %v3857_v47  ;;  %v4858_v62 = vmax.f32 %v2842_v54, 0.0  ;;  %v8133_v54 = vld [vmem:[%s8324_s22 + $0x1d8] sm:$0xff]  }
  0xec   : > { %v5489_v51 = vmax.f32 %v5105_v36, %v5109_v42  ;;  %5620 = vst.msk [vmem:[#allocation2 + $0x18] sm:$0xff] %vm5616_vm3, %v5363_v43  ;;  %5748 = vst.msk [vmem:[#allocation2 + $0x418] sm:$0xff] %vm5616_vm3, %v5491_v44  ;;  %v7499_v55 = vpop.f32.mrf.mxu0  ;;  %v7755_v56 = vpop.f32.mrf.mxu1  ;;  %v5114_v3 = vmax.f32 %v3866_v57, 0.0 }
  0xed   : > { %5618 = vst.msk [vmem:[#allocation2 + $0x8] sm:$0xff] %vm5616_vm3, %v5361_v50  ;;  %v8601_v63 = vadd.f32 %v7499_v55, %v8529_v45  ;;  %v8604_v0 = vadd.f32 %v7755_v56, %v8529_v45  ;;  %v4856_v13 = vmax.f32 %v2834_v60, 0.0  ;;  %v5112_v14 = vmax.f32 %v3858_v61, 0.0  ;;  %v8134_v55 = vld [vmem:[%s8324_s22 + $0x5d8] sm:$0xff]  }
  0xee   : > { %5746 = vst.msk [vmem:[#allocation2 + $0x408] sm:$0xff] %vm5616_vm3, %v5489_v51  ;;  %v2836_v58 = vpop.f32.mrf.mxu0  ;;  %v3860_v59 = vpop.f32.mrf.mxu1 }
  0xef   : > { %v8609_v4 = vadd.f32 %v8529_v45, %v2836_v58  ;;  %v4859_v20 = vmax.f32 %v8601_v63, 0.0  ;;  %v5115_v21 = vmax.f32 %v8604_v0, 0.0  ;;  %v3861_v30 = vadd.f32 %v8529_v45, %v3860_v59  ;;  %v8135_v58 = vld [vmem:[%s8324_s22 + $0x1e0] sm:$0xff]  }
  0xf0   : > { %v7502_v1 = vpop.f32.mrf.mxu0  ;;  %7597 = vmatmul.mubr.msk.bf16.gmra.mxu0 %vm1991_vm2, %v8125_v48  ;;  %v7758_v2 = vpop.f32.mrf.mxu1  ;;  %7853 = vmatmul.mubr.msk.bf16.gmra.mxu1 %vm1991_vm2, %v8126_v49  ;;  %v8136_v59 = vld [vmem:[%s8324_s22 + $0x5e0] sm:$0xff]  }
  0xf1   : > { %v2858_v5 = vadd.f32 %v7502_v1, %v8529_v45  ;;  %v3882_v6 = vadd.f32 %v7758_v2, %v8529_v45  ;;  %7600 = vmatprep.mubr.msk.bf16.mxu0 %vm1991_vm2, %v8127_v52  ;;  %7856 = vmatprep.mubr.msk.bf16.mxu1 %vm1991_vm2, %v8128_v53  ;;  %v4857_v25 = vmax.f32 %v8609_v4, 0.0  ;;  %v5113_v49 = vmax.f32 %v3861_v30, 0.0  ;;  %v8138_v30 = vld [vmem:[%s8324_s22 + $0x5e8] sm:$0xff]  }
  0xf2   : > { %v2849_v7 = vpop.f32.mrf.mxu0  ;;  %v3873_v8 = vpop.f32.mrf.mxu1 }
  0xf3   : > { %v5875_v11 = vld [vmem:[#allocation2 + $0x10] ss:$2 sm:$0xff]  ;;  %v6131_v12 = vld [vmem:[#allocation2 + $0x11] ss:$2 sm:$0xff]  ;;  %v2850_v15 = vadd.f32 %v8529_v45, %v2849_v7  ;;  %v3874_v16 = vadd.f32 %v8529_v45, %v3873_v8  ;;  %v4862_v26 = vmax.f32 %v2858_v5, 0.0  ;;  %v5118_v27 = vmax.f32 %v3882_v6, 0.0 }
  0xf4   : > { %v6385_v17 = vmax.f32 %v5875_v11, %v6131_v12  ;;  %v5873_v18 = vld [vmem:[#allocation2] ss:$2 sm:$0xff]  ;;  %v6129_v19 = vld [vmem:[#allocation2 + $0x1] ss:$2 sm:$0xff]  ;;  %v7503_v22 = vpop.f32.mrf.mxu0  ;;  %v7759_v23 = vpop.f32.mrf.mxu1 }
  0xf5   : > { %v6384_v24 = vmax.f32 %v5873_v18, %v6129_v19  ;;  %v4860_v31 = vmax.f32 %v2850_v15, 0.0  ;;  %v5116_v32 = vmax.f32 %v3874_v16, 0.0  ;;  %v2861_v33 = vadd.f32 %v7503_v22, %v8529_v45 }
  0xf6   : > { %6513 = vst.msk [vmem:[%s8620_s29 + $0x8] sm:$0xff] %vm5616_vm3, %v6385_v17  ;;  %v2852_v34 = vpop.f32.mrf.mxu0  ;;  %v3876_v35 = vpop.f32.mrf.mxu1  ;;  %v5366_v36 = vmax.f32 %v4858_v62, %v4862_v26  ;;  %v5494_v37 = vmax.f32 %v5114_v3, %v5118_v27  ;;  %v3885_v38 = vadd.f32 %v7759_v23, %v8529_v45 }
  0xf7   : > { %6512 = vst.msk [vmem:[%s8620_s29] sm:$0xff] %vm5616_vm3, %v6384_v24  ;;  %v2853_v39 = vadd.f32 %v8529_v45, %v2852_v34  ;;  %v5364_v40 = vmax.f32 %v4856_v13, %v4860_v31  ;;  %v5492_v41 = vmax.f32 %v5112_v14, %v5116_v32  ;;  %v4863_v42 = vmax.f32 %v2861_v33, 0.0 }
  0xf8   : > { %v3877_v43 = vadd.f32 %v8529_v45, %v3876_v35  ;;  %v7506_v44 = vpop.f32.mrf.mxu0  ;;  %7601 = vmatmul.mubr.msk.bf16.gmra.mxu0 %vm1991_vm2, %v8129_v9  ;;  %v7762_v46 = vpop.f32.mrf.mxu1  ;;  %7857 = vmatmul.mubr.msk.bf16.gmra.mxu1 %vm1991_vm2, %v8130_v10  ;;  %5623 = vst.msk [vmem:[#allocation2 + $0x30] sm:$0xff] %vm5616_vm3, %v5366_v36  ;;  %5751 = vst.msk [vmem:[#allocation2 + $0x430] sm:$0xff] %vm5616_vm3, %v5494_v37  ;;  %v5119_v47 = vmax.f32 %v3885_v38, 0.0  ;;  %v8139_v36 = vld [vmem:[%s8324_s22 + $0x1f0] sm:$0xff]  }
  0xf9   : > { %v4861_v48 = vmax.f32 %v2853_v39, 0.0  ;;  %7604 = vmatprep.mubr.msk.bf16.mxu0 %vm1991_vm2, %v8131_v28  ;;  %7860 = vmatprep.mubr.msk.bf16.mxu1 %vm1991_vm2, %v8132_v29  ;;  %5621 = vst.msk [vmem:[#allocation2 + $0x20] sm:$0xff] %vm5616_vm3, %v5364_v40  ;;  %5749 = vst.msk [vmem:[#allocation2 + $0x420] sm:$0xff] %vm5616_vm3, %v5492_v41  ;;  %v5367_v50 = vmax.f32 %v4859_v20, %v4863_v42  ;;  %v2874_v61 = vadd.f32 %v7506_v44, %v8529_v45  ;;  %v8137_v29 = vld [vmem:[%s8324_s22 + $0x1e8] sm:$0xff]   ;;  %v8140_v37 = vld [vmem:[%s8324_s22 + $0x5f0] sm:$0xff]  }
  0xfa   : > { %v5117_v51 = vmax.f32 %v3877_v43, 0.0  ;;  %v2865_v52 = vpop.f32.mrf.mxu0  ;;  %v3889_v53 = vpop.f32.mrf.mxu1  ;;  %v5495_v56 = vmax.f32 %v5115_v21, %v5119_v47  ;;  %v3898_v62 = vadd.f32 %v7762_v46, %v8529_v45 }
  0xfb   : > { %v5365_v57 = vmax.f32 %v4857_v25, %v4861_v48  ;;  %5624 = vst.msk [vmem:[#allocation2 + $0x38] sm:$0xff] %vm5616_vm3, %v5367_v50  ;;  %v2866_v1 = vadd.f32 %v8529_v45, %v2865_v52  ;;  %v4866_v4 = vmax.f32 %v2874_v61, 0.0  ;;  %v3890_v6 = vadd.f32 %v8529_v45, %v3889_v53 }
  0xfc   : > { %v5493_v60 = vmax.f32 %v5113_v49, %v5117_v51  ;;  %v7507_v63 = vpop.f32.mrf.mxu0  ;;  %v7763_v0 = vpop.f32.mrf.mxu1  ;;  %5752 = vst.msk [vmem:[#allocation2 + $0x438] sm:$0xff] %vm5616_vm3, %v5495_v56  ;;  %v5122_v5 = vmax.f32 %v3898_v62, 0.0 }
  0xfd   : > { %5622 = vst.msk [vmem:[#allocation2 + $0x28] sm:$0xff] %vm5616_vm3, %v5365_v57  ;;  %v4864_v9 = vmax.f32 %v2866_v1, 0.0  ;;  %v2877_v10 = vadd.f32 %v7507_v63, %v8529_v45  ;;  %v3901_v13 = vadd.f32 %v7763_v0, %v8529_v45  ;;  %v5120_v24 = vmax.f32 %v3890_v6, 0.0  ;;  %v8144_v6 = vld [vmem:[%s8324_s22 + $0x600] sm:$0xff]  }
  0xfe   : > { %5750 = vst.msk [vmem:[#allocation2 + $0x428] sm:$0xff] %vm5616_vm3, %v5493_v60  ;;  %v2868_v2 = vpop.f32.mrf.mxu0  ;;  %v3892_v3 = vpop.f32.mrf.mxu1 }
  0xff   : > { %v2869_v25 = vadd.f32 %v8529_v45, %v2868_v2  ;;  %v3893_v26 = vadd.f32 %v8529_v45, %v3892_v3  ;;  %v4867_v32 = vmax.f32 %v2877_v10, 0.0  ;;  %v5123_v39 = vmax.f32 %v3901_v13, 0.0  ;;  %v8141_v2 = vld [vmem:[%s8324_s22 + $0x1f8] sm:$0xff]  }
 0x100   : > { %v7510_v7 = vpop.f32.mrf.mxu0  ;;  %7605 = vmatmul.mubr.msk.bf16.gmra.mxu0 %vm1991_vm2, %v8133_v54  ;;  %v7766_v8 = vpop.f32.mrf.mxu1  ;;  %7861 = vmatmul.mubr.msk.bf16.gmra.mxu1 %vm1991_vm2, %v8134_v55  ;;  %v8142_v3 = vld [vmem:[%s8324_s22 + $0x5f8] sm:$0xff]  }
 0x101   : > { %v2890_v11 = vadd.f32 %v7510_v7, %v8529_v45  ;;  %v3914_v12 = vadd.f32 %v7766_v8, %v8529_v45  ;;  %7608 = vmatprep.mubr.msk.bf16.mxu0 %vm1991_vm2, %v8135_v58  ;;  %7864 = vmatprep.mubr.msk.bf16.mxu1 %vm1991_vm2, %v8136_v59  ;;  %v4865_v49 = vmax.f32 %v2869_v25, 0.0  ;;  %v5121_v50 = vmax.f32 %v3893_v26, 0.0 }
 0x102   : > { %v2881_v14 = vpop.f32.mrf.mxu0  ;;  %v3905_v15 = vpop.f32.mrf.mxu1  ;;  %v5879_v16 = vld [vmem:[#allocation2 + $0x30] ss:$2 sm:$0xff]  ;;  %v6135_v17 = vld [vmem:[#allocation2 + $0x31] ss:$2 sm:$0xff] }
 0x103   : > { %v4870_v18 = vmax.f32 %v2890_v11, 0.0  ;;  %v5126_v19 = vmax.f32 %v3914_v12, 0.0  ;;  %v2882_v20 = vadd.f32 %v8529_v45, %v2881_v14  ;;  %v3906_v21 = vadd.f32 %v8529_v45, %v3905_v15 }
 0x104   : > { %v6387_v22 = vmax.f32 %v5879_v16, %v6135_v17  ;;  %v5877_v23 = vld [vmem:[#allocation2 + $0x20] ss:$2 sm:$0xff]  ;;  %v7511_v27 = vpop.f32.mrf.mxu0  ;;  %v7767_v28 = vpop.f32.mrf.mxu1  ;;  %v6133_v31 = vld [vmem:[#allocation2 + $0x21] ss:$2 sm:$0xff] }
 0x105   : > { %v5370_v33 = vmax.f32 %v4866_v4, %v4870_v18  ;;  %v5498_v34 = vmax.f32 %v5122_v5, %v5126_v19  ;;  %v2893_v35 = vadd.f32 %v7511_v27, %v8529_v45  ;;  %v6386_v38 = vmax.f32 %v5877_v23, %v6133_v31  ;;  %v8143_v5 = vld [vmem:[%s8324_s22 + $0x200] sm:$0xff]  }
 0x106   : > { %6515 = vst.msk [vmem:[%s8620_s29 + $0x18] sm:$0xff] %vm5616_vm3, %v6387_v22  ;;  %v4868_v40 = vmax.f32 %v2882_v20, 0.0  ;;  %v5124_v41 = vmax.f32 %v3906_v21, 0.0  ;;  %v2884_v42 = vpop.f32.mrf.mxu0  ;;  %v3908_v43 = vpop.f32.mrf.mxu1  ;;  %v3917_v46 = vadd.f32 %v7767_v28, %v8529_v45 }
 0x107   : > { %5627 = vst.msk [vmem:[#allocation2 + $0x50] sm:$0xff] %vm5616_vm3, %v5370_v33  ;;  %5755 = vst.msk [vmem:[#allocation2 + $0x450] sm:$0xff] %vm5616_vm3, %v5498_v34  ;;  %v4871_v44 = vmax.f32 %v2893_v35, 0.0  ;;  %v2885_v47 = vadd.f32 %v8529_v45, %v2884_v42  ;;  %v3909_v48 = vadd.f32 %v8529_v45, %v3908_v43  ;;  %v8147_v43 = vld [vmem:[%s8324_s22 + $0x210] sm:$0xff]  }
 0x108   : > { %6514 = vst.msk [vmem:[%s8620_s29 + $0x10] sm:$0xff] %vm5616_vm3, %v6386_v38  ;;  %v5368_v51 = vmax.f32 %v4864_v9, %v4868_v40  ;;  %v5496_v52 = vmax.f32 %v5120_v24, %v5124_v41  ;;  %v7514_v53 = vpop.f32.mrf.mxu0  ;;  %7609 = vmatmul.mubr.msk.bf16.gmra.mxu0 %vm1991_vm2, %v8137_v29  ;;  %v7770_v54 = vpop.f32.mrf.mxu1  ;;  %7865 = vmatmul.mubr.msk.bf16.gmra.mxu1 %vm1991_vm2, %v8138_v30  ;;  %v5127_v56 = vmax.f32 %v3917_v46, 0.0 }
 0x109   : > { %v5371_v55 = vmax.f32 %v4867_v32, %v4871_v44  ;;  %v4869_v57 = vmax.f32 %v2885_v47, 0.0  ;;  %v5125_v58 = vmax.f32 %v3909_v48, 0.0  ;;  %7612 = vmatprep.mubr.msk.bf16.mxu0 %vm1991_vm2, %v8139_v36  ;;  %7868 = vmatprep.mubr.msk.bf16.mxu1 %vm1991_vm2, %v8140_v37  ;;  %v2906_v4 = vadd.f32 %v7514_v53, %v8529_v45  ;;  %v8145_v36 = vld [vmem:[%s8324_s22 + $0x208] sm:$0xff]   ;;  %v8148_v44 = vld [vmem:[%s8324_s22 + $0x610] sm:$0xff]  }
 0x10a   : > { %5625 = vst.msk [vmem:[#allocation2 + $0x40] sm:$0xff] %vm5616_vm3, %v5368_v51  ;;  %5753 = vst.msk [vmem:[#allocation2 + $0x440] sm:$0xff] %vm5616_vm3, %v5496_v52  ;;  %v2897_v59 = vpop.f32.mrf.mxu0  ;;  %v3921_v60 = vpop.f32.mrf.mxu1  ;;  %v5499_v61 = vmax.f32 %v5123_v39, %v5127_v56  ;;  %v3930_v7 = vadd.f32 %v7770_v54, %v8529_v45  ;;  %v8146_v37 = vld [vmem:[%s8324_s22 + $0x608] sm:$0xff]  }
 0x10b   : > { %5628 = vst.msk [vmem:[#allocation2 + $0x58] sm:$0xff] %vm5616_vm3, %v5371_v55  ;;  %v5369_v62 = vmax.f32 %v4865_v49, %v4869_v57  ;;  %v5497_v63 = vmax.f32 %v5121_v50, %v5125_v58  ;;  %v2898_v8 = vadd.f32 %v8529_v45, %v2897_v59  ;;  %v3922_v11 = vadd.f32 %v8529_v45, %v3921_v60 }
 0x10c   : > { %v7515_v0 = vpop.f32.mrf.mxu0  ;;  %v7771_v1 = vpop.f32.mrf.mxu1  ;;  %5756 = vst.msk [vmem:[#allocation2 + $0x458] sm:$0xff] %vm5616_vm3, %v5499_v61  ;;  %v4874_v14 = vmax.f32 %v2906_v4, 0.0  ;;  %v5130_v20 = vmax.f32 %v3930_v7, 0.0 }
 0x10d   : > { %5626 = vst.msk [vmem:[#allocation2 + $0x48] sm:$0xff] %vm5616_vm3, %v5369_v62  ;;  %5754 = vst.msk [vmem:[#allocation2 + $0x448] sm:$0xff] %vm5616_vm3, %v5497_v63  ;;  %v2909_v15 = vadd.f32 %v7515_v0, %v8529_v45  ;;  %v4872_v21 = vmax.f32 %v2898_v8, 0.0  ;;  %v3933_v22 = vadd.f32 %v7771_v1, %v8529_v45  ;;  %v5128_v30 = vmax.f32 %v3922_v11, 0.0 }
 0x10e   : > { %v2900_v9 = vpop.f32.mrf.mxu0  ;;  %v3924_v10 = vpop.f32.mrf.mxu1 }
 0x10f   : > { %v2901_v31 = vadd.f32 %v8529_v45, %v2900_v9  ;;  %v3925_v32 = vadd.f32 %v8529_v45, %v3924_v10  ;;  %v4875_v39 = vmax.f32 %v2909_v15, 0.0  ;;  %v5131_v47 = vmax.f32 %v3933_v22, 0.0  ;;  %v8149_v9 = vld [vmem:[%s8324_s22 + $0x218] sm:$0xff]  }
 0x110   : > { %v7518_v12 = vpop.f32.mrf.mxu0  ;;  %7613 = vmatmul.mubr.msk.bf16.gmra.mxu0 %vm1991_vm2, %v8141_v2  ;;  %v7774_v13 = vpop.f32.mrf.mxu1  ;;  %7869 = vmatmul.mubr.msk.bf16.gmra.mxu1 %vm1991_vm2, %v8142_v3  ;;  %v8150_v10 = vld [vmem:[%s8324_s22 + $0x618] sm:$0xff]  }
 0x111   : > { %v2922_v16 = vadd.f32 %v7518_v12, %v8529_v45  ;;  %v3946_v17 = vadd.f32 %v7774_v13, %v8529_v45  ;;  %7616 = vmatprep.mubr.msk.bf16.mxu0 %vm1991_vm2, %v8143_v5  ;;  %7872 = vmatprep.mubr.msk.bf16.mxu1 %vm1991_vm2, %v8144_v6  ;;  %v4873_v56 = vmax.f32 %v2901_v31, 0.0  ;;  %v5129_v57 = vmax.f32 %v3925_v32, 0.0  ;;  %v8151_v12 = vld [vmem:[%s8324_s22 + $0x220] sm:$0xff]  }
 0x112   : > { %v5883_v18 = vld [vmem:[#allocation2 + $0x50] ss:$2 sm:$0xff]  ;;  %v6139_v19 = vld [vmem:[#allocation2 + $0x51] ss:$2 sm:$0xff]  ;;  %v2913_v23 = vpop.f32.mrf.mxu0  ;;  %v3937_v24 = vpop.f32.mrf.mxu1  ;;  %v8152_v13 = vld [vmem:[%s8324_s22 + $0x620] sm:$0xff]  }
 0x113   : > { %v6389_v25 = vmax.f32 %v5883_v18, %v6139_v19  ;;  %v4878_v26 = vmax.f32 %v2922_v16, 0.0  ;;  %v5134_v27 = vmax.f32 %v3946_v17, 0.0  ;;  %v2914_v28 = vadd.f32 %v8529_v45, %v2913_v23 }
 0x114   : > { %v5881_v29 = vld [vmem:[#allocation2 + $0x40] ss:$2 sm:$0xff]  ;;  %v3938_v33 = vadd.f32 %v8529_v45, %v3937_v24  ;;  %v7519_v34 = vpop.f32.mrf.mxu0  ;;  %v7775_v35 = vpop.f32.mrf.mxu1  ;;  %v6137_v38 = vld [vmem:[#allocation2 + $0x41] ss:$2 sm:$0xff] }
 0x115   : > { %6517 = vst.msk [vmem:[%s8620_s29 + $0x28] sm:$0xff] %vm5616_vm3, %v6389_v25  ;;  %v5374_v40 = vmax.f32 %v4874_v14, %v4878_v26  ;;  %v5502_v41 = vmax.f32 %v5130_v20, %v5134_v27  ;;  %v2925_v42 = vadd.f32 %v7519_v34, %v8529_v45  ;;  %v6388_v46 = vmax.f32 %v5881_v29, %v6137_v38 }
 0x116   : > { %v4876_v48 = vmax.f32 %v2914_v28, 0.0  ;;  %v5132_v49 = vmax.f32 %v3938_v33, 0.0  ;;  %v2916_v50 = vpop.f32.mrf.mxu0  ;;  %v3940_v51 = vpop.f32.mrf.mxu1  ;;  %v3949_v53 = vadd.f32 %v7775_v35, %v8529_v45 }
 0x117   : > { %5631 = vst.msk [vmem:[#allocation2 + $0x70] sm:$0xff] %vm5616_vm3, %v5374_v40  ;;  %5759 = vst.msk [vmem:[#allocation2 + $0x470] sm:$0xff] %vm5616_vm3, %v5502_v41  ;;  %v4879_v52 = vmax.f32 %v2925_v42, 0.0  ;;  %v2917_v54 = vadd.f32 %v8529_v45, %v2916_v50  ;;  %v3941_v55 = vadd.f32 %v8529_v45, %v3940_v51  ;;  %v8155_v51 = vld [vmem:[%s8324_s22 + $0x230] sm:$0xff]  }
 0x118   : > { %6516 = vst.msk [vmem:[%s8620_s29 + $0x20] sm:$0xff] %vm5616_vm3, %v6388_v46  ;;  %v5372_v58 = vmax.f32 %v4872_v21, %v4876_v48  ;;  %v5500_v59 = vmax.f32 %v5128_v30, %v5132_v49  ;;  %v7522_v60 = vpop.f32.mrf.mxu0  ;;  %7617 = vmatmul.mubr.msk.bf16.gmra.mxu0 %vm1991_vm2, %v8145_v36  ;;  %v7778_v61 = vpop.f32.mrf.mxu1  ;;  %7873 = vmatmul.mubr.msk.bf16.gmra.mxu1 %vm1991_vm2, %v8146_v37  ;;  %v5135_v63 = vmax.f32 %v3949_v53, 0.0 }
 0x119   : > { %v5375_v62 = vmax.f32 %v4875_v39, %v4879_v52  ;;  %v4877_v0 = vmax.f32 %v2917_v54, 0.0  ;;  %v5133_v1 = vmax.f32 %v3941_v55, 0.0  ;;  %7620 = vmatprep.mubr.msk.bf16.mxu0 %vm1991_vm2, %v8147_v43  ;;  %7876 = vmatprep.mubr.msk.bf16.mxu1 %vm1991_vm2, %v8148_v44  ;;  %v2938_v11 = vadd.f32 %v7522_v60, %v8529_v45  ;;  %v8153_v43 = vld [vmem:[%s8324_s22 + $0x228] sm:$0xff]   ;;  %v8156_v52 = vld [vmem:[%s8324_s22 + $0x630] sm:$0xff]  }
 0x11a   : > { %5629 = vst.msk [vmem:[#allocation2 + $0x60] sm:$0xff] %vm5616_vm3, %v5372_v58  ;;  %5757 = vst.msk [vmem:[#allocation2 + $0x460] sm:$0xff] %vm5616_vm3, %v5500_v59  ;;  %v2929_v2 = vpop.f32.mrf.mxu0  ;;  %v3953_v3 = vpop.f32.mrf.mxu1  ;;  %v5503_v4 = vmax.f32 %v5131_v47, %v5135_v63  ;;  %v3962_v14 = vadd.f32 %v7778_v61, %v8529_v45  ;;  %v8154_v44 = vld [vmem:[%s8324_s22 + $0x628] sm:$0xff]  }
 0x11b   : > { %5632 = vst.msk [vmem:[#allocation2 + $0x78] sm:$0xff] %vm5616_vm3, %v5375_v62  ;;  %v5373_v5 = vmax.f32 %v4873_v56, %v4877_v0  ;;  %v5501_v6 = vmax.f32 %v5129_v57, %v5133_v1  ;;  %v2930_v15 = vadd.f32 %v8529_v45, %v2929_v2  ;;  %v3954_v18 = vadd.f32 %v8529_v45, %v3953_v3 }
 0x11c   : > { %v7523_v7 = vpop.f32.mrf.mxu0  ;;  %v7779_v8 = vpop.f32.mrf.mxu1  ;;  %5760 = vst.msk [vmem:[#allocation2 + $0x478] sm:$0xff] %vm5616_vm3, %v5503_v4  ;;  %v4882_v21 = vmax.f32 %v2938_v11, 0.0  ;;  %v5138_v27 = vmax.f32 %v3962_v14, 0.0 }
 0x11d   : > { %5630 = vst.msk [vmem:[#allocation2 + $0x68] sm:$0xff] %vm5616_vm3, %v5373_v5  ;;  %5758 = vst.msk [vmem:[#allocation2 + $0x468] sm:$0xff] %vm5616_vm3, %v5501_v6  ;;  %v2941_v22 = vadd.f32 %v7523_v7, %v8529_v45  ;;  %v4880_v28 = vmax.f32 %v2930_v15, 0.0  ;;  %v3965_v29 = vadd.f32 %v7779_v8, %v8529_v45  ;;  %v5136_v37 = vmax.f32 %v3954_v18, 0.0  ;;  %v8157_v15 = vld [vmem:[%s8324_s22 + $0x238] sm:$0xff]  }
 0x11e   : > { %v2932_v16 = vpop.f32.mrf.mxu0  ;;  %v3956_v17 = vpop.f32.mrf.mxu1 }
 0x11f   : > { %v2933_v38 = vadd.f32 %v8529_v45, %v2932_v16  ;;  %v3957_v39 = vadd.f32 %v8529_v45, %v3956_v17  ;;  %v4883_v47 = vmax.f32 %v2941_v22, 0.0  ;;  %v5139_v54 = vmax.f32 %v3965_v29, 0.0  ;;  %v8158_v16 = vld [vmem:[%s8324_s22 + $0x638] sm:$0xff]   ;;  %v8787_v17 = vld [vmem:[%s10142_s2] ss:$0 sm:$0xff] }
 0x120   : > { %v7526_v19 = vpop.f32.mrf.mxu0  ;;  %7621 = vmatmul.mubr.msk.bf16.gmra.mxu0 %vm1991_vm2, %v8149_v9  ;;  %v7782_v20 = vpop.f32.mrf.mxu1  ;;  %7877 = vmatmul.mubr.msk.bf16.gmra.mxu1 %vm1991_vm2, %v8150_v10 }
 0x121   : > { %v2954_v23 = vadd.f32 %v7526_v19, %v8529_v45  ;;  %v3978_v24 = vadd.f32 %v7782_v20, %v8529_v45  ;;  %7624 = vmatprep.mubr.msk.bf16.mxu0 %vm1991_vm2, %v8151_v12  ;;  %7880 = vmatprep.mubr.msk.bf16.mxu1 %vm1991_vm2, %v8152_v13  ;;  %v4881_v63 = vmax.f32 %v2933_v38, 0.0  ;;  %v5137_v0 = vmax.f32 %v3957_v39, 0.0  ;;  %v8159_v19 = vld [vmem:[%s8324_s22 + $0x240] sm:$0xff]  }
 0x122   : > { %v5887_v25 = vld [vmem:[#allocation2 + $0x70] ss:$2 sm:$0xff]  ;;  %v6143_v26 = vld [vmem:[#allocation2 + $0x71] ss:$2 sm:$0xff]  ;;  %v2945_v30 = vpop.f32.mrf.mxu0  ;;  %v3969_v31 = vpop.f32.mrf.mxu1  ;;  %v8160_v20 = vld [vmem:[%s8324_s22 + $0x640] sm:$0xff]  }
 0x123   : > { %v6391_v32 = vmax.f32 %v5887_v25, %v6143_v26  ;;  %v4886_v33 = vmax.f32 %v2954_v23, 0.0  ;;  %v5142_v34 = vmax.f32 %v3978_v24, 0.0  ;;  %v2946_v35 = vadd.f32 %v8529_v45, %v2945_v30 }
 0x124   : > { %v5885_v36 = vld [vmem:[#allocation2 + $0x60] ss:$2 sm:$0xff]  ;;  %v3970_v40 = vadd.f32 %v8529_v45, %v3969_v31  ;;  %v7527_v41 = vpop.f32.mrf.mxu0  ;;  %v7783_v42 = vpop.f32.mrf.mxu1  ;;  %v6141_v46 = vld [vmem:[#allocation2 + $0x61] ss:$2 sm:$0xff] }
 0x125   : > { %6519 = vst.msk [vmem:[%s8620_s29 + $0x38] sm:$0xff] %vm5616_vm3, %v6391_v32  ;;  %v5378_v48 = vmax.f32 %v4882_v21, %v4886_v33  ;;  %v5506_v49 = vmax.f32 %v5138_v27, %v5142_v34  ;;  %v2957_v50 = vadd.f32 %v7527_v41, %v8529_v45  ;;  %v6390_v53 = vmax.f32 %v5885_v36, %v6141_v46 }
 0x126   : > { %v4884_v55 = vmax.f32 %v2946_v35, 0.0  ;;  %v5140_v56 = vmax.f32 %v3970_v40, 0.0  ;;  %v2948_v57 = vpop.f32.mrf.mxu0  ;;  %v3972_v58 = vpop.f32.mrf.mxu1  ;;  %v3981_v60 = vadd.f32 %v7783_v42, %v8529_v45 }
 0x127   : > { %5635 = vst.msk [vmem:[#allocation2 + $0x90] sm:$0xff] %vm5616_vm3, %v5378_v48  ;;  %5763 = vst.msk [vmem:[#allocation2 + $0x490] sm:$0xff] %vm5616_vm3, %v5506_v49  ;;  %v4887_v59 = vmax.f32 %v2957_v50, 0.0  ;;  %v2949_v61 = vadd.f32 %v8529_v45, %v2948_v57  ;;  %v3973_v62 = vadd.f32 %v8529_v45, %v3972_v58  ;;  %v8163_v58 = vld [vmem:[%s8324_s22 + $0x250] sm:$0xff]  }
 0x128   : > { %6518 = vst.msk [vmem:[%s8620_s29 + $0x30] sm:$0xff] %vm5616_vm3, %v6390_v53  ;;  %v5376_v1 = vmax.f32 %v4880_v28, %v4884_v55  ;;  %v5504_v2 = vmax.f32 %v5136_v37, %v5140_v56  ;;  %v7530_v3 = vpop.f32.mrf.mxu0  ;;  %7625 = vmatmul.mubr.msk.bf16.gmra.mxu0 %vm1991_vm2, %v8153_v43  ;;  %v7786_v4 = vpop.f32.mrf.mxu1  ;;  %7881 = vmatmul.mubr.msk.bf16.gmra.mxu1 %vm1991_vm2, %v8154_v44  ;;  %v5143_v6 = vmax.f32 %v3981_v60, 0.0 }
 0x129   : > { %v5379_v5 = vmax.f32 %v4883_v47, %v4887_v59  ;;  %v4885_v7 = vmax.f32 %v2949_v61, 0.0  ;;  %v5141_v8 = vmax.f32 %v3973_v62, 0.0  ;;  %7628 = vmatprep.mubr.msk.bf16.mxu0 %vm1991_vm2, %v8155_v51  ;;  %7884 = vmatprep.mubr.msk.bf16.mxu1 %vm1991_vm2, %v8156_v52  ;;  %v2970_v18 = vadd.f32 %v8787_v17, %v7530_v3  ;;  %v8161_v51 = vld [vmem:[%s8324_s22 + $0x248] sm:$0xff]   ;;  %v8164_v59 = vld [vmem:[%s8324_s22 + $0x650] sm:$0xff]  }
 0x12a   : > { %5633 = vst.msk [vmem:[#allocation2 + $0x80] sm:$0xff] %vm5616_vm3, %v5376_v1  ;;  %5761 = vst.msk [vmem:[#allocation2 + $0x480] sm:$0xff] %vm5616_vm3, %v5504_v2  ;;  %v2961_v45 = vpop.f32.mrf.mxu0  ;;  %v3985_v9 = vpop.f32.mrf.mxu1  ;;  %v5507_v10 = vmax.f32 %v5139_v54, %v5143_v6  ;;  %v3994_v21 = vadd.f32 %v8787_v17, %v7786_v4  ;;  %v8162_v52 = vld [vmem:[%s8324_s22 + $0x648] sm:$0xff]  }
 0x12b   : > { %5636 = vst.msk [vmem:[#allocation2 + $0x98] sm:$0xff] %vm5616_vm3, %v5379_v5  ;;  %v5377_v11 = vmax.f32 %v4881_v63, %v4885_v7  ;;  %v5505_v12 = vmax.f32 %v5137_v0, %v5141_v8  ;;  %v2962_v22 = vadd.f32 %v8787_v17, %v2961_v45  ;;  %v3986_v25 = vadd.f32 %v8787_v17, %v3985_v9 }
 0x12c   : > { %v7531_v13 = vpop.f32.mrf.mxu0  ;;  %v7787_v14 = vpop.f32.mrf.mxu1  ;;  %5764 = vst.msk [vmem:[#allocation2 + $0x498] sm:$0xff] %vm5616_vm3, %v5507_v10  ;;  %v4890_v28 = vmax.f32 %v2970_v18, 0.0  ;;  %v5146_v34 = vmax.f32 %v3994_v21, 0.0 }
 0x12d   : > { %5634 = vst.msk [vmem:[#allocation2 + $0x88] sm:$0xff] %vm5616_vm3, %v5377_v11  ;;  %5762 = vst.msk [vmem:[#allocation2 + $0x488] sm:$0xff] %vm5616_vm3, %v5505_v12  ;;  %v2973_v29 = vadd.f32 %v8787_v17, %v7531_v13  ;;  %v4888_v35 = vmax.f32 %v2962_v22, 0.0  ;;  %v3997_v36 = vadd.f32 %v8787_v17, %v7787_v14  ;;  %v5144_v44 = vmax.f32 %v3986_v25, 0.0 }
 0x12e   : > { %v2964_v23 = vpop.f32.mrf.mxu0  ;;  %v3988_v24 = vpop.f32.mrf.mxu1 }
 0x12f   : > { %v2965_v46 = vadd.f32 %v8787_v17, %v2964_v23  ;;  %v3989_v47 = vadd.f32 %v8787_v17, %v3988_v24  ;;  %v4891_v54 = vmax.f32 %v2973_v29, 0.0  ;;  %v5147_v61 = vmax.f32 %v3997_v36, 0.0  ;;  %v8165_v23 = vld [vmem:[%s8324_s22 + $0x258] sm:$0xff]  }
 0x130   : > { %v7534_v26 = vpop.f32.mrf.mxu0  ;;  %7629 = vmatmul.mubr.msk.bf16.gmra.mxu0 %vm1991_vm2, %v8157_v15  ;;  %v7790_v27 = vpop.f32.mrf.mxu1  ;;  %7885 = vmatmul.mubr.msk.bf16.gmra.mxu1 %vm1991_vm2, %v8158_v16  ;;  %v8166_v24 = vld [vmem:[%s8324_s22 + $0x658] sm:$0xff]  }
 0x131   : > { %v2986_v30 = vadd.f32 %v8787_v17, %v7534_v26  ;;  %v4010_v31 = vadd.f32 %v8787_v17, %v7790_v27  ;;  %7632 = vmatprep.mubr.msk.bf16.mxu0 %vm1991_vm2, %v8159_v19  ;;  %7888 = vmatprep.mubr.msk.bf16.mxu1 %vm1991_vm2, %v8160_v20  ;;  %v4889_v6 = vmax.f32 %v2965_v46, 0.0  ;;  %v5145_v7 = vmax.f32 %v3989_v47, 0.0  ;;  %v8167_v26 = vld [vmem:[%s8324_s22 + $0x260] sm:$0xff]  }
 0x132   : > { %v5891_v32 = vld [vmem:[#allocation2 + $0x90] ss:$2 sm:$0xff]  ;;  %v6147_v33 = vld [vmem:[#allocation2 + $0x91] ss:$2 sm:$0xff]  ;;  %v2977_v37 = vpop.f32.mrf.mxu0  ;;  %v4001_v38 = vpop.f32.mrf.mxu1  ;;  %v8168_v27 = vld [vmem:[%s8324_s22 + $0x660] sm:$0xff]  }
 0x133   : > { %v6393_v39 = vmax.f32 %v5891_v32, %v6147_v33  ;;  %v4894_v40 = vmax.f32 %v2986_v30, 0.0  ;;  %v5150_v41 = vmax.f32 %v4010_v31, 0.0  ;;  %v2978_v42 = vadd.f32 %v8787_v17, %v2977_v37 }
 0x134   : > { %v5889_v43 = vld [vmem:[#allocation2 + $0x80] ss:$2 sm:$0xff]  ;;  %v4002_v48 = vadd.f32 %v8787_v17, %v4001_v38  ;;  %v7535_v49 = vpop.f32.mrf.mxu0  ;;  %v7791_v50 = vpop.f32.mrf.mxu1  ;;  %v6145_v53 = vld [vmem:[#allocation2 + $0x81] ss:$2 sm:$0xff] }
 0x135   : > { %6521 = vst.msk [vmem:[%s8620_s29 + $0x48] sm:$0xff] %vm5616_vm3, %v6393_v39  ;;  %v5382_v55 = vmax.f32 %v4890_v28, %v4894_v40  ;;  %v5510_v56 = vmax.f32 %v5146_v34, %v5150_v41  ;;  %v2989_v57 = vadd.f32 %v8787_v17, %v7535_v49  ;;  %v6392_v60 = vmax.f32 %v5889_v43, %v6145_v53 }
 0x136   : > { %v4892_v62 = vmax.f32 %v2978_v42, 0.0  ;;  %v5148_v63 = vmax.f32 %v4002_v48, 0.0  ;;  %v2980_v0 = vpop.f32.mrf.mxu0  ;;  %v4004_v1 = vpop.f32.mrf.mxu1  ;;  %v4013_v3 = vadd.f32 %v8787_v17, %v7791_v50 }
 0x137   : > { %5639 = vst.msk [vmem:[#allocation2 + $0xb0] sm:$0xff] %vm5616_vm3, %v5382_v55  ;;  %5767 = vst.msk [vmem:[#allocation2 + $0x4b0] sm:$0xff] %vm5616_vm3, %v5510_v56  ;;  %v4895_v2 = vmax.f32 %v2989_v57, 0.0  ;;  %v2981_v4 = vadd.f32 %v8787_v17, %v2980_v0  ;;  %v4005_v5 = vadd.f32 %v8787_v17, %v4004_v1  ;;  %v8171_v1 = vld [vmem:[%s8324_s22 + $0x270] sm:$0xff]  }
 0x138   : > { %6520 = vst.msk [vmem:[%s8620_s29 + $0x40] sm:$0xff] %vm5616_vm3, %v6392_v60  ;;  %v5380_v8 = vmax.f32 %v4888_v35, %v4892_v62  ;;  %v5508_v45 = vmax.f32 %v5144_v44, %v5148_v63  ;;  %v7538_v9 = vpop.f32.mrf.mxu0  ;;  %7633 = vmatmul.mubr.msk.bf16.gmra.mxu0 %vm1991_vm2, %v8161_v51  ;;  %v7794_v10 = vpop.f32.mrf.mxu1  ;;  %7889 = vmatmul.mubr.msk.bf16.gmra.mxu1 %vm1991_vm2, %v8162_v52  ;;  %v5151_v12 = vmax.f32 %v4013_v3, 0.0 }
 0x139   : > { %v5383_v11 = vmax.f32 %v4891_v54, %v4895_v2  ;;  %v4893_v13 = vmax.f32 %v2981_v4, 0.0  ;;  %v5149_v14 = vmax.f32 %v4005_v5, 0.0  ;;  %7636 = vmatprep.mubr.msk.bf16.mxu0 %vm1991_vm2, %v8163_v58  ;;  %7892 = vmatprep.mubr.msk.bf16.mxu1 %vm1991_vm2, %v8164_v59  ;;  %v3002_v25 = vadd.f32 %v8787_v17, %v7538_v9  ;;  %v8169_v58 = vld [vmem:[%s8324_s22 + $0x268] sm:$0xff]   ;;  %v8172_v2 = vld [vmem:[%s8324_s22 + $0x670] sm:$0xff]  }
 0x13a   : > { %5637 = vst.msk [vmem:[#allocation2 + $0xa0] sm:$0xff] %vm5616_vm3, %v5380_v8  ;;  %5765 = vst.msk [vmem:[#allocation2 + $0x4a0] sm:$0xff] %vm5616_vm3, %v5508_v45  ;;  %v2993_v15 = vpop.f32.mrf.mxu0  ;;  %v4017_v16 = vpop.f32.mrf.mxu1  ;;  %v5511_v18 = vmax.f32 %v5147_v61, %v5151_v12  ;;  %v4026_v28 = vadd.f32 %v8787_v17, %v7794_v10  ;;  %v8170_v59 = vld [vmem:[%s8324_s22 + $0x668] sm:$0xff]  }
 0x13b   : > { %5640 = vst.msk [vmem:[#allocation2 + $0xb8] sm:$0xff] %vm5616_vm3, %v5383_v11  ;;  %v5381_v19 = vmax.f32 %v4889_v6, %v4893_v13  ;;  %v5509_v20 = vmax.f32 %v5145_v7, %v5149_v14  ;;  %v2994_v29 = vadd.f32 %v8787_v17, %v2993_v15  ;;  %v4018_v32 = vadd.f32 %v8787_v17, %v4017_v16 }
 0x13c   : > { %v7539_v21 = vpop.f32.mrf.mxu0  ;;  %v7795_v22 = vpop.f32.mrf.mxu1  ;;  %5768 = vst.msk [vmem:[#allocation2 + $0x4b8] sm:$0xff] %vm5616_vm3, %v5511_v18  ;;  %v4898_v35 = vmax.f32 %v3002_v25, 0.0  ;;  %v5154_v41 = vmax.f32 %v4026_v28, 0.0 }
 0x13d   : > { %5638 = vst.msk [vmem:[#allocation2 + $0xa8] sm:$0xff] %vm5616_vm3, %v5381_v19  ;;  %5766 = vst.msk [vmem:[#allocation2 + $0x4a8] sm:$0xff] %vm5616_vm3, %v5509_v20  ;;  %v3005_v36 = vadd.f32 %v8787_v17, %v7539_v21  ;;  %v4896_v42 = vmax.f32 %v2994_v29, 0.0  ;;  %v4029_v43 = vadd.f32 %v8787_v17, %v7795_v22  ;;  %v5152_v52 = vmax.f32 %v4018_v32, 0.0 }
 0x13e   : > { %v2996_v30 = vpop.f32.mrf.mxu0  ;;  %v4020_v31 = vpop.f32.mrf.mxu1 }
 0x13f   : > { %v2997_v53 = vadd.f32 %v8787_v17, %v2996_v30  ;;  %v4021_v54 = vadd.f32 %v8787_v17, %v4020_v31  ;;  %v4899_v61 = vmax.f32 %v3005_v36, 0.0  ;;  %v5155_v4 = vmax.f32 %v4029_v43, 0.0  ;;  %v8173_v30 = vld [vmem:[%s8324_s22 + $0x278] sm:$0xff]  }
 0x140   : > { %v7542_v33 = vpop.f32.mrf.mxu0  ;;  %7637 = vmatmul.mubr.msk.bf16.gmra.mxu0 %vm1991_vm2, %v8165_v23  ;;  %v7798_v34 = vpop.f32.mrf.mxu1  ;;  %7893 = vmatmul.mubr.msk.bf16.gmra.mxu1 %vm1991_vm2, %v8166_v24  ;;  %v8174_v31 = vld [vmem:[%s8324_s22 + $0x678] sm:$0xff]  }
 0x141   : > { %v3018_v37 = vadd.f32 %v8787_v17, %v7542_v33  ;;  %v4042_v38 = vadd.f32 %v8787_v17, %v7798_v34  ;;  %7640 = vmatprep.mubr.msk.bf16.mxu0 %vm1991_vm2, %v8167_v26  ;;  %7896 = vmatprep.mubr.msk.bf16.mxu1 %vm1991_vm2, %v8168_v27  ;;  %v4897_v12 = vmax.f32 %v2997_v53, 0.0  ;;  %v5153_v13 = vmax.f32 %v4021_v54, 0.0  ;;  %v8175_v33 = vld [vmem:[%s8324_s22 + $0x280] sm:$0xff]  }
 0x142   : > { %v5895_v39 = vld [vmem:[#allocation2 + $0xb0] ss:$2 sm:$0xff]  ;;  %v6151_v40 = vld [vmem:[#allocation2 + $0xb1] ss:$2 sm:$0xff]  ;;  %v3009_v44 = vpop.f32.mrf.mxu0  ;;  %v4033_v46 = vpop.f32.mrf.mxu1  ;;  %v8176_v34 = vld [vmem:[%s8324_s22 + $0x680] sm:$0xff]  }
 0x143   : > { %v6395_v47 = vmax.f32 %v5895_v39, %v6151_v40  ;;  %v4902_v48 = vmax.f32 %v3018_v37, 0.0  ;;  %v5158_v49 = vmax.f32 %v4042_v38, 0.0  ;;  %v3010_v50 = vadd.f32 %v8787_v17, %v3009_v44 }
 0x144   : > { %v5893_v51 = vld [vmem:[#allocation2 + $0xa0] ss:$2 sm:$0xff]  ;;  %v4034_v55 = vadd.f32 %v8787_v17, %v4033_v46  ;;  %v7543_v56 = vpop.f32.mrf.mxu0  ;;  %v7799_v57 = vpop.f32.mrf.mxu1  ;;  %v6149_v60 = vld [vmem:[#allocation2 + $0xa1] ss:$2 sm:$0xff] }
 0x145   : > { %6523 = vst.msk [vmem:[%s8620_s29 + $0x58] sm:$0xff] %vm5616_vm3, %v6395_v47  ;;  %v5386_v62 = vmax.f32 %v4898_v35, %v4902_v48  ;;  %v5514_v63 = vmax.f32 %v5154_v41, %v5158_v49  ;;  %v3021_v0 = vadd.f32 %v8787_v17, %v7543_v56  ;;  %v6394_v3 = vmax.f32 %v5893_v51, %v6149_v60 }
 0x146   : > { %v4900_v5 = vmax.f32 %v3010_v50, 0.0  ;;  %v5156_v6 = vmax.f32 %v4034_v55, 0.0  ;;  %v3012_v7 = vpop.f32.mrf.mxu0  ;;  %v4036_v8 = vpop.f32.mrf.mxu1  ;;  %v4045_v9 = vadd.f32 %v8787_v17, %v7799_v57 }
 0x147   : > { %5643 = vst.msk [vmem:[#allocation2 + $0xd0] sm:$0xff] %vm5616_vm3, %v5386_v62  ;;  %5771 = vst.msk [vmem:[#allocation2 + $0x4d0] sm:$0xff] %vm5616_vm3, %v5514_v63  ;;  %v4903_v45 = vmax.f32 %v3021_v0, 0.0  ;;  %v3013_v10 = vadd.f32 %v8787_v17, %v3012_v7  ;;  %v4037_v11 = vadd.f32 %v8787_v17, %v4036_v8  ;;  %v8179_v8 = vld [vmem:[%s8324_s22 + $0x290] sm:$0xff]  }
 0x148   : > { %6522 = vst.msk [vmem:[%s8620_s29 + $0x50] sm:$0xff] %vm5616_vm3, %v6394_v3  ;;  %v5384_v14 = vmax.f32 %v4896_v42, %v4900_v5  ;;  %v5512_v15 = vmax.f32 %v5152_v52, %v5156_v6  ;;  %v7546_v16 = vpop.f32.mrf.mxu0  ;;  %7641 = vmatmul.mubr.msk.bf16.gmra.mxu0 %vm1991_vm2, %v8169_v58  ;;  %v7802_v18 = vpop.f32.mrf.mxu1  ;;  %7897 = vmatmul.mubr.msk.bf16.gmra.mxu1 %vm1991_vm2, %v8170_v59  ;;  %v5159_v20 = vmax.f32 %v4045_v9, 0.0 }
 0x149   : > { %v5387_v19 = vmax.f32 %v4899_v61, %v4903_v45  ;;  %v4901_v21 = vmax.f32 %v3013_v10, 0.0  ;;  %v5157_v22 = vmax.f32 %v4037_v11, 0.0  ;;  %7644 = vmatprep.mubr.msk.bf16.mxu0 %vm1991_vm2, %v8171_v1  ;;  %7900 = vmatprep.mubr.msk.bf16.mxu1 %vm1991_vm2, %v8172_v2  ;;  %v3034_v32 = vadd.f32 %v8787_v17, %v7546_v16  ;;  %v8177_v1 = vld [vmem:[%s8324_s22 + $0x288] sm:$0xff]   ;;  %v8180_v45 = vld [vmem:[%s8324_s22 + $0x690] sm:$0xff]  }
 0x14a   : > { %5641 = vst.msk [vmem:[#allocation2 + $0xc0] sm:$0xff] %vm5616_vm3, %v5384_v14  ;;  %5769 = vst.msk [vmem:[#allocation2 + $0x4c0] sm:$0xff] %vm5616_vm3, %v5512_v15  ;;  %v3025_v23 = vpop.f32.mrf.mxu0  ;;  %v4049_v24 = vpop.f32.mrf.mxu1  ;;  %v5515_v25 = vmax.f32 %v5155_v4, %v5159_v20  ;;  %v4058_v35 = vadd.f32 %v8787_v17, %v7802_v18  ;;  %v8178_v2 = vld [vmem:[%s8324_s22 + $0x688] sm:$0xff]  }
 0x14b   : > { %5644 = vst.msk [vmem:[#allocation2 + $0xd8] sm:$0xff] %vm5616_vm3, %v5387_v19  ;;  %v5385_v26 = vmax.f32 %v4897_v12, %v4901_v21  ;;  %v5513_v27 = vmax.f32 %v5153_v13, %v5157_v22  ;;  %v3026_v36 = vadd.f32 %v8787_v17, %v3025_v23  ;;  %v4050_v39 = vadd.f32 %v8787_v17, %v4049_v24 }
 0x14c   : > { %v7547_v28 = vpop.f32.mrf.mxu0  ;;  %v7803_v29 = vpop.f32.mrf.mxu1  ;;  %5772 = vst.msk [vmem:[#allocation2 + $0x4d8] sm:$0xff] %vm5616_vm3, %v5515_v25  ;;  %v4906_v42 = vmax.f32 %v3034_v32, 0.0  ;;  %v5162_v49 = vmax.f32 %v4058_v35, 0.0 }
 0x14d   : > { %5642 = vst.msk [vmem:[#allocation2 + $0xc8] sm:$0xff] %vm5616_vm3, %v5385_v26  ;;  %5770 = vst.msk [vmem:[#allocation2 + $0x4c8] sm:$0xff] %vm5616_vm3, %v5513_v27  ;;  %v3037_v43 = vadd.f32 %v8787_v17, %v7547_v28  ;;  %v4904_v50 = vmax.f32 %v3026_v36, 0.0  ;;  %v4061_v51 = vadd.f32 %v8787_v17, %v7803_v29  ;;  %v5160_v59 = vmax.f32 %v4050_v39, 0.0 }
 0x14e   : > { %v3028_v37 = vpop.f32.mrf.mxu0  ;;  %v4052_v38 = vpop.f32.mrf.mxu1 }
 0x14f   : > { %v3029_v60 = vadd.f32 %v8787_v17, %v3028_v37  ;;  %v4053_v61 = vadd.f32 %v8787_v17, %v4052_v38  ;;  %v4907_v4 = vmax.f32 %v3037_v43, 0.0  ;;  %v5163_v10 = vmax.f32 %v4061_v51, 0.0  ;;  %v8181_v37 = vld [vmem:[%s8324_s22 + $0x298] sm:$0xff]  }
 0x150   : > { %v7550_v40 = vpop.f32.mrf.mxu0  ;;  %7645 = vmatmul.mubr.msk.bf16.gmra.mxu0 %vm1991_vm2, %v8173_v30  ;;  %v7806_v41 = vpop.f32.mrf.mxu1  ;;  %7901 = vmatmul.mubr.msk.bf16.gmra.mxu1 %vm1991_vm2, %v8174_v31  ;;  %v8182_v38 = vld [vmem:[%s8324_s22 + $0x698] sm:$0xff]  }
 0x151   : > { %v3050_v44 = vadd.f32 %v8787_v17, %v7550_v40  ;;  %v4074_v46 = vadd.f32 %v8787_v17, %v7806_v41  ;;  %7648 = vmatprep.mubr.msk.bf16.mxu0 %vm1991_vm2, %v8175_v33  ;;  %7904 = vmatprep.mubr.msk.bf16.mxu1 %vm1991_vm2, %v8176_v34  ;;  %v4905_v20 = vmax.f32 %v3029_v60, 0.0  ;;  %v5161_v21 = vmax.f32 %v4053_v61, 0.0  ;;  %v8183_v40 = vld [vmem:[%s8324_s22 + $0x2a0] sm:$0xff]  }
 0x152   : > { %v5899_v47 = vld [vmem:[#allocation2 + $0xd0] ss:$2 sm:$0xff]  ;;  %v6155_v48 = vld [vmem:[#allocation2 + $0xd1] ss:$2 sm:$0xff]  ;;  %v3041_v52 = vpop.f32.mrf.mxu0  ;;  %v4065_v53 = vpop.f32.mrf.mxu1  ;;  %v8184_v41 = vld [vmem:[%s8324_s22 + $0x6a0] sm:$0xff]  }
 0x153   : > { %v6397_v54 = vmax.f32 %v5899_v47, %v6155_v48  ;;  %v4910_v55 = vmax.f32 %v3050_v44, 0.0  ;;  %v5166_v56 = vmax.f32 %v4074_v46, 0.0  ;;  %v3042_v57 = vadd.f32 %v8787_v17, %v3041_v52 }
 0x154   : > { %v5897_v58 = vld [vmem:[#allocation2 + $0xc0] ss:$2 sm:$0xff]  ;;  %v4066_v62 = vadd.f32 %v8787_v17, %v4065_v53  ;;  %v7551_v63 = vpop.f32.mrf.mxu0  ;;  %v7807_v0 = vpop.f32.mrf.mxu1  ;;  %v6153_v3 = vld [vmem:[#allocation2 + $0xc1] ss:$2 sm:$0xff] }
 0x155   : > { %6525 = vst.msk [vmem:[%s8620_s29 + $0x68] sm:$0xff] %vm5616_vm3, %v6397_v54  ;;  %v5390_v5 = vmax.f32 %v4906_v42, %v4910_v55  ;;  %v5518_v6 = vmax.f32 %v5162_v49, %v5166_v56  ;;  %v3053_v7 = vadd.f32 %v8787_v17, %v7551_v63  ;;  %v6396_v9 = vmax.f32 %v5897_v58, %v6153_v3 }
 0x156   : > { %v4908_v11 = vmax.f32 %v3042_v57, 0.0  ;;  %v5164_v12 = vmax.f32 %v4066_v62, 0.0  ;;  %v3044_v13 = vpop.f32.mrf.mxu0  ;;  %v4068_v14 = vpop.f32.mrf.mxu1  ;;  %v4077_v16 = vadd.f32 %v8787_v17, %v7807_v0 }
 0x157   : > { %5647 = vst.msk [vmem:[#allocation2 + $0xf0] sm:$0xff] %vm5616_vm3, %v5390_v5  ;;  %5775 = vst.msk [vmem:[#allocation2 + $0x4f0] sm:$0xff] %vm5616_vm3, %v5518_v6  ;;  %v4911_v15 = vmax.f32 %v3053_v7, 0.0  ;;  %v3045_v18 = vadd.f32 %v8787_v17, %v3044_v13  ;;  %v4069_v19 = vadd.f32 %v8787_v17, %v4068_v14  ;;  %v8187_v14 = vld [vmem:[%s8324_s22 + $0x2b0] sm:$0xff]  }
 0x158   : > { %6524 = vst.msk [vmem:[%s8620_s29 + $0x60] sm:$0xff] %vm5616_vm3, %v6396_v9  ;;  %v5388_v22 = vmax.f32 %v4904_v50, %v4908_v11  ;;  %v5516_v23 = vmax.f32 %v5160_v59, %v5164_v12  ;;  %v7554_v24 = vpop.f32.mrf.mxu0  ;;  %7649 = vmatmul.mubr.msk.bf16.gmra.mxu0 %vm1991_vm2, %v8177_v1  ;;  %v7810_v25 = vpop.f32.mrf.mxu1  ;;  %7905 = vmatmul.mubr.msk.bf16.gmra.mxu1 %vm1991_vm2, %v8178_v2  ;;  %v5167_v27 = vmax.f32 %v4077_v16, 0.0 }
 0x159   : > { %v5391_v26 = vmax.f32 %v4907_v4, %v4911_v15  ;;  %v4909_v28 = vmax.f32 %v3045_v18, 0.0  ;;  %v5165_v29 = vmax.f32 %v4069_v19, 0.0  ;;  %7652 = vmatprep.mubr.msk.bf16.mxu0 %vm1991_vm2, %v8179_v8  ;;  %7908 = vmatprep.mubr.msk.bf16.mxu1 %vm1991_vm2, %v8180_v45  ;;  %v3066_v39 = vadd.f32 %v8787_v17, %v7554_v24  ;;  %v8185_v8 = vld [vmem:[%s8324_s22 + $0x2a8] sm:$0xff]   ;;  %v8188_v15 = vld [vmem:[%s8324_s22 + $0x6b0] sm:$0xff]  }
 0x15a   : > { %5645 = vst.msk [vmem:[#allocation2 + $0xe0] sm:$0xff] %vm5616_vm3, %v5388_v22  ;;  %5773 = vst.msk [vmem:[#allocation2 + $0x4e0] sm:$0xff] %vm5616_vm3, %v5516_v23  ;;  %v3057_v30 = vpop.f32.mrf.mxu0  ;;  %v4081_v31 = vpop.f32.mrf.mxu1  ;;  %v5519_v32 = vmax.f32 %v5163_v10, %v5167_v27  ;;  %v4090_v42 = vadd.f32 %v8787_v17, %v7810_v25  ;;  %v8186_v45 = vld [vmem:[%s8324_s22 + $0x6a8] sm:$0xff]  }
 0x15b   : > { %5648 = vst.msk [vmem:[#allocation2 + $0xf8] sm:$0xff] %vm5616_vm3, %v5391_v26  ;;  %v5389_v33 = vmax.f32 %v4905_v20, %v4909_v28  ;;  %v5517_v34 = vmax.f32 %v5161_v21, %v5165_v29  ;;  %v3058_v43 = vadd.f32 %v8787_v17, %v3057_v30  ;;  %v4082_v47 = vadd.f32 %v8787_v17, %v4081_v31 }
 0x15c   : > { %v7555_v35 = vpop.f32.mrf.mxu0  ;;  %v7811_v36 = vpop.f32.mrf.mxu1  ;;  %5776 = vst.msk [vmem:[#allocation2 + $0x4f8] sm:$0xff] %vm5616_vm3, %v5519_v32  ;;  %v4914_v50 = vmax.f32 %v3066_v39, 0.0  ;;  %v5170_v56 = vmax.f32 %v4090_v42, 0.0 }
 0x15d   : > { %5646 = vst.msk [vmem:[#allocation2 + $0xe8] sm:$0xff] %vm5616_vm3, %v5389_v33  ;;  %5774 = vst.msk [vmem:[#allocation2 + $0x4e8] sm:$0xff] %vm5616_vm3, %v5517_v34  ;;  %v3069_v51 = vadd.f32 %v8787_v17, %v7555_v35  ;;  %v4912_v57 = vmax.f32 %v3058_v43, 0.0  ;;  %v4093_v58 = vadd.f32 %v8787_v17, %v7811_v36  ;;  %v5168_v2 = vmax.f32 %v4082_v47, 0.0 }
 0x15e   : > { %v3060_v44 = vpop.f32.mrf.mxu0  ;;  %v4084_v46 = vpop.f32.mrf.mxu1 }
 0x15f   : > { %v3061_v3 = vadd.f32 %v8787_v17, %v3060_v44  ;;  %v4085_v4 = vadd.f32 %v8787_v17, %v4084_v46  ;;  %v4915_v10 = vmax.f32 %v3069_v51, 0.0  ;;  %v5171_v18 = vmax.f32 %v4093_v58, 0.0  ;;  %v8189_v44 = vld [vmem:[%s8324_s22 + $0x2b8] sm:$0xff]  }
 0x160   : > { %v7558_v48 = vpop.f32.mrf.mxu0  ;;  %7653 = vmatmul.mubr.msk.bf16.gmra.mxu0 %vm1991_vm2, %v8181_v37  ;;  %v7814_v49 = vpop.f32.mrf.mxu1  ;;  %7909 = vmatmul.mubr.msk.bf16.gmra.mxu1 %vm1991_vm2, %v8182_v38  ;;  %v8190_v46 = vld [vmem:[%s8324_s22 + $0x6b8] sm:$0xff]  }
 0x161   : > { %v3082_v52 = vadd.f32 %v8787_v17, %v7558_v48  ;;  %v4106_v53 = vadd.f32 %v8787_v17, %v7814_v49  ;;  %7656 = vmatprep.mubr.msk.bf16.mxu0 %vm1991_vm2, %v8183_v40  ;;  %7912 = vmatprep.mubr.msk.bf16.mxu1 %vm1991_vm2, %v8184_v41  ;;  %v4913_v27 = vmax.f32 %v3061_v3, 0.0  ;;  %v5169_v28 = vmax.f32 %v4085_v4, 0.0  ;;  %v8191_v48 = vld [vmem:[%s8324_s22 + $0x2c0] sm:$0xff]  }
 0x162   : > { %v5903_v54 = vld [vmem:[#allocation2 + $0xf0] ss:$2 sm:$0xff]  ;;  %v6159_v55 = vld [vmem:[#allocation2 + $0xf1] ss:$2 sm:$0xff]  ;;  %v3073_v59 = vpop.f32.mrf.mxu0  ;;  %v4097_v60 = vpop.f32.mrf.mxu1  ;;  %v8192_v49 = vld [vmem:[%s8324_s22 + $0x6c0] sm:$0xff]  }
 0x163   : > { %v6399_v61 = vmax.f32 %v5903_v54, %v6159_v55  ;;  %v4918_v62 = vmax.f32 %v3082_v52, 0.0  ;;  %v5174_v63 = vmax.f32 %v4106_v53, 0.0  ;;  %v3074_v0 = vadd.f32 %v8787_v17, %v3073_v59 }
 0x164   : > { %v5901_v1 = vld [vmem:[#allocation2 + $0xe0] ss:$2 sm:$0xff]  ;;  %v4098_v5 = vadd.f32 %v8787_v17, %v4097_v60  ;;  %v7559_v6 = vpop.f32.mrf.mxu0  ;;  %v7815_v7 = vpop.f32.mrf.mxu1  ;;  %v6157_v9 = vld [vmem:[#allocation2 + $0xe1] ss:$2 sm:$0xff] }
 0x165   : > { %6527 = vst.msk [vmem:[%s8620_s29 + $0x78] sm:$0xff] %vm5616_vm3, %v6399_v61  ;;  %v5394_v11 = vmax.f32 %v4914_v50, %v4918_v62  ;;  %v5522_v12 = vmax.f32 %v5170_v56, %v5174_v63  ;;  %v3085_v13 = vadd.f32 %v8787_v17, %v7559_v6  ;;  %v6398_v16 = vmax.f32 %v5901_v1, %v6157_v9 }
 0x166   : > { %v4916_v19 = vmax.f32 %v3074_v0, 0.0  ;;  %v5172_v20 = vmax.f32 %v4098_v5, 0.0  ;;  %v3076_v21 = vpop.f32.mrf.mxu0  ;;  %v4100_v22 = vpop.f32.mrf.mxu1  ;;  %v4109_v24 = vadd.f32 %v8787_v17, %v7815_v7 }
 0x167   : > { %5651 = vst.msk [vmem:[#allocation2 + $0x110] sm:$0xff] %vm5616_vm3, %v5394_v11  ;;  %5779 = vst.msk [vmem:[#allocation2 + $0x510] sm:$0xff] %vm5616_vm3, %v5522_v12  ;;  %v4919_v23 = vmax.f32 %v3085_v13, 0.0  ;;  %v3077_v25 = vadd.f32 %v8787_v17, %v3076_v21  ;;  %v4101_v26 = vadd.f32 %v8787_v17, %v4100_v22  ;;  %v8195_v22 = vld [vmem:[%s8324_s22 + $0x2d0] sm:$0xff]  }
 0x168   : > { %6526 = vst.msk [vmem:[%s8620_s29 + $0x70] sm:$0xff] %vm5616_vm3, %v6398_v16  ;;  %v5392_v29 = vmax.f32 %v4912_v57, %v4916_v19  ;;  %v5520_v30 = vmax.f32 %v5168_v2, %v5172_v20  ;;  %v7562_v31 = vpop.f32.mrf.mxu0  ;;  %7657 = vmatmul.mubr.msk.bf16.gmra.mxu0 %vm1991_vm2, %v8185_v8  ;;  %v7818_v32 = vpop.f32.mrf.mxu1  ;;  %7913 = vmatmul.mubr.msk.bf16.gmra.mxu1 %vm1991_vm2, %v8186_v45  ;;  %v5175_v34 = vmax.f32 %v4109_v24, 0.0 }
 0x169   : > { %v5395_v33 = vmax.f32 %v4915_v10, %v4919_v23  ;;  %v4917_v35 = vmax.f32 %v3077_v25, 0.0  ;;  %v5173_v36 = vmax.f32 %v4101_v26, 0.0  ;;  %7660 = vmatprep.mubr.msk.bf16.mxu0 %vm1991_vm2, %v8187_v14  ;;  %7916 = vmatprep.mubr.msk.bf16.mxu1 %vm1991_vm2, %v8188_v15  ;;  %v3098_v47 = vadd.f32 %v8787_v17, %v7562_v31  ;;  %v8193_v14 = vld [vmem:[%s8324_s22 + $0x2c8] sm:$0xff]   ;;  %v8196_v23 = vld [vmem:[%s8324_s22 + $0x6d0] sm:$0xff]  }
 0x16a   : > { %5649 = vst.msk [vmem:[#allocation2 + $0x100] sm:$0xff] %vm5616_vm3, %v5392_v29  ;;  %5777 = vst.msk [vmem:[#allocation2 + $0x500] sm:$0xff] %vm5616_vm3, %v5520_v30  ;;  %v3089_v37 = vpop.f32.mrf.mxu0  ;;  %v4113_v38 = vpop.f32.mrf.mxu1  ;;  %v5523_v39 = vmax.f32 %v5171_v18, %v5175_v34  ;;  %v4122_v50 = vadd.f32 %v8787_v17, %v7818_v32  ;;  %v8194_v15 = vld [vmem:[%s8324_s22 + $0x6c8] sm:$0xff]  }
 0x16b   : > { %5652 = vst.msk [vmem:[#allocation2 + $0x118] sm:$0xff] %vm5616_vm3, %v5395_v33  ;;  %v5393_v40 = vmax.f32 %v4913_v27, %v4917_v35  ;;  %v5521_v41 = vmax.f32 %v5169_v28, %v5173_v36  ;;  %v3090_v51 = vadd.f32 %v8787_v17, %v3089_v37  ;;  %v4114_v54 = vadd.f32 %v8787_v17, %v4113_v38 }
 0x16c   : > { %v7563_v42 = vpop.f32.mrf.mxu0  ;;  %v7819_v43 = vpop.f32.mrf.mxu1  ;;  %5780 = vst.msk [vmem:[#allocation2 + $0x518] sm:$0xff] %vm5616_vm3, %v5523_v39  ;;  %v4922_v57 = vmax.f32 %v3098_v47, 0.0  ;;  %v5178_v63 = vmax.f32 %v4122_v50, 0.0 }
 0x16d   : > { %5650 = vst.msk [vmem:[#allocation2 + $0x108] sm:$0xff] %vm5616_vm3, %v5393_v40  ;;  %5778 = vst.msk [vmem:[#allocation2 + $0x508] sm:$0xff] %vm5616_vm3, %v5521_v41  ;;  %v3101_v58 = vadd.f32 %v8787_v17, %v7563_v42  ;;  %v4920_v0 = vmax.f32 %v3090_v51, 0.0  ;;  %v4125_v1 = vadd.f32 %v8787_v17, %v7819_v43  ;;  %v5176_v45 = vmax.f32 %v4114_v54, 0.0 }
 0x16e   : > { %v3092_v52 = vpop.f32.mrf.mxu0  ;;  %v4116_v53 = vpop.f32.mrf.mxu1 }
 0x16f   : > { %v3093_v9 = vadd.f32 %v8787_v17, %v3092_v52  ;;  %v4117_v10 = vadd.f32 %v8787_v17, %v4116_v53  ;;  %v4923_v18 = vmax.f32 %v3101_v58, 0.0  ;;  %v5179_v25 = vmax.f32 %v4125_v1, 0.0  ;;  %v8197_v52 = vld [vmem:[%s8324_s22 + $0x2d8] sm:$0xff]  }
 0x170   : > { %v7566_v55 = vpop.f32.mrf.mxu0  ;;  %7661 = vmatmul.mubr.msk.bf16.gmra.mxu0 %vm1991_vm2, %v8189_v44  ;;  %v7822_v56 = vpop.f32.mrf.mxu1  ;;  %7917 = vmatmul.mubr.msk.bf16.gmra.mxu1 %vm1991_vm2, %v8190_v46  ;;  %v8198_v53 = vld [vmem:[%s8324_s22 + $0x6d8] sm:$0xff]  }
 0x171   : > { %v3114_v59 = vadd.f32 %v8787_v17, %v7566_v55  ;;  %v4138_v60 = vadd.f32 %v8787_v17, %v7822_v56  ;;  %7664 = vmatprep.mubr.msk.bf16.mxu0 %vm1991_vm2, %v8191_v48  ;;  %7920 = vmatprep.mubr.msk.bf16.mxu1 %vm1991_vm2, %v8192_v49  ;;  %v4921_v34 = vmax.f32 %v3093_v9, 0.0  ;;  %v5177_v35 = vmax.f32 %v4117_v10, 0.0  ;;  %v8199_v55 = vld [vmem:[%s8324_s22 + $0x2e0] sm:$0xff]  }
 0x172   : > { %v5907_v61 = vld [vmem:[#allocation2 + $0x110] ss:$2 sm:$0xff]  ;;  %v6163_v62 = vld [vmem:[#allocation2 + $0x111] ss:$2 sm:$0xff]  ;;  %v3105_v2 = vpop.f32.mrf.mxu0  ;;  %v4129_v3 = vpop.f32.mrf.mxu1  ;;  %v8200_v56 = vld [vmem:[%s8324_s22 + $0x6e0] sm:$0xff]  }
 0x173   : > { %v6401_v4 = vmax.f32 %v5907_v61, %v6163_v62  ;;  %v4926_v5 = vmax.f32 %v3114_v59, 0.0  ;;  %v5182_v6 = vmax.f32 %v4138_v60, 0.0  ;;  %v3106_v7 = vadd.f32 %v8787_v17, %v3105_v2 }
 0x174   : > { %v5905_v8 = vld [vmem:[#allocation2 + $0x100] ss:$2 sm:$0xff]  ;;  %v4130_v11 = vadd.f32 %v8787_v17, %v4129_v3  ;;  %v7567_v12 = vpop.f32.mrf.mxu0  ;;  %v7823_v13 = vpop.f32.mrf.mxu1  ;;  %v6161_v16 = vld [vmem:[#allocation2 + $0x101] ss:$2 sm:$0xff] }
 0x175   : > { %6529 = vst.msk [vmem:[%s8620_s29 + $0x88] sm:$0xff] %vm5616_vm3, %v6401_v4  ;;  %v5398_v19 = vmax.f32 %v4922_v57, %v4926_v5  ;;  %v5526_v20 = vmax.f32 %v5178_v63, %v5182_v6  ;;  %v3117_v21 = vadd.f32 %v8787_v17, %v7567_v12  ;;  %v6400_v24 = vmax.f32 %v5905_v8, %v6161_v16 }
 0x176   : > { %v4924_v26 = vmax.f32 %v3106_v7, 0.0  ;;  %v5180_v27 = vmax.f32 %v4130_v11, 0.0  ;;  %v3108_v28 = vpop.f32.mrf.mxu0  ;;  %v4132_v29 = vpop.f32.mrf.mxu1  ;;  %v4141_v31 = vadd.f32 %v8787_v17, %v7823_v13 }
 0x177   : > { %5655 = vst.msk [vmem:[#allocation2 + $0x130] sm:$0xff] %vm5616_vm3, %v5398_v19  ;;  %5783 = vst.msk [vmem:[#allocation2 + $0x530] sm:$0xff] %vm5616_vm3, %v5526_v20  ;;  %v4927_v30 = vmax.f32 %v3117_v21, 0.0  ;;  %v3109_v32 = vadd.f32 %v8787_v17, %v3108_v28  ;;  %v4133_v33 = vadd.f32 %v8787_v17, %v4132_v29  ;;  %v8203_v29 = vld [vmem:[%s8324_s22 + $0x2f0] sm:$0xff]  }
 0x178   : > { %6528 = vst.msk [vmem:[%s8620_s29 + $0x80] sm:$0xff] %vm5616_vm3, %v6400_v24  ;;  %v5396_v36 = vmax.f32 %v4920_v0, %v4924_v26  ;;  %v5524_v37 = vmax.f32 %v5176_v45, %v5180_v27  ;;  %v7570_v38 = vpop.f32.mrf.mxu0  ;;  %7665 = vmatmul.mubr.msk.bf16.gmra.mxu0 %vm1991_vm2, %v8193_v14  ;;  %v7826_v39 = vpop.f32.mrf.mxu1  ;;  %7921 = vmatmul.mubr.msk.bf16.gmra.mxu1 %vm1991_vm2, %v8194_v15  ;;  %v5183_v41 = vmax.f32 %v4141_v31, 0.0 }
 0x179   : > { %v5399_v40 = vmax.f32 %v4923_v18, %v4927_v30  ;;  %v4925_v42 = vmax.f32 %v3109_v32, 0.0  ;;  %v5181_v43 = vmax.f32 %v4133_v33, 0.0  ;;  %7668 = vmatprep.mubr.msk.bf16.mxu0 %vm1991_vm2, %v8195_v22  ;;  %7924 = vmatprep.mubr.msk.bf16.mxu1 %vm1991_vm2, %v8196_v23  ;;  %v3130_v54 = vadd.f32 %v8787_v17, %v7570_v38  ;;  %v8201_v22 = vld [vmem:[%s8324_s22 + $0x2e8] sm:$0xff]   ;;  %v8204_v30 = vld [vmem:[%s8324_s22 + $0x6f0] sm:$0xff]  }
 0x17a   : > { %5653 = vst.msk [vmem:[#allocation2 + $0x120] sm:$0xff] %vm5616_vm3, %v5396_v36  ;;  %5781 = vst.msk [vmem:[#allocation2 + $0x520] sm:$0xff] %vm5616_vm3, %v5524_v37  ;;  %v3121_v44 = vpop.f32.mrf.mxu0  ;;  %v4145_v46 = vpop.f32.mrf.mxu1  ;;  %v5527_v47 = vmax.f32 %v5179_v25, %v5183_v41  ;;  %v4154_v57 = vadd.f32 %v8787_v17, %v7826_v39  ;;  %v8202_v23 = vld [vmem:[%s8324_s22 + $0x6e8] sm:$0xff]  }
 0x17b   : > { %5656 = vst.msk [vmem:[#allocation2 + $0x138] sm:$0xff] %vm5616_vm3, %v5399_v40  ;;  %v5397_v48 = vmax.f32 %v4921_v34, %v4925_v42  ;;  %v5525_v49 = vmax.f32 %v5177_v35, %v5181_v43  ;;  %v3122_v58 = vadd.f32 %v8787_v17, %v3121_v44  ;;  %v4146_v61 = vadd.f32 %v8787_v17, %v4145_v46 }
 0x17c   : > { %v7571_v50 = vpop.f32.mrf.mxu0  ;;  %v7827_v51 = vpop.f32.mrf.mxu1  ;;  %5784 = vst.msk [vmem:[#allocation2 + $0x538] sm:$0xff] %vm5616_vm3, %v5527_v47  ;;  %v4930_v0 = vmax.f32 %v3130_v54, 0.0  ;;  %v5186_v6 = vmax.f32 %v4154_v57, 0.0 }
 0x17d   : > { %5654 = vst.msk [vmem:[#allocation2 + $0x128] sm:$0xff] %vm5616_vm3, %v5397_v48  ;;  %5782 = vst.msk [vmem:[#allocation2 + $0x528] sm:$0xff] %vm5616_vm3, %v5525_v49  ;;  %v3133_v1 = vadd.f32 %v8787_v17, %v7571_v50  ;;  %v4928_v7 = vmax.f32 %v3122_v58, 0.0  ;;  %v4157_v8 = vadd.f32 %v8787_v17, %v7827_v51  ;;  %v5184_v15 = vmax.f32 %v4146_v61, 0.0  ;;  %v8205_v58 = vld [vmem:[%s8324_s22 + $0x2f8] sm:$0xff]  }
 0x17e   : > { %v3124_v59 = vpop.f32.mrf.mxu0  ;;  %v4148_v60 = vpop.f32.mrf.mxu1 }
 0x17f   : > { %v3125_v16 = vadd.f32 %v8787_v17, %v3124_v59  ;;  %v4149_v18 = vadd.f32 %v8787_v17, %v4148_v60  ;;  %v4931_v25 = vmax.f32 %v3133_v1, 0.0  ;;  %v5187_v32 = vmax.f32 %v4157_v8, 0.0  ;;  %v8206_v59 = vld [vmem:[%s8324_s22 + $0x6f8] sm:$0xff]   ;;  %v9056_v60 = vld [vmem:[%s10142_s2] ss:$0 sm:$0xff] }
 0x180   : > { %v7574_v62 = vpop.f32.mrf.mxu0  ;;  %7669 = vmatmul.mubr.msk.bf16.gmra.mxu0 %vm1991_vm2, %v8197_v52  ;;  %v7830_v63 = vpop.f32.mrf.mxu1  ;;  %7925 = vmatmul.mubr.msk.bf16.gmra.mxu1 %vm1991_vm2, %v8198_v53 }
 0x181   : > { %v3146_v2 = vadd.f32 %v8787_v17, %v7574_v62  ;;  %v4170_v3 = vadd.f32 %v8787_v17, %v7830_v63  ;;  %7672 = vmatprep.mubr.msk.bf16.mxu0 %vm1991_vm2, %v8199_v55  ;;  %7928 = vmatprep.mubr.msk.bf16.mxu1 %vm1991_vm2, %v8200_v56  ;;  %v4929_v41 = vmax.f32 %v3125_v16, 0.0  ;;  %v5185_v42 = vmax.f32 %v4149_v18, 0.0  ;;  %v8207_v62 = vld [vmem:[%s8324_s22 + $0x300] sm:$0xff]  }
 0x182   : > { %v5911_v4 = vld [vmem:[#allocation2 + $0x130] ss:$2 sm:$0xff]  ;;  %v6167_v5 = vld [vmem:[#allocation2 + $0x131] ss:$2 sm:$0xff]  ;;  %v3137_v45 = vpop.f32.mrf.mxu0  ;;  %v4161_v9 = vpop.f32.mrf.mxu1  ;;  %v8208_v63 = vld [vmem:[%s8324_s22 + $0x700] sm:$0xff]  }
 0x183   : > { %v6403_v10 = vmax.f32 %v5911_v4, %v6167_v5  ;;  %v4934_v11 = vmax.f32 %v3146_v2, 0.0  ;;  %v5190_v12 = vmax.f32 %v4170_v3, 0.0  ;;  %v3138_v13 = vadd.f32 %v8787_v17, %v3137_v45 }
 0x184   : > { %v5909_v14 = vld [vmem:[#allocation2 + $0x120] ss:$2 sm:$0xff]  ;;  %v4162_v19 = vadd.f32 %v8787_v17, %v4161_v9  ;;  %v7575_v20 = vpop.f32.mrf.mxu0  ;;  %v7831_v21 = vpop.f32.mrf.mxu1  ;;  %v6165_v24 = vld [vmem:[#allocation2 + $0x121] ss:$2 sm:$0xff] }
 0x185   : > { %6531 = vst.msk [vmem:[%s8620_s29 + $0x98] sm:$0xff] %vm5616_vm3, %v6403_v10  ;;  %v5402_v26 = vmax.f32 %v4930_v0, %v4934_v11  ;;  %v5530_v27 = vmax.f32 %v5186_v6, %v5190_v12  ;;  %v3149_v28 = vadd.f32 %v8787_v17, %v7575_v20  ;;  %v6402_v31 = vmax.f32 %v5909_v14, %v6165_v24 }
 0x186   : > { %v4932_v33 = vmax.f32 %v3138_v13, 0.0  ;;  %v5188_v34 = vmax.f32 %v4162_v19, 0.0  ;;  %v3140_v35 = vpop.f32.mrf.mxu0  ;;  %v4164_v36 = vpop.f32.mrf.mxu1  ;;  %v4173_v38 = vadd.f32 %v8787_v17, %v7831_v21 }
 0x187   : > { %5659 = vst.msk [vmem:[#allocation2 + $0x150] sm:$0xff] %vm5616_vm3, %v5402_v26  ;;  %5787 = vst.msk [vmem:[#allocation2 + $0x550] sm:$0xff] %vm5616_vm3, %v5530_v27  ;;  %v4935_v37 = vmax.f32 %v3149_v28, 0.0  ;;  %v3141_v39 = vadd.f32 %v8787_v17, %v3140_v35  ;;  %v4165_v40 = vadd.f32 %v8787_v17, %v4164_v36  ;;  %v8211_v36 = vld [vmem:[%s8324_s22 + $0x310] sm:$0xff]  }
 0x188   : > { %6530 = vst.msk [vmem:[%s8620_s29 + $0x90] sm:$0xff] %vm5616_vm3, %v6402_v31  ;;  %v5400_v43 = vmax.f32 %v4928_v7, %v4932_v33  ;;  %v5528_v44 = vmax.f32 %v5184_v15, %v5188_v34  ;;  %v7578_v46 = vpop.f32.mrf.mxu0  ;;  %7673 = vmatmul.mubr.msk.bf16.gmra.mxu0 %vm1991_vm2, %v8201_v22  ;;  %v7834_v47 = vpop.f32.mrf.mxu1  ;;  %7929 = vmatmul.mubr.msk.bf16.gmra.mxu1 %vm1991_vm2, %v8202_v23  ;;  %v5191_v49 = vmax.f32 %v4173_v38, 0.0 }
 0x189   : > { %v5403_v48 = vmax.f32 %v4931_v25, %v4935_v37  ;;  %v4933_v50 = vmax.f32 %v3141_v39, 0.0  ;;  %v5189_v51 = vmax.f32 %v4165_v40, 0.0  ;;  %7676 = vmatprep.mubr.msk.bf16.mxu0 %vm1991_vm2, %v8203_v29  ;;  %7932 = vmatprep.mubr.msk.bf16.mxu1 %vm1991_vm2, %v8204_v30  ;;  %v3162_v61 = vadd.f32 %v9056_v60, %v7578_v46  ;;  %v8209_v29 = vld [vmem:[%s8324_s22 + $0x308] sm:$0xff]   ;;  %v8212_v37 = vld [vmem:[%s8324_s22 + $0x710] sm:$0xff]  }
 0x18a   : > { %5657 = vst.msk [vmem:[#allocation2 + $0x140] sm:$0xff] %vm5616_vm3, %v5400_v43  ;;  %5785 = vst.msk [vmem:[#allocation2 + $0x540] sm:$0xff] %vm5616_vm3, %v5528_v44  ;;  %v3153_v17 = vpop.f32.mrf.mxu0  ;;  %v4177_v52 = vpop.f32.mrf.mxu1  ;;  %v5531_v53 = vmax.f32 %v5187_v32, %v5191_v49  ;;  %v4186_v0 = vadd.f32 %v9056_v60, %v7834_v47  ;;  %v8210_v30 = vld [vmem:[%s8324_s22 + $0x708] sm:$0xff]  }
 0x18b   : > { %5660 = vst.msk [vmem:[#allocation2 + $0x158] sm:$0xff] %vm5616_vm3, %v5403_v48  ;;  %v5401_v54 = vmax.f32 %v4929_v41, %v4933_v50  ;;  %v5529_v55 = vmax.f32 %v5185_v42, %v5189_v51  ;;  %v3154_v1 = vadd.f32 %v9056_v60, %v3153_v17  ;;  %v4178_v4 = vadd.f32 %v9056_v60, %v4177_v52 }
 0x18c   : > { %v7579_v56 = vpop.f32.mrf.mxu0  ;;  %v7835_v57 = vpop.f32.mrf.mxu1  ;;  %5788 = vst.msk [vmem:[#allocation2 + $0x558] sm:$0xff] %vm5616_vm3, %v5531_v53  ;;  %v4938_v7 = vmax.f32 %v3162_v61, 0.0  ;;  %v5194_v12 = vmax.f32 %v4186_v0, 0.0 }
 0x18d   : > { %5658 = vst.msk [vmem:[#allocation2 + $0x148] sm:$0xff] %vm5616_vm3, %v5401_v54  ;;  %5786 = vst.msk [vmem:[#allocation2 + $0x548] sm:$0xff] %vm5616_vm3, %v5529_v55  ;;  %v3165_v8 = vadd.f32 %v9056_v60, %v7579_v56  ;;  %v4936_v13 = vmax.f32 %v3154_v1, 0.0  ;;  %v4189_v14 = vadd.f32 %v9056_v60, %v7835_v57  ;;  %v5192_v23 = vmax.f32 %v4178_v4, 0.0 }
 0x18e   : > { %v3156_v2 = vpop.f32.mrf.mxu0  ;;  %v4180_v3 = vpop.f32.mrf.mxu1 }
 0x18f   : > { %v3157_v24 = vadd.f32 %v9056_v60, %v3156_v2  ;;  %v4181_v25 = vadd.f32 %v9056_v60, %v4180_v3  ;;  %v4939_v32 = vmax.f32 %v3165_v8, 0.0  ;;  %v5195_v39 = vmax.f32 %v4189_v14, 0.0  ;;  %v8213_v2 = vld [vmem:[%s8324_s22 + $0x318] sm:$0xff]  }
 0x190   : > { %v7582_v5 = vpop.f32.mrf.mxu0  ;;  %7677 = vmatmul.mubr.msk.bf16.gmra.mxu0 %vm1991_vm2, %v8205_v58  ;;  %v7838_v6 = vpop.f32.mrf.mxu1  ;;  %7933 = vmatmul.mubr.msk.bf16.gmra.mxu1 %vm1991_vm2, %v8206_v59  ;;  %v8214_v3 = vld [vmem:[%s8324_s22 + $0x718] sm:$0xff]  }
 0x191   : > { %v3178_v45 = vadd.f32 %v9056_v60, %v7582_v5  ;;  %v4202_v9 = vadd.f32 %v9056_v60, %v7838_v6  ;;  %7680 = vmatprep.mubr.msk.bf16.mxu0 %vm1991_vm2, %v8207_v62  ;;  %7936 = vmatprep.mubr.msk.bf16.mxu1 %vm1991_vm2, %v8208_v63  ;;  %v4937_v49 = vmax.f32 %v3157_v24, 0.0  ;;  %v5193_v50 = vmax.f32 %v4181_v25, 0.0  ;;  %v8215_v5 = vld [vmem:[%s8324_s22 + $0x320] sm:$0xff]  }
 0x192   : > { %v5915_v10 = vld [vmem:[#allocation2 + $0x150] ss:$2 sm:$0xff]  ;;  %v6171_v11 = vld [vmem:[#allocation2 + $0x151] ss:$2 sm:$0xff]  ;;  %v3169_v15 = vpop.f32.mrf.mxu0  ;;  %v4193_v16 = vpop.f32.mrf.mxu1  ;;  %v8216_v6 = vld [vmem:[%s8324_s22 + $0x720] sm:$0xff]  }
 0x193   : > { %v6405_v18 = vmax.f32 %v5915_v10, %v6171_v11  ;;  %v4942_v19 = vmax.f32 %v3178_v45, 0.0  ;;  %v5198_v20 = vmax.f32 %v4202_v9, 0.0  ;;  %v3170_v21 = vadd.f32 %v9056_v60, %v3169_v15 }
 0x194   : > { %v5913_v22 = vld [vmem:[#allocation2 + $0x140] ss:$2 sm:$0xff]  ;;  %v4194_v26 = vadd.f32 %v9056_v60, %v4193_v16  ;;  %v7583_v27 = vpop.f32.mrf.mxu0  ;;  %v7839_v28 = vpop.f32.mrf.mxu1  ;;  %v6169_v31 = vld [vmem:[#allocation2 + $0x141] ss:$2 sm:$0xff] }
 0x195   : > { %6533 = vst.msk [vmem:[%s8620_s29 + $0xa8] sm:$0xff] %vm5616_vm3, %v6405_v18  ;;  %v5406_v33 = vmax.f32 %v4938_v7, %v4942_v19  ;;  %v5534_v34 = vmax.f32 %v5194_v12, %v5198_v20  ;;  %v3181_v35 = vadd.f32 %v9056_v60, %v7583_v27  ;;  %v6404_v38 = vmax.f32 %v5913_v22, %v6169_v31 }
 0x196   : > { %v4940_v40 = vmax.f32 %v3170_v21, 0.0  ;;  %v5196_v41 = vmax.f32 %v4194_v26, 0.0  ;;  %v3172_v42 = vpop.f32.mrf.mxu0  ;;  %v4196_v43 = vpop.f32.mrf.mxu1  ;;  %v4205_v46 = vadd.f32 %v9056_v60, %v7839_v28 }
 0x197   : > { %5663 = vst.msk [vmem:[#allocation2 + $0x170] sm:$0xff] %vm5616_vm3, %v5406_v33  ;;  %5791 = vst.msk [vmem:[#allocation2 + $0x570] sm:$0xff] %vm5616_vm3, %v5534_v34  ;;  %v4943_v44 = vmax.f32 %v3181_v35, 0.0  ;;  %v3173_v47 = vadd.f32 %v9056_v60, %v3172_v42  ;;  %v4197_v48 = vadd.f32 %v9056_v60, %v4196_v43  ;;  %v8219_v43 = vld [vmem:[%s8324_s22 + $0x330] sm:$0xff]  }
 0x198   : > { %6532 = vst.msk [vmem:[%s8620_s29 + $0xa0] sm:$0xff] %vm5616_vm3, %v6404_v38  ;;  %v5404_v51 = vmax.f32 %v4936_v13, %v4940_v40  ;;  %v5532_v17 = vmax.f32 %v5192_v23, %v5196_v41  ;;  %v7586_v52 = vpop.f32.mrf.mxu0  ;;  %7681 = vmatmul.mubr.msk.bf16.gmra.mxu0 %vm1991_vm2, %v8209_v29  ;;  %v7842_v53 = vpop.f32.mrf.mxu1  ;;  %7937 = vmatmul.mubr.msk.bf16.gmra.mxu1 %vm1991_vm2, %v8210_v30  ;;  %v5199_v55 = vmax.f32 %v4205_v46, 0.0 }
 0x199   : > { %v5407_v54 = vmax.f32 %v4939_v32, %v4943_v44  ;;  %v4941_v56 = vmax.f32 %v3173_v47, 0.0  ;;  %v5197_v57 = vmax.f32 %v4197_v48, 0.0  ;;  %7684 = vmatprep.mubr.msk.bf16.mxu0 %vm1991_vm2, %v8211_v36  ;;  %7940 = vmatprep.mubr.msk.bf16.mxu1 %vm1991_vm2, %v8212_v37  ;;  %v3194_v4 = vadd.f32 %v9056_v60, %v7586_v52  ;;  %v8217_v36 = vld [vmem:[%s8324_s22 + $0x328] sm:$0xff]   ;;  %v8220_v44 = vld [vmem:[%s8324_s22 + $0x730] sm:$0xff]  }
 0x19a   : > { %5661 = vst.msk [vmem:[#allocation2 + $0x160] sm:$0xff] %vm5616_vm3, %v5404_v51  ;;  %5789 = vst.msk [vmem:[#allocation2 + $0x560] sm:$0xff] %vm5616_vm3, %v5532_v17  ;;  %v3185_v58 = vpop.f32.mrf.mxu0  ;;  %v4209_v59 = vpop.f32.mrf.mxu1  ;;  %v5535_v61 = vmax.f32 %v5195_v39, %v5199_v55  ;;  %v4218_v7 = vadd.f32 %v9056_v60, %v7842_v53  ;;  %v8218_v37 = vld [vmem:[%s8324_s22 + $0x728] sm:$0xff]  }
 0x19b   : > { %5664 = vst.msk [vmem:[#allocation2 + $0x178] sm:$0xff] %vm5616_vm3, %v5407_v54  ;;  %v5405_v62 = vmax.f32 %v4937_v49, %v4941_v56  ;;  %v5533_v63 = vmax.f32 %v5193_v50, %v5197_v57  ;;  %v3186_v8 = vadd.f32 %v9056_v60, %v3185_v58  ;;  %v4210_v10 = vadd.f32 %v9056_v60, %v4209_v59 }
 0x19c   : > { %v7587_v0 = vpop.f32.mrf.mxu0  ;;  %v7843_v1 = vpop.f32.mrf.mxu1  ;;  %5792 = vst.msk [vmem:[#allocation2 + $0x578] sm:$0xff] %vm5616_vm3, %v5535_v61  ;;  %v4946_v13 = vmax.f32 %v3194_v4, 0.0  ;;  %v5202_v20 = vmax.f32 %v4218_v7, 0.0 }
 0x19d   : > { %5662 = vst.msk [vmem:[#allocation2 + $0x168] sm:$0xff] %vm5616_vm3, %v5405_v62  ;;  %5790 = vst.msk [vmem:[#allocation2 + $0x568] sm:$0xff] %vm5616_vm3, %v5533_v63  ;;  %v3197_v14 = vadd.f32 %v9056_v60, %v7587_v0  ;;  %v4944_v21 = vmax.f32 %v3186_v8, 0.0  ;;  %v4221_v22 = vadd.f32 %v9056_v60, %v7843_v1  ;;  %v5200_v30 = vmax.f32 %v4210_v10, 0.0 }
 0x19e   : > { %v3188_v45 = vpop.f32.mrf.mxu0  ;;  %v4212_v9 = vpop.f32.mrf.mxu1 }
 0x19f   : > { %v3189_v31 = vadd.f32 %v9056_v60, %v3188_v45  ;;  %v4213_v32 = vadd.f32 %v9056_v60, %v4212_v9  ;;  %v4947_v39 = vmax.f32 %v3197_v14, 0.0  ;;  %v5203_v47 = vmax.f32 %v4221_v22, 0.0  ;;  %v8221_v45 = vld [vmem:[%s8324_s22 + $0x338] sm:$0xff]  }
 0x1a0   : > { %v7590_v11 = vpop.f32.mrf.mxu0  ;;  %7685 = vmatmul.mubr.msk.bf16.gmra.mxu0 %vm1991_vm2, %v8213_v2  ;;  %v7846_v12 = vpop.f32.mrf.mxu1  ;;  %7941 = vmatmul.mubr.msk.bf16.gmra.mxu1 %vm1991_vm2, %v8214_v3  ;;  %v8222_v9 = vld [vmem:[%s8324_s22 + $0x738] sm:$0xff]  }
 0x1a1   : > { %v3210_v15 = vadd.f32 %v9056_v60, %v7590_v11  ;;  %v4234_v16 = vadd.f32 %v9056_v60, %v7846_v12  ;;  %7688 = vmatprep.mubr.msk.bf16.mxu0 %vm1991_vm2, %v8215_v5  ;;  %7944 = vmatprep.mubr.msk.bf16.mxu1 %vm1991_vm2, %v8216_v6  ;;  %v4945_v55 = vmax.f32 %v3189_v31, 0.0  ;;  %v5201_v56 = vmax.f32 %v4213_v32, 0.0  ;;  %v8223_v11 = vld [vmem:[%s8324_s22 + $0x340] sm:$0xff]  }
 0x1a2   : > { %v5919_v18 = vld [vmem:[#allocation2 + $0x170] ss:$2 sm:$0xff]  ;;  %v6175_v19 = vld [vmem:[#allocation2 + $0x171] ss:$2 sm:$0xff]  ;;  %v3201_v23 = vpop.f32.mrf.mxu0  ;;  %v4225_v24 = vpop.f32.mrf.mxu1  ;;  %v8224_v12 = vld [vmem:[%s8324_s22 + $0x740] sm:$0xff]  }
 0x1a3   : > { %v6407_v25 = vmax.f32 %v5919_v18, %v6175_v19  ;;  %v4950_v26 = vmax.f32 %v3210_v15, 0.0  ;;  %v5206_v27 = vmax.f32 %v4234_v16, 0.0  ;;  %v3202_v28 = vadd.f32 %v9056_v60, %v3201_v23 }
 0x1a4   : > { %v5917_v29 = vld [vmem:[#allocation2 + $0x160] ss:$2 sm:$0xff]  ;;  %v4226_v33 = vadd.f32 %v9056_v60, %v4225_v24  ;;  %v7591_v34 = vpop.f32.mrf.mxu0  ;;  %v7847_v35 = vpop.f32.mrf.mxu1  ;;  %v6173_v38 = vld [vmem:[#allocation2 + $0x161] ss:$2 sm:$0xff] }
 0x1a5   : > { %6535 = vst.msk [vmem:[%s8620_s29 + $0xb8] sm:$0xff] %vm5616_vm3, %v6407_v25  ;;  %v5410_v40 = vmax.f32 %v4946_v13, %v4950_v26  ;;  %v5538_v41 = vmax.f32 %v5202_v20, %v5206_v27  ;;  %v3213_v42 = vadd.f32 %v9056_v60, %v7591_v34  ;;  %v6406_v46 = vmax.f32 %v5917_v29, %v6173_v38 }
 0x1a6   : > { %v4948_v48 = vmax.f32 %v3202_v28, 0.0  ;;  %v5204_v49 = vmax.f32 %v4226_v33, 0.0  ;;  %v3204_v50 = vpop.f32.mrf.mxu0  ;;  %v4228_v51 = vpop.f32.mrf.mxu1  ;;  %v4237_v52 = vadd.f32 %v9056_v60, %v7847_v35 }
 0x1a7   : > { %5667 = vst.msk [vmem:[#allocation2 + $0x190] sm:$0xff] %vm5616_vm3, %v5410_v40  ;;  %5795 = vst.msk [vmem:[#allocation2 + $0x590] sm:$0xff] %vm5616_vm3, %v5538_v41  ;;  %v4951_v17 = vmax.f32 %v3213_v42, 0.0  ;;  %v3205_v53 = vadd.f32 %v9056_v60, %v3204_v50  ;;  %v4229_v54 = vadd.f32 %v9056_v60, %v4228_v51  ;;  %v8227_v51 = vld [vmem:[%s8324_s22 + $0x350] sm:$0xff]  }
 0x1a8   : > { %6534 = vst.msk [vmem:[%s8620_s29 + $0xb0] sm:$0xff] %vm5616_vm3, %v6406_v46  ;;  %v5408_v57 = vmax.f32 %v4944_v21, %v4948_v48  ;;  %v5536_v58 = vmax.f32 %v5200_v30, %v5204_v49  ;;  %v7594_v59 = vpop.f32.mrf.mxu0  ;;  %7689 = vmatmul.mubr.msk.bf16.gmra.mxu0 %vm1991_vm2, %v8217_v36  ;;  %v7850_v61 = vpop.f32.mrf.mxu1  ;;  %7945 = vmatmul.mubr.msk.bf16.gmra.mxu1 %vm1991_vm2, %v8218_v37  ;;  %v5207_v63 = vmax.f32 %v4237_v52, 0.0 }
 0x1a9   : > { %v5411_v62 = vmax.f32 %v4947_v39, %v4951_v17  ;;  %v4949_v0 = vmax.f32 %v3205_v53, 0.0  ;;  %v5205_v1 = vmax.f32 %v4229_v54, 0.0  ;;  %7692 = vmatprep.mubr.msk.bf16.mxu0 %vm1991_vm2, %v8219_v43  ;;  %7948 = vmatprep.mubr.msk.bf16.mxu1 %vm1991_vm2, %v8220_v44  ;;  %v3226_v10 = vadd.f32 %v9056_v60, %v7594_v59  ;;  %v8225_v43 = vld [vmem:[%s8324_s22 + $0x348] sm:$0xff]   ;;  %v8228_v17 = vld [vmem:[%s8324_s22 + $0x750] sm:$0xff]  }
 0x1aa   : > { %5665 = vst.msk [vmem:[#allocation2 + $0x180] sm:$0xff] %vm5616_vm3, %v5408_v57  ;;  %5793 = vst.msk [vmem:[#allocation2 + $0x580] sm:$0xff] %vm5616_vm3, %v5536_v58  ;;  %v3217_v2 = vpop.f32.mrf.mxu0  ;;  %v4241_v3 = vpop.f32.mrf.mxu1  ;;  %v5539_v4 = vmax.f32 %v5203_v47, %v5207_v63  ;;  %v4250_v13 = vadd.f32 %v9056_v60, %v7850_v61  ;;  %v8226_v44 = vld [vmem:[%s8324_s22 + $0x748] sm:$0xff]  }
 0x1ab   : > { %5668 = vst.msk [vmem:[#allocation2 + $0x198] sm:$0xff] %vm5616_vm3, %v5411_v62  ;;  %v5409_v5 = vmax.f32 %v4945_v55, %v4949_v0  ;;  %v5537_v6 = vmax.f32 %v5201_v56, %v5205_v1  ;;  %v3218_v14 = vadd.f32 %v9056_v60, %v3217_v2  ;;  %v4242_v18 = vadd.f32 %v9056_v60, %v4241_v3 }
 0x1ac   : > { %v7595_v7 = vpop.f32.mrf.mxu0  ;;  %v7851_v8 = vpop.f32.mrf.mxu1  ;;  %5796 = vst.msk [vmem:[#allocation2 + $0x598] sm:$0xff] %vm5616_vm3, %v5539_v4  ;;  %v4954_v21 = vmax.f32 %v3226_v10, 0.0  ;;  %v5210_v27 = vmax.f32 %v4250_v13, 0.0 }
 0x1ad   : > { %5666 = vst.msk [vmem:[#allocation2 + $0x188] sm:$0xff] %vm5616_vm3, %v5409_v5  ;;  %5794 = vst.msk [vmem:[#allocation2 + $0x588] sm:$0xff] %vm5616_vm3, %v5537_v6  ;;  %v3229_v22 = vadd.f32 %v9056_v60, %v7595_v7  ;;  %v4952_v28 = vmax.f32 %v3218_v14, 0.0  ;;  %v4253_v29 = vadd.f32 %v9056_v60, %v7851_v8  ;;  %v5208_v37 = vmax.f32 %v4242_v18, 0.0 }
 0x1ae   : > { %v3220_v15 = vpop.f32.mrf.mxu0  ;;  %v4244_v16 = vpop.f32.mrf.mxu1 }
 0x1af   : > { %v3221_v38 = vadd.f32 %v9056_v60, %v3220_v15  ;;  %v4245_v39 = vadd.f32 %v9056_v60, %v4244_v16  ;;  %v4955_v47 = vmax.f32 %v3229_v22, 0.0  ;;  %v5211_v53 = vmax.f32 %v4253_v29, 0.0  ;;  %v8229_v15 = vld [vmem:[%s8324_s22 + $0x358] sm:$0xff]  }
 0x1b0   : > { %v7598_v19 = vpop.f32.mrf.mxu0  ;;  %7693 = vmatmul.mubr.msk.bf16.gmra.mxu0 %vm1991_vm2, %v8221_v45  ;;  %v7854_v20 = vpop.f32.mrf.mxu1  ;;  %7949 = vmatmul.mubr.msk.bf16.gmra.mxu1 %vm1991_vm2, %v8222_v9  ;;  %v8230_v16 = vld [vmem:[%s8324_s22 + $0x758] sm:$0xff]  }
 0x1b1   : > { %v3242_v23 = vadd.f32 %v9056_v60, %v7598_v19  ;;  %v4266_v24 = vadd.f32 %v9056_v60, %v7854_v20  ;;  %7696 = vmatprep.mubr.msk.bf16.mxu0 %vm1991_vm2, %v8223_v11  ;;  %7952 = vmatprep.mubr.msk.bf16.mxu1 %vm1991_vm2, %v8224_v12  ;;  %v4953_v63 = vmax.f32 %v3221_v38, 0.0  ;;  %v5209_v0 = vmax.f32 %v4245_v39, 0.0  ;;  %v8231_v19 = vld [vmem:[%s8324_s22 + $0x360] sm:$0xff]  }
 0x1b2   : > { %v5923_v25 = vld [vmem:[#allocation2 + $0x190] ss:$2 sm:$0xff]  ;;  %v6179_v26 = vld [vmem:[#allocation2 + $0x191] ss:$2 sm:$0xff]  ;;  %v3233_v30 = vpop.f32.mrf.mxu0  ;;  %v4257_v31 = vpop.f32.mrf.mxu1  ;;  %v8232_v20 = vld [vmem:[%s8324_s22 + $0x760] sm:$0xff]  }
 0x1b3   : > { %v6409_v32 = vmax.f32 %v5923_v25, %v6179_v26  ;;  %v4958_v33 = vmax.f32 %v3242_v23, 0.0  ;;  %v5214_v34 = vmax.f32 %v4266_v24, 0.0  ;;  %v3234_v35 = vadd.f32 %v9056_v60, %v3233_v30 }
 0x1b4   : > { %v5921_v36 = vld [vmem:[#allocation2 + $0x180] ss:$2 sm:$0xff]  ;;  %v4258_v40 = vadd.f32 %v9056_v60, %v4257_v31  ;;  %v7599_v41 = vpop.f32.mrf.mxu0  ;;  %v7855_v42 = vpop.f32.mrf.mxu1  ;;  %v6177_v46 = vld [vmem:[#allocation2 + $0x181] ss:$2 sm:$0xff] }
 0x1b5   : > { %6537 = vst.msk [vmem:[%s8620_s29 + $0xc8] sm:$0xff] %vm5616_vm3, %v6409_v32  ;;  %v5414_v48 = vmax.f32 %v4954_v21, %v4958_v33  ;;  %v5542_v49 = vmax.f32 %v5210_v27, %v5214_v34  ;;  %v3245_v50 = vadd.f32 %v9056_v60, %v7599_v41  ;;  %v6408_v52 = vmax.f32 %v5921_v36, %v6177_v46 }
 0x1b6   : > { %v4956_v54 = vmax.f32 %v3234_v35, 0.0  ;;  %v5212_v55 = vmax.f32 %v4258_v40, 0.0  ;;  %v3236_v56 = vpop.f32.mrf.mxu0  ;;  %v4260_v57 = vpop.f32.mrf.mxu1  ;;  %v4269_v59 = vadd.f32 %v9056_v60, %v7855_v42 }
 0x1b7   : > { %5671 = vst.msk [vmem:[#allocation2 + $0x1b0] sm:$0xff] %vm5616_vm3, %v5414_v48  ;;  %5799 = vst.msk [vmem:[#allocation2 + $0x5b0] sm:$0xff] %vm5616_vm3, %v5542_v49  ;;  %v4959_v58 = vmax.f32 %v3245_v50, 0.0  ;;  %v3237_v61 = vadd.f32 %v9056_v60, %v3236_v56  ;;  %v4261_v62 = vadd.f32 %v9056_v60, %v4260_v57  ;;  %v8235_v57 = vld [vmem:[%s8324_s22 + $0x370] sm:$0xff]  }
 0x1b8   : > { %6536 = vst.msk [vmem:[%s8620_s29 + $0xc0] sm:$0xff] %vm5616_vm3, %v6408_v52  ;;  %v5412_v1 = vmax.f32 %v4952_v28, %v4956_v54  ;;  %v5540_v2 = vmax.f32 %v5208_v37, %v5212_v55  ;;  %v7602_v3 = vpop.f32.mrf.mxu0  ;;  %7697 = vmatmul.mubr.msk.bf16.gmra.mxu0 %vm1991_vm2, %v8225_v43  ;;  %v7858_v4 = vpop.f32.mrf.mxu1  ;;  %7953 = vmatmul.mubr.msk.bf16.gmra.mxu1 %vm1991_vm2, %v8226_v44  ;;  %v5215_v6 = vmax.f32 %v4269_v59, 0.0 }
 0x1b9   : > { %v5415_v5 = vmax.f32 %v4955_v47, %v4959_v58  ;;  %v4957_v7 = vmax.f32 %v3237_v61, 0.0  ;;  %v5213_v8 = vmax.f32 %v4261_v62, 0.0  ;;  %7700 = vmatprep.mubr.msk.bf16.mxu0 %vm1991_vm2, %v8227_v51  ;;  %7956 = vmatprep.mubr.msk.bf16.mxu1 %vm1991_vm2, %v8228_v17  ;;  %v3258_v18 = vadd.f32 %v9056_v60, %v7602_v3  ;;  %v8233_v51 = vld [vmem:[%s8324_s22 + $0x368] sm:$0xff]   ;;  %v8236_v58 = vld [vmem:[%s8324_s22 + $0x770] sm:$0xff]  }
 0x1ba   : > { %5669 = vst.msk [vmem:[#allocation2 + $0x1a0] sm:$0xff] %vm5616_vm3, %v5412_v1  ;;  %5797 = vst.msk [vmem:[#allocation2 + $0x5a0] sm:$0xff] %vm5616_vm3, %v5540_v2  ;;  %v3249_v45 = vpop.f32.mrf.mxu0  ;;  %v4273_v9 = vpop.f32.mrf.mxu1  ;;  %v5543_v10 = vmax.f32 %v5211_v53, %v5215_v6  ;;  %v4282_v21 = vadd.f32 %v9056_v60, %v7858_v4  ;;  %v8234_v17 = vld [vmem:[%s8324_s22 + $0x768] sm:$0xff]  }
 0x1bb   : > { %5672 = vst.msk [vmem:[#allocation2 + $0x1b8] sm:$0xff] %vm5616_vm3, %v5415_v5  ;;  %v5413_v11 = vmax.f32 %v4953_v63, %v4957_v7  ;;  %v5541_v12 = vmax.f32 %v5209_v0, %v5213_v8  ;;  %v3250_v22 = vadd.f32 %v9056_v60, %v3249_v45  ;;  %v4274_v25 = vadd.f32 %v9056_v60, %v4273_v9 }
 0x1bc   : > { %v7603_v13 = vpop.f32.mrf.mxu0  ;;  %v7859_v14 = vpop.f32.mrf.mxu1  ;;  %5800 = vst.msk [vmem:[#allocation2 + $0x5b8] sm:$0xff] %vm5616_vm3, %v5543_v10  ;;  %v4962_v28 = vmax.f32 %v3258_v18, 0.0  ;;  %v5218_v34 = vmax.f32 %v4282_v21, 0.0 }
 0x1bd   : > { %5670 = vst.msk [vmem:[#allocation2 + $0x1a8] sm:$0xff] %vm5616_vm3, %v5413_v11  ;;  %5798 = vst.msk [vmem:[#allocation2 + $0x5a8] sm:$0xff] %vm5616_vm3, %v5541_v12  ;;  %v3261_v29 = vadd.f32 %v9056_v60, %v7603_v13  ;;  %v4960_v35 = vmax.f32 %v3250_v22, 0.0  ;;  %v4285_v36 = vadd.f32 %v9056_v60, %v7859_v14  ;;  %v5216_v44 = vmax.f32 %v4274_v25, 0.0 }
 0x1be   : > { %v3252_v23 = vpop.f32.mrf.mxu0  ;;  %v4276_v24 = vpop.f32.mrf.mxu1 }
 0x1bf   : > { %v3253_v46 = vadd.f32 %v9056_v60, %v3252_v23  ;;  %v4277_v47 = vadd.f32 %v9056_v60, %v4276_v24  ;;  %v4963_v53 = vmax.f32 %v3261_v29, 0.0  ;;  %v5219_v61 = vmax.f32 %v4285_v36, 0.0  ;;  %v8237_v23 = vld [vmem:[%s8324_s22 + $0x378] sm:$0xff]  }
 0x1c0   : > { %v7606_v26 = vpop.f32.mrf.mxu0  ;;  %7701 = vmatmul.mubr.msk.bf16.gmra.mxu0 %vm1991_vm2, %v8229_v15  ;;  %v7862_v27 = vpop.f32.mrf.mxu1  ;;  %7957 = vmatmul.mubr.msk.bf16.gmra.mxu1 %vm1991_vm2, %v8230_v16  ;;  %v8238_v24 = vld [vmem:[%s8324_s22 + $0x778] sm:$0xff]  }
 0x1c1   : > { %v3274_v30 = vadd.f32 %v9056_v60, %v7606_v26  ;;  %v4298_v31 = vadd.f32 %v9056_v60, %v7862_v27  ;;  %7704 = vmatprep.mubr.msk.bf16.mxu0 %vm1991_vm2, %v8231_v19  ;;  %7960 = vmatprep.mubr.msk.bf16.mxu1 %vm1991_vm2, %v8232_v20  ;;  %v4961_v6 = vmax.f32 %v3253_v46, 0.0  ;;  %v5217_v7 = vmax.f32 %v4277_v47, 0.0  ;;  %v8239_v26 = vld [vmem:[%s8324_s22 + $0x380] sm:$0xff]  }
 0x1c2   : > { %v5927_v32 = vld [vmem:[#allocation2 + $0x1b0] ss:$2 sm:$0xff]  ;;  %v6183_v33 = vld [vmem:[#allocation2 + $0x1b1] ss:$2 sm:$0xff]  ;;  %v3265_v37 = vpop.f32.mrf.mxu0  ;;  %v4289_v38 = vpop.f32.mrf.mxu1  ;;  %v8240_v27 = vld [vmem:[%s8324_s22 + $0x780] sm:$0xff]  }
 0x1c3   : > { %v6411_v39 = vmax.f32 %v5927_v32, %v6183_v33  ;;  %v4966_v40 = vmax.f32 %v3274_v30, 0.0  ;;  %v5222_v41 = vmax.f32 %v4298_v31, 0.0  ;;  %v3266_v42 = vadd.f32 %v9056_v60, %v3265_v37 }
 0x1c4   : > { %v5925_v43 = vld [vmem:[#allocation2 + $0x1a0] ss:$2 sm:$0xff]  ;;  %v4290_v48 = vadd.f32 %v9056_v60, %v4289_v38  ;;  %v7607_v49 = vpop.f32.mrf.mxu0  ;;  %v7863_v50 = vpop.f32.mrf.mxu1  ;;  %v6181_v52 = vld [vmem:[#allocation2 + $0x1a1] ss:$2 sm:$0xff] }
 0x1c5   : > { %6539 = vst.msk [vmem:[%s8620_s29 + $0xd8] sm:$0xff] %vm5616_vm3, %v6411_v39  ;;  %v5418_v54 = vmax.f32 %v4962_v28, %v4966_v40  ;;  %v5546_v55 = vmax.f32 %v5218_v34, %v5222_v41  ;;  %v3277_v56 = vadd.f32 %v9056_v60, %v7607_v49  ;;  %v6410_v59 = vmax.f32 %v5925_v43, %v6181_v52 }
 0x1c6   : > { %v4964_v62 = vmax.f32 %v3266_v42, 0.0  ;;  %v5220_v63 = vmax.f32 %v4290_v48, 0.0  ;;  %v3268_v0 = vpop.f32.mrf.mxu0  ;;  %v4292_v1 = vpop.f32.mrf.mxu1  ;;  %v4301_v3 = vadd.f32 %v9056_v60, %v7863_v50 }
 0x1c7   : > { %5675 = vst.msk [vmem:[#allocation2 + $0x1d0] sm:$0xff] %vm5616_vm3, %v5418_v54  ;;  %5803 = vst.msk [vmem:[#allocation2 + $0x5d0] sm:$0xff] %vm5616_vm3, %v5546_v55  ;;  %v4967_v2 = vmax.f32 %v3277_v56, 0.0  ;;  %v3269_v4 = vadd.f32 %v9056_v60, %v3268_v0  ;;  %v4293_v5 = vadd.f32 %v9056_v60, %v4292_v1  ;;  %v8243_v1 = vld [vmem:[%s8324_s22 + $0x390] sm:$0xff]  }
 0x1c8   : > { %6538 = vst.msk [vmem:[%s8620_s29 + $0xd0] sm:$0xff] %vm5616_vm3, %v6410_v59  ;;  %v5416_v8 = vmax.f32 %v4960_v35, %v4964_v62  ;;  %v5544_v45 = vmax.f32 %v5216_v44, %v5220_v63  ;;  %v7610_v9 = vpop.f32.mrf.mxu0  ;;  %7705 = vmatmul.mubr.msk.bf16.gmra.mxu0 %vm1991_vm2, %v8233_v51  ;;  %v7866_v10 = vpop.f32.mrf.mxu1  ;;  %7961 = vmatmul.mubr.msk.bf16.gmra.mxu1 %vm1991_vm2, %v8234_v17  ;;  %v5223_v12 = vmax.f32 %v4301_v3, 0.0 }
 0x1c9   : > { %v5419_v11 = vmax.f32 %v4963_v53, %v4967_v2  ;;  %v4965_v13 = vmax.f32 %v3269_v4, 0.0  ;;  %v5221_v14 = vmax.f32 %v4293_v5, 0.0  ;;  %7708 = vmatprep.mubr.msk.bf16.mxu0 %vm1991_vm2, %v8235_v57  ;;  %7964 = vmatprep.mubr.msk.bf16.mxu1 %vm1991_vm2, %v8236_v58  ;;  %v3290_v25 = vadd.f32 %v9056_v60, %v7610_v9  ;;  %v8241_v57 = vld [vmem:[%s8324_s22 + $0x388] sm:$0xff]   ;;  %v8244_v2 = vld [vmem:[%s8324_s22 + $0x790] sm:$0xff]  }
 0x1ca   : > { %5673 = vst.msk [vmem:[#allocation2 + $0x1c0] sm:$0xff] %vm5616_vm3, %v5416_v8  ;;  %5801 = vst.msk [vmem:[#allocation2 + $0x5c0] sm:$0xff] %vm5616_vm3, %v5544_v45  ;;  %v3281_v15 = vpop.f32.mrf.mxu0  ;;  %v4305_v16 = vpop.f32.mrf.mxu1  ;;  %v5547_v18 = vmax.f32 %v5219_v61, %v5223_v12  ;;  %v4314_v28 = vadd.f32 %v9056_v60, %v7866_v10  ;;  %v8242_v58 = vld [vmem:[%s8324_s22 + $0x788] sm:$0xff]  }
 0x1cb   : > { %5676 = vst.msk [vmem:[#allocation2 + $0x1d8] sm:$0xff] %vm5616_vm3, %v5419_v11  ;;  %v5417_v19 = vmax.f32 %v4961_v6, %v4965_v13  ;;  %v5545_v20 = vmax.f32 %v5217_v7, %v5221_v14  ;;  %v3282_v29 = vadd.f32 %v9056_v60, %v3281_v15  ;;  %v4306_v32 = vadd.f32 %v9056_v60, %v4305_v16 }
 0x1cc   : > { %v7611_v21 = vpop.f32.mrf.mxu0  ;;  %v7867_v22 = vpop.f32.mrf.mxu1  ;;  %5804 = vst.msk [vmem:[#allocation2 + $0x5d8] sm:$0xff] %vm5616_vm3, %v5547_v18  ;;  %v4970_v35 = vmax.f32 %v3290_v25, 0.0  ;;  %v5226_v41 = vmax.f32 %v4314_v28, 0.0 }
 0x1cd   : > { %5674 = vst.msk [vmem:[#allocation2 + $0x1c8] sm:$0xff] %vm5616_vm3, %v5417_v19  ;;  %5802 = vst.msk [vmem:[#allocation2 + $0x5c8] sm:$0xff] %vm5616_vm3, %v5545_v20  ;;  %v3293_v36 = vadd.f32 %v9056_v60, %v7611_v21  ;;  %v4968_v42 = vmax.f32 %v3282_v29, 0.0  ;;  %v4317_v43 = vadd.f32 %v9056_v60, %v7867_v22  ;;  %v5224_v17 = vmax.f32 %v4306_v32, 0.0 }
 0x1ce   : > { %v3284_v30 = vpop.f32.mrf.mxu0  ;;  %v4308_v31 = vpop.f32.mrf.mxu1 }
 0x1cf   : > { %v3285_v52 = vadd.f32 %v9056_v60, %v3284_v30  ;;  %v4309_v53 = vadd.f32 %v9056_v60, %v4308_v31  ;;  %v4971_v61 = vmax.f32 %v3293_v36, 0.0  ;;  %v5227_v4 = vmax.f32 %v4317_v43, 0.0  ;;  %v8245_v30 = vld [vmem:[%s8324_s22 + $0x398] sm:$0xff]  }
 0x1d0   : > { %v7614_v33 = vpop.f32.mrf.mxu0  ;;  %7709 = vmatmul.mubr.msk.bf16.gmra.mxu0 %vm1991_vm2, %v8237_v23  ;;  %v7870_v34 = vpop.f32.mrf.mxu1  ;;  %7965 = vmatmul.mubr.msk.bf16.gmra.mxu1 %vm1991_vm2, %v8238_v24  ;;  %v8246_v31 = vld [vmem:[%s8324_s22 + $0x798] sm:$0xff]  }
 0x1d1   : > { %v3306_v37 = vadd.f32 %v9056_v60, %v7614_v33  ;;  %v4330_v38 = vadd.f32 %v9056_v60, %v7870_v34  ;;  %7712 = vmatprep.mubr.msk.bf16.mxu0 %vm1991_vm2, %v8239_v26  ;;  %7968 = vmatprep.mubr.msk.bf16.mxu1 %vm1991_vm2, %v8240_v27  ;;  %v4969_v12 = vmax.f32 %v3285_v52, 0.0  ;;  %v5225_v13 = vmax.f32 %v4309_v53, 0.0  ;;  %v8247_v33 = vld [vmem:[%s8324_s22 + $0x3a0] sm:$0xff]  }
 0x1d2   : > { %v5931_v39 = vld [vmem:[#allocation2 + $0x1d0] ss:$2 sm:$0xff]  ;;  %v6187_v40 = vld [vmem:[#allocation2 + $0x1d1] ss:$2 sm:$0xff]  ;;  %v3297_v44 = vpop.f32.mrf.mxu0  ;;  %v4321_v46 = vpop.f32.mrf.mxu1  ;;  %v8248_v34 = vld [vmem:[%s8324_s22 + $0x7a0] sm:$0xff]  }
 0x1d3   : > { %v6413_v47 = vmax.f32 %v5931_v39, %v6187_v40  ;;  %v4974_v48 = vmax.f32 %v3306_v37, 0.0  ;;  %v5230_v49 = vmax.f32 %v4330_v38, 0.0  ;;  %v3298_v50 = vadd.f32 %v9056_v60, %v3297_v44 }
 0x1d4   : > { %v5929_v51 = vld [vmem:[#allocation2 + $0x1c0] ss:$2 sm:$0xff]  ;;  %v4322_v54 = vadd.f32 %v9056_v60, %v4321_v46  ;;  %v7615_v55 = vpop.f32.mrf.mxu0  ;;  %v7871_v56 = vpop.f32.mrf.mxu1  ;;  %v6185_v59 = vld [vmem:[#allocation2 + $0x1c1] ss:$2 sm:$0xff] }
 0x1d5   : > { %6541 = vst.msk [vmem:[%s8620_s29 + $0xe8] sm:$0xff] %vm5616_vm3, %v6413_v47  ;;  %v5422_v62 = vmax.f32 %v4970_v35, %v4974_v48  ;;  %v5550_v63 = vmax.f32 %v5226_v41, %v5230_v49  ;;  %v3309_v0 = vadd.f32 %v9056_v60, %v7615_v55  ;;  %v6412_v3 = vmax.f32 %v5929_v51, %v6185_v59 }
 0x1d6   : > { %v4972_v5 = vmax.f32 %v3298_v50, 0.0  ;;  %v5228_v6 = vmax.f32 %v4322_v54, 0.0  ;;  %v3300_v7 = vpop.f32.mrf.mxu0  ;;  %v4324_v8 = vpop.f32.mrf.mxu1  ;;  %v4333_v9 = vadd.f32 %v9056_v60, %v7871_v56 }
 0x1d7   : > { %5679 = vst.msk [vmem:[#allocation2 + $0x1f0] sm:$0xff] %vm5616_vm3, %v5422_v62  ;;  %5807 = vst.msk [vmem:[#allocation2 + $0x5f0] sm:$0xff] %vm5616_vm3, %v5550_v63  ;;  %v4975_v45 = vmax.f32 %v3309_v0, 0.0  ;;  %v3301_v10 = vadd.f32 %v9056_v60, %v3300_v7  ;;  %v4325_v11 = vadd.f32 %v9056_v60, %v4324_v8  ;;  %v8251_v8 = vld [vmem:[%s8324_s22 + $0x3b0] sm:$0xff]  }
 0x1d8   : > { %6540 = vst.msk [vmem:[%s8620_s29 + $0xe0] sm:$0xff] %vm5616_vm3, %v6412_v3  ;;  %v5420_v14 = vmax.f32 %v4968_v42, %v4972_v5  ;;  %v5548_v15 = vmax.f32 %v5224_v17, %v5228_v6  ;;  %v7618_v16 = vpop.f32.mrf.mxu0  ;;  %7713 = vmatmul.mubr.msk.bf16.gmra.mxu0 %vm1991_vm2, %v8241_v57  ;;  %v7874_v18 = vpop.f32.mrf.mxu1  ;;  %7969 = vmatmul.mubr.msk.bf16.gmra.mxu1 %vm1991_vm2, %v8242_v58  ;;  %v5231_v20 = vmax.f32 %v4333_v9, 0.0 }
 0x1d9   : > { %v5423_v19 = vmax.f32 %v4971_v61, %v4975_v45  ;;  %v4973_v21 = vmax.f32 %v3301_v10, 0.0  ;;  %v5229_v22 = vmax.f32 %v4325_v11, 0.0  ;;  %7716 = vmatprep.mubr.msk.bf16.mxu0 %vm1991_vm2, %v8243_v1  ;;  %7972 = vmatprep.mubr.msk.bf16.mxu1 %vm1991_vm2, %v8244_v2  ;;  %v3322_v32 = vadd.f32 %v9056_v60, %v7618_v16  ;;  %v8249_v1 = vld [vmem:[%s8324_s22 + $0x3a8] sm:$0xff]   ;;  %v8252_v45 = vld [vmem:[%s8324_s22 + $0x7b0] sm:$0xff]  }
 0x1da   : > { %5677 = vst.msk [vmem:[#allocation2 + $0x1e0] sm:$0xff] %vm5616_vm3, %v5420_v14  ;;  %5805 = vst.msk [vmem:[#allocation2 + $0x5e0] sm:$0xff] %vm5616_vm3, %v5548_v15  ;;  %v3313_v23 = vpop.f32.mrf.mxu0  ;;  %v4337_v24 = vpop.f32.mrf.mxu1  ;;  %v5551_v25 = vmax.f32 %v5227_v4, %v5231_v20  ;;  %v4346_v35 = vadd.f32 %v9056_v60, %v7874_v18  ;;  %v8250_v2 = vld [vmem:[%s8324_s22 + $0x7a8] sm:$0xff]  }
 0x1db   : > { %5680 = vst.msk [vmem:[#allocation2 + $0x1f8] sm:$0xff] %vm5616_vm3, %v5423_v19  ;;  %v5421_v26 = vmax.f32 %v4969_v12, %v4973_v21  ;;  %v5549_v27 = vmax.f32 %v5225_v13, %v5229_v22  ;;  %v3314_v36 = vadd.f32 %v9056_v60, %v3313_v23  ;;  %v4338_v39 = vadd.f32 %v9056_v60, %v4337_v24 }
 0x1dc   : > { %v7619_v28 = vpop.f32.mrf.mxu0  ;;  %v7875_v29 = vpop.f32.mrf.mxu1  ;;  %5808 = vst.msk [vmem:[#allocation2 + $0x5f8] sm:$0xff] %vm5616_vm3, %v5551_v25  ;;  %v4978_v42 = vmax.f32 %v3322_v32, 0.0  ;;  %v5234_v49 = vmax.f32 %v4346_v35, 0.0 }
 0x1dd   : > { %5678 = vst.msk [vmem:[#allocation2 + $0x1e8] sm:$0xff] %vm5616_vm3, %v5421_v26  ;;  %5806 = vst.msk [vmem:[#allocation2 + $0x5e8] sm:$0xff] %vm5616_vm3, %v5549_v27  ;;  %v3325_v43 = vadd.f32 %v9056_v60, %v7619_v28  ;;  %v4976_v50 = vmax.f32 %v3314_v36, 0.0  ;;  %v4349_v51 = vadd.f32 %v9056_v60, %v7875_v29  ;;  %v5232_v58 = vmax.f32 %v4338_v39, 0.0  ;;  %v8253_v39 = vld [vmem:[%s8324_s22 + $0x3b8] sm:$0xff]  }
 0x1de   : > { %v3316_v37 = vpop.f32.mrf.mxu0  ;;  %v4340_v38 = vpop.f32.mrf.mxu1 }
 0x1df   : > { %v3317_v59 = vadd.f32 %v9056_v60, %v3316_v37  ;;  %v4341_v61 = vadd.f32 %v9056_v60, %v4340_v38  ;;  %v4979_v4 = vmax.f32 %v3325_v43, 0.0  ;;  %v5235_v10 = vmax.f32 %v4349_v51, 0.0  ;;  %v8255_v43 = vld [vmem:[%s8324_s22 + $0x3c0] sm:$0xff]   ;;  %v6259_v51 = vld [vmem:[#allocation2 + $0x411] ss:$2 sm:$0xff] }
 0x1e0   : > { %v7622_v40 = vpop.f32.mrf.mxu0  ;;  %7717 = vmatmul.mubr.msk.bf16.gmra.mxu0 %vm1991_vm2, %v8245_v30  ;;  %v7878_v41 = vpop.f32.mrf.mxu1  ;;  %7973 = vmatmul.mubr.msk.bf16.gmra.mxu1 %vm1991_vm2, %v8246_v31 }
 0x1e1   : > { %v3338_v44 = vadd.f32 %v9056_v60, %v7622_v40  ;;  %v4362_v46 = vadd.f32 %v9056_v60, %v7878_v41  ;;  %7720 = vmatprep.mubr.msk.bf16.mxu0 %vm1991_vm2, %v8247_v33  ;;  %7976 = vmatprep.mubr.msk.bf16.mxu1 %vm1991_vm2, %v8248_v34  ;;  %v4977_v20 = vmax.f32 %v3317_v59, 0.0  ;;  %v5233_v21 = vmax.f32 %v4341_v61, 0.0  ;;  %v9320_v34 = vld [vmem:[%s10142_s2] ss:$0 sm:$0xff]  ;;  %v8254_v40 = vld [vmem:[%s8324_s22 + $0x7b8] sm:$0xff]  }
 0x1e2   : > { %v5935_v47 = vld [vmem:[#allocation2 + $0x1f0] ss:$2 sm:$0xff]  ;;  %v6191_v48 = vld [vmem:[#allocation2 + $0x1f1] ss:$2 sm:$0xff]  ;;  %v3329_v17 = vpop.f32.mrf.mxu0  ;;  %v4353_v52 = vpop.f32.mrf.mxu1 }
 0x1e3   : > { %v6415_v53 = vmax.f32 %v5935_v47, %v6191_v48  ;;  %v4982_v54 = vmax.f32 %v3338_v44, 0.0  ;;  %v5238_v55 = vmax.f32 %v4362_v46, 0.0  ;;  %v3330_v56 = vadd.f32 %v9056_v60, %v3329_v17  ;;  %v8256_v44 = vld [vmem:[%s8324_s22 + $0x7c0] sm:$0xff]  }
 0x1e4   : > { %v5933_v57 = vld [vmem:[#allocation2 + $0x1e0] ss:$2 sm:$0xff]  ;;  %v4354_v62 = vadd.f32 %v9056_v60, %v4353_v52  ;;  %v7623_v63 = vpop.f32.mrf.mxu0  ;;  %v7879_v0 = vpop.f32.mrf.mxu1  ;;  %v6189_v3 = vld [vmem:[#allocation2 + $0x1e1] ss:$2 sm:$0xff] }
 0x1e5   : > { %6543 = vst.msk [vmem:[%s8620_s29 + $0xf8] sm:$0xff] %vm5616_vm3, %v6415_v53  ;;  %v5426_v5 = vmax.f32 %v4978_v42, %v4982_v54  ;;  %v5554_v6 = vmax.f32 %v5234_v49, %v5238_v55  ;;  %v3341_v7 = vadd.f32 %v9056_v60, %v7623_v63  ;;  %v6414_v9 = vmax.f32 %v5933_v57, %v6189_v3  ;;  %v9351_v55 = vld [vmem:[#allocation2 + $0x400] ss:$2 sm:$0xff] }
 0x1e6   : > { %v4980_v11 = vmax.f32 %v3330_v56, 0.0  ;;  %v5236_v12 = vmax.f32 %v4354_v62, 0.0  ;;  %v3332_v13 = vpop.f32.mrf.mxu0  ;;  %v4356_v14 = vpop.f32.mrf.mxu1  ;;  %v4365_v16 = vadd.f32 %v9056_v60, %v7879_v0  ;;  %v9353_v56 = vld [vmem:[#allocation2 + $0x401] ss:$2 sm:$0xff] }
 0x1e7   : > { %5683 = vst.msk [vmem:[#allocation2 + $0x210] sm:$0xff] %vm5616_vm3, %v5426_v5  ;;  %5811 = vst.msk [vmem:[#allocation2 + $0x610] sm:$0xff] %vm5616_vm3, %v5554_v6  ;;  %v4983_v15 = vmax.f32 %v3341_v7, 0.0  ;;  %v3333_v18 = vadd.f32 %v9056_v60, %v3332_v13  ;;  %v4357_v19 = vadd.f32 %v9056_v60, %v4356_v14  ;;  %v8257_v5 = vld [vmem:[%s8324_s22 + $0x3c8] sm:$0xff]   ;;  %v6448_v13 = vmax.f32 %v9351_v55, %v9353_v56 }
 0x1e8   : > { %6542 = vst.msk [vmem:[%s8620_s29 + $0xf0] sm:$0xff] %vm5616_vm3, %v6414_v9  ;;  %v5424_v22 = vmax.f32 %v4976_v50, %v4980_v11  ;;  %v5552_v23 = vmax.f32 %v5232_v58, %v5236_v12  ;;  %v7626_v24 = vpop.f32.mrf.mxu0  ;;  %7721 = vmatmul.mubr.msk.bf16.gmra.mxu0 %vm1991_vm2, %v8249_v1  ;;  %v7882_v25 = vpop.f32.mrf.mxu1  ;;  %7977 = vmatmul.mubr.msk.bf16.gmra.mxu1 %vm1991_vm2, %v8250_v2  ;;  %v5239_v27 = vmax.f32 %v4365_v16, 0.0  ;;  %v6003_v50 = vld [vmem:[#allocation2 + $0x410] ss:$2 sm:$0xff]  ;;  %v8258_v9 = vld [vmem:[%s8324_s22 + $0x7c8] sm:$0xff]  }
 0x1e9   : > { %v5427_v26 = vmax.f32 %v4979_v4, %v4983_v15  ;;  %v4981_v28 = vmax.f32 %v3333_v18, 0.0  ;;  %v5237_v29 = vmax.f32 %v4357_v19, 0.0  ;;  %7724 = vmatprep.mubr.msk.bf16.mxu0 %vm1991_vm2, %v8251_v8  ;;  %7980 = vmatprep.mubr.msk.bf16.mxu1 %vm1991_vm2, %v8252_v45  ;;  %v9323_v35 = vadd.f32 %v9320_v34, %v7626_v24  ;;  %v8260_v11 = vld [vmem:[%s8324_s22 + $0x7d0] sm:$0xff]   ;;  %6576 = vst.msk [vmem:[%s8620_s29 + $0x200] sm:$0xff] %vm5616_vm3, %v6448_v13 }
 0x1ea   : > { %5681 = vst.msk [vmem:[#allocation2 + $0x200] sm:$0xff] %vm5616_vm3, %v5424_v22  ;;  %5809 = vst.msk [vmem:[#allocation2 + $0x600] sm:$0xff] %vm5616_vm3, %v5552_v23  ;;  %v3345_v60 = vpop.f32.mrf.mxu0  ;;  %v4369_v30 = vpop.f32.mrf.mxu1  ;;  %v5555_v31 = vmax.f32 %v5235_v10, %v5239_v27  ;;  %v9326_v36 = vadd.f32 %v9320_v34, %v7882_v25  ;;  %v8259_v10 = vld [vmem:[%s8324_s22 + $0x3d0] sm:$0xff]   ;;  %v6449_v12 = vmax.f32 %v6003_v50, %v6259_v51 }
 0x1eb   : > { %5684 = vst.msk [vmem:[#allocation2 + $0x218] sm:$0xff] %vm5616_vm3, %v5427_v26  ;;  %v5425_v32 = vmax.f32 %v4977_v20, %v4981_v28  ;;  %v5553_v33 = vmax.f32 %v5233_v21, %v5237_v29  ;;  %v9334_v41 = vadd.f32 %v9320_v34, %v3345_v60  ;;  %v9337_v42 = vadd.f32 %v9320_v34, %v4369_v30 }
 0x1ec   : > { %v7627_v37 = vpop.f32.mrf.mxu0  ;;  %v7883_v38 = vpop.f32.mrf.mxu1  ;;  %5812 = vst.msk [vmem:[#allocation2 + $0x618] sm:$0xff] %vm5616_vm3, %v5555_v31  ;;  %v4986_v17 = vmax.f32 %v9323_v35, 0.0  ;;  %v5242_v52 = vmax.f32 %v9326_v36, 0.0  ;;  %6577 = vst.msk [vmem:[%s8620_s29 + $0x208] sm:$0xff] %vm5616_vm3, %v6449_v12 }
 0x1ed   : > { %5682 = vst.msk [vmem:[#allocation2 + $0x208] sm:$0xff] %vm5616_vm3, %v5425_v32  ;;  %5810 = vst.msk [vmem:[#allocation2 + $0x608] sm:$0xff] %vm5616_vm3, %v5553_v33  ;;  %v9342_v46 = vadd.f32 %v9320_v34, %v7627_v37  ;;  %v9345_v47 = vadd.f32 %v9320_v34, %v7883_v38  ;;  %v4984_v57 = vmax.f32 %v9334_v41, 0.0  ;;  %v5240_v58 = vmax.f32 %v9337_v42, 0.0 }
 0x1ee   : > { %v3348_v48 = vpop.f32.mrf.mxu0  ;;  %v4372_v49 = vpop.f32.mrf.mxu1 }
 0x1ef   : > { %v4987_v0 = vmax.f32 %v9342_v46, 0.0  ;;  %v5243_v1 = vmax.f32 %v9345_v47, 0.0  ;;  %v9364_v2 = vadd.f32 %v9320_v34, %v3348_v48  ;;  %v4373_v18 = vadd.f32 %v9320_v34, %v4372_v49 }
 0x1f0   : > { %v7630_v53 = vpop.f32.mrf.mxu0  ;;  %7725 = vmatmul.mubr.msk.bf16.gmra.mxu0 %vm1991_vm2, %v8253_v39  ;;  %v7886_v54 = vpop.f32.mrf.mxu1  ;;  %7981 = vmatmul.mubr.msk.bf16.gmra.mxu1 %vm1991_vm2, %v8254_v40 }
 0x1f1   : > { %v3370_v59 = vadd.f32 %v9320_v34, %v7630_v53  ;;  %v4394_v61 = vadd.f32 %v9320_v34, %v7886_v54  ;;  %7728 = vmatprep.mubr.msk.bf16.mxu0 %vm1991_vm2, %v8255_v43  ;;  %7984 = vmatprep.mubr.msk.bf16.mxu1 %vm1991_vm2, %v8256_v44  ;;  %v4985_v60 = vmax.f32 %v9364_v2, 0.0  ;;  %v5241_v40 = vmax.f32 %v4373_v18, 0.0 }
 0x1f2   : > { %v5939_v62 = vld [vmem:[#allocation2 + $0x210] ss:$2 sm:$0xff]  ;;  %v6195_v63 = vld [vmem:[#allocation2 + $0x211] ss:$2 sm:$0xff]  ;;  %v3361_v3 = vpop.f32.mrf.mxu0  ;;  %v4385_v4 = vpop.f32.mrf.mxu1 }
 0x1f3   : > { %v6417_v6 = vmax.f32 %v5939_v62, %v6195_v63  ;;  %v4990_v7 = vmax.f32 %v3370_v59, 0.0  ;;  %v5246_v8 = vmax.f32 %v4394_v61, 0.0  ;;  %v3362_v45 = vadd.f32 %v9320_v34, %v3361_v3  ;;  %v6067_v14 = vld [vmem:[#allocation2 + $0x610] ss:$2 sm:$0xff]  ;;  %v6323_v15 = vld [vmem:[#allocation2 + $0x611] ss:$2 sm:$0xff] }
 0x1f4   : > { %v5937_v16 = vld [vmem:[#allocation2 + $0x200] ss:$2 sm:$0xff]  ;;  %v4386_v19 = vadd.f32 %v9320_v34, %v4385_v4  ;;  %v7631_v20 = vpop.f32.mrf.mxu0  ;;  %v7887_v21 = vpop.f32.mrf.mxu1  ;;  %v6481_v22 = vmax.f32 %v6067_v14, %v6323_v15  ;;  %v6193_v23 = vld [vmem:[#allocation2 + $0x201] ss:$2 sm:$0xff]  ;;  %v8261_v59 = vld [vmem:[%s8324_s22 + $0x3d8] sm:$0xff]  }
 0x1f5   : > { %6545 = vst.msk [vmem:[%s8620_s29 + $0x108] sm:$0xff] %vm5616_vm3, %v6417_v6  ;;  %v6065_v24 = vld [vmem:[#allocation2 + $0x600] ss:$2 sm:$0xff]  ;;  %v6321_v25 = vld [vmem:[#allocation2 + $0x601] ss:$2 sm:$0xff]  ;;  %v5430_v26 = vmax.f32 %v4986_v17, %v4990_v7  ;;  %v5558_v27 = vmax.f32 %v5242_v52, %v5246_v8  ;;  %v3373_v28 = vadd.f32 %v9320_v34, %v7631_v20  ;;  %v6416_v29 = vmax.f32 %v5937_v16, %v6193_v23  ;;  %v8262_v61 = vld [vmem:[%s8324_s22 + $0x7d8] sm:$0xff]  }
 0x1f6   : > { %v4988_v30 = vmax.f32 %v3362_v45, 0.0  ;;  %v5244_v31 = vmax.f32 %v4386_v19, 0.0  ;;  %v3364_v32 = vpop.f32.mrf.mxu0  ;;  %v4388_v33 = vpop.f32.mrf.mxu1  ;;  %6609 = vst.msk [vmem:[%s8620_s29 + $0x308] sm:$0xff] %vm5616_vm3, %v6481_v22  ;;  %v4397_v36 = vadd.f32 %v9320_v34, %v7887_v21  ;;  %v6480_v39 = vmax.f32 %v6065_v24, %v6321_v25  ;;  %v8263_v63 = vld [vmem:[%s8324_s22 + $0x3e0] sm:$0xff]   ;;  %v6263_v6 = vld [vmem:[#allocation2 + $0x431] ss:$2 sm:$0xff] }
 0x1f7   : > { %5687 = vst.msk [vmem:[#allocation2 + $0x230] sm:$0xff] %vm5616_vm3, %v5430_v26  ;;  %5815 = vst.msk [vmem:[#allocation2 + $0x630] sm:$0xff] %vm5616_vm3, %v5558_v27  ;;  %v4991_v35 = vmax.f32 %v3373_v28, 0.0  ;;  %v3365_v37 = vadd.f32 %v9320_v34, %v3364_v32  ;;  %v4389_v38 = vadd.f32 %v9320_v34, %v4388_v33  ;;  %v8265_v24 = vld [vmem:[%s8324_s22 + $0x3e8] sm:$0xff]  }
 0x1f8   : > { %6544 = vst.msk [vmem:[%s8620_s29 + $0x100] sm:$0xff] %vm5616_vm3, %v6416_v29  ;;  %v5428_v41 = vmax.f32 %v4984_v57, %v4988_v30  ;;  %v5556_v42 = vmax.f32 %v5240_v58, %v5244_v31  ;;  %v7634_v43 = vpop.f32.mrf.mxu0  ;;  %7729 = vmatmul.mubr.msk.bf16.gmra.mxu0 %vm1991_vm2, %v8257_v5  ;;  %v7890_v44 = vpop.f32.mrf.mxu1  ;;  %7985 = vmatmul.mubr.msk.bf16.gmra.mxu1 %vm1991_vm2, %v8258_v9  ;;  %v5247_v48 = vmax.f32 %v4397_v36, 0.0  ;;  %6608 = vst.msk [vmem:[%s8620_s29 + $0x300] sm:$0xff] %vm5616_vm3, %v6480_v39  ;;  %v6007_v5 = vld [vmem:[#allocation2 + $0x430] ss:$2 sm:$0xff]  ;;  %v8266_v29 = vld [vmem:[%s8324_s22 + $0x7e8] sm:$0xff]  }
 0x1f9   : > { %v5431_v46 = vmax.f32 %v4987_v0, %v4991_v35  ;;  %v4989_v49 = vmax.f32 %v3365_v37, 0.0  ;;  %v5245_v50 = vmax.f32 %v4389_v38, 0.0  ;;  %7732 = vmatprep.mubr.msk.bf16.mxu0 %vm1991_vm2, %v8259_v10  ;;  %7988 = vmatprep.mubr.msk.bf16.mxu1 %vm1991_vm2, %v8260_v11  ;;  %v9404_v55 = vadd.f32 %v9320_v34, %v7634_v43  ;;  %v8264_v0 = vld [vmem:[%s8324_s22 + $0x7e0] sm:$0xff]   ;;  %v8268_v30 = vld [vmem:[%s8324_s22 + $0x7f0] sm:$0xff]  }
 0x1fa   : > { %5685 = vst.msk [vmem:[#allocation2 + $0x220] sm:$0xff] %vm5616_vm3, %v5428_v41  ;;  %5813 = vst.msk [vmem:[#allocation2 + $0x620] sm:$0xff] %vm5616_vm3, %v5556_v42  ;;  %v3377_v51 = vpop.f32.mrf.mxu0  ;;  %v4401_v17 = vpop.f32.mrf.mxu1  ;;  %v5559_v52 = vmax.f32 %v5243_v1, %v5247_v48  ;;  %v9407_v56 = vadd.f32 %v9320_v34, %v7890_v44  ;;  %v9432_v10 = vld [vmem:[#allocation2 + $0x420] ss:$2 sm:$0xff]  ;;  %v9434_v11 = vld [vmem:[#allocation2 + $0x421] ss:$2 sm:$0xff]  ;;  %v6451_v31 = vmax.f32 %v6007_v5, %v6263_v6 }
 0x1fb   : > { %5688 = vst.msk [vmem:[#allocation2 + $0x238] sm:$0xff] %vm5616_vm3, %v5431_v46  ;;  %v5429_v53 = vmax.f32 %v4985_v60, %v4989_v49  ;;  %v5557_v54 = vmax.f32 %v5241_v40, %v5245_v50  ;;  %v9415_v47 = vadd.f32 %v9320_v34, %v3377_v51  ;;  %v9418_v62 = vadd.f32 %v9320_v34, %v4401_v17  ;;  %v8267_v60 = vld [vmem:[%s8324_s22 + $0x3f0] sm:$0xff]  }
 0x1fc   : > { %v7635_v57 = vpop.f32.mrf.mxu0  ;;  %v7891_v58 = vpop.f32.mrf.mxu1  ;;  %5816 = vst.msk [vmem:[#allocation2 + $0x638] sm:$0xff] %vm5616_vm3, %v5559_v52  ;;  %v4994_v7 = vmax.f32 %v9404_v55, 0.0  ;;  %v5250_v8 = vmax.f32 %v9407_v56, 0.0  ;;  %v6450_v32 = vmax.f32 %v9432_v10, %v9434_v11  ;;  %6579 = vst.msk [vmem:[%s8620_s29 + $0x218] sm:$0xff] %vm5616_vm3, %v6451_v31 }
 0x1fd   : > { %5686 = vst.msk [vmem:[#allocation2 + $0x228] sm:$0xff] %vm5616_vm3, %v5429_v53  ;;  %5814 = vst.msk [vmem:[#allocation2 + $0x628] sm:$0xff] %vm5616_vm3, %v5557_v54  ;;  %v9423_v1 = vadd.f32 %v9320_v34, %v7635_v57  ;;  %v9426_v2 = vadd.f32 %v9320_v34, %v7891_v58  ;;  %v4992_v12 = vmax.f32 %v9415_v47, 0.0  ;;  %v5248_v13 = vmax.f32 %v9418_v62, 0.0 }
 0x1fe   : > { %v3380_v3 = vpop.f32.mrf.mxu0  ;;  %v4404_v4 = vpop.f32.mrf.mxu1  ;;  %6578 = vst.msk [vmem:[%s8620_s29 + $0x210] sm:$0xff] %vm5616_vm3, %v6450_v32 }
 0x1ff   : > { %v4995_v19 = vmax.f32 %v9423_v1, 0.0  ;;  %v5251_v20 = vmax.f32 %v9426_v2, 0.0  ;;  %v9445_v21 = vadd.f32 %v9320_v34, %v3380_v3  ;;  %v4405_v37 = vadd.f32 %v9320_v34, %v4404_v4 }
 0x200   : > { %v7638_v45 = vpop.f32.mrf.mxu0  ;;  %7733 = vmatmul.mubr.msk.bf16.gmra.mxu0 %vm1991_vm2, %v8261_v59  ;;  %v7894_v9 = vpop.f32.mrf.mxu1  ;;  %7989 = vmatmul.mubr.msk.bf16.gmra.mxu1 %vm1991_vm2, %v8262_v61 }
 0x201   : > { %v3402_v14 = vadd.f32 %v9320_v34, %v7638_v45  ;;  %v4426_v15 = vadd.f32 %v9320_v34, %v7894_v9  ;;  %7736 = vmatprep.mubr.msk.bf16.mxu0 %vm1991_vm2, %v8263_v63  ;;  %7992 = vmatprep.mubr.msk.bf16.mxu1 %vm1991_vm2, %v8264_v0  ;;  %v4993_v51 = vmax.f32 %v9445_v21, 0.0  ;;  %v5249_v61 = vmax.f32 %v4405_v37, 0.0 }
 0x202   : > { %v5943_v16 = vld [vmem:[#allocation2 + $0x230] ss:$2 sm:$0xff]  ;;  %v6199_v18 = vld [vmem:[#allocation2 + $0x231] ss:$2 sm:$0xff]  ;;  %v3393_v22 = vpop.f32.mrf.mxu0  ;;  %v4417_v23 = vpop.f32.mrf.mxu1 }
 0x203   : > { %v6419_v25 = vmax.f32 %v5943_v16, %v6199_v18  ;;  %v4998_v26 = vmax.f32 %v3402_v14, 0.0  ;;  %v5254_v27 = vmax.f32 %v4426_v15, 0.0  ;;  %v3394_v28 = vadd.f32 %v9320_v34, %v3393_v22  ;;  %v6071_v33 = vld [vmem:[#allocation2 + $0x630] ss:$2 sm:$0xff]  ;;  %v6327_v35 = vld [vmem:[#allocation2 + $0x631] ss:$2 sm:$0xff] }
 0x204   : > { %v5941_v36 = vld [vmem:[#allocation2 + $0x220] ss:$2 sm:$0xff]  ;;  %v4418_v38 = vadd.f32 %v9320_v34, %v4417_v23  ;;  %v7639_v39 = vpop.f32.mrf.mxu0  ;;  %v7895_v40 = vpop.f32.mrf.mxu1  ;;  %v6483_v41 = vmax.f32 %v6071_v33, %v6327_v35  ;;  %v6197_v42 = vld [vmem:[#allocation2 + $0x221] ss:$2 sm:$0xff]  ;;  %v8269_v14 = vld [vmem:[%s8324_s22 + $0x3f8] sm:$0xff]  }
 0x205   : > { %6547 = vst.msk [vmem:[%s8620_s29 + $0x118] sm:$0xff] %vm5616_vm3, %v6419_v25  ;;  %v6069_v43 = vld [vmem:[#allocation2 + $0x620] ss:$2 sm:$0xff]  ;;  %v6325_v44 = vld [vmem:[#allocation2 + $0x621] ss:$2 sm:$0xff]  ;;  %v5434_v46 = vmax.f32 %v4994_v7, %v4998_v26  ;;  %v5562_v48 = vmax.f32 %v5250_v8, %v5254_v27  ;;  %v3405_v49 = vadd.f32 %v9320_v34, %v7639_v39  ;;  %v6418_v50 = vmax.f32 %v5941_v36, %v6197_v42  ;;  %v8270_v15 = vld [vmem:[%s8324_s22 + $0x7f8] sm:$0xff]  }
 0x206   : > { %v4996_v17 = vmax.f32 %v3394_v28, 0.0  ;;  %v5252_v52 = vmax.f32 %v4418_v38, 0.0  ;;  %v3396_v53 = vpop.f32.mrf.mxu0  ;;  %v4420_v54 = vpop.f32.mrf.mxu1  ;;  %6611 = vst.msk [vmem:[%s8620_s29 + $0x318] sm:$0xff] %vm5616_vm3, %v6483_v41  ;;  %v4429_v56 = vadd.f32 %v9320_v34, %v7895_v40  ;;  %v6482_v59 = vmax.f32 %v6069_v43, %v6325_v44  ;;  %v6011_v22 = vld [vmem:[#allocation2 + $0x450] ss:$2 sm:$0xff] }
 0x207   : > { %5691 = vst.msk [vmem:[#allocation2 + $0x250] sm:$0xff] %vm5616_vm3, %v5434_v46  ;;  %5819 = vst.msk [vmem:[#allocation2 + $0x650] sm:$0xff] %vm5616_vm3, %v5562_v48  ;;  %v4999_v55 = vmax.f32 %v3405_v49, 0.0  ;;  %v3397_v57 = vadd.f32 %v9320_v34, %v3396_v53  ;;  %v4421_v58 = vadd.f32 %v9320_v34, %v4420_v54  ;;  %v6267_v23 = vld [vmem:[#allocation2 + $0x451] ss:$2 sm:$0xff] }
 0x208   : > { %6546 = vst.msk [vmem:[%s8620_s29 + $0x110] sm:$0xff] %vm5616_vm3, %v6418_v50  ;;  %v5432_v47 = vmax.f32 %v4992_v12, %v4996_v17  ;;  %v5560_v62 = vmax.f32 %v5248_v13, %v5252_v52  ;;  %v7642_v63 = vpop.f32.mrf.mxu0  ;;  %7737 = vmatmul.mubr.msk.bf16.gmra.mxu0 %vm1991_vm2, %v8265_v24  ;;  %v7898_v0 = vpop.f32.mrf.mxu1  ;;  %7993 = vmatmul.mubr.msk.bf16.gmra.mxu1 %vm1991_vm2, %v8266_v29  ;;  %v5255_v3 = vmax.f32 %v4429_v56, 0.0  ;;  %6610 = vst.msk [vmem:[%s8620_s29 + $0x310] sm:$0xff] %vm5616_vm3, %v6482_v59  ;;  %v6009_v28 = vld [vmem:[#allocation2 + $0x440] ss:$2 sm:$0xff] }
 0x209   : > { %v5435_v1 = vmax.f32 %v4995_v19, %v4999_v55  ;;  %v4997_v4 = vmax.f32 %v3397_v57, 0.0  ;;  %v5253_v5 = vmax.f32 %v4421_v58, 0.0  ;;  %7740 = vmatprep.mubr.msk.bf16.mxu0 %vm1991_vm2, %v8267_v60  ;;  %7996 = vmatprep.mubr.msk.bf16.mxu1 %vm1991_vm2, %v8268_v30  ;;  %v3418_v10 = vadd.f32 %v9320_v34, %v7642_v63  ;;  %v6265_v29 = vld [vmem:[#allocation2 + $0x441] ss:$2 sm:$0xff] }
 0x20a   : > { %5689 = vst.msk [vmem:[#allocation2 + $0x240] sm:$0xff] %vm5616_vm3, %v5432_v47  ;;  %5817 = vst.msk [vmem:[#allocation2 + $0x640] sm:$0xff] %vm5616_vm3, %v5560_v62  ;;  %v3409_v6 = vpop.f32.mrf.mxu0  ;;  %v4433_v7 = vpop.f32.mrf.mxu1  ;;  %v5563_v8 = vmax.f32 %v5251_v20, %v5255_v3  ;;  %v4442_v11 = vadd.f32 %v9320_v34, %v7898_v0  ;;  %v6453_v46 = vmax.f32 %v6011_v22, %v6267_v23 }
 0x20b   : > { %5692 = vst.msk [vmem:[#allocation2 + $0x258] sm:$0xff] %vm5616_vm3, %v5435_v1  ;;  %v5433_v45 = vmax.f32 %v4993_v51, %v4997_v4  ;;  %v5561_v9 = vmax.f32 %v5249_v61, %v5253_v5  ;;  %v9492_v16 = vadd.f32 %v9320_v34, %v3409_v6  ;;  %v9495_v2 = vadd.f32 %v9320_v34, %v4433_v7 }
 0x20c   : > { %v7643_v12 = vpop.f32.mrf.mxu0  ;;  %v7899_v13 = vpop.f32.mrf.mxu1  ;;  %5820 = vst.msk [vmem:[#allocation2 + $0x658] sm:$0xff] %vm5616_vm3, %v5563_v8  ;;  %v5002_v24 = vmax.f32 %v3418_v10, 0.0  ;;  %v5258_v25 = vmax.f32 %v4442_v11, 0.0  ;;  %v6452_v48 = vmax.f32 %v6009_v28, %v6265_v29  ;;  %6581 = vst.msk [vmem:[%s8620_s29 + $0x228] sm:$0xff] %vm5616_vm3, %v6453_v46 }
 0x20d   : > { %5690 = vst.msk [vmem:[#allocation2 + $0x248] sm:$0xff] %vm5616_vm3, %v5433_v45  ;;  %5818 = vst.msk [vmem:[#allocation2 + $0x648] sm:$0xff] %vm5616_vm3, %v5561_v9  ;;  %v9498_v18 = vadd.f32 %v9320_v34, %v7643_v12  ;;  %v9501_v19 = vadd.f32 %v9320_v34, %v7899_v13  ;;  %v5000_v60 = vmax.f32 %v9492_v16, 0.0  ;;  %v5256_v30 = vmax.f32 %v9495_v2, 0.0 }
 0x20e   : > { %v3412_v20 = vpop.f32.mrf.mxu0  ;;  %v4436_v21 = vpop.f32.mrf.mxu1  ;;  %6580 = vst.msk [vmem:[%s8620_s29 + $0x220] sm:$0xff] %vm5616_vm3, %v6452_v48 }
 0x20f   : > { %v5003_v36 = vmax.f32 %v9498_v18, 0.0  ;;  %v5259_v37 = vmax.f32 %v9501_v19, 0.0  ;;  %v3413_v38 = vadd.f32 %v9320_v34, %v3412_v20  ;;  %v4437_v17 = vadd.f32 %v9320_v34, %v4436_v21 }
 0x210   : > { %v7646_v26 = vpop.f32.mrf.mxu0  ;;  %7741 = vmatmul.mubr.msk.bf16.gmra.mxu0 %vm1991_vm2, %v8269_v14  ;;  %v7902_v27 = vpop.f32.mrf.mxu1  ;;  %7997 = vmatmul.mubr.msk.bf16.gmra.mxu1 %vm1991_vm2, %v8270_v15 }
 0x211   : > { %v3434_v31 = vadd.f32 %v9320_v34, %v7646_v26  ;;  %v4458_v32 = vadd.f32 %v9320_v34, %v7902_v27  ;;  %v5001_v63 = vmax.f32 %v3413_v38, 0.0  ;;  %v5257_v9 = vmax.f32 %v4437_v17, 0.0 }
 0x212   : > { %v5947_v33 = vld [vmem:[#allocation2 + $0x250] ss:$2 sm:$0xff]  ;;  %v6203_v35 = vld [vmem:[#allocation2 + $0x251] ss:$2 sm:$0xff]  ;;  %v3425_v39 = vpop.f32.mrf.mxu0  ;;  %v4449_v40 = vpop.f32.mrf.mxu1 }
 0x213   : > { %v6421_v41 = vmax.f32 %v5947_v33, %v6203_v35  ;;  %v5006_v42 = vmax.f32 %v3434_v31, 0.0  ;;  %v5262_v43 = vmax.f32 %v4458_v32, 0.0  ;;  %v3426_v44 = vadd.f32 %v9320_v34, %v3425_v39  ;;  %v6075_v49 = vld [vmem:[#allocation2 + $0x650] ss:$2 sm:$0xff]  ;;  %v6331_v50 = vld [vmem:[#allocation2 + $0x651] ss:$2 sm:$0xff] }
 0x214   : > { %v5945_v51 = vld [vmem:[#allocation2 + $0x240] ss:$2 sm:$0xff]  ;;  %v4450_v52 = vadd.f32 %v9320_v34, %v4449_v40  ;;  %v7647_v53 = vpop.f32.mrf.mxu0  ;;  %v7903_v54 = vpop.f32.mrf.mxu1  ;;  %v6485_v55 = vmax.f32 %v6075_v49, %v6331_v50  ;;  %v6201_v56 = vld [vmem:[#allocation2 + $0x241] ss:$2 sm:$0xff]  ;;  %v6015_v32 = vld [vmem:[#allocation2 + $0x470] ss:$2 sm:$0xff] }
 0x215   : > { %6549 = vst.msk [vmem:[%s8620_s29 + $0x128] sm:$0xff] %vm5616_vm3, %v6421_v41  ;;  %v6073_v57 = vld [vmem:[#allocation2 + $0x640] ss:$2 sm:$0xff]  ;;  %v6329_v58 = vld [vmem:[#allocation2 + $0x641] ss:$2 sm:$0xff]  ;;  %v5438_v59 = vmax.f32 %v5002_v24, %v5006_v42  ;;  %v5566_v61 = vmax.f32 %v5258_v25, %v5262_v43  ;;  %v3437_v47 = vadd.f32 %v9320_v34, %v7647_v53  ;;  %v6420_v62 = vmax.f32 %v5945_v51, %v6201_v56 }
 0x216   : > { %v5004_v0 = vmax.f32 %v3426_v44, 0.0  ;;  %v5260_v1 = vmax.f32 %v4450_v52, 0.0  ;;  %v3428_v3 = vpop.f32.mrf.mxu0  ;;  %v4452_v4 = vpop.f32.mrf.mxu1  ;;  %6613 = vst.msk [vmem:[%s8620_s29 + $0x328] sm:$0xff] %vm5616_vm3, %v6485_v55  ;;  %v4461_v6 = vadd.f32 %v9320_v34, %v7903_v54  ;;  %v6484_v45 = vmax.f32 %v6073_v57, %v6329_v58  ;;  %v6271_v33 = vld [vmem:[#allocation2 + $0x471] ss:$2 sm:$0xff] }
 0x217   : > { %5695 = vst.msk [vmem:[#allocation2 + $0x270] sm:$0xff] %vm5616_vm3, %v5438_v59  ;;  %5823 = vst.msk [vmem:[#allocation2 + $0x670] sm:$0xff] %vm5616_vm3, %v5566_v61  ;;  %v5007_v5 = vmax.f32 %v3437_v47, 0.0  ;;  %v3429_v7 = vadd.f32 %v9320_v34, %v3428_v3  ;;  %v4453_v8 = vadd.f32 %v9320_v34, %v4452_v4  ;;  %v6013_v39 = vld [vmem:[#allocation2 + $0x460] ss:$2 sm:$0xff]  ;;  %v6455_v57 = vmax.f32 %v6015_v32, %v6271_v33 }
 0x218   : > { %6548 = vst.msk [vmem:[%s8620_s29 + $0x120] sm:$0xff] %vm5616_vm3, %v6420_v62  ;;  %v5436_v10 = vmax.f32 %v5000_v60, %v5004_v0  ;;  %v5564_v11 = vmax.f32 %v5256_v30, %v5260_v1  ;;  %v7650_v12 = vpop.f32.mrf.mxu0  ;;  %v7906_v13 = vpop.f32.mrf.mxu1  ;;  %v5263_v15 = vmax.f32 %v4461_v6, 0.0  ;;  %6612 = vst.msk [vmem:[%s8620_s29 + $0x320] sm:$0xff] %vm5616_vm3, %v6484_v45  ;;  %v6269_v40 = vld [vmem:[#allocation2 + $0x461] ss:$2 sm:$0xff] }
 0x219   : > { %v5439_v14 = vmax.f32 %v5003_v36, %v5007_v5  ;;  %v5005_v16 = vmax.f32 %v3429_v7, 0.0  ;;  %v5261_v2 = vmax.f32 %v4453_v8, 0.0  ;;  %v3450_v23 = vadd.f32 %v9320_v34, %v7650_v12  ;;  %6583 = vst.msk [vmem:[%s8620_s29 + $0x238] sm:$0xff] %vm5616_vm3, %v6455_v57 }
 0x21a   : > { %5693 = vst.msk [vmem:[#allocation2 + $0x260] sm:$0xff] %vm5616_vm3, %v5436_v10  ;;  %5821 = vst.msk [vmem:[#allocation2 + $0x660] sm:$0xff] %vm5616_vm3, %v5564_v11  ;;  %v3441_v18 = vpop.f32.mrf.mxu0  ;;  %v4465_v19 = vpop.f32.mrf.mxu1  ;;  %v5567_v20 = vmax.f32 %v5259_v37, %v5263_v15  ;;  %v4474_v24 = vadd.f32 %v9320_v34, %v7906_v13  ;;  %v6454_v58 = vmax.f32 %v6013_v39, %v6269_v40 }
 0x21b   : > { %5696 = vst.msk [vmem:[#allocation2 + $0x278] sm:$0xff] %vm5616_vm3, %v5439_v14  ;;  %v5437_v21 = vmax.f32 %v5001_v63, %v5005_v16  ;;  %v5565_v22 = vmax.f32 %v5257_v9, %v5261_v2  ;;  %v9542_v27 = vadd.f32 %v9320_v34, %v3441_v18  ;;  %v9545_v28 = vadd.f32 %v9320_v34, %v4465_v19 }
 0x21c   : > { %v7651_v25 = vpop.f32.mrf.mxu0  ;;  %v7907_v26 = vpop.f32.mrf.mxu1  ;;  %5824 = vst.msk [vmem:[#allocation2 + $0x678] sm:$0xff] %vm5616_vm3, %v5567_v20  ;;  %v5010_v35 = vmax.f32 %v3450_v23, 0.0  ;;  %v5266_v36 = vmax.f32 %v4474_v24, 0.0  ;;  %6582 = vst.msk [vmem:[%s8620_s29 + $0x230] sm:$0xff] %vm5616_vm3, %v6454_v58 }
 0x21d   : > { %5694 = vst.msk [vmem:[#allocation2 + $0x268] sm:$0xff] %vm5616_vm3, %v5437_v21  ;;  %5822 = vst.msk [vmem:[#allocation2 + $0x668] sm:$0xff] %vm5616_vm3, %v5565_v22  ;;  %v9548_v29 = vadd.f32 %v9320_v34, %v7651_v25  ;;  %v9551_v60 = vadd.f32 %v9320_v34, %v7907_v26  ;;  %v5008_v41 = vmax.f32 %v9542_v27, 0.0  ;;  %v5264_v42 = vmax.f32 %v9545_v28, 0.0 }
 0x21e   : > { %v3444_v30 = vpop.f32.mrf.mxu0  ;;  %v4468_v31 = vpop.f32.mrf.mxu1 }
 0x21f   : > { %v5011_v49 = vmax.f32 %v9548_v29, 0.0  ;;  %v5267_v50 = vmax.f32 %v9551_v60, 0.0  ;;  %v3445_v51 = vadd.f32 %v9320_v34, %v3444_v30  ;;  %v4469_v62 = vadd.f32 %v9320_v34, %v4468_v31 }
 0x220   : > { %v7654_v37 = vpop.f32.mrf.mxu0  ;;  %v7910_v38 = vpop.f32.mrf.mxu1 }
 0x221   : > { %v3466_v43 = vadd.f32 %v9320_v34, %v7654_v37  ;;  %v4490_v44 = vadd.f32 %v9320_v34, %v7910_v38  ;;  %v5009_v10 = vmax.f32 %v3445_v51, 0.0  ;;  %v5265_v20 = vmax.f32 %v4469_v62, 0.0 }
 0x222   : > { %v5951_v46 = vld [vmem:[#allocation2 + $0x270] ss:$2 sm:$0xff]  ;;  %v6207_v48 = vld [vmem:[#allocation2 + $0x271] ss:$2 sm:$0xff]  ;;  %v3457_v17 = vpop.f32.mrf.mxu0  ;;  %v4481_v52 = vpop.f32.mrf.mxu1 }
 0x223   : > { %v6423_v53 = vmax.f32 %v5951_v46, %v6207_v48  ;;  %v5014_v54 = vmax.f32 %v3466_v43, 0.0  ;;  %v5270_v55 = vmax.f32 %v4490_v44, 0.0  ;;  %v3458_v56 = vadd.f32 %v9320_v34, %v3457_v17  ;;  %v6079_v59 = vld [vmem:[#allocation2 + $0x670] ss:$2 sm:$0xff]  ;;  %v6335_v61 = vld [vmem:[#allocation2 + $0x671] ss:$2 sm:$0xff] }
 0x224   : > { %v5949_v47 = vld [vmem:[#allocation2 + $0x260] ss:$2 sm:$0xff]  ;;  %v4482_v63 = vadd.f32 %v9320_v34, %v4481_v52  ;;  %v7655_v0 = vpop.f32.mrf.mxu0  ;;  %v7911_v1 = vpop.f32.mrf.mxu1  ;;  %v6487_v3 = vmax.f32 %v6079_v59, %v6335_v61  ;;  %v6205_v4 = vld [vmem:[#allocation2 + $0x261] ss:$2 sm:$0xff]  ;;  %v6019_v44 = vld [vmem:[#allocation2 + $0x490] ss:$2 sm:$0xff] }
 0x225   : > { %6551 = vst.msk [vmem:[%s8620_s29 + $0x138] sm:$0xff] %vm5616_vm3, %v6423_v53  ;;  %v6077_v5 = vld [vmem:[#allocation2 + $0x660] ss:$2 sm:$0xff]  ;;  %v6333_v6 = vld [vmem:[#allocation2 + $0x661] ss:$2 sm:$0xff]  ;;  %v5442_v7 = vmax.f32 %v5010_v35, %v5014_v54  ;;  %v5570_v8 = vmax.f32 %v5266_v36, %v5270_v55  ;;  %v3469_v45 = vadd.f32 %v9320_v34, %v7655_v0  ;;  %v6422_v9 = vmax.f32 %v5949_v47, %v6205_v4 }
 0x226   : > { %v5012_v11 = vmax.f32 %v3458_v56, 0.0  ;;  %v5268_v12 = vmax.f32 %v4482_v63, 0.0  ;;  %v3460_v13 = vpop.f32.mrf.mxu0  ;;  %v4484_v14 = vpop.f32.mrf.mxu1  ;;  %6615 = vst.msk [vmem:[%s8620_s29 + $0x338] sm:$0xff] %vm5616_vm3, %v6487_v3  ;;  %v4493_v16 = vadd.f32 %v9320_v34, %v7911_v1  ;;  %v6486_v19 = vmax.f32 %v6077_v5, %v6333_v6  ;;  %v6275_v46 = vld [vmem:[#allocation2 + $0x491] ss:$2 sm:$0xff] }
 0x227   : > { %5699 = vst.msk [vmem:[#allocation2 + $0x290] sm:$0xff] %vm5616_vm3, %v5442_v7  ;;  %5827 = vst.msk [vmem:[#allocation2 + $0x690] sm:$0xff] %vm5616_vm3, %v5570_v8  ;;  %v5015_v15 = vmax.f32 %v3469_v45, 0.0  ;;  %v3461_v2 = vadd.f32 %v9320_v34, %v3460_v13  ;;  %v4485_v18 = vadd.f32 %v9320_v34, %v4484_v14  ;;  %v6017_v17 = vld [vmem:[#allocation2 + $0x480] ss:$2 sm:$0xff]  ;;  %v6457_v5 = vmax.f32 %v6019_v44, %v6275_v46 }
 0x228   : > { %6550 = vst.msk [vmem:[%s8620_s29 + $0x130] sm:$0xff] %vm5616_vm3, %v6422_v9  ;;  %v5440_v21 = vmax.f32 %v5008_v41, %v5012_v11  ;;  %v5568_v22 = vmax.f32 %v5264_v42, %v5268_v12  ;;  %v7658_v23 = vpop.f32.mrf.mxu0  ;;  %v7914_v24 = vpop.f32.mrf.mxu1  ;;  %v5271_v26 = vmax.f32 %v4493_v16, 0.0  ;;  %6614 = vst.msk [vmem:[%s8620_s29 + $0x330] sm:$0xff] %vm5616_vm3, %v6486_v19  ;;  %v6273_v52 = vld [vmem:[#allocation2 + $0x481] ss:$2 sm:$0xff] }
 0x229   : > { %v5443_v25 = vmax.f32 %v5011_v49, %v5015_v15  ;;  %v5013_v27 = vmax.f32 %v3461_v2, 0.0  ;;  %v5269_v28 = vmax.f32 %v4485_v18, 0.0  ;;  %v3482_v33 = vadd.f32 %v9320_v34, %v7658_v23  ;;  %6585 = vst.msk [vmem:[%s8620_s29 + $0x248] sm:$0xff] %vm5616_vm3, %v6457_v5 }
 0x22a   : > { %5697 = vst.msk [vmem:[#allocation2 + $0x280] sm:$0xff] %vm5616_vm3, %v5440_v21  ;;  %5825 = vst.msk [vmem:[#allocation2 + $0x680] sm:$0xff] %vm5616_vm3, %v5568_v22  ;;  %v3473_v29 = vpop.f32.mrf.mxu0  ;;  %v4497_v60 = vpop.f32.mrf.mxu1  ;;  %v5571_v30 = vmax.f32 %v5267_v50, %v5271_v26  ;;  %v4506_v35 = vadd.f32 %v9320_v34, %v7914_v24  ;;  %v6456_v6 = vmax.f32 %v6017_v17, %v6273_v52 }
 0x22b   : > { %5700 = vst.msk [vmem:[#allocation2 + $0x298] sm:$0xff] %vm5616_vm3, %v5443_v25  ;;  %v5441_v31 = vmax.f32 %v5009_v10, %v5013_v27  ;;  %v5569_v32 = vmax.f32 %v5265_v20, %v5269_v28  ;;  %v9590_v38 = vadd.f32 %v9320_v34, %v3473_v29  ;;  %v9593_v39 = vadd.f32 %v9320_v34, %v4497_v60 }
 0x22c   : > { %v7659_v36 = vpop.f32.mrf.mxu0  ;;  %v7915_v37 = vpop.f32.mrf.mxu1  ;;  %5828 = vst.msk [vmem:[#allocation2 + $0x698] sm:$0xff] %vm5616_vm3, %v5571_v30  ;;  %v5018_v48 = vmax.f32 %v3482_v33, 0.0  ;;  %v5274_v49 = vmax.f32 %v4506_v35, 0.0  ;;  %6584 = vst.msk [vmem:[%s8620_s29 + $0x240] sm:$0xff] %vm5616_vm3, %v6456_v6 }
 0x22d   : > { %5698 = vst.msk [vmem:[#allocation2 + $0x288] sm:$0xff] %vm5616_vm3, %v5441_v31  ;;  %5826 = vst.msk [vmem:[#allocation2 + $0x688] sm:$0xff] %vm5616_vm3, %v5569_v32  ;;  %v9596_v40 = vadd.f32 %v9320_v34, %v7659_v36  ;;  %v9599_v41 = vadd.f32 %v9320_v34, %v7915_v37  ;;  %v5016_v53 = vmax.f32 %v9590_v38, 0.0  ;;  %v5272_v54 = vmax.f32 %v9593_v39, 0.0 }
 0x22e   : > { %v3476_v42 = vpop.f32.mrf.mxu0  ;;  %v4500_v43 = vpop.f32.mrf.mxu1 }
 0x22f   : > { %v5019_v59 = vmax.f32 %v9596_v40, 0.0  ;;  %v5275_v61 = vmax.f32 %v9599_v41, 0.0  ;;  %v3477_v47 = vadd.f32 %v9320_v34, %v3476_v42  ;;  %v4501_v9 = vadd.f32 %v9320_v34, %v4500_v43 }
 0x230   : > { %v7662_v50 = vpop.f32.mrf.mxu0  ;;  %v7918_v51 = vpop.f32.mrf.mxu1 }
 0x231   : > { %v3498_v55 = vadd.f32 %v9320_v34, %v7662_v50  ;;  %v4522_v56 = vadd.f32 %v9320_v34, %v7918_v51  ;;  %v5017_v21 = vmax.f32 %v3477_v47, 0.0  ;;  %v5273_v30 = vmax.f32 %v4501_v9, 0.0 }
 0x232   : > { %v5955_v57 = vld [vmem:[#allocation2 + $0x290] ss:$2 sm:$0xff]  ;;  %v6211_v58 = vld [vmem:[#allocation2 + $0x291] ss:$2 sm:$0xff]  ;;  %v3489_v62 = vpop.f32.mrf.mxu0  ;;  %v4513_v63 = vpop.f32.mrf.mxu1 }
 0x233   : > { %v6425_v0 = vmax.f32 %v5955_v57, %v6211_v58  ;;  %v5022_v1 = vmax.f32 %v3498_v55, 0.0  ;;  %v5278_v3 = vmax.f32 %v4522_v56, 0.0  ;;  %v3490_v4 = vadd.f32 %v9320_v34, %v3489_v62  ;;  %v6083_v7 = vld [vmem:[#allocation2 + $0x690] ss:$2 sm:$0xff]  ;;  %v6339_v8 = vld [vmem:[#allocation2 + $0x691] ss:$2 sm:$0xff] }
 0x234   : > { %v5953_v45 = vld [vmem:[#allocation2 + $0x280] ss:$2 sm:$0xff]  ;;  %v4514_v10 = vadd.f32 %v9320_v34, %v4513_v63  ;;  %v7663_v11 = vpop.f32.mrf.mxu0  ;;  %v7919_v12 = vpop.f32.mrf.mxu1  ;;  %v6489_v13 = vmax.f32 %v6083_v7, %v6339_v8  ;;  %v6209_v14 = vld [vmem:[#allocation2 + $0x281] ss:$2 sm:$0xff]  ;;  %v6023_v56 = vld [vmem:[#allocation2 + $0x4b0] ss:$2 sm:$0xff] }
 0x235   : > { %6553 = vst.msk [vmem:[%s8620_s29 + $0x148] sm:$0xff] %vm5616_vm3, %v6425_v0  ;;  %v6081_v15 = vld [vmem:[#allocation2 + $0x680] ss:$2 sm:$0xff]  ;;  %v6337_v16 = vld [vmem:[#allocation2 + $0x681] ss:$2 sm:$0xff]  ;;  %v5446_v2 = vmax.f32 %v5018_v48, %v5022_v1  ;;  %v5574_v18 = vmax.f32 %v5274_v49, %v5278_v3  ;;  %v3501_v19 = vadd.f32 %v9320_v34, %v7663_v11  ;;  %v6424_v20 = vmax.f32 %v5953_v45, %v6209_v14 }
 0x236   : > { %v5020_v22 = vmax.f32 %v3490_v4, 0.0  ;;  %v5276_v23 = vmax.f32 %v4514_v10, 0.0  ;;  %v3492_v24 = vpop.f32.mrf.mxu0  ;;  %v4516_v25 = vpop.f32.mrf.mxu1  ;;  %6617 = vst.msk [vmem:[%s8620_s29 + $0x348] sm:$0xff] %vm5616_vm3, %v6489_v13  ;;  %v4525_v27 = vadd.f32 %v9320_v34, %v7919_v12  ;;  %v6488_v60 = vmax.f32 %v6081_v15, %v6337_v16  ;;  %v6279_v57 = vld [vmem:[#allocation2 + $0x4b1] ss:$2 sm:$0xff] }
 0x237   : > { %5703 = vst.msk [vmem:[#allocation2 + $0x2b0] sm:$0xff] %vm5616_vm3, %v5446_v2  ;;  %5831 = vst.msk [vmem:[#allocation2 + $0x6b0] sm:$0xff] %vm5616_vm3, %v5574_v18  ;;  %v5023_v26 = vmax.f32 %v3501_v19, 0.0  ;;  %v3493_v28 = vadd.f32 %v9320_v34, %v3492_v24  ;;  %v4517_v29 = vadd.f32 %v9320_v34, %v4516_v25  ;;  %v6021_v62 = vld [vmem:[#allocation2 + $0x4a0] ss:$2 sm:$0xff]  ;;  %v6459_v15 = vmax.f32 %v6023_v56, %v6279_v57 }
 0x238   : > { %6552 = vst.msk [vmem:[%s8620_s29 + $0x140] sm:$0xff] %vm5616_vm3, %v6424_v20  ;;  %v5444_v31 = vmax.f32 %v5016_v53, %v5020_v22  ;;  %v5572_v32 = vmax.f32 %v5272_v54, %v5276_v23  ;;  %v7666_v33 = vpop.f32.mrf.mxu0  ;;  %v7922_v35 = vpop.f32.mrf.mxu1  ;;  %v5279_v37 = vmax.f32 %v4525_v27, 0.0  ;;  %6616 = vst.msk [vmem:[%s8620_s29 + $0x340] sm:$0xff] %vm5616_vm3, %v6488_v60  ;;  %v6277_v63 = vld [vmem:[#allocation2 + $0x4a1] ss:$2 sm:$0xff] }
 0x239   : > { %v5447_v36 = vmax.f32 %v5019_v59, %v5023_v26  ;;  %v5021_v38 = vmax.f32 %v3493_v28, 0.0  ;;  %v5277_v39 = vmax.f32 %v4517_v29, 0.0  ;;  %v3514_v46 = vadd.f32 %v9320_v34, %v7666_v33  ;;  %v9660_v20 = vld [vmem:[%s10142_s2] ss:$0 sm:$0xff]  ;;  %6587 = vst.msk [vmem:[%s8620_s29 + $0x258] sm:$0xff] %vm5616_vm3, %v6459_v15 }
 0x23a   : > { %5701 = vst.msk [vmem:[#allocation2 + $0x2a0] sm:$0xff] %vm5616_vm3, %v5444_v31  ;;  %5829 = vst.msk [vmem:[#allocation2 + $0x6a0] sm:$0xff] %vm5616_vm3, %v5572_v32  ;;  %v3505_v40 = vpop.f32.mrf.mxu0  ;;  %v4529_v41 = vpop.f32.mrf.mxu1  ;;  %v5575_v42 = vmax.f32 %v5275_v61, %v5279_v37  ;;  %v4538_v48 = vadd.f32 %v9320_v34, %v7922_v35  ;;  %v6458_v16 = vmax.f32 %v6021_v62, %v6277_v63 }
 0x23b   : > { %5704 = vst.msk [vmem:[#allocation2 + $0x2b8] sm:$0xff] %vm5616_vm3, %v5447_v36  ;;  %v5445_v43 = vmax.f32 %v5017_v21, %v5021_v38  ;;  %v5573_v44 = vmax.f32 %v5273_v30, %v5277_v39  ;;  %v9638_v51 = vadd.f32 %v9320_v34, %v3505_v40  ;;  %v9641_v17 = vadd.f32 %v9320_v34, %v4529_v41 }
 0x23c   : > { %v7667_v49 = vpop.f32.mrf.mxu0  ;;  %v7923_v50 = vpop.f32.mrf.mxu1  ;;  %5832 = vst.msk [vmem:[#allocation2 + $0x6b8] sm:$0xff] %vm5616_vm3, %v5575_v42  ;;  %v5026_v58 = vmax.f32 %v3514_v46, 0.0  ;;  %v5282_v59 = vmax.f32 %v4538_v48, 0.0  ;;  %6586 = vst.msk [vmem:[%s8620_s29 + $0x250] sm:$0xff] %vm5616_vm3, %v6458_v16 }
 0x23d   : > { %5702 = vst.msk [vmem:[#allocation2 + $0x2a8] sm:$0xff] %vm5616_vm3, %v5445_v43  ;;  %5830 = vst.msk [vmem:[#allocation2 + $0x6a8] sm:$0xff] %vm5616_vm3, %v5573_v44  ;;  %v9644_v52 = vadd.f32 %v9320_v34, %v7667_v49  ;;  %v9647_v53 = vadd.f32 %v9320_v34, %v7923_v50  ;;  %v5024_v0 = vmax.f32 %v9638_v51, 0.0  ;;  %v5280_v1 = vmax.f32 %v9641_v17, 0.0 }
 0x23e   : > { %v3508_v54 = vpop.f32.mrf.mxu0  ;;  %v4532_v55 = vpop.f32.mrf.mxu1 }
 0x23f   : > { %v5027_v7 = vmax.f32 %v9644_v52, 0.0  ;;  %v5283_v8 = vmax.f32 %v9647_v53, 0.0  ;;  %v3509_v45 = vadd.f32 %v9320_v34, %v3508_v54  ;;  %v4533_v21 = vadd.f32 %v9660_v20, %v4532_v55 }
 0x240   : > { %v7670_v61 = vpop.f32.mrf.mxu0  ;;  %v7926_v47 = vpop.f32.mrf.mxu1 }
 0x241   : > { %v3530_v3 = vadd.f32 %v9320_v34, %v7670_v61  ;;  %v4554_v4 = vadd.f32 %v9320_v34, %v7926_v47  ;;  %v5025_v31 = vmax.f32 %v3509_v45, 0.0  ;;  %v5281_v42 = vmax.f32 %v4533_v21, 0.0 }
 0x242   : > { %v5959_v5 = vld [vmem:[#allocation2 + $0x2b0] ss:$2 sm:$0xff]  ;;  %v6215_v6 = vld [vmem:[#allocation2 + $0x2b1] ss:$2 sm:$0xff]  ;;  %v3521_v9 = vpop.f32.mrf.mxu0  ;;  %v4545_v10 = vpop.f32.mrf.mxu1 }
 0x243   : > { %v6427_v11 = vmax.f32 %v5959_v5, %v6215_v6  ;;  %v5030_v12 = vmax.f32 %v3530_v3, 0.0  ;;  %v5286_v13 = vmax.f32 %v4554_v4, 0.0  ;;  %v3522_v14 = vadd.f32 %v9320_v34, %v3521_v9  ;;  %v6087_v2 = vld [vmem:[#allocation2 + $0x6b0] ss:$2 sm:$0xff]  ;;  %v6343_v18 = vld [vmem:[#allocation2 + $0x6b1] ss:$2 sm:$0xff] }
 0x244   : > { %v5957_v19 = vld [vmem:[#allocation2 + $0x2a0] ss:$2 sm:$0xff]  ;;  %v4546_v22 = vadd.f32 %v9660_v20, %v4545_v10  ;;  %v7671_v23 = vpop.f32.mrf.mxu0  ;;  %v7927_v24 = vpop.f32.mrf.mxu1  ;;  %v6491_v34 = vmax.f32 %v6087_v2, %v6343_v18  ;;  %v6213_v25 = vld [vmem:[#allocation2 + $0x2a1] ss:$2 sm:$0xff]  ;;  %v6027_v4 = vld [vmem:[#allocation2 + $0x4d0] ss:$2 sm:$0xff] }
 0x245   : > { %6555 = vst.msk [vmem:[%s8620_s29 + $0x158] sm:$0xff] %vm5616_vm3, %v6427_v11  ;;  %v6085_v26 = vld [vmem:[#allocation2 + $0x6a0] ss:$2 sm:$0xff]  ;;  %v6341_v27 = vld [vmem:[#allocation2 + $0x6a1] ss:$2 sm:$0xff]  ;;  %v5450_v28 = vmax.f32 %v5026_v58, %v5030_v12  ;;  %v5578_v29 = vmax.f32 %v5282_v59, %v5286_v13  ;;  %v3533_v60 = vadd.f32 %v9660_v20, %v7671_v23  ;;  %v6426_v30 = vmax.f32 %v5957_v19, %v6213_v25 }
 0x246   : > { %v5028_v32 = vmax.f32 %v3522_v14, 0.0  ;;  %v5284_v33 = vmax.f32 %v4546_v22, 0.0  ;;  %v3524_v35 = vpop.f32.mrf.mxu0  ;;  %v4548_v36 = vpop.f32.mrf.mxu1  ;;  %6619 = vst.msk [vmem:[%s8620_s29 + $0x358] sm:$0xff] %vm5616_vm3, %v6491_v34  ;;  %v4557_v38 = vadd.f32 %v9660_v20, %v7927_v24  ;;  %v6490_v41 = vmax.f32 %v6085_v26, %v6341_v27  ;;  %v6283_v5 = vld [vmem:[#allocation2 + $0x4d1] ss:$2 sm:$0xff] }
 0x247   : > { %5707 = vst.msk [vmem:[#allocation2 + $0x2d0] sm:$0xff] %vm5616_vm3, %v5450_v28  ;;  %5835 = vst.msk [vmem:[#allocation2 + $0x6d0] sm:$0xff] %vm5616_vm3, %v5578_v29  ;;  %v5031_v37 = vmax.f32 %v3533_v60, 0.0  ;;  %v3525_v39 = vadd.f32 %v9660_v20, %v3524_v35  ;;  %v4549_v40 = vadd.f32 %v9660_v20, %v4548_v36  ;;  %v6025_v9 = vld [vmem:[#allocation2 + $0x4c0] ss:$2 sm:$0xff]  ;;  %v6461_v26 = vmax.f32 %v6027_v4, %v6283_v5 }
 0x248   : > { %6554 = vst.msk [vmem:[%s8620_s29 + $0x150] sm:$0xff] %vm5616_vm3, %v6426_v30  ;;  %v5448_v43 = vmax.f32 %v5024_v0, %v5028_v32  ;;  %v5576_v44 = vmax.f32 %v5280_v1, %v5284_v33  ;;  %v7674_v46 = vpop.f32.mrf.mxu0  ;;  %v7930_v48 = vpop.f32.mrf.mxu1  ;;  %v5287_v50 = vmax.f32 %v4557_v38, 0.0  ;;  %6618 = vst.msk [vmem:[%s8620_s29 + $0x350] sm:$0xff] %vm5616_vm3, %v6490_v41  ;;  %v6281_v10 = vld [vmem:[#allocation2 + $0x4c1] ss:$2 sm:$0xff] }
 0x249   : > { %v5451_v49 = vmax.f32 %v5027_v7, %v5031_v37  ;;  %v5029_v51 = vmax.f32 %v3525_v39, 0.0  ;;  %v5285_v17 = vmax.f32 %v4549_v40, 0.0  ;;  %v3546_v57 = vadd.f32 %v9660_v20, %v7674_v46  ;;  %6589 = vst.msk [vmem:[%s8620_s29 + $0x268] sm:$0xff] %vm5616_vm3, %v6461_v26 }
 0x24a   : > { %5705 = vst.msk [vmem:[#allocation2 + $0x2c0] sm:$0xff] %vm5616_vm3, %v5448_v43  ;;  %5833 = vst.msk [vmem:[#allocation2 + $0x6c0] sm:$0xff] %vm5616_vm3, %v5576_v44  ;;  %v3537_v52 = vpop.f32.mrf.mxu0  ;;  %v4561_v53 = vpop.f32.mrf.mxu1  ;;  %v5579_v54 = vmax.f32 %v5283_v8, %v5287_v50  ;;  %v4570_v58 = vadd.f32 %v9660_v20, %v7930_v48  ;;  %v6460_v27 = vmax.f32 %v6025_v9, %v6281_v10 }
 0x24b   : > { %5708 = vst.msk [vmem:[#allocation2 + $0x2d8] sm:$0xff] %vm5616_vm3, %v5451_v49  ;;  %v5449_v55 = vmax.f32 %v5025_v31, %v5029_v51  ;;  %v5577_v56 = vmax.f32 %v5281_v42, %v5285_v17  ;;  %v9691_v47 = vadd.f32 %v9660_v20, %v3537_v52  ;;  %v9694_v62 = vadd.f32 %v9660_v20, %v4561_v53 }
 0x24c   : > { %v7675_v59 = vpop.f32.mrf.mxu0  ;;  %v7931_v61 = vpop.f32.mrf.mxu1  ;;  %5836 = vst.msk [vmem:[#allocation2 + $0x6d8] sm:$0xff] %vm5616_vm3, %v5579_v54  ;;  %v5034_v6 = vmax.f32 %v3546_v57, 0.0  ;;  %v5290_v7 = vmax.f32 %v4570_v58, 0.0  ;;  %6588 = vst.msk [vmem:[%s8620_s29 + $0x260] sm:$0xff] %vm5616_vm3, %v6460_v27 }
 0x24d   : > { %5706 = vst.msk [vmem:[#allocation2 + $0x2c8] sm:$0xff] %vm5616_vm3, %v5449_v55  ;;  %5834 = vst.msk [vmem:[#allocation2 + $0x6c8] sm:$0xff] %vm5616_vm3, %v5577_v56  ;;  %v9697_v63 = vadd.f32 %v9660_v20, %v7675_v59  ;;  %v9700_v0 = vadd.f32 %v9660_v20, %v7931_v61  ;;  %v5032_v11 = vmax.f32 %v9691_v47, 0.0  ;;  %v5288_v12 = vmax.f32 %v9694_v62, 0.0 }
 0x24e   : > { %v3540_v1 = vpop.f32.mrf.mxu0  ;;  %v4564_v3 = vpop.f32.mrf.mxu1 }
 0x24f   : > { %v5035_v2 = vmax.f32 %v9697_v63, 0.0  ;;  %v5291_v18 = vmax.f32 %v9700_v0, 0.0  ;;  %v3541_v19 = vadd.f32 %v9660_v20, %v3540_v1  ;;  %v4565_v30 = vadd.f32 %v9660_v20, %v4564_v3 }
 0x250   : > { %v7678_v8 = vpop.f32.mrf.mxu0  ;;  %v7934_v45 = vpop.f32.mrf.mxu1 }
 0x251   : > { %v3562_v13 = vadd.f32 %v9660_v20, %v7678_v8  ;;  %v4586_v14 = vadd.f32 %v9660_v20, %v7934_v45  ;;  %v5033_v43 = vmax.f32 %v3541_v19, 0.0  ;;  %v5289_v54 = vmax.f32 %v4565_v30, 0.0 }
 0x252   : > { %v5963_v15 = vld [vmem:[#allocation2 + $0x2d0] ss:$2 sm:$0xff]  ;;  %v6219_v16 = vld [vmem:[#allocation2 + $0x2d1] ss:$2 sm:$0xff]  ;;  %v3553_v21 = vpop.f32.mrf.mxu0  ;;  %v4577_v22 = vpop.f32.mrf.mxu1 }
 0x253   : > { %v6429_v23 = vmax.f32 %v5963_v15, %v6219_v16  ;;  %v5038_v24 = vmax.f32 %v3562_v13, 0.0  ;;  %v5294_v34 = vmax.f32 %v4586_v14, 0.0  ;;  %v3554_v25 = vadd.f32 %v9660_v20, %v3553_v21  ;;  %v6091_v28 = vld [vmem:[#allocation2 + $0x6d0] ss:$2 sm:$0xff]  ;;  %v6347_v29 = vld [vmem:[#allocation2 + $0x6d1] ss:$2 sm:$0xff] }
 0x254   : > { %v5961_v60 = vld [vmem:[#allocation2 + $0x2c0] ss:$2 sm:$0xff]  ;;  %v4578_v31 = vadd.f32 %v9660_v20, %v4577_v22  ;;  %v7679_v32 = vpop.f32.mrf.mxu0  ;;  %v7935_v33 = vpop.f32.mrf.mxu1  ;;  %v6493_v35 = vmax.f32 %v6091_v28, %v6347_v29  ;;  %v6217_v36 = vld [vmem:[#allocation2 + $0x2c1] ss:$2 sm:$0xff]  ;;  %v6031_v14 = vld [vmem:[#allocation2 + $0x4f0] ss:$2 sm:$0xff] }
 0x255   : > { %6557 = vst.msk [vmem:[%s8620_s29 + $0x168] sm:$0xff] %vm5616_vm3, %v6429_v23  ;;  %v6089_v37 = vld [vmem:[#allocation2 + $0x6c0] ss:$2 sm:$0xff]  ;;  %v6345_v38 = vld [vmem:[#allocation2 + $0x6c1] ss:$2 sm:$0xff]  ;;  %v5454_v39 = vmax.f32 %v5034_v6, %v5038_v24  ;;  %v5582_v40 = vmax.f32 %v5290_v7, %v5294_v34  ;;  %v3565_v41 = vadd.f32 %v9660_v20, %v7679_v32  ;;  %v6428_v42 = vmax.f32 %v5961_v60, %v6217_v36 }
 0x256   : > { %v5036_v44 = vmax.f32 %v3554_v25, 0.0  ;;  %v5292_v46 = vmax.f32 %v4578_v31, 0.0  ;;  %v3556_v48 = vpop.f32.mrf.mxu0  ;;  %v4580_v49 = vpop.f32.mrf.mxu1  ;;  %6621 = vst.msk [vmem:[%s8620_s29 + $0x368] sm:$0xff] %vm5616_vm3, %v6493_v35  ;;  %v4589_v51 = vadd.f32 %v9660_v20, %v7935_v33  ;;  %v6492_v53 = vmax.f32 %v6089_v37, %v6345_v38  ;;  %v6287_v15 = vld [vmem:[#allocation2 + $0x4f1] ss:$2 sm:$0xff] }
 0x257   : > { %5711 = vst.msk [vmem:[#allocation2 + $0x2f0] sm:$0xff] %vm5616_vm3, %v5454_v39  ;;  %5839 = vst.msk [vmem:[#allocation2 + $0x6f0] sm:$0xff] %vm5616_vm3, %v5582_v40  ;;  %v5039_v50 = vmax.f32 %v3565_v41, 0.0  ;;  %v3557_v17 = vadd.f32 %v9660_v20, %v3556_v48  ;;  %v4581_v52 = vadd.f32 %v9660_v20, %v4580_v49  ;;  %v6029_v21 = vld [vmem:[#allocation2 + $0x4e0] ss:$2 sm:$0xff]  ;;  %v6463_v37 = vmax.f32 %v6031_v14, %v6287_v15 }
 0x258   : > { %6556 = vst.msk [vmem:[%s8620_s29 + $0x160] sm:$0xff] %vm5616_vm3, %v6428_v42  ;;  %v5452_v55 = vmax.f32 %v5032_v11, %v5036_v44  ;;  %v5580_v56 = vmax.f32 %v5288_v12, %v5292_v46  ;;  %v7682_v57 = vpop.f32.mrf.mxu0  ;;  %v7938_v58 = vpop.f32.mrf.mxu1  ;;  %v5295_v61 = vmax.f32 %v4589_v51, 0.0  ;;  %6620 = vst.msk [vmem:[%s8620_s29 + $0x360] sm:$0xff] %vm5616_vm3, %v6492_v53  ;;  %v6285_v22 = vld [vmem:[#allocation2 + $0x4e1] ss:$2 sm:$0xff] }
 0x259   : > { %v5455_v59 = vmax.f32 %v5035_v2, %v5039_v50  ;;  %v5037_v47 = vmax.f32 %v3557_v17, 0.0  ;;  %v5293_v62 = vmax.f32 %v4581_v52, 0.0  ;;  %v3578_v5 = vadd.f32 %v9660_v20, %v7682_v57  ;;  %6591 = vst.msk [vmem:[%s8620_s29 + $0x278] sm:$0xff] %vm5616_vm3, %v6463_v37 }
 0x25a   : > { %5709 = vst.msk [vmem:[#allocation2 + $0x2e0] sm:$0xff] %vm5616_vm3, %v5452_v55  ;;  %5837 = vst.msk [vmem:[#allocation2 + $0x6e0] sm:$0xff] %vm5616_vm3, %v5580_v56  ;;  %v3569_v63 = vpop.f32.mrf.mxu0  ;;  %v4593_v0 = vpop.f32.mrf.mxu1  ;;  %v5583_v1 = vmax.f32 %v5291_v18, %v5295_v61  ;;  %v4602_v6 = vadd.f32 %v9660_v20, %v7938_v58  ;;  %v6462_v38 = vmax.f32 %v6029_v21, %v6285_v22 }
 0x25b   : > { %5712 = vst.msk [vmem:[#allocation2 + $0x2f8] sm:$0xff] %vm5616_vm3, %v5455_v59  ;;  %v5453_v3 = vmax.f32 %v5033_v43, %v5037_v47  ;;  %v5581_v4 = vmax.f32 %v5289_v54, %v5293_v62  ;;  %v9739_v45 = vadd.f32 %v9660_v20, %v3569_v63  ;;  %v9742_v9 = vadd.f32 %v9660_v20, %v4593_v0 }
 0x25c   : > { %v7683_v7 = vpop.f32.mrf.mxu0  ;;  %v7939_v8 = vpop.f32.mrf.mxu1  ;;  %5840 = vst.msk [vmem:[#allocation2 + $0x6f8] sm:$0xff] %vm5616_vm3, %v5583_v1  ;;  %v5042_v16 = vmax.f32 %v3578_v5, 0.0  ;;  %v5298_v2 = vmax.f32 %v4602_v6, 0.0  ;;  %6590 = vst.msk [vmem:[%s8620_s29 + $0x270] sm:$0xff] %vm5616_vm3, %v6462_v38 }
 0x25d   : > { %5710 = vst.msk [vmem:[#allocation2 + $0x2e8] sm:$0xff] %vm5616_vm3, %v5453_v3  ;;  %5838 = vst.msk [vmem:[#allocation2 + $0x6e8] sm:$0xff] %vm5616_vm3, %v5581_v4  ;;  %v9745_v10 = vadd.f32 %v9660_v20, %v7683_v7  ;;  %v9748_v11 = vadd.f32 %v9660_v20, %v7939_v8  ;;  %v5040_v23 = vmax.f32 %v9739_v45, 0.0  ;;  %v5296_v24 = vmax.f32 %v9742_v9, 0.0 }
 0x25e   : > { %v3572_v12 = vpop.f32.mrf.mxu0  ;;  %v4596_v13 = vpop.f32.mrf.mxu1 }
 0x25f   : > { %v5043_v28 = vmax.f32 %v9745_v10, 0.0  ;;  %v5299_v29 = vmax.f32 %v9748_v11, 0.0  ;;  %v3573_v60 = vadd.f32 %v9660_v20, %v3572_v12  ;;  %v4597_v42 = vadd.f32 %v9660_v20, %v4596_v13 }
 0x260   : > { %v7686_v18 = vpop.f32.mrf.mxu0  ;;  %v7942_v19 = vpop.f32.mrf.mxu1 }
 0x261   : > { %v3594_v34 = vadd.f32 %v9660_v20, %v7686_v18  ;;  %v4618_v25 = vadd.f32 %v9660_v20, %v7942_v19  ;;  %v5041_v55 = vmax.f32 %v3573_v60, 0.0  ;;  %v5297_v1 = vmax.f32 %v4597_v42, 0.0 }
 0x262   : > { %v5967_v26 = vld [vmem:[#allocation2 + $0x2f0] ss:$2 sm:$0xff]  ;;  %v6223_v27 = vld [vmem:[#allocation2 + $0x2f1] ss:$2 sm:$0xff]  ;;  %v3585_v30 = vpop.f32.mrf.mxu0  ;;  %v4609_v31 = vpop.f32.mrf.mxu1 }
 0x263   : > { %v6431_v32 = vmax.f32 %v5967_v26, %v6223_v27  ;;  %v5046_v33 = vmax.f32 %v3594_v34, 0.0  ;;  %v5302_v35 = vmax.f32 %v4618_v25, 0.0  ;;  %v3586_v36 = vadd.f32 %v9660_v20, %v3585_v30  ;;  %v6095_v39 = vld [vmem:[#allocation2 + $0x6f0] ss:$2 sm:$0xff]  ;;  %v6351_v40 = vld [vmem:[#allocation2 + $0x6f1] ss:$2 sm:$0xff] }
 0x264   : > { %v5965_v41 = vld [vmem:[#allocation2 + $0x2e0] ss:$2 sm:$0xff]  ;;  %v4610_v43 = vadd.f32 %v9660_v20, %v4609_v31  ;;  %v7687_v44 = vpop.f32.mrf.mxu0  ;;  %v7943_v46 = vpop.f32.mrf.mxu1  ;;  %v6495_v48 = vmax.f32 %v6095_v39, %v6351_v40  ;;  %v6221_v49 = vld [vmem:[#allocation2 + $0x2e1] ss:$2 sm:$0xff]  ;;  %v6035_v25 = vld [vmem:[#allocation2 + $0x510] ss:$2 sm:$0xff] }
 0x265   : > { %6559 = vst.msk [vmem:[%s8620_s29 + $0x178] sm:$0xff] %vm5616_vm3, %v6431_v32  ;;  %v6093_v50 = vld [vmem:[#allocation2 + $0x6e0] ss:$2 sm:$0xff]  ;;  %v6349_v51 = vld [vmem:[#allocation2 + $0x6e1] ss:$2 sm:$0xff]  ;;  %v5458_v17 = vmax.f32 %v5042_v16, %v5046_v33  ;;  %v5586_v52 = vmax.f32 %v5298_v2, %v5302_v35  ;;  %v3597_v53 = vadd.f32 %v9660_v20, %v7687_v44  ;;  %v6430_v54 = vmax.f32 %v5965_v41, %v6221_v49 }
 0x266   : > { %v5044_v56 = vmax.f32 %v3586_v36, 0.0  ;;  %v5300_v57 = vmax.f32 %v4610_v43, 0.0  ;;  %v3588_v58 = vpop.f32.mrf.mxu0  ;;  %v4612_v59 = vpop.f32.mrf.mxu1  ;;  %6623 = vst.msk [vmem:[%s8620_s29 + $0x378] sm:$0xff] %vm5616_vm3, %v6495_v48  ;;  %v4621_v47 = vadd.f32 %v9660_v20, %v7943_v46  ;;  %v6494_v0 = vmax.f32 %v6093_v50, %v6349_v51  ;;  %v6291_v26 = vld [vmem:[#allocation2 + $0x511] ss:$2 sm:$0xff] }
 0x267   : > { %5715 = vst.msk [vmem:[#allocation2 + $0x310] sm:$0xff] %vm5616_vm3, %v5458_v17  ;;  %5843 = vst.msk [vmem:[#allocation2 + $0x710] sm:$0xff] %vm5616_vm3, %v5586_v52  ;;  %v5047_v61 = vmax.f32 %v3597_v53, 0.0  ;;  %v3589_v62 = vadd.f32 %v9660_v20, %v3588_v58  ;;  %v4613_v63 = vadd.f32 %v9660_v20, %v4612_v59  ;;  %v6033_v30 = vld [vmem:[#allocation2 + $0x500] ss:$2 sm:$0xff]  ;;  %v6465_v50 = vmax.f32 %v6035_v25, %v6291_v26 }
 0x268   : > { %6558 = vst.msk [vmem:[%s8620_s29 + $0x170] sm:$0xff] %vm5616_vm3, %v6430_v54  ;;  %v5456_v3 = vmax.f32 %v5040_v23, %v5044_v56  ;;  %v5584_v4 = vmax.f32 %v5296_v24, %v5300_v57  ;;  %v7690_v5 = vpop.f32.mrf.mxu0  ;;  %v7946_v6 = vpop.f32.mrf.mxu1  ;;  %v5303_v8 = vmax.f32 %v4621_v47, 0.0  ;;  %6622 = vst.msk [vmem:[%s8620_s29 + $0x370] sm:$0xff] %vm5616_vm3, %v6494_v0  ;;  %v6289_v31 = vld [vmem:[#allocation2 + $0x501] ss:$2 sm:$0xff] }
 0x269   : > { %v5459_v7 = vmax.f32 %v5043_v28, %v5047_v61  ;;  %v5045_v45 = vmax.f32 %v3589_v62, 0.0  ;;  %v5301_v9 = vmax.f32 %v4613_v63, 0.0  ;;  %v3610_v15 = vadd.f32 %v9660_v20, %v7690_v5  ;;  %6593 = vst.msk [vmem:[%s8620_s29 + $0x288] sm:$0xff] %vm5616_vm3, %v6465_v50 }
 0x26a   : > { %5713 = vst.msk [vmem:[#allocation2 + $0x300] sm:$0xff] %vm5616_vm3, %v5456_v3  ;;  %5841 = vst.msk [vmem:[#allocation2 + $0x700] sm:$0xff] %vm5616_vm3, %v5584_v4  ;;  %v3601_v10 = vpop.f32.mrf.mxu0  ;;  %v4625_v11 = vpop.f32.mrf.mxu1  ;;  %v5587_v12 = vmax.f32 %v5299_v29, %v5303_v8  ;;  %v4634_v16 = vadd.f32 %v9660_v20, %v7946_v6  ;;  %v6464_v51 = vmax.f32 %v6033_v30, %v6289_v31 }
 0x26b   : > { %5716 = vst.msk [vmem:[#allocation2 + $0x318] sm:$0xff] %vm5616_vm3, %v5459_v7  ;;  %v5457_v13 = vmax.f32 %v5041_v55, %v5045_v45  ;;  %v5585_v14 = vmax.f32 %v5297_v1, %v5301_v9  ;;  %v9787_v19 = vadd.f32 %v9660_v20, %v3601_v10  ;;  %v9790_v21 = vadd.f32 %v9660_v20, %v4625_v11 }
 0x26c   : > { %v7691_v2 = vpop.f32.mrf.mxu0  ;;  %v7947_v18 = vpop.f32.mrf.mxu1  ;;  %5844 = vst.msk [vmem:[#allocation2 + $0x718] sm:$0xff] %vm5616_vm3, %v5587_v12  ;;  %v5050_v27 = vmax.f32 %v3610_v15, 0.0  ;;  %v5306_v28 = vmax.f32 %v4634_v16, 0.0  ;;  %6592 = vst.msk [vmem:[%s8620_s29 + $0x280] sm:$0xff] %vm5616_vm3, %v6464_v51 }
 0x26d   : > { %5714 = vst.msk [vmem:[#allocation2 + $0x308] sm:$0xff] %vm5616_vm3, %v5457_v13  ;;  %5842 = vst.msk [vmem:[#allocation2 + $0x708] sm:$0xff] %vm5616_vm3, %v5585_v14  ;;  %v9793_v22 = vadd.f32 %v9660_v20, %v7691_v2  ;;  %v9796_v23 = vadd.f32 %v9660_v20, %v7947_v18  ;;  %v5048_v32 = vmax.f32 %v9787_v19, 0.0  ;;  %v5304_v33 = vmax.f32 %v9790_v21, 0.0 }
 0x26e   : > { %v3604_v24 = vpop.f32.mrf.mxu0  ;;  %v4628_v34 = vpop.f32.mrf.mxu1 }
 0x26f   : > { %v5051_v39 = vmax.f32 %v9793_v22, 0.0  ;;  %v5307_v40 = vmax.f32 %v9796_v23, 0.0  ;;  %v3605_v41 = vadd.f32 %v9660_v20, %v3604_v24  ;;  %v4629_v54 = vadd.f32 %v9660_v20, %v4628_v34 }
 0x270   : > { %v7694_v29 = vpop.f32.mrf.mxu0  ;;  %v7950_v60 = vpop.f32.mrf.mxu1 }
 0x271   : > { %v3626_v35 = vadd.f32 %v9660_v20, %v7694_v29  ;;  %v4650_v36 = vadd.f32 %v9660_v20, %v7950_v60  ;;  %v5049_v3 = vmax.f32 %v3605_v41, 0.0  ;;  %v5305_v12 = vmax.f32 %v4629_v54, 0.0 }
 0x272   : > { %v5971_v37 = vld [vmem:[#allocation2 + $0x310] ss:$2 sm:$0xff]  ;;  %v6227_v38 = vld [vmem:[#allocation2 + $0x311] ss:$2 sm:$0xff]  ;;  %v3617_v42 = vpop.f32.mrf.mxu0  ;;  %v4641_v43 = vpop.f32.mrf.mxu1 }
 0x273   : > { %v6433_v44 = vmax.f32 %v5971_v37, %v6227_v38  ;;  %v5054_v46 = vmax.f32 %v3626_v35, 0.0  ;;  %v5310_v48 = vmax.f32 %v4650_v36, 0.0  ;;  %v3618_v49 = vadd.f32 %v9660_v20, %v3617_v42  ;;  %v6099_v17 = vld [vmem:[#allocation2 + $0x710] ss:$2 sm:$0xff]  ;;  %v6355_v52 = vld [vmem:[#allocation2 + $0x711] ss:$2 sm:$0xff] }
 0x274   : > { %v5969_v53 = vld [vmem:[#allocation2 + $0x300] ss:$2 sm:$0xff]  ;;  %v4642_v55 = vadd.f32 %v9660_v20, %v4641_v43  ;;  %v7695_v56 = vpop.f32.mrf.mxu0  ;;  %v7951_v57 = vpop.f32.mrf.mxu1  ;;  %v6497_v58 = vmax.f32 %v6099_v17, %v6355_v52  ;;  %v6225_v59 = vld [vmem:[#allocation2 + $0x301] ss:$2 sm:$0xff]  ;;  %v6039_v36 = vld [vmem:[#allocation2 + $0x530] ss:$2 sm:$0xff] }
 0x275   : > { %6561 = vst.msk [vmem:[%s8620_s29 + $0x188] sm:$0xff] %vm5616_vm3, %v6433_v44  ;;  %v6097_v61 = vld [vmem:[#allocation2 + $0x700] ss:$2 sm:$0xff]  ;;  %v6353_v47 = vld [vmem:[#allocation2 + $0x701] ss:$2 sm:$0xff]  ;;  %v5462_v62 = vmax.f32 %v5050_v27, %v5054_v46  ;;  %v5590_v63 = vmax.f32 %v5306_v28, %v5310_v48  ;;  %v3629_v0 = vadd.f32 %v9660_v20, %v7695_v56  ;;  %v6432_v1 = vmax.f32 %v5969_v53, %v6225_v59 }
 0x276   : > { %v5052_v4 = vmax.f32 %v3618_v49, 0.0  ;;  %v5308_v5 = vmax.f32 %v4642_v55, 0.0  ;;  %v3620_v6 = vpop.f32.mrf.mxu0  ;;  %v4644_v7 = vpop.f32.mrf.mxu1  ;;  %6625 = vst.msk [vmem:[%s8620_s29 + $0x388] sm:$0xff] %vm5616_vm3, %v6497_v58  ;;  %v4653_v45 = vadd.f32 %v9660_v20, %v7951_v57  ;;  %v6496_v11 = vmax.f32 %v6097_v61, %v6353_v47  ;;  %v6295_v37 = vld [vmem:[#allocation2 + $0x531] ss:$2 sm:$0xff] }
 0x277   : > { %5719 = vst.msk [vmem:[#allocation2 + $0x330] sm:$0xff] %vm5616_vm3, %v5462_v62  ;;  %5847 = vst.msk [vmem:[#allocation2 + $0x730] sm:$0xff] %vm5616_vm3, %v5590_v63  ;;  %v5055_v8 = vmax.f32 %v3629_v0, 0.0  ;;  %v3621_v9 = vadd.f32 %v9660_v20, %v3620_v6  ;;  %v4645_v10 = vadd.f32 %v9660_v20, %v4644_v7  ;;  %v6037_v42 = vld [vmem:[#allocation2 + $0x520] ss:$2 sm:$0xff]  ;;  %v6467_v61 = vmax.f32 %v6039_v36, %v6295_v37 }
 0x278   : > { %6560 = vst.msk [vmem:[%s8620_s29 + $0x180] sm:$0xff] %vm5616_vm3, %v6432_v1  ;;  %v5460_v13 = vmax.f32 %v5048_v32, %v5052_v4  ;;  %v5588_v14 = vmax.f32 %v5304_v33, %v5308_v5  ;;  %v7698_v15 = vpop.f32.mrf.mxu0  ;;  %v7954_v16 = vpop.f32.mrf.mxu1  ;;  %v5311_v18 = vmax.f32 %v4653_v45, 0.0  ;;  %6624 = vst.msk [vmem:[%s8620_s29 + $0x380] sm:$0xff] %vm5616_vm3, %v6496_v11  ;;  %v6293_v43 = vld [vmem:[#allocation2 + $0x521] ss:$2 sm:$0xff] }
 0x279   : > { %v5463_v2 = vmax.f32 %v5051_v39, %v5055_v8  ;;  %v5053_v19 = vmax.f32 %v3621_v9, 0.0  ;;  %v5309_v21 = vmax.f32 %v4645_v10, 0.0  ;;  %v3642_v26 = vadd.f32 %v9660_v20, %v7698_v15  ;;  %6595 = vst.msk [vmem:[%s8620_s29 + $0x298] sm:$0xff] %vm5616_vm3, %v6467_v61 }
 0x27a   : > { %5717 = vst.msk [vmem:[#allocation2 + $0x320] sm:$0xff] %vm5616_vm3, %v5460_v13  ;;  %5845 = vst.msk [vmem:[#allocation2 + $0x720] sm:$0xff] %vm5616_vm3, %v5588_v14  ;;  %v3633_v22 = vpop.f32.mrf.mxu0  ;;  %v4657_v23 = vpop.f32.mrf.mxu1  ;;  %v5591_v24 = vmax.f32 %v5307_v40, %v5311_v18  ;;  %v4666_v27 = vadd.f32 %v9660_v20, %v7954_v16  ;;  %v6466_v47 = vmax.f32 %v6037_v42, %v6293_v43 }
 0x27b   : > { %5720 = vst.msk [vmem:[#allocation2 + $0x338] sm:$0xff] %vm5616_vm3, %v5463_v2  ;;  %v5461_v34 = vmax.f32 %v5049_v3, %v5053_v19  ;;  %v5589_v25 = vmax.f32 %v5305_v12, %v5309_v21  ;;  %v9835_v60 = vadd.f32 %v9660_v20, %v3633_v22  ;;  %v9838_v30 = vadd.f32 %v9660_v20, %v4657_v23 }
 0x27c   : > { %v7699_v28 = vpop.f32.mrf.mxu0  ;;  %v7955_v29 = vpop.f32.mrf.mxu1  ;;  %5848 = vst.msk [vmem:[#allocation2 + $0x738] sm:$0xff] %vm5616_vm3, %v5591_v24  ;;  %v5058_v38 = vmax.f32 %v3642_v26, 0.0  ;;  %v5314_v39 = vmax.f32 %v4666_v27, 0.0  ;;  %6594 = vst.msk [vmem:[%s8620_s29 + $0x290] sm:$0xff] %vm5616_vm3, %v6466_v47 }
 0x27d   : > { %5718 = vst.msk [vmem:[#allocation2 + $0x328] sm:$0xff] %vm5616_vm3, %v5461_v34  ;;  %5846 = vst.msk [vmem:[#allocation2 + $0x728] sm:$0xff] %vm5616_vm3, %v5589_v25  ;;  %v9841_v31 = vadd.f32 %v9660_v20, %v7699_v28  ;;  %v9844_v32 = vadd.f32 %v9660_v20, %v7955_v29  ;;  %v5056_v44 = vmax.f32 %v9835_v60, 0.0  ;;  %v5312_v46 = vmax.f32 %v9838_v30, 0.0 }
 0x27e   : > { %v3636_v33 = vpop.f32.mrf.mxu0  ;;  %v4660_v35 = vpop.f32.mrf.mxu1 }
 0x27f   : > { %v5059_v17 = vmax.f32 %v9841_v31, 0.0  ;;  %v5315_v52 = vmax.f32 %v9844_v32, 0.0  ;;  %v3637_v53 = vadd.f32 %v9660_v20, %v3636_v33  ;;  %v4661_v1 = vadd.f32 %v9660_v20, %v4660_v35 }
 0x280   : > { %v7702_v40 = vpop.f32.mrf.mxu0  ;;  %v7958_v41 = vpop.f32.mrf.mxu1 }
 0x281   : > { %v3658_v48 = vadd.f32 %v9660_v20, %v7702_v40  ;;  %v4682_v49 = vadd.f32 %v9660_v20, %v7958_v41  ;;  %v5057_v13 = vmax.f32 %v3637_v53, 0.0  ;;  %v5313_v24 = vmax.f32 %v4661_v1, 0.0 }
 0x282   : > { %v5975_v50 = vld [vmem:[#allocation2 + $0x330] ss:$2 sm:$0xff]  ;;  %v6231_v51 = vld [vmem:[#allocation2 + $0x331] ss:$2 sm:$0xff]  ;;  %v3649_v54 = vpop.f32.mrf.mxu0  ;;  %v4673_v55 = vpop.f32.mrf.mxu1 }
 0x283   : > { %v6435_v56 = vmax.f32 %v5975_v50, %v6231_v51  ;;  %v5062_v57 = vmax.f32 %v3658_v48, 0.0  ;;  %v5318_v58 = vmax.f32 %v4682_v49, 0.0  ;;  %v3650_v59 = vadd.f32 %v9660_v20, %v3649_v54  ;;  %v6103_v62 = vld [vmem:[#allocation2 + $0x730] ss:$2 sm:$0xff]  ;;  %v6359_v63 = vld [vmem:[#allocation2 + $0x731] ss:$2 sm:$0xff] }
 0x284   : > { %v5973_v0 = vld [vmem:[#allocation2 + $0x320] ss:$2 sm:$0xff]  ;;  %v4674_v3 = vadd.f32 %v9660_v20, %v4673_v55  ;;  %v7703_v4 = vpop.f32.mrf.mxu0  ;;  %v7959_v5 = vpop.f32.mrf.mxu1  ;;  %v6499_v6 = vmax.f32 %v6103_v62, %v6359_v63  ;;  %v6229_v7 = vld [vmem:[#allocation2 + $0x321] ss:$2 sm:$0xff]  ;;  %v6043_v49 = vld [vmem:[#allocation2 + $0x550] ss:$2 sm:$0xff] }
 0x285   : > { %6563 = vst.msk [vmem:[%s8620_s29 + $0x198] sm:$0xff] %vm5616_vm3, %v6435_v56  ;;  %v6101_v8 = vld [vmem:[#allocation2 + $0x720] ss:$2 sm:$0xff]  ;;  %v6357_v45 = vld [vmem:[#allocation2 + $0x721] ss:$2 sm:$0xff]  ;;  %v5466_v9 = vmax.f32 %v5058_v38, %v5062_v57  ;;  %v5594_v10 = vmax.f32 %v5314_v39, %v5318_v58  ;;  %v3661_v11 = vadd.f32 %v9660_v20, %v7703_v4  ;;  %v6434_v12 = vmax.f32 %v5973_v0, %v6229_v7 }
 0x286   : > { %v5060_v14 = vmax.f32 %v3650_v59, 0.0  ;;  %v5316_v15 = vmax.f32 %v4674_v3, 0.0  ;;  %v3652_v16 = vpop.f32.mrf.mxu0  ;;  %v4676_v2 = vpop.f32.mrf.mxu1  ;;  %6627 = vst.msk [vmem:[%s8620_s29 + $0x398] sm:$0xff] %vm5616_vm3, %v6499_v6  ;;  %v4685_v19 = vadd.f32 %v9660_v20, %v7959_v5  ;;  %v6498_v23 = vmax.f32 %v6101_v8, %v6357_v45  ;;  %v6299_v50 = vld [vmem:[#allocation2 + $0x551] ss:$2 sm:$0xff] }
 0x287   : > { %5723 = vst.msk [vmem:[#allocation2 + $0x350] sm:$0xff] %vm5616_vm3, %v5466_v9  ;;  %5851 = vst.msk [vmem:[#allocation2 + $0x750] sm:$0xff] %vm5616_vm3, %v5594_v10  ;;  %v5063_v18 = vmax.f32 %v3661_v11, 0.0  ;;  %v3653_v21 = vadd.f32 %v9660_v20, %v3652_v16  ;;  %v4677_v22 = vadd.f32 %v9660_v20, %v4676_v2  ;;  %v6041_v54 = vld [vmem:[#allocation2 + $0x540] ss:$2 sm:$0xff]  ;;  %v6469_v8 = vmax.f32 %v6043_v49, %v6299_v50 }
 0x288   : > { %6562 = vst.msk [vmem:[%s8620_s29 + $0x190] sm:$0xff] %vm5616_vm3, %v6434_v12  ;;  %v5464_v34 = vmax.f32 %v5056_v44, %v5060_v14  ;;  %v5592_v25 = vmax.f32 %v5312_v46, %v5316_v15  ;;  %v7706_v26 = vpop.f32.mrf.mxu0  ;;  %v7962_v27 = vpop.f32.mrf.mxu1  ;;  %v5319_v29 = vmax.f32 %v4685_v19, 0.0  ;;  %6626 = vst.msk [vmem:[%s8620_s29 + $0x390] sm:$0xff] %vm5616_vm3, %v6498_v23  ;;  %v6297_v55 = vld [vmem:[#allocation2 + $0x541] ss:$2 sm:$0xff] }
 0x289   : > { %v5467_v28 = vmax.f32 %v5059_v17, %v5063_v18  ;;  %v5061_v60 = vmax.f32 %v3653_v21, 0.0  ;;  %v5317_v30 = vmax.f32 %v4677_v22, 0.0  ;;  %v3674_v37 = vadd.f32 %v9660_v20, %v7706_v26  ;;  %6597 = vst.msk [vmem:[%s8620_s29 + $0x2a8] sm:$0xff] %vm5616_vm3, %v6469_v8 }
 0x28a   : > { %5721 = vst.msk [vmem:[#allocation2 + $0x340] sm:$0xff] %vm5616_vm3, %v5464_v34  ;;  %5849 = vst.msk [vmem:[#allocation2 + $0x740] sm:$0xff] %vm5616_vm3, %v5592_v25  ;;  %v3665_v31 = vpop.f32.mrf.mxu0  ;;  %v4689_v32 = vpop.f32.mrf.mxu1  ;;  %v5595_v33 = vmax.f32 %v5315_v52, %v5319_v29  ;;  %v4698_v38 = vadd.f32 %v9660_v20, %v7962_v27  ;;  %v6468_v45 = vmax.f32 %v6041_v54, %v6297_v55 }
 0x28b   : > { %5724 = vst.msk [vmem:[#allocation2 + $0x358] sm:$0xff] %vm5616_vm3, %v5467_v28  ;;  %v5465_v35 = vmax.f32 %v5057_v13, %v5061_v60  ;;  %v5593_v36 = vmax.f32 %v5313_v24, %v5317_v30  ;;  %v9883_v41 = vadd.f32 %v9660_v20, %v3665_v31  ;;  %v9886_v42 = vadd.f32 %v9660_v20, %v4689_v32 }
 0x28c   : > { %v7707_v39 = vpop.f32.mrf.mxu0  ;;  %v7963_v40 = vpop.f32.mrf.mxu1  ;;  %5852 = vst.msk [vmem:[#allocation2 + $0x758] sm:$0xff] %vm5616_vm3, %v5595_v33  ;;  %v5066_v51 = vmax.f32 %v3674_v37, 0.0  ;;  %v5322_v17 = vmax.f32 %v4698_v38, 0.0  ;;  %6596 = vst.msk [vmem:[%s8620_s29 + $0x2a0] sm:$0xff] %vm5616_vm3, %v6468_v45 }
 0x28d   : > { %5722 = vst.msk [vmem:[#allocation2 + $0x348] sm:$0xff] %vm5616_vm3, %v5465_v35  ;;  %5850 = vst.msk [vmem:[#allocation2 + $0x748] sm:$0xff] %vm5616_vm3, %v5593_v36  ;;  %v9889_v43 = vadd.f32 %v9660_v20, %v7707_v39  ;;  %v9892_v44 = vadd.f32 %v9660_v20, %v7963_v40  ;;  %v5064_v56 = vmax.f32 %v9883_v41, 0.0  ;;  %v5320_v57 = vmax.f32 %v9886_v42, 0.0 }
 0x28e   : > { %v3668_v46 = vpop.f32.mrf.mxu0  ;;  %v4692_v48 = vpop.f32.mrf.mxu1 }
 0x28f   : > { %v5067_v62 = vmax.f32 %v9889_v43, 0.0  ;;  %v5323_v63 = vmax.f32 %v9892_v44, 0.0  ;;  %v3669_v0 = vadd.f32 %v9660_v20, %v3668_v46  ;;  %v4693_v12 = vadd.f32 %v9660_v20, %v4692_v48 }
 0x290   : > { %v7710_v52 = vpop.f32.mrf.mxu0  ;;  %v7966_v53 = vpop.f32.mrf.mxu1 }
 0x291   : > { %v3690_v58 = vadd.f32 %v9660_v20, %v7710_v52  ;;  %v4714_v59 = vadd.f32 %v9660_v20, %v7966_v53  ;;  %v5065_v34 = vmax.f32 %v3669_v0, 0.0  ;;  %v5321_v33 = vmax.f32 %v4693_v12, 0.0 }
 0x292   : > { %v5979_v61 = vld [vmem:[#allocation2 + $0x350] ss:$2 sm:$0xff]  ;;  %v6235_v47 = vld [vmem:[#allocation2 + $0x351] ss:$2 sm:$0xff]  ;;  %v3681_v1 = vpop.f32.mrf.mxu0  ;;  %v4705_v3 = vpop.f32.mrf.mxu1 }
 0x293   : > { %v6437_v4 = vmax.f32 %v5979_v61, %v6235_v47  ;;  %v5070_v5 = vmax.f32 %v3690_v58, 0.0  ;;  %v5326_v6 = vmax.f32 %v4714_v59, 0.0  ;;  %v3682_v7 = vadd.f32 %v9660_v20, %v3681_v1  ;;  %v6107_v9 = vld [vmem:[#allocation2 + $0x750] ss:$2 sm:$0xff]  ;;  %v6363_v10 = vld [vmem:[#allocation2 + $0x751] ss:$2 sm:$0xff] }
 0x294   : > { %v5977_v11 = vld [vmem:[#allocation2 + $0x340] ss:$2 sm:$0xff]  ;;  %v4706_v13 = vadd.f32 %v9660_v20, %v4705_v3  ;;  %v7711_v14 = vpop.f32.mrf.mxu0  ;;  %v7967_v15 = vpop.f32.mrf.mxu1  ;;  %v6501_v16 = vmax.f32 %v6107_v9, %v6363_v10  ;;  %v6233_v2 = vld [vmem:[#allocation2 + $0x341] ss:$2 sm:$0xff]  ;;  %v6047_v59 = vld [vmem:[#allocation2 + $0x570] ss:$2 sm:$0xff] }
 0x295   : > { %6565 = vst.msk [vmem:[%s8620_s29 + $0x1a8] sm:$0xff] %vm5616_vm3, %v6437_v4  ;;  %v6105_v18 = vld [vmem:[#allocation2 + $0x740] ss:$2 sm:$0xff]  ;;  %v6361_v19 = vld [vmem:[#allocation2 + $0x741] ss:$2 sm:$0xff]  ;;  %v5470_v21 = vmax.f32 %v5066_v51, %v5070_v5  ;;  %v5598_v22 = vmax.f32 %v5322_v17, %v5326_v6  ;;  %v3693_v23 = vadd.f32 %v9660_v20, %v7711_v14  ;;  %v6436_v24 = vmax.f32 %v5977_v11, %v6233_v2 }
 0x296   : > { %v5068_v25 = vmax.f32 %v3682_v7, 0.0  ;;  %v5324_v26 = vmax.f32 %v4706_v13, 0.0  ;;  %v3684_v27 = vpop.f32.mrf.mxu0  ;;  %v4708_v28 = vpop.f32.mrf.mxu1  ;;  %6629 = vst.msk [vmem:[%s8620_s29 + $0x3a8] sm:$0xff] %vm5616_vm3, %v6501_v16  ;;  %v4717_v60 = vadd.f32 %v9660_v20, %v7967_v15  ;;  %v6500_v32 = vmax.f32 %v6105_v18, %v6361_v19  ;;  %v6303_v61 = vld [vmem:[#allocation2 + $0x571] ss:$2 sm:$0xff] }
 0x297   : > { %5727 = vst.msk [vmem:[#allocation2 + $0x370] sm:$0xff] %vm5616_vm3, %v5470_v21  ;;  %5855 = vst.msk [vmem:[#allocation2 + $0x770] sm:$0xff] %vm5616_vm3, %v5598_v22  ;;  %v5071_v29 = vmax.f32 %v3693_v23, 0.0  ;;  %v3685_v30 = vadd.f32 %v9660_v20, %v3684_v27  ;;  %v4709_v31 = vadd.f32 %v9660_v20, %v4708_v28  ;;  %v6045_v1 = vld [vmem:[#allocation2 + $0x560] ss:$2 sm:$0xff]  ;;  %v6471_v18 = vmax.f32 %v6047_v59, %v6303_v61 }
 0x298   : > { %6564 = vst.msk [vmem:[%s8620_s29 + $0x1a0] sm:$0xff] %vm5616_vm3, %v6436_v24  ;;  %v5468_v35 = vmax.f32 %v5064_v56, %v5068_v25  ;;  %v5596_v36 = vmax.f32 %v5320_v57, %v5324_v26  ;;  %v7714_v37 = vpop.f32.mrf.mxu0  ;;  %v7970_v38 = vpop.f32.mrf.mxu1  ;;  %v5327_v40 = vmax.f32 %v4717_v60, 0.0  ;;  %6628 = vst.msk [vmem:[%s8620_s29 + $0x3a0] sm:$0xff] %vm5616_vm3, %v6500_v32  ;;  %v6301_v3 = vld [vmem:[#allocation2 + $0x561] ss:$2 sm:$0xff] }
 0x299   : > { %v5471_v39 = vmax.f32 %v5067_v62, %v5071_v29  ;;  %v5069_v41 = vmax.f32 %v3685_v30, 0.0  ;;  %v5325_v42 = vmax.f32 %v4709_v31, 0.0  ;;  %v3706_v50 = vadd.f32 %v9660_v20, %v7714_v37  ;;  %v9951_v11 = vld [vmem:[%s10142_s2] ss:$0 sm:$0xff]  ;;  %6599 = vst.msk [vmem:[%s8620_s29 + $0x2b8] sm:$0xff] %vm5616_vm3, %v6471_v18 }
 0x29a   : > { %5725 = vst.msk [vmem:[#allocation2 + $0x360] sm:$0xff] %vm5616_vm3, %v5468_v35  ;;  %5853 = vst.msk [vmem:[#allocation2 + $0x760] sm:$0xff] %vm5616_vm3, %v5596_v36  ;;  %v3697_v43 = vpop.f32.mrf.mxu0  ;;  %v4721_v44 = vpop.f32.mrf.mxu1  ;;  %v5599_v46 = vmax.f32 %v5323_v63, %v5327_v40  ;;  %v4730_v51 = vadd.f32 %v9660_v20, %v7970_v38  ;;  %v6470_v19 = vmax.f32 %v6045_v1, %v6301_v3 }
 0x29b   : > { %5728 = vst.msk [vmem:[#allocation2 + $0x378] sm:$0xff] %vm5616_vm3, %v5471_v39  ;;  %v5469_v48 = vmax.f32 %v5065_v34, %v5069_v41  ;;  %v5597_v49 = vmax.f32 %v5321_v33, %v5325_v42  ;;  %v9931_v53 = vadd.f32 %v9660_v20, %v3697_v43  ;;  %v9934_v54 = vadd.f32 %v9660_v20, %v4721_v44 }
 0x29c   : > { %v7715_v17 = vpop.f32.mrf.mxu0  ;;  %v7971_v52 = vpop.f32.mrf.mxu1  ;;  %5856 = vst.msk [vmem:[#allocation2 + $0x778] sm:$0xff] %vm5616_vm3, %v5599_v46  ;;  %v5074_v47 = vmax.f32 %v3706_v50, 0.0  ;;  %v5330_v62 = vmax.f32 %v4730_v51, 0.0  ;;  %6598 = vst.msk [vmem:[%s8620_s29 + $0x2b0] sm:$0xff] %vm5616_vm3, %v6470_v19 }
 0x29d   : > { %5726 = vst.msk [vmem:[#allocation2 + $0x368] sm:$0xff] %vm5616_vm3, %v5469_v48  ;;  %5854 = vst.msk [vmem:[#allocation2 + $0x768] sm:$0xff] %vm5616_vm3, %v5597_v49  ;;  %v9937_v55 = vadd.f32 %v9660_v20, %v7715_v17  ;;  %v9940_v56 = vadd.f32 %v9660_v20, %v7971_v52  ;;  %v5072_v4 = vmax.f32 %v9931_v53, 0.0  ;;  %v5328_v5 = vmax.f32 %v9934_v54, 0.0 }
 0x29e   : > { %v3700_v57 = vpop.f32.mrf.mxu0  ;;  %v4724_v58 = vpop.f32.mrf.mxu1 }
 0x29f   : > { %v5075_v9 = vmax.f32 %v9937_v55, 0.0  ;;  %v5331_v10 = vmax.f32 %v9940_v56, 0.0  ;;  %v3701_v12 = vadd.f32 %v9951_v11, %v3700_v57  ;;  %v4725_v24 = vadd.f32 %v9951_v11, %v4724_v58 }
 0x2a0   : > { %v7718_v63 = vpop.f32.mrf.mxu0  ;;  %v7974_v0 = vpop.f32.mrf.mxu1 }
 0x2a1   : > { %v3722_v6 = vadd.f32 %v9660_v20, %v7718_v63  ;;  %v4746_v7 = vadd.f32 %v9660_v20, %v7974_v0  ;;  %v5073_v35 = vmax.f32 %v3701_v12, 0.0  ;;  %v5329_v46 = vmax.f32 %v4725_v24, 0.0 }
 0x2a2   : > { %v5983_v8 = vld [vmem:[#allocation2 + $0x370] ss:$2 sm:$0xff]  ;;  %v6239_v45 = vld [vmem:[#allocation2 + $0x371] ss:$2 sm:$0xff]  ;;  %v3713_v13 = vpop.f32.mrf.mxu0  ;;  %v4737_v14 = vpop.f32.mrf.mxu1 }
 0x2a3   : > { %v6439_v15 = vmax.f32 %v5983_v8, %v6239_v45  ;;  %v5078_v16 = vmax.f32 %v3722_v6, 0.0  ;;  %v5334_v2 = vmax.f32 %v4746_v7, 0.0  ;;  %v3714_v20 = vadd.f32 %v9951_v11, %v3713_v13  ;;  %v6111_v21 = vld [vmem:[#allocation2 + $0x770] ss:$2 sm:$0xff]  ;;  %v6367_v22 = vld [vmem:[#allocation2 + $0x771] ss:$2 sm:$0xff] }
 0x2a4   : > { %v5981_v23 = vld [vmem:[#allocation2 + $0x360] ss:$2 sm:$0xff]  ;;  %v4738_v34 = vadd.f32 %v9951_v11, %v4737_v14  ;;  %v7719_v25 = vpop.f32.mrf.mxu0  ;;  %v7975_v26 = vpop.f32.mrf.mxu1  ;;  %v6503_v27 = vmax.f32 %v6111_v21, %v6367_v22  ;;  %v6237_v28 = vld [vmem:[#allocation2 + $0x361] ss:$2 sm:$0xff]  ;;  %v6051_v7 = vld [vmem:[#allocation2 + $0x590] ss:$2 sm:$0xff] }
 0x2a5   : > { %6567 = vst.msk [vmem:[%s8620_s29 + $0x1b8] sm:$0xff] %vm5616_vm3, %v6439_v15  ;;  %v6109_v29 = vld [vmem:[#allocation2 + $0x760] ss:$2 sm:$0xff]  ;;  %v6365_v60 = vld [vmem:[#allocation2 + $0x761] ss:$2 sm:$0xff]  ;;  %v5474_v30 = vmax.f32 %v5074_v47, %v5078_v16  ;;  %v5602_v31 = vmax.f32 %v5330_v62, %v5334_v2  ;;  %v3725_v32 = vadd.f32 %v9951_v11, %v7719_v25  ;;  %v6438_v33 = vmax.f32 %v5981_v23, %v6237_v28 }
 0x2a6   : > { %v5076_v36 = vmax.f32 %v3714_v20, 0.0  ;;  %v5332_v37 = vmax.f32 %v4738_v34, 0.0  ;;  %v3716_v38 = vpop.f32.mrf.mxu0  ;;  %v4740_v39 = vpop.f32.mrf.mxu1  ;;  %6631 = vst.msk [vmem:[%s8620_s29 + $0x3b8] sm:$0xff] %vm5616_vm3, %v6503_v27  ;;  %v4749_v41 = vadd.f32 %v9951_v11, %v7975_v26  ;;  %v6502_v44 = vmax.f32 %v6109_v29, %v6365_v60  ;;  %v6307_v8 = vld [vmem:[#allocation2 + $0x591] ss:$2 sm:$0xff] }
 0x2a7   : > { %5731 = vst.msk [vmem:[#allocation2 + $0x390] sm:$0xff] %vm5616_vm3, %v5474_v30  ;;  %5859 = vst.msk [vmem:[#allocation2 + $0x790] sm:$0xff] %vm5616_vm3, %v5602_v31  ;;  %v5079_v40 = vmax.f32 %v3725_v32, 0.0  ;;  %v3717_v42 = vadd.f32 %v9951_v11, %v3716_v38  ;;  %v4741_v43 = vadd.f32 %v9951_v11, %v4740_v39  ;;  %v6049_v13 = vld [vmem:[#allocation2 + $0x580] ss:$2 sm:$0xff]  ;;  %v6473_v29 = vmax.f32 %v6051_v7, %v6307_v8 }
 0x2a8   : > { %6566 = vst.msk [vmem:[%s8620_s29 + $0x1b0] sm:$0xff] %vm5616_vm3, %v6438_v33  ;;  %v5472_v48 = vmax.f32 %v5072_v4, %v5076_v36  ;;  %v5600_v49 = vmax.f32 %v5328_v5, %v5332_v37  ;;  %v7722_v50 = vpop.f32.mrf.mxu0  ;;  %v7978_v51 = vpop.f32.mrf.mxu1  ;;  %v5335_v52 = vmax.f32 %v4749_v41, 0.0  ;;  %6630 = vst.msk [vmem:[%s8620_s29 + $0x3b0] sm:$0xff] %vm5616_vm3, %v6502_v44  ;;  %v6305_v14 = vld [vmem:[#allocation2 + $0x581] ss:$2 sm:$0xff] }
 0x2a9   : > { %v5475_v17 = vmax.f32 %v5075_v9, %v5079_v40  ;;  %v5077_v53 = vmax.f32 %v3717_v42, 0.0  ;;  %v5333_v54 = vmax.f32 %v4741_v43, 0.0  ;;  %v3738_v61 = vadd.f32 %v9951_v11, %v7722_v50  ;;  %6601 = vst.msk [vmem:[%s8620_s29 + $0x2c8] sm:$0xff] %vm5616_vm3, %v6473_v29 }
 0x2aa   : > { %5729 = vst.msk [vmem:[#allocation2 + $0x380] sm:$0xff] %vm5616_vm3, %v5472_v48  ;;  %5857 = vst.msk [vmem:[#allocation2 + $0x780] sm:$0xff] %vm5616_vm3, %v5600_v49  ;;  %v3729_v55 = vpop.f32.mrf.mxu0  ;;  %v4753_v56 = vpop.f32.mrf.mxu1  ;;  %v5603_v57 = vmax.f32 %v5331_v10, %v5335_v52  ;;  %v4762_v47 = vadd.f32 %v9951_v11, %v7978_v51  ;;  %v6472_v60 = vmax.f32 %v6049_v13, %v6305_v14 }
 0x2ab   : > { %5732 = vst.msk [vmem:[#allocation2 + $0x398] sm:$0xff] %vm5616_vm3, %v5475_v17  ;;  %v5473_v58 = vmax.f32 %v5073_v35, %v5077_v53  ;;  %v5601_v59 = vmax.f32 %v5329_v46, %v5333_v54  ;;  %v9984_v0 = vadd.f32 %v9951_v11, %v3729_v55  ;;  %v9987_v1 = vadd.f32 %v9951_v11, %v4753_v56 }
 0x2ac   : > { %v7723_v62 = vpop.f32.mrf.mxu0  ;;  %v7979_v63 = vpop.f32.mrf.mxu1  ;;  %5860 = vst.msk [vmem:[#allocation2 + $0x798] sm:$0xff] %vm5616_vm3, %v5603_v57  ;;  %v5082_v45 = vmax.f32 %v3738_v61, 0.0  ;;  %v5338_v9 = vmax.f32 %v4762_v47, 0.0  ;;  %6600 = vst.msk [vmem:[%s8620_s29 + $0x2c0] sm:$0xff] %vm5616_vm3, %v6472_v60 }
 0x2ad   : > { %5730 = vst.msk [vmem:[#allocation2 + $0x388] sm:$0xff] %vm5616_vm3, %v5473_v58  ;;  %5858 = vst.msk [vmem:[#allocation2 + $0x788] sm:$0xff] %vm5616_vm3, %v5601_v59  ;;  %v9990_v3 = vadd.f32 %v9951_v11, %v7723_v62  ;;  %v9993_v4 = vadd.f32 %v9951_v11, %v7979_v63  ;;  %v5080_v15 = vmax.f32 %v9984_v0, 0.0  ;;  %v5336_v16 = vmax.f32 %v9987_v1, 0.0 }
 0x2ae   : > { %v3732_v5 = vpop.f32.mrf.mxu0  ;;  %v4756_v6 = vpop.f32.mrf.mxu1 }
 0x2af   : > { %v5083_v21 = vmax.f32 %v9990_v3, 0.0  ;;  %v5339_v22 = vmax.f32 %v9993_v4, 0.0  ;;  %v3733_v23 = vadd.f32 %v9951_v11, %v3732_v5  ;;  %v4757_v33 = vadd.f32 %v9951_v11, %v4756_v6 }
 0x2b0   : > { %v7726_v10 = vpop.f32.mrf.mxu0  ;;  %v7982_v12 = vpop.f32.mrf.mxu1 }
 0x2b1   : > { %v3754_v2 = vadd.f32 %v9951_v11, %v7726_v10  ;;  %v4778_v20 = vadd.f32 %v9951_v11, %v7982_v12  ;;  %v5081_v48 = vmax.f32 %v3733_v23, 0.0  ;;  %v5337_v57 = vmax.f32 %v4757_v33, 0.0 }
 0x2b2   : > { %v5987_v18 = vld [vmem:[#allocation2 + $0x390] ss:$2 sm:$0xff]  ;;  %v6243_v19 = vld [vmem:[#allocation2 + $0x391] ss:$2 sm:$0xff]  ;;  %v3745_v24 = vpop.f32.mrf.mxu0  ;;  %v4769_v34 = vpop.f32.mrf.mxu1 }
 0x2b3   : > { %v6441_v25 = vmax.f32 %v5987_v18, %v6243_v19  ;;  %v5086_v26 = vmax.f32 %v3754_v2, 0.0  ;;  %v5342_v27 = vmax.f32 %v4778_v20, 0.0  ;;  %v3746_v28 = vadd.f32 %v9951_v11, %v3745_v24  ;;  %v6115_v30 = vld [vmem:[#allocation2 + $0x790] ss:$2 sm:$0xff]  ;;  %v6371_v31 = vld [vmem:[#allocation2 + $0x791] ss:$2 sm:$0xff] }
 0x2b4   : > { %v5985_v32 = vld [vmem:[#allocation2 + $0x380] ss:$2 sm:$0xff]  ;;  %v4770_v35 = vadd.f32 %v9951_v11, %v4769_v34  ;;  %v7727_v36 = vpop.f32.mrf.mxu0  ;;  %v7983_v37 = vpop.f32.mrf.mxu1  ;;  %v6505_v38 = vmax.f32 %v6115_v30, %v6371_v31  ;;  %v6241_v39 = vld [vmem:[#allocation2 + $0x381] ss:$2 sm:$0xff]  ;;  %v6055_v20 = vld [vmem:[#allocation2 + $0x5b0] ss:$2 sm:$0xff] }
 0x2b5   : > { %6569 = vst.msk [vmem:[%s8620_s29 + $0x1c8] sm:$0xff] %vm5616_vm3, %v6441_v25  ;;  %v6113_v40 = vld [vmem:[#allocation2 + $0x780] ss:$2 sm:$0xff]  ;;  %v6369_v41 = vld [vmem:[#allocation2 + $0x781] ss:$2 sm:$0xff]  ;;  %v5478_v42 = vmax.f32 %v5082_v45, %v5086_v26  ;;  %v5606_v43 = vmax.f32 %v5338_v9, %v5342_v27  ;;  %v3757_v44 = vadd.f32 %v9951_v11, %v7727_v36  ;;  %v6440_v46 = vmax.f32 %v5985_v32, %v6241_v39 }
 0x2b6   : > { %v5084_v49 = vmax.f32 %v3746_v28, 0.0  ;;  %v5340_v50 = vmax.f32 %v4770_v35, 0.0  ;;  %v3748_v51 = vpop.f32.mrf.mxu0  ;;  %v4772_v17 = vpop.f32.mrf.mxu1  ;;  %6633 = vst.msk [vmem:[%s8620_s29 + $0x3c8] sm:$0xff] %vm5616_vm3, %v6505_v38  ;;  %v4781_v53 = vadd.f32 %v9951_v11, %v7983_v37  ;;  %v6504_v56 = vmax.f32 %v6113_v40, %v6369_v41  ;;  %v6311_v18 = vld [vmem:[#allocation2 + $0x5b1] ss:$2 sm:$0xff] }
 0x2b7   : > { %5735 = vst.msk [vmem:[#allocation2 + $0x3b0] sm:$0xff] %vm5616_vm3, %v5478_v42  ;;  %5863 = vst.msk [vmem:[#allocation2 + $0x7b0] sm:$0xff] %vm5616_vm3, %v5606_v43  ;;  %v5087_v52 = vmax.f32 %v3757_v44, 0.0  ;;  %v3749_v54 = vadd.f32 %v9951_v11, %v3748_v51  ;;  %v4773_v55 = vadd.f32 %v9951_v11, %v4772_v17  ;;  %v6053_v24 = vld [vmem:[#allocation2 + $0x5a0] ss:$2 sm:$0xff]  ;;  %v6475_v40 = vmax.f32 %v6055_v20, %v6311_v18 }
 0x2b8   : > { %6568 = vst.msk [vmem:[%s8620_s29 + $0x1c0] sm:$0xff] %vm5616_vm3, %v6440_v46  ;;  %v5476_v58 = vmax.f32 %v5080_v15, %v5084_v49  ;;  %v5604_v59 = vmax.f32 %v5336_v16, %v5340_v50  ;;  %v7730_v61 = vpop.f32.mrf.mxu0  ;;  %v7986_v47 = vpop.f32.mrf.mxu1  ;;  %v5343_v63 = vmax.f32 %v4781_v53, 0.0  ;;  %6632 = vst.msk [vmem:[%s8620_s29 + $0x3c0] sm:$0xff] %vm5616_vm3, %v6504_v56  ;;  %v6309_v34 = vld [vmem:[#allocation2 + $0x5a1] ss:$2 sm:$0xff] }
 0x2b9   : > { %v5479_v62 = vmax.f32 %v5083_v21, %v5087_v52  ;;  %v5085_v0 = vmax.f32 %v3749_v54, 0.0  ;;  %v5341_v1 = vmax.f32 %v4773_v55, 0.0  ;;  %v3770_v8 = vadd.f32 %v9951_v11, %v7730_v61  ;;  %6603 = vst.msk [vmem:[%s8620_s29 + $0x2d8] sm:$0xff] %vm5616_vm3, %v6475_v40 }
 0x2ba   : > { %5733 = vst.msk [vmem:[#allocation2 + $0x3a0] sm:$0xff] %vm5616_vm3, %v5476_v58  ;;  %5861 = vst.msk [vmem:[#allocation2 + $0x7a0] sm:$0xff] %vm5616_vm3, %v5604_v59  ;;  %v3761_v3 = vpop.f32.mrf.mxu0  ;;  %v4785_v4 = vpop.f32.mrf.mxu1  ;;  %v5607_v5 = vmax.f32 %v5339_v22, %v5343_v63  ;;  %v4794_v45 = vadd.f32 %v9951_v11, %v7986_v47  ;;  %v6474_v41 = vmax.f32 %v6053_v24, %v6309_v34 }
 0x2bb   : > { %5736 = vst.msk [vmem:[#allocation2 + $0x3b8] sm:$0xff] %vm5616_vm3, %v5479_v62  ;;  %v5477_v6 = vmax.f32 %v5081_v48, %v5085_v0  ;;  %v5605_v7 = vmax.f32 %v5337_v57, %v5341_v1  ;;  %v10032_v12 = vadd.f32 %v9951_v11, %v3761_v3  ;;  %v10035_v13 = vadd.f32 %v9951_v11, %v4785_v4 }
 0x2bc   : > { %v7731_v9 = vpop.f32.mrf.mxu0  ;;  %v7987_v10 = vpop.f32.mrf.mxu1  ;;  %5864 = vst.msk [vmem:[#allocation2 + $0x7b8] sm:$0xff] %vm5616_vm3, %v5607_v5  ;;  %v5090_v19 = vmax.f32 %v3770_v8, 0.0  ;;  %v5346_v21 = vmax.f32 %v4794_v45, 0.0  ;;  %6602 = vst.msk [vmem:[%s8620_s29 + $0x2d0] sm:$0xff] %vm5616_vm3, %v6474_v41 }
 0x2bd   : > { %5734 = vst.msk [vmem:[#allocation2 + $0x3a8] sm:$0xff] %vm5616_vm3, %v5477_v6  ;;  %5862 = vst.msk [vmem:[#allocation2 + $0x7a8] sm:$0xff] %vm5616_vm3, %v5605_v7  ;;  %v10038_v14 = vadd.f32 %v9951_v11, %v7731_v9  ;;  %v10041_v15 = vadd.f32 %v9951_v11, %v7987_v10  ;;  %v5088_v25 = vmax.f32 %v10032_v12, 0.0  ;;  %v5344_v26 = vmax.f32 %v10035_v13, 0.0 }
 0x2be   : > { %v3764_v16 = vpop.f32.mrf.mxu0  ;;  %v4788_v2 = vpop.f32.mrf.mxu1 }
 0x2bf   : > { %v5091_v30 = vmax.f32 %v10038_v14, 0.0  ;;  %v5347_v31 = vmax.f32 %v10041_v15, 0.0  ;;  %v3765_v32 = vadd.f32 %v9951_v11, %v3764_v16  ;;  %v4789_v46 = vadd.f32 %v9951_v11, %v4788_v2 }
 0x2c0   : > { %v7734_v22 = vpop.f32.mrf.mxu0  ;;  %v7990_v23 = vpop.f32.mrf.mxu1 }
 0x2c1   : > { %v3786_v27 = vadd.f32 %v9951_v11, %v7734_v22  ;;  %v4810_v28 = vadd.f32 %v9951_v11, %v7990_v23  ;;  %v5089_v58 = vmax.f32 %v3765_v32, 0.0  ;;  %v5345_v5 = vmax.f32 %v4789_v46, 0.0 }
 0x2c2   : > { %v5991_v29 = vld [vmem:[#allocation2 + $0x3b0] ss:$2 sm:$0xff]  ;;  %v6247_v60 = vld [vmem:[#allocation2 + $0x3b1] ss:$2 sm:$0xff]  ;;  %v3777_v33 = vpop.f32.mrf.mxu0  ;;  %v4801_v35 = vpop.f32.mrf.mxu1 }
 0x2c3   : > { %v6443_v36 = vmax.f32 %v5991_v29, %v6247_v60  ;;  %v5094_v37 = vmax.f32 %v3786_v27, 0.0  ;;  %v5350_v38 = vmax.f32 %v4810_v28, 0.0  ;;  %v3778_v39 = vadd.f32 %v9951_v11, %v3777_v33  ;;  %v6119_v42 = vld [vmem:[#allocation2 + $0x7b0] ss:$2 sm:$0xff]  ;;  %v6375_v43 = vld [vmem:[#allocation2 + $0x7b1] ss:$2 sm:$0xff] }
 0x2c4   : > { %v5989_v44 = vld [vmem:[#allocation2 + $0x3a0] ss:$2 sm:$0xff]  ;;  %v4802_v48 = vadd.f32 %v9951_v11, %v4801_v35  ;;  %v7735_v49 = vpop.f32.mrf.mxu0  ;;  %v7991_v50 = vpop.f32.mrf.mxu1  ;;  %v6507_v51 = vmax.f32 %v6119_v42, %v6375_v43  ;;  %v6245_v17 = vld [vmem:[#allocation2 + $0x3a1] ss:$2 sm:$0xff]  ;;  %v6059_v28 = vld [vmem:[#allocation2 + $0x5d0] ss:$2 sm:$0xff] }
 0x2c5   : > { %6571 = vst.msk [vmem:[%s8620_s29 + $0x1d8] sm:$0xff] %vm5616_vm3, %v6443_v36  ;;  %v6117_v52 = vld [vmem:[#allocation2 + $0x7a0] ss:$2 sm:$0xff]  ;;  %v6373_v53 = vld [vmem:[#allocation2 + $0x7a1] ss:$2 sm:$0xff]  ;;  %v5482_v54 = vmax.f32 %v5090_v19, %v5094_v37  ;;  %v5610_v55 = vmax.f32 %v5346_v21, %v5350_v38  ;;  %v3789_v56 = vadd.f32 %v9951_v11, %v7735_v49  ;;  %v6442_v57 = vmax.f32 %v5989_v44, %v6245_v17 }
 0x2c6   : > { %v5092_v59 = vmax.f32 %v3778_v39, 0.0  ;;  %v5348_v61 = vmax.f32 %v4802_v48, 0.0  ;;  %v3780_v47 = vpop.f32.mrf.mxu0  ;;  %v4804_v62 = vpop.f32.mrf.mxu1  ;;  %6635 = vst.msk [vmem:[%s8620_s29 + $0x3d8] sm:$0xff] %vm5616_vm3, %v6507_v51  ;;  %v4813_v0 = vadd.f32 %v9951_v11, %v7991_v50  ;;  %v6506_v4 = vmax.f32 %v6117_v52, %v6373_v53  ;;  %v6315_v29 = vld [vmem:[#allocation2 + $0x5d1] ss:$2 sm:$0xff] }
 0x2c7   : > { %5739 = vst.msk [vmem:[#allocation2 + $0x3d0] sm:$0xff] %vm5616_vm3, %v5482_v54  ;;  %5867 = vst.msk [vmem:[#allocation2 + $0x7d0] sm:$0xff] %vm5616_vm3, %v5610_v55  ;;  %v5095_v63 = vmax.f32 %v3789_v56, 0.0  ;;  %v3781_v1 = vadd.f32 %v9951_v11, %v3780_v47  ;;  %v4805_v3 = vadd.f32 %v9951_v11, %v4804_v62  ;;  %v6057_v33 = vld [vmem:[#allocation2 + $0x5c0] ss:$2 sm:$0xff]  ;;  %v6477_v52 = vmax.f32 %v6059_v28, %v6315_v29 }
 0x2c8   : > { %6570 = vst.msk [vmem:[%s8620_s29 + $0x1d0] sm:$0xff] %vm5616_vm3, %v6442_v57  ;;  %v5480_v6 = vmax.f32 %v5088_v25, %v5092_v59  ;;  %v5608_v7 = vmax.f32 %v5344_v26, %v5348_v61  ;;  %v7738_v8 = vpop.f32.mrf.mxu0  ;;  %v7994_v45 = vpop.f32.mrf.mxu1  ;;  %v5351_v10 = vmax.f32 %v4813_v0, 0.0  ;;  %6634 = vst.msk [vmem:[%s8620_s29 + $0x3d0] sm:$0xff] %vm5616_vm3, %v6506_v4  ;;  %v6313_v35 = vld [vmem:[#allocation2 + $0x5c1] ss:$2 sm:$0xff] }
 0x2c9   : > { %v5483_v9 = vmax.f32 %v5091_v30, %v5095_v63  ;;  %v5093_v12 = vmax.f32 %v3781_v1, 0.0  ;;  %v5349_v13 = vmax.f32 %v4805_v3, 0.0  ;;  %v3802_v18 = vadd.f32 %v9951_v11, %v7738_v8  ;;  %6605 = vst.msk [vmem:[%s8620_s29 + $0x2e8] sm:$0xff] %vm5616_vm3, %v6477_v52  ;;  %v6061_v28 = vld [vmem:[#allocation2 + $0x5e0] ss:$2 sm:$0xff] }
 0x2ca   : > { %5737 = vst.msk [vmem:[#allocation2 + $0x3c0] sm:$0xff] %vm5616_vm3, %v5480_v6  ;;  %5865 = vst.msk [vmem:[#allocation2 + $0x7c0] sm:$0xff] %vm5616_vm3, %v5608_v7  ;;  %v3793_v14 = vpop.f32.mrf.mxu0  ;;  %v4817_v15 = vpop.f32.mrf.mxu1  ;;  %v5611_v16 = vmax.f32 %v5347_v31, %v5351_v10  ;;  %v4826_v19 = vadd.f32 %v9951_v11, %v7994_v45  ;;  %v6476_v53 = vmax.f32 %v6057_v33, %v6313_v35  ;;  %v6317_v29 = vld [vmem:[#allocation2 + $0x5e1] ss:$2 sm:$0xff] }
 0x2cb   : > { %5740 = vst.msk [vmem:[#allocation2 + $0x3d8] sm:$0xff] %vm5616_vm3, %v5483_v9  ;;  %v5481_v2 = vmax.f32 %v5089_v58, %v5093_v12  ;;  %v5609_v20 = vmax.f32 %v5345_v5, %v5349_v13  ;;  %v10080_v23 = vadd.f32 %v9951_v11, %v3793_v14  ;;  %v10083_v24 = vadd.f32 %v9951_v11, %v4817_v15 }
 0x2cc   : > { %v7739_v21 = vpop.f32.mrf.mxu0  ;;  %v7995_v22 = vpop.f32.mrf.mxu1  ;;  %5868 = vst.msk [vmem:[#allocation2 + $0x7d8] sm:$0xff] %vm5616_vm3, %v5611_v16  ;;  %v5098_v60 = vmax.f32 %v3802_v18, 0.0  ;;  %v5354_v30 = vmax.f32 %v4826_v19, 0.0  ;;  %6604 = vst.msk [vmem:[%s8620_s29 + $0x2e0] sm:$0xff] %vm5616_vm3, %v6476_v53 }
 0x2cd   : > { %5738 = vst.msk [vmem:[#allocation2 + $0x3c8] sm:$0xff] %vm5616_vm3, %v5481_v2  ;;  %5866 = vst.msk [vmem:[#allocation2 + $0x7c8] sm:$0xff] %vm5616_vm3, %v5609_v20  ;;  %v10086_v34 = vadd.f32 %v9951_v11, %v7739_v21  ;;  %v10089_v25 = vadd.f32 %v9951_v11, %v7995_v22  ;;  %v5096_v36 = vmax.f32 %v10080_v23, 0.0  ;;  %v5352_v37 = vmax.f32 %v10083_v24, 0.0 }
 0x2ce   : > { %v3796_v26 = vpop.f32.mrf.mxu0  ;;  %v4820_v27 = vpop.f32.mrf.mxu1 }
 0x2cf   : > { %v5099_v42 = vmax.f32 %v10086_v34, 0.0  ;;  %v5355_v43 = vmax.f32 %v10089_v25, 0.0  ;;  %v3797_v44 = vadd.f32 %v9951_v11, %v3796_v26  ;;  %v4821_v57 = vadd.f32 %v9951_v11, %v4820_v27  ;;  %v6063_v34 = vld [vmem:[#allocation2 + $0x5f0] ss:$2 sm:$0xff]  ;;  %v6319_v25 = vld [vmem:[#allocation2 + $0x5f1] ss:$2 sm:$0xff] }
 0x2d0   : > { %v7742_v31 = vpop.f32.mrf.mxu0  ;;  %v7998_v32 = vpop.f32.mrf.mxu1 }
 0x2d1   : > { %v3818_v38 = vadd.f32 %v9951_v11, %v7742_v31  ;;  %v4842_v39 = vadd.f32 %v9951_v11, %v7998_v32  ;;  %v5097_v6 = vmax.f32 %v3797_v44, 0.0  ;;  %v5353_v16 = vmax.f32 %v4821_v57, 0.0 }
 0x2d2   : > { %v5995_v40 = vld [vmem:[#allocation2 + $0x3d0] ss:$2 sm:$0xff]  ;;  %v6251_v41 = vld [vmem:[#allocation2 + $0x3d1] ss:$2 sm:$0xff]  ;;  %v3809_v46 = vpop.f32.mrf.mxu0  ;;  %v4833_v48 = vpop.f32.mrf.mxu1 }
 0x2d3   : > { %v6445_v49 = vmax.f32 %v5995_v40, %v6251_v41  ;;  %v5102_v50 = vmax.f32 %v3818_v38, 0.0  ;;  %v5358_v51 = vmax.f32 %v4842_v39, 0.0  ;;  %v3810_v17 = vadd.f32 %v9951_v11, %v3809_v46  ;;  %v6123_v54 = vld [vmem:[#allocation2 + $0x7d0] ss:$2 sm:$0xff]  ;;  %v6379_v55 = vld [vmem:[#allocation2 + $0x7d1] ss:$2 sm:$0xff] }
 0x2d4   : > { %v5993_v56 = vld [vmem:[#allocation2 + $0x3c0] ss:$2 sm:$0xff]  ;;  %v4834_v58 = vadd.f32 %v9951_v11, %v4833_v48  ;;  %v7743_v59 = vpop.f32.mrf.mxu0  ;;  %v7999_v61 = vpop.f32.mrf.mxu1  ;;  %v6509_v47 = vmax.f32 %v6123_v54, %v6379_v55  ;;  %v6249_v62 = vld [vmem:[#allocation2 + $0x3c1] ss:$2 sm:$0xff]  ;;  %v6478_v40 = vmax.f32 %v6061_v28, %v6317_v29 }
 0x2d5   : > { %6573 = vst.msk [vmem:[%s8620_s29 + $0x1e8] sm:$0xff] %vm5616_vm3, %v6445_v49  ;;  %v6121_v63 = vld [vmem:[#allocation2 + $0x7c0] ss:$2 sm:$0xff]  ;;  %v6377_v0 = vld [vmem:[#allocation2 + $0x7c1] ss:$2 sm:$0xff]  ;;  %v5486_v1 = vmax.f32 %v5098_v60, %v5102_v50  ;;  %v5614_v3 = vmax.f32 %v5354_v30, %v5358_v51  ;;  %v3821_v4 = vadd.f32 %v9951_v11, %v7743_v59  ;;  %v6444_v5 = vmax.f32 %v5993_v56, %v6249_v62 }
 0x2d6   : > { %v5100_v7 = vmax.f32 %v3810_v17, 0.0  ;;  %v5356_v8 = vmax.f32 %v4834_v58, 0.0  ;;  %v3812_v45 = vpop.f32.mrf.mxu0  ;;  %v4836_v9 = vpop.f32.mrf.mxu1  ;;  %6637 = vst.msk [vmem:[%s8620_s29 + $0x3e8] sm:$0xff] %vm5616_vm3, %v6509_v47  ;;  %v4845_v12 = vadd.f32 %v9951_v11, %v7999_v61  ;;  %v6508_v15 = vmax.f32 %v6121_v63, %v6377_v0  ;;  %6606 = vst.msk [vmem:[%s8620_s29 + $0x2f0] sm:$0xff] %vm5616_vm3, %v6478_v40 }
 0x2d7   : > { %5743 = vst.msk [vmem:[#allocation2 + $0x3f0] sm:$0xff] %vm5616_vm3, %v5486_v1  ;;  %5871 = vst.msk [vmem:[#allocation2 + $0x7f0] sm:$0xff] %vm5616_vm3, %v5614_v3  ;;  %v5103_v10 = vmax.f32 %v3821_v4, 0.0  ;;  %v3813_v13 = vadd.f32 %v9951_v11, %v3812_v45  ;;  %v4837_v14 = vadd.f32 %v9951_v11, %v4836_v9  ;;  %v6479_v30 = vmax.f32 %v6063_v34, %v6319_v25 }
 0x2d8   : > { %6572 = vst.msk [vmem:[%s8620_s29 + $0x1e0] sm:$0xff] %vm5616_vm3, %v6444_v5  ;;  %v5484_v2 = vmax.f32 %v5096_v36, %v5100_v7  ;;  %v5612_v20 = vmax.f32 %v5352_v37, %v5356_v8  ;;  %v5359_v19 = vmax.f32 %v4845_v12, 0.0  ;;  %6636 = vst.msk [vmem:[%s8620_s29 + $0x3e0] sm:$0xff] %vm5616_vm3, %v6508_v15 }
 0x2d9   : > { %v5487_v18 = vmax.f32 %v5099_v42, %v5103_v10  ;;  %v5101_v21 = vmax.f32 %v3813_v13, 0.0  ;;  %v5357_v22 = vmax.f32 %v4837_v14, 0.0  ;;  %6607 = vst.msk [vmem:[%s8620_s29 + $0x2f8] sm:$0xff] %vm5616_vm3, %v6479_v30 }
 0x2da   : > { %5741 = vst.msk [vmem:[#allocation2 + $0x3e0] sm:$0xff] %vm5616_vm3, %v5484_v2  ;;  %5869 = vst.msk [vmem:[#allocation2 + $0x7e0] sm:$0xff] %vm5616_vm3, %v5612_v20  ;;  %v5615_v11 = vmax.f32 %v5355_v43, %v5359_v19 }
 0x2db   : > { %5744 = vst.msk [vmem:[#allocation2 + $0x3f8] sm:$0xff] %vm5616_vm3, %v5487_v18  ;;  %v5485_v23 = vmax.f32 %v5097_v6, %v5101_v21  ;;  %v5613_v24 = vmax.f32 %v5353_v16, %v5357_v22 }
 0x2dc   : > { %5872 = vst.msk [vmem:[#allocation2 + $0x7f8] sm:$0xff] %vm5616_vm3, %v5615_v11 }
 0x2dd   : > { %5742 = vst.msk [vmem:[#allocation2 + $0x3e8] sm:$0xff] %vm5616_vm3, %v5485_v23  ;;  %5870 = vst.msk [vmem:[#allocation2 + $0x7e8] sm:$0xff] %vm5616_vm3, %v5613_v24 }
 0x2e2   : > { %v5999_v26 = vld [vmem:[#allocation2 + $0x3f0] ss:$2 sm:$0xff]  ;;  %v6255_v27 = vld [vmem:[#allocation2 + $0x3f1] ss:$2 sm:$0xff] }
 0x2e3   : > { %v6447_v60 = vmax.f32 %v5999_v26, %v6255_v27  ;;  %v6127_v31 = vld [vmem:[#allocation2 + $0x7f0] ss:$2 sm:$0xff]  ;;  %v6383_v32 = vld [vmem:[#allocation2 + $0x7f1] ss:$2 sm:$0xff] }
 0x2e4   : > { %v5997_v33 = vld [vmem:[#allocation2 + $0x3e0] ss:$2 sm:$0xff]  ;;  %v6511_v35 = vmax.f32 %v6127_v31, %v6383_v32  ;;  %v6253_v36 = vld [vmem:[#allocation2 + $0x3e1] ss:$2 sm:$0xff] }
 0x2e5   : > { %6575 = vst.msk [vmem:[%s8620_s29 + $0x1f8] sm:$0xff] %vm5616_vm3, %v6447_v60  ;;  %v6125_v37 = vld [vmem:[#allocation2 + $0x7e0] ss:$2 sm:$0xff]  ;;  %v6381_v38 = vld [vmem:[#allocation2 + $0x7e1] ss:$2 sm:$0xff]  ;;  %v6446_v39 = vmax.f32 %v5997_v33, %v6253_v36 }
 0x2e6   : > { %6639 = vst.msk [vmem:[%s8620_s29 + $0x3f8] sm:$0xff] %vm5616_vm3, %v6511_v35  ;;  %v6510_v41 = vmax.f32 %v6125_v37, %v6381_v38 }
 0x2e7   : > { %6574 = vst.msk [vmem:[%s8620_s29 + $0x1f0] sm:$0xff] %vm5616_vm3, %v6446_v39 }
 0x2e8   : > { %6638 = vst.msk [vmem:[%s8620_s29 + $0x3f0] sm:$0xff] %vm5616_vm3, %v6510_v41 }
 0x2e9 PF: > { %s13_s12 = sadd.s32 1, %s8282_s12  }
 0x2ea   : > { %p10_p5 = scmp.ge.s32.totalorder %s13_s12, 4  }
 0x2ec   :  { %12 = sbr.rel (!%p10_p5) target bundleno = 1 (0x1), region = 317 }

// kernel: cifar_cnn_forward.5
= control target key start
LH: loop header
LB: loop body
LE: loop exit
PB: predicated region body
PF: predicated region fallthrough
CT: control target
= control target key end

     0   :  { %s4168_s12 = smov 0   ;;  %s5128_s0 = inlined_call_operand.vmem [shape: bf16[2048,288], index: 0, kind: input, shape index: {}]   ;;  %s5129_s1 = inlined_call_operand.vmem [shape: bf16[288,64], index: 1, kind: input, shape index: {}]   ;;  %s5130_s2 = inlined_call_operand.vmem [shape: f32[1,64], index: 2, kind: input, shape index: {}]   ;;  %s5131_s3 = inlined_call_operand.vmem [shape: f32[8,8,8,64], index: 3, kind: output, shape index: {}]  }
   0x1 LB: > { %s3336_s13 = sadd.s32 4294967295, %s4145_s12   ;;  %p3340_p0 = scmp.ge.s32.totalorder %s4145_s12, 1  ;;  %s4145_s12 = sphi %s4168_s12, %s13_s12  }
   0x2   : > { %p139_p1 = scmp.lt.s32.totalorder %s4145_s12, 3 }
   0x4   : > { %p140_p2 = pnand %p3340_p0, %p139_p1 }
   0x6   : > { %143 = sbr.rel (%p140_p2) target bundleno = 669 (0x29d), region = 32 }
   0xb   : > { %v3864_v0 = vld [vmem:[%s5129_s1 + $0x38] sm:$0xff]   ;;  %v4147_v1 = vmov 0   ;;  %s3341_s16 = sshll.u32 %s3336_s13, 7  ;;  %v3865_v2 = vld [vmem:[%s5129_s1 + $0x30] sm:$0xff]   ;;  %v3866_v3 = vld [vmem:[%s5129_s1 + $0x28] sm:$0xff]   ;;  %vm1547_vm0 = vcmask 261120  }
   0xc   : > { %1740 = vmatprep.subr.bf16.mxu0 %v4147_v1  ;;  %3822 = vmatprep.subr.bf16.mxu1 %v4147_v1  ;;  %p166_p3 = scmp.lt.s32.totalorder %s3341_s16, 255  ;;  %v3867_v4 = vld [vmem:[%s5129_s1 + $0x20] sm:$0xff]   ;;  %v3868_v5 = vld [vmem:[%s5129_s1 + $0x18] sm:$0xff]   ;;  %v3869_v7 = vld [vmem:[%s5129_s1 + $0x10] sm:$0xff]   ;;  %s4631_s6 = sshll.u32 %s3336_s13, 2  ;;  %vm3022_vm1 = vcmask 523264  }
   0xd   : > { %1741 = vmatpush1.bf16.msra.mxu0 %v3864_v0  ;;  %3838 = vmatpush1.bf16.msra.mxu1 %v3864_v0  ;;  %v3870_v9 = vld [vmem:[%s5129_s1 + $0x8] sm:$0xff]   ;;  %v3871_v10 = vld [vmem:[%s5129_s1] sm:$0xff]   ;;  %v3872_v11 = vld [vmem:[%s5129_s1 + $0x78] sm:$0xff]   ;;  %p173_p4 = scmp.lt.s32.totalorder %s4631_s6, 7 }
   0xe   : > { %1742 = vmatprep.subr.bf16.mxu0 %v4147_v1  ;;  %3823 = vmatprep.subr.bf16.mxu1 %v4147_v1  ;;  %s5169_s16 = smov (!%p166_p3, %s3341_s16), 255  ;;  %v3873_v12 = vld [vmem:[%s5129_s1 + $0x70] sm:$0xff]   ;;  %v3874_v13 = vld [vmem:[%s5129_s1 + $0x68] sm:$0xff]   ;;  %v3875_v14 = vld [vmem:[%s5129_s1 + $0x60] sm:$0xff]  }
   0xf   : > { %s3854_s23 = smul.u32 12, %s5169_s16  ;;  %v3876_v15 = vld [vmem:[%s5129_s1 + $0x58] sm:$0xff]   ;;  %v3877_v16 = vld [vmem:[%s5129_s1 + $0x50] sm:$0xff]   ;;  %v3878_v17 = vld [vmem:[%s5129_s1 + $0x48] sm:$0xff]   ;;  %s5171_s6 = smov (!%p173_p4, %s4631_s6), 7 }
  0x10   : > { %v3879_v18 = vld [vmem:[%s5129_s1 + $0x40] sm:$0xff]   ;;  %v3886_v19 = vld [vmem:[%s5129_s1 + $0x88] sm:$0xff]   ;;  %s3623_s13 = sshll.u32 %s5171_s6, 6 }
  0x11   : > { %1743 = vmatpush1.bf16.msra.mxu0 %v3865_v2  ;;  %3839 = vmatpush1.bf16.msra.mxu1 %v3865_v2  ;;  %s4204_s28 = scalar_lea.vmem %s5128_s0, %s3854_s23  ;;  %v3935_v24 = vld [vmem:[%s5129_s1 + $0x80] sm:$0xff]   ;;  %s4683_s9 = scalar_lea.vmem %s5131_s3, %s3623_s13 }
  0x12   : > { %1744 = vmatprep.subr.bf16.mxu0 %v4147_v1  ;;  %3824 = vmatprep.subr.bf16.mxu1 %v4147_v1  ;;  %v3882_v6 = vld [vmem:[%s4204_s28 + $0x4] ss:$12 sps:$4 sm:$0xff]   ;;  %v3880_v20 = vld [vmem:[%s4204_s28] ss:$12 sps:$4 sm:$0xff]   ;;  %v3887_v22 = vld [vmem:[%s4204_s28 + $0x1c] ss:$12 sps:$4 sm:$0xff]  }
  0x13   : > { %v3885_v8 = vld [vmem:[%s4204_s28 + $0x484] ss:$12 sps:$4 sm:$0xff]   ;;  %1772 = vmatprep.mubr.bf16.mxu0 %v3882_v6  ;;  %v3883_v21 = vld [vmem:[%s4204_s28 + $0x480] ss:$12 sps:$4 sm:$0xff]   ;;  %v3889_v23 = vld [vmem:[%s4204_s28 + $0x49c] ss:$12 sps:$4 sm:$0xff]  }
  0x14   : > { %2156 = vmatprep.mubr.bf16.mxu1 %v3885_v8  ;;  %v3891_v25 = vld [vmem:[%s4204_s28 + $0x18] ss:$12 sps:$4 sm:$0xff]   ;;  %v3893_v27 = vld [vmem:[%s4204_s28 + $0x34] ss:$12 sps:$4 sm:$0xff]   ;;  %v3897_v29 = vld [vmem:[%s4204_s28 + $0x30] ss:$12 sps:$4 sm:$0xff]  }
  0x15   : > { %1745 = vmatpush1.bf16.msra.mxu0 %v3866_v3  ;;  %3840 = vmatpush1.bf16.msra.mxu1 %v3866_v3  ;;  %v3892_v26 = vld [vmem:[%s4204_s28 + $0x498] ss:$12 sps:$4 sm:$0xff]   ;;  %v3895_v28 = vld [vmem:[%s4204_s28 + $0x4b4] ss:$12 sps:$4 sm:$0xff]   ;;  %v3898_v30 = vld [vmem:[%s4204_s28 + $0x4b0] ss:$12 sps:$4 sm:$0xff]  }
  0x16   : > { %1746 = vmatprep.subr.bf16.mxu0 %v4147_v1  ;;  %3825 = vmatprep.subr.bf16.mxu1 %v4147_v1  ;;  %v3899_v31 = vld [vmem:[%s4204_s28 + $0x4c] ss:$12 sps:$4 sm:$0xff]   ;;  %v3903_v33 = vld [vmem:[%s4204_s28 + $0x48] ss:$12 sps:$4 sm:$0xff]   ;;  %v3905_v35 = vld [vmem:[%s4204_s28 + $0x64] ss:$12 sps:$4 sm:$0xff]  }
  0x17   : > { %v3901_v32 = vld [vmem:[%s4204_s28 + $0x4cc] ss:$12 sps:$4 sm:$0xff]   ;;  %v3904_v34 = vld [vmem:[%s4204_s28 + $0x4c8] ss:$12 sps:$4 sm:$0xff]   ;;  %v3907_v36 = vld [vmem:[%s4204_s28 + $0x4e4] ss:$12 sps:$4 sm:$0xff]  }
  0x18   : > { %v3909_v37 = vld [vmem:[%s4204_s28 + $0x60] ss:$12 sps:$4 sm:$0xff]   ;;  %v3911_v39 = vld [vmem:[%s4204_s28 + $0x7c] ss:$12 sps:$4 sm:$0xff]   ;;  %v3915_v41 = vld [vmem:[%s4204_s28 + $0x78] ss:$12 sps:$4 sm:$0xff]  }
  0x19   : > { %1747 = vmatpush1.bf16.msra.mxu0 %v3867_v4  ;;  %3841 = vmatpush1.bf16.msra.mxu1 %v3867_v4  ;;  %v3910_v38 = vld [vmem:[%s4204_s28 + $0x4e0] ss:$12 sps:$4 sm:$0xff]   ;;  %v3913_v40 = vld [vmem:[%s4204_s28 + $0x4fc] ss:$12 sps:$4 sm:$0xff]   ;;  %v3916_v42 = vld [vmem:[%s4204_s28 + $0x4f8] ss:$12 sps:$4 sm:$0xff]  }
  0x1a   : > { %1748 = vmatprep.subr.bf16.mxu0 %v4147_v1  ;;  %3826 = vmatprep.subr.bf16.mxu1 %v4147_v1  ;;  %v3917_v43 = vld [vmem:[%s4204_s28 + $0x94] ss:$12 sps:$4 sm:$0xff]   ;;  %v3921_v45 = vld [vmem:[%s4204_s28 + $0x90] ss:$12 sps:$4 sm:$0xff]   ;;  %v3923_v47 = vld [vmem:[%s4204_s28 + $0xac] ss:$12 sps:$4 sm:$0xff]  }
  0x1b   : > { %v3919_v44 = vld [vmem:[%s4204_s28 + $0x514] ss:$12 sps:$4 sm:$0xff]   ;;  %v3922_v46 = vld [vmem:[%s4204_s28 + $0x510] ss:$12 sps:$4 sm:$0xff]   ;;  %v3925_v48 = vld [vmem:[%s4204_s28 + $0x52c] ss:$12 sps:$4 sm:$0xff]  }
  0x1c   : > { %v3927_v49 = vld [vmem:[%s4204_s28 + $0xa8] ss:$12 sps:$4 sm:$0xff]   ;;  %v3929_v51 = vld [vmem:[%s4204_s28 + $0xc4] ss:$12 sps:$4 sm:$0xff]   ;;  %v3933_v53 = vld [vmem:[%s4204_s28 + $0xc0] ss:$12 sps:$4 sm:$0xff]  }
  0x1d   : > { %1749 = vmatpush1.bf16.msra.mxu0 %v3868_v5  ;;  %3842 = vmatpush1.bf16.msra.mxu1 %v3868_v5  ;;  %v3928_v50 = vld [vmem:[%s4204_s28 + $0x528] ss:$12 sps:$4 sm:$0xff]   ;;  %v3931_v52 = vld [vmem:[%s4204_s28 + $0x544] ss:$12 sps:$4 sm:$0xff]   ;;  %v3934_v54 = vld [vmem:[%s4204_s28 + $0x540] ss:$12 sps:$4 sm:$0xff]  }
  0x1e   : > { %1750 = vmatprep.subr.bf16.mxu0 %v4147_v1  ;;  %3827 = vmatprep.subr.bf16.mxu1 %v4147_v1  ;;  %v3936_v55 = vld [vmem:[%s4204_s28 + $0xdc] ss:$12 sps:$4 sm:$0xff]   ;;  %v3940_v57 = vld [vmem:[%s4204_s28 + $0xd8] ss:$12 sps:$4 sm:$0xff]   ;;  %v3942_v59 = vld [vmem:[%s4204_s28 + $0xf4] ss:$12 sps:$4 sm:$0xff]  }
  0x1f   : > { %v3938_v56 = vld [vmem:[%s4204_s28 + $0x55c] ss:$12 sps:$4 sm:$0xff]   ;;  %v3941_v58 = vld [vmem:[%s4204_s28 + $0x558] ss:$12 sps:$4 sm:$0xff]   ;;  %v3944_v60 = vld [vmem:[%s4204_s28 + $0x574] ss:$12 sps:$4 sm:$0xff]  }
  0x20   : > { %v3946_v61 = vld [vmem:[%s4204_s28 + $0xf0] ss:$12 sps:$4 sm:$0xff]   ;;  %v3948_v63 = vld [vmem:[%s4204_s28 + $0x10c] ss:$12 sps:$4 sm:$0xff]   ;;  %v3953_v2 = vld [vmem:[%s4204_s28 + $0x588] ss:$12 sps:$4 sm:$0xff]  }
  0x21   : > { %1751 = vmatpush1.bf16.msra.mxu0 %v3869_v7  ;;  %3843 = vmatpush1.bf16.msra.mxu1 %v3869_v7  ;;  %v3947_v62 = vld [vmem:[%s4204_s28 + $0x570] ss:$12 sps:$4 sm:$0xff]   ;;  %v3950_v0 = vld [vmem:[%s4204_s28 + $0x58c] ss:$12 sps:$4 sm:$0xff]  }
  0x22   : > { %1752 = vmatprep.subr.bf16.mxu0 %v4147_v1  ;;  %3828 = vmatprep.subr.bf16.mxu1 %v4147_v1  ;;  %v3954_v3 = vld [vmem:[%s4204_s28 + $0x124] ss:$12 sps:$4 sm:$0xff]   ;;  %v3958_v5 = vld [vmem:[%s4204_s28 + $0x120] ss:$12 sps:$4 sm:$0xff]   ;;  %v3960_v7 = vld [vmem:[%s4204_s28 + $0x13c] ss:$12 sps:$4 sm:$0xff]  }
  0x23   : > { %v3956_v4 = vld [vmem:[%s4204_s28 + $0x5a4] ss:$12 sps:$4 sm:$0xff]   ;;  %v3959_v6 = vld [vmem:[%s4204_s28 + $0x5a0] ss:$12 sps:$4 sm:$0xff]   ;;  %v3962_v8 = vld [vmem:[%s4204_s28 + $0x5bc] ss:$12 sps:$4 sm:$0xff]  }
  0x25   : > { %1753 = vmatpush1.bf16.msra.mxu0 %v3870_v9  ;;  %3844 = vmatpush1.bf16.msra.mxu1 %v3870_v9  ;;  %v3964_v9 = vld [vmem:[%s4204_s28 + $0x138] ss:$12 sps:$4 sm:$0xff]  }
  0x26   : > { %1754 = vmatprep.subr.bf16.mxu0 %v4147_v1  ;;  %3829 = vmatprep.subr.bf16.mxu1 %v4147_v1 }
  0x29   : > { %1755 = vmatpush1.bf16.msra.mxu0 %v3871_v10  ;;  %3845 = vmatpush1.bf16.msra.mxu1 %v3871_v10  ;;  %v3965_v10 = vld [vmem:[%s4204_s28 + $0x5b8] ss:$12 sps:$4 sm:$0xff]  }
  0x2a   : > { %1756 = vmatprep.subr.bf16.mxu0 %v4147_v1  ;;  %3830 = vmatprep.subr.bf16.mxu1 %v4147_v1 }
  0x2d   : > { %1757 = vmatpush2.bf16.msra.mxu0 %v3872_v11  ;;  %3846 = vmatpush2.bf16.msra.mxu1 %v3872_v11  ;;  %v3966_v11 = vld [vmem:[%s4204_s28 + $0x154] ss:$12 sps:$4 sm:$0xff]  }
  0x2e   : > { %1758 = vmatprep.subr.bf16.mxu0 %v4147_v1  ;;  %3831 = vmatprep.subr.bf16.mxu1 %v4147_v1 }
  0x31   : > { %1759 = vmatpush2.bf16.msra.mxu0 %v3873_v12  ;;  %3847 = vmatpush2.bf16.msra.mxu1 %v3873_v12  ;;  %v3968_v12 = vld [vmem:[%s4204_s28 + $0x5d4] ss:$12 sps:$4 sm:$0xff]  }
  0x32   : > { %1760 = vmatprep.subr.bf16.mxu0 %v4147_v1  ;;  %3832 = vmatprep.subr.bf16.mxu1 %v4147_v1 }
  0x35   : > { %1761 = vmatpush2.bf16.msra.mxu0 %v3874_v13  ;;  %3848 = vmatpush2.bf16.msra.mxu1 %v3874_v13  ;;  %v3970_v13 = vld [vmem:[%s4204_s28 + $0x150] ss:$12 sps:$4 sm:$0xff]  }
  0x36   : > { %1762 = vmatprep.subr.bf16.mxu0 %v4147_v1  ;;  %3833 = vmatprep.subr.bf16.mxu1 %v4147_v1 }
  0x39   : > { %1763 = vmatpush2.bf16.msra.mxu0 %v3875_v14  ;;  %3849 = vmatpush2.bf16.msra.mxu1 %v3875_v14  ;;  %v3971_v14 = vld [vmem:[%s4204_s28 + $0x5d0] ss:$12 sps:$4 sm:$0xff]  }
  0x3a   : > { %1764 = vmatprep.subr.bf16.mxu0 %v4147_v1  ;;  %3834 = vmatprep.subr.bf16.mxu1 %v4147_v1 }
  0x3d   : > { %1765 = vmatpush2.bf16.msra.mxu0 %v3876_v15  ;;  %3850 = vmatpush2.bf16.msra.mxu1 %v3876_v15  ;;  %v3972_v15 = vld [vmem:[%s4204_s28 + $0x16c] ss:$12 sps:$4 sm:$0xff]  }
  0x3e   : > { %1766 = vmatprep.subr.bf16.mxu0 %v4147_v1  ;;  %3835 = vmatprep.subr.bf16.mxu1 %v4147_v1 }
  0x41   : > { %1767 = vmatpush2.bf16.msra.mxu0 %v3877_v16  ;;  %3851 = vmatpush2.bf16.msra.mxu1 %v3877_v16  ;;  %v3974_v16 = vld [vmem:[%s4204_s28 + $0x5ec] ss:$12 sps:$4 sm:$0xff]  }
  0x42   : > { %1768 = vmatprep.subr.bf16.mxu0 %v4147_v1  ;;  %3836 = vmatprep.subr.bf16.mxu1 %v4147_v1 }
  0x45   : > { %1769 = vmatpush2.bf16.msra.mxu0 %v3878_v17  ;;  %3852 = vmatpush2.bf16.msra.mxu1 %v3878_v17  ;;  %v3976_v17 = vld [vmem:[%s4204_s28 + $0x168] ss:$12 sps:$4 sm:$0xff]  }
  0x46   : > { %1770 = vmatprep.subr.bf16.mxu0 %v4147_v1  ;;  %3837 = vmatprep.subr.bf16.mxu1 %v4147_v1  ;;  %v3952_v1 = vld [vmem:[%s4204_s28 + $0x108] ss:$12 sps:$4 sm:$0xff]  }
  0x49   : > { %1771 = vmatpush2.bf16.msra.mxu0 %v3879_v18  ;;  %3853 = vmatpush2.bf16.msra.mxu1 %v3879_v18  ;;  %v3977_v18 = vld [vmem:[%s4204_s28 + $0x5e8] ss:$12 sps:$4 sm:$0xff]  }
  0x4a   : > { %3690 = vmatprep.subr.bf16.mxu1 %v3886_v19 }
  0x4c   : > { %1773 = vmatmul.mubr.bf16.vlgmr.msra.gmra.mxu0 %v3880_v20  ;;  %2157 = vmatmul.mubr.bf16.vlgmr.msra.gmra.mxu1 %v3883_v21  ;;  %v3980_v20 = vld [vmem:[%s4204_s28 + $0x8] ss:$12 sps:$4 sm:$0xff]   ;;  %v3981_v21 = vld [vmem:[%s4204_s28 + $0x180] ss:$12 sps:$4 sm:$0xff]  }
  0x4d   : > { %3691 = vmatpush3.bf16.msra.mxu1 %v3886_v19  ;;  %1780 = vmatprep.mubr.bf16.mxu0 %v3887_v22  ;;  %v3978_v19 = vld [vmem:[%s4204_s28 + $0x184] ss:$12 sps:$4 sm:$0xff]   ;;  %v3982_v22 = vld [vmem:[%s4204_s28 + $0x20] ss:$12 sps:$4 sm:$0xff]  }
  0x4e   : > { %2164 = vmatprep.mubr.bf16.mxu1 %v3889_v23  ;;  %3692 = vmatprep.subr.bf16.mxu1 %v3935_v24  ;;  %v3983_v23 = vld [vmem:[%s4204_s28 + $0x19c] ss:$12 sps:$4 sm:$0xff]  }
  0x51   : > { %3693 = vmatpush3.bf16.msra.mxu1 %v3935_v24  ;;  %v3985_v24 = vld [vmem:[%s4204_s28 + $0x38] ss:$12 sps:$4 sm:$0xff]  }
  0x54   : > { %1781 = vmatmul.mubr.bf16.gmra.mxu0 %v3891_v25  ;;  %2165 = vmatmul.mubr.bf16.gmra.mxu1 %v3892_v26  ;;  %v3986_v25 = vld [vmem:[%s4204_s28 + $0x198] ss:$12 sps:$4 sm:$0xff]   ;;  %v3987_v26 = vld [vmem:[%s4204_s28 + $0x50] ss:$12 sps:$4 sm:$0xff]  }
  0x55   : > { %1788 = vmatprep.mubr.bf16.mxu0 %v3893_v27  ;;  %2172 = vmatprep.mubr.bf16.mxu1 %v3895_v28  ;;  %v3988_v27 = vld [vmem:[%s4204_s28 + $0x1b4] ss:$12 sps:$4 sm:$0xff]  }
  0x56   : > { %v3990_v28 = vld [vmem:[%s4204_s28 + $0x68] ss:$12 sps:$4 sm:$0xff]  }
  0x5c   : > { %1789 = vmatmul.mubr.bf16.gmra.mxu0 %v3897_v29  ;;  %2173 = vmatmul.mubr.bf16.gmra.mxu1 %v3898_v30  ;;  %v3991_v29 = vld [vmem:[%s4204_s28 + $0x1b0] ss:$12 sps:$4 sm:$0xff]   ;;  %v3992_v30 = vld [vmem:[%s4204_s28 + $0x80] ss:$12 sps:$4 sm:$0xff]  }
  0x5d   : > { %1796 = vmatprep.mubr.bf16.mxu0 %v3899_v31  ;;  %2180 = vmatprep.mubr.bf16.mxu1 %v3901_v32  ;;  %v3993_v31 = vld [vmem:[%s4204_s28 + $0x1cc] ss:$12 sps:$4 sm:$0xff]  }
  0x5e   : > { %v3995_v32 = vld [vmem:[%s4204_s28 + $0x98] ss:$12 sps:$4 sm:$0xff]  }
  0x64   : > { %1797 = vmatmul.mubr.bf16.gmra.mxu0 %v3903_v33  ;;  %2181 = vmatmul.mubr.bf16.gmra.mxu1 %v3904_v34  ;;  %v3996_v33 = vld [vmem:[%s4204_s28 + $0x1c8] ss:$12 sps:$4 sm:$0xff]   ;;  %v3997_v34 = vld [vmem:[%s4204_s28 + $0xb0] ss:$12 sps:$4 sm:$0xff]  }
  0x65   : > { %1804 = vmatprep.mubr.bf16.mxu0 %v3905_v35  ;;  %2188 = vmatprep.mubr.bf16.mxu1 %v3907_v36  ;;  %v3998_v35 = vld [vmem:[%s4204_s28 + $0x1e4] ss:$12 sps:$4 sm:$0xff]   ;;  %v4000_v36 = vld [vmem:[%s4204_s28 + $0xc8] ss:$12 sps:$4 sm:$0xff]  }
  0x6c   : > { %1805 = vmatmul.mubr.bf16.gmra.mxu0 %v3909_v37  ;;  %2189 = vmatmul.mubr.bf16.gmra.mxu1 %v3910_v38  ;;  %v4001_v37 = vld [vmem:[%s4204_s28 + $0x1e0] ss:$12 sps:$4 sm:$0xff]  }
  0x6d   : > { %1812 = vmatprep.mubr.bf16.mxu0 %v3911_v39  ;;  %2196 = vmatprep.mubr.bf16.mxu1 %v3913_v40  ;;  %v4002_v38 = vld [vmem:[%s4204_s28 + $0xe0] ss:$12 sps:$4 sm:$0xff]   ;;  %v4003_v39 = vld [vmem:[%s4204_s28 + $0x1fc] ss:$12 sps:$4 sm:$0xff]   ;;  %v4005_v40 = vld [vmem:[%s4204_s28 + $0xf8] ss:$12 sps:$4 sm:$0xff]  }
  0x74   : > { %1813 = vmatmul.mubr.bf16.gmra.mxu0 %v3915_v41  ;;  %2197 = vmatmul.mubr.bf16.gmra.mxu1 %v3916_v42  ;;  %v4006_v41 = vld [vmem:[%s4204_s28 + $0x1f8] ss:$12 sps:$4 sm:$0xff]   ;;  %v4007_v42 = vld [vmem:[%s4204_s28 + $0x110] ss:$12 sps:$4 sm:$0xff]  }
  0x75   : > { %1820 = vmatprep.mubr.bf16.mxu0 %v3917_v43  ;;  %2204 = vmatprep.mubr.bf16.mxu1 %v3919_v44  ;;  %v4008_v43 = vld [vmem:[%s4204_s28 + $0x214] ss:$12 sps:$4 sm:$0xff]  }
  0x76   : > { %v4010_v44 = vld [vmem:[%s4204_s28 + $0x128] ss:$12 sps:$4 sm:$0xff]  }
  0x7c   : > { %1821 = vmatmul.mubr.bf16.gmra.mxu0 %v3921_v45  ;;  %2205 = vmatmul.mubr.bf16.gmra.mxu1 %v3922_v46  ;;  %v4011_v45 = vld [vmem:[%s4204_s28 + $0x210] ss:$12 sps:$4 sm:$0xff]   ;;  %v4012_v46 = vld [vmem:[%s4204_s28 + $0x140] ss:$12 sps:$4 sm:$0xff]  }
  0x7d   : > { %1828 = vmatprep.mubr.bf16.mxu0 %v3923_v47  ;;  %2212 = vmatprep.mubr.bf16.mxu1 %v3925_v48  ;;  %v4013_v47 = vld [vmem:[%s4204_s28 + $0x22c] ss:$12 sps:$4 sm:$0xff]  }
  0x7e   : > { %v4015_v48 = vld [vmem:[%s4204_s28 + $0x158] ss:$12 sps:$4 sm:$0xff]  }
  0x84   : > { %1829 = vmatmul.mubr.bf16.gmra.mxu0 %v3927_v49  ;;  %2213 = vmatmul.mubr.bf16.gmra.mxu1 %v3928_v50  ;;  %v4016_v49 = vld [vmem:[%s4204_s28 + $0x228] ss:$12 sps:$4 sm:$0xff]   ;;  %v4017_v50 = vld [vmem:[%s4204_s28 + $0x170] ss:$12 sps:$4 sm:$0xff]  }
  0x85   : > { %1836 = vmatprep.mubr.bf16.mxu0 %v3929_v51  ;;  %2220 = vmatprep.mubr.bf16.mxu1 %v3931_v52  ;;  %v4018_v51 = vld [vmem:[%s4204_s28 + $0x244] ss:$12 sps:$4 sm:$0xff]   ;;  %v4020_v52 = vld [vmem:[%s4204_s28 + $0x188] ss:$12 sps:$4 sm:$0xff]  }
  0x8c   : > { %1837 = vmatmul.mubr.bf16.gmra.mxu0 %v3933_v53  ;;  %2221 = vmatmul.mubr.bf16.gmra.mxu1 %v3934_v54  ;;  %v4021_v53 = vld [vmem:[%s4204_s28 + $0x240] ss:$12 sps:$4 sm:$0xff]  }
  0x8d   : > { %1844 = vmatprep.mubr.bf16.mxu0 %v3936_v55  ;;  %2228 = vmatprep.mubr.bf16.mxu1 %v3938_v56  ;;  %v4022_v54 = vld [vmem:[%s4204_s28 + $0x1a0] ss:$12 sps:$4 sm:$0xff]   ;;  %v4023_v55 = vld [vmem:[%s4204_s28 + $0x25c] ss:$12 sps:$4 sm:$0xff]   ;;  %v4025_v56 = vld [vmem:[%s4204_s28 + $0x1b8] ss:$12 sps:$4 sm:$0xff]  }
  0x94   : > { %1845 = vmatmul.mubr.bf16.gmra.mxu0 %v3940_v57  ;;  %2229 = vmatmul.mubr.bf16.gmra.mxu1 %v3941_v58 }
  0x95   : > { %1852 = vmatprep.mubr.bf16.mxu0 %v3942_v59  ;;  %2236 = vmatprep.mubr.bf16.mxu1 %v3944_v60 }
  0x9c   : > { %1853 = vmatmul.mubr.bf16.gmra.mxu0 %v3946_v61  ;;  %2237 = vmatmul.mubr.bf16.gmra.mxu1 %v3947_v62 }
  0x9d   : > { %1860 = vmatprep.mubr.bf16.mxu0 %v3948_v63  ;;  %2244 = vmatprep.mubr.bf16.mxu1 %v3950_v0  ;;  %v4026_v63 = vld [vmem:[%s4204_s28 + $0x258] ss:$12 sps:$4 sm:$0xff]   ;;  %v4027_v0 = vld [vmem:[%s4204_s28 + $0x1d0] ss:$12 sps:$4 sm:$0xff]  }
  0xa4   : > { %1861 = vmatmul.mubr.bf16.gmra.mxu0 %v3952_v1  ;;  %2245 = vmatmul.mubr.bf16.gmra.mxu1 %v3953_v2  ;;  %v4028_v1 = vld [vmem:[%s4204_s28 + $0x274] ss:$12 sps:$4 sm:$0xff]  }
  0xa5   : > { %1868 = vmatprep.mubr.bf16.mxu0 %v3954_v3  ;;  %2252 = vmatprep.mubr.bf16.mxu1 %v3956_v4  ;;  %v4030_v2 = vld [vmem:[%s4204_s28 + $0x1e8] ss:$12 sps:$4 sm:$0xff]  }
  0xac   : > { %1869 = vmatmul.mubr.bf16.gmra.mxu0 %v3958_v5  ;;  %2253 = vmatmul.mubr.bf16.gmra.mxu1 %v3959_v6 }
  0xad   : > { %1876 = vmatprep.mubr.bf16.mxu0 %v3960_v7  ;;  %2260 = vmatprep.mubr.bf16.mxu1 %v3962_v8 }
  0xb4   : > { %1877 = vmatmul.mubr.bf16.gmra.mxu0 %v3964_v9  ;;  %2261 = vmatmul.mubr.bf16.gmra.mxu1 %v3965_v10 }
  0xb5   : > { %1884 = vmatprep.mubr.bf16.mxu0 %v3966_v11  ;;  %2268 = vmatprep.mubr.bf16.mxu1 %v3968_v12  ;;  %v4031_v11 = vld [vmem:[%s4204_s28 + $0x270] ss:$12 sps:$4 sm:$0xff]   ;;  %v4032_v12 = vld [vmem:[%s4204_s28 + $0x200] ss:$12 sps:$4 sm:$0xff]  }
  0xbc   : > { %1885 = vmatmul.mubr.bf16.gmra.mxu0 %v3970_v13  ;;  %2269 = vmatmul.mubr.bf16.gmra.mxu1 %v3971_v14  ;;  %v4033_v13 = vld [vmem:[%s4204_s28 + $0x28c] ss:$12 sps:$4 sm:$0xff]  }
  0xbd   : > { %1892 = vmatprep.mubr.bf16.mxu0 %v3972_v15  ;;  %2276 = vmatprep.mubr.bf16.mxu1 %v3974_v16  ;;  %v4035_v14 = vld [vmem:[%s4204_s28 + $0x218] ss:$12 sps:$4 sm:$0xff]  }
  0xc4   : > { %1893 = vmatmul.mubr.bf16.gmra.mxu0 %v3976_v17  ;;  %2277 = vmatmul.mubr.bf16.gmra.mxu1 %v3977_v18 }
  0xc5   : > { %1900 = vmatprep.mubr.bf16.mxu0 %v3978_v19  ;;  %3694 = vmatprep.mubr.msk.bf16.mxu1 %vm1547_vm0, %v3980_v20 }
  0xcc   : > { %1901 = vmatmul.mubr.bf16.gmra.mxu0 %v3981_v21  ;;  %3695 = vmatmul.mubr.msk.bf16.vlgmr.msra.gmra.mxu1 %vm1547_vm0, %v3982_v22 }
  0xcd   : > { %1908 = vmatprep.mubr.bf16.mxu0 %v3983_v23  ;;  %3698 = vmatprep.mubr.msk.bf16.mxu1 %vm1547_vm0, %v3985_v24  ;;  %v4036_v23 = vld [vmem:[%s4204_s28 + $0x288] ss:$12 sps:$4 sm:$0xff]   ;;  %v4037_v24 = vld [vmem:[%s4204_s28 + $0x230] ss:$12 sps:$4 sm:$0xff]  }
  0xd4   : > { %1909 = vmatmul.mubr.bf16.gmra.mxu0 %v3986_v25  ;;  %3699 = vmatmul.mubr.msk.bf16.gmra.mxu1 %vm1547_vm0, %v3987_v26  ;;  %v4040_v25 = vld [vmem:[%s4204_s28 + $0x2a4] ss:$12 sps:$4 sm:$0xff]   ;;  %v4041_v26 = vld [vmem:[%s4204_s28 + $0x248] ss:$12 sps:$4 sm:$0xff]  }
  0xd5   : > { %1916 = vmatprep.mubr.bf16.mxu0 %v3988_v27  ;;  %3702 = vmatprep.mubr.msk.bf16.mxu1 %vm1547_vm0, %v3990_v28 }
  0xdc   : > { %1917 = vmatmul.mubr.bf16.gmra.mxu0 %v3991_v29  ;;  %3703 = vmatmul.mubr.msk.bf16.gmra.mxu1 %vm1547_vm0, %v3992_v30 }
  0xdd   : > { %1924 = vmatprep.mubr.bf16.mxu0 %v3993_v31  ;;  %3706 = vmatprep.mubr.msk.bf16.mxu1 %vm1547_vm0, %v3995_v32 }
  0xe4   : > { %1925 = vmatmul.mubr.bf16.gmra.mxu0 %v3996_v33  ;;  %3707 = vmatmul.mubr.msk.bf16.gmra.mxu1 %vm1547_vm0, %v3997_v34 }
  0xe5   : > { %1932 = vmatprep.mubr.bf16.mxu0 %v3998_v35  ;;  %3710 = vmatprep.mubr.msk.bf16.mxu1 %vm1547_vm0, %v4000_v36  ;;  %v4038_v35 = vld [vmem:[%s4204_s28 + $0x2a0] ss:$12 sps:$4 sm:$0xff]  }
  0xe6   : > { %v4042_v36 = vld [vmem:[%s4204_s28 + $0x260] ss:$12 sps:$4 sm:$0xff]  }
  0xec   : > { %1933 = vmatmul.mubr.bf16.gmra.mxu0 %v4001_v37  ;;  %3711 = vmatmul.mubr.msk.bf16.gmra.mxu1 %vm1547_vm0, %v4002_v38  ;;  %v4045_v37 = vld [vmem:[%s4204_s28 + $0x2bc] ss:$12 sps:$4 sm:$0xff]   ;;  %v4046_v38 = vld [vmem:[%s4204_s28 + $0x278] ss:$12 sps:$4 sm:$0xff]  }
  0xed   : > { %1940 = vmatprep.mubr.bf16.mxu0 %v4003_v39  ;;  %3714 = vmatprep.mubr.msk.bf16.mxu1 %vm1547_vm0, %v4005_v40 }
  0xf4   : > { %1941 = vmatmul.mubr.bf16.gmra.mxu0 %v4006_v41  ;;  %3715 = vmatmul.mubr.msk.bf16.gmra.mxu1 %vm1547_vm0, %v4007_v42 }
  0xf5   : > { %1948 = vmatprep.mubr.bf16.mxu0 %v4008_v43  ;;  %3718 = vmatprep.mubr.msk.bf16.mxu1 %vm1547_vm0, %v4010_v44 }
  0xfc   : > { %1949 = vmatmul.mubr.bf16.gmra.mxu0 %v4011_v45  ;;  %3719 = vmatmul.mubr.msk.bf16.gmra.mxu1 %vm1547_vm0, %v4012_v46 }
  0xfd   : > { %1956 = vmatprep.mubr.bf16.mxu0 %v4013_v47  ;;  %3722 = vmatprep.mubr.msk.bf16.mxu1 %vm1547_vm0, %v4015_v48  ;;  %v4043_v47 = vld [vmem:[%s4204_s28 + $0x2b8] ss:$12 sps:$4 sm:$0xff]   ;;  %v4047_v48 = vld [vmem:[%s4204_s28 + $0x290] ss:$12 sps:$4 sm:$0xff]  }
 0x104   : > { %1957 = vmatmul.mubr.bf16.gmra.mxu0 %v4016_v49  ;;  %3723 = vmatmul.mubr.msk.bf16.gmra.mxu1 %vm1547_vm0, %v4017_v50  ;;  %v4050_v49 = vld [vmem:[%s4204_s28 + $0x2d4] ss:$12 sps:$4 sm:$0xff]  }
 0x105   : > { %1964 = vmatprep.mubr.bf16.mxu0 %v4018_v51  ;;  %3726 = vmatprep.mubr.msk.bf16.mxu1 %vm1547_vm0, %v4020_v52  ;;  %v4051_v50 = vld [vmem:[%s4204_s28 + $0x2a8] ss:$12 sps:$4 sm:$0xff]  }
 0x10c   : > { %v4388_v57 = vpop.f32.mrf.mxu0  ;;  %1965 = vmatmul.mubr.bf16.gmra.mxu0 %v4021_v53  ;;  %v4390_v58 = vpop.f32.mrf.mxu1  ;;  %3727 = vmatmul.mubr.msk.bf16.gmra.mxu1 %vm1547_vm0, %v4022_v54 }
 0x10d   : > { %1972 = vmatprep.mubr.bf16.mxu0 %v4023_v55  ;;  %3730 = vmatprep.mubr.msk.bf16.mxu1 %vm1547_vm0, %v4025_v56 }
 0x10e   : > { %v1776_v59 = vpop.f32.mrf.mxu0  ;;  %v2160_v60 = vpop.f32.mrf.mxu1 }
 0x110   : > { %v4394_v61 = vpop.f32.mrf.mxu0  ;;  %v4396_v62 = vpop.f32.mrf.mxu1 }
 0x112   : > { %v1779_v3 = vpop.f32.mrf.mxu0  ;;  %v2163_v4 = vpop.f32.mrf.mxu1 }
 0x114   : > { %v4402_v5 = vpop.f32.mrf.mxu0  ;;  %1973 = vmatmul.mubr.bf16.gmra.mxu0 %v4026_v63  ;;  %v4404_v6 = vpop.f32.mrf.mxu1  ;;  %3731 = vmatmul.mubr.msk.bf16.gmra.mxu1 %vm1547_vm0, %v4027_v0  ;;  %v4048_v63 = vld [vmem:[%s4204_s28 + $0x2d0] ss:$12 sps:$4 sm:$0xff]   ;;  %v4052_v0 = vld [vmem:[%s4204_s28 + $0x2c0] ss:$12 sps:$4 sm:$0xff]  }
 0x115   : > { %1980 = vmatprep.mubr.bf16.mxu0 %v4028_v1  ;;  %3734 = vmatprep.mubr.msk.bf16.mxu1 %vm1547_vm0, %v4030_v2  ;;  %v4055_v1 = vld [vmem:[%s4204_s28 + $0x2ec] ss:$12 sps:$4 sm:$0xff]  }
 0x116   : > { %v1784_v7 = vpop.f32.mrf.mxu0  ;;  %v2168_v8 = vpop.f32.mrf.mxu1  ;;  %v4056_v2 = vld [vmem:[%s4204_s28 + $0x2d8] ss:$12 sps:$4 sm:$0xff]  }
 0x118   : > { %v4408_v9 = vpop.f32.mrf.mxu0  ;;  %v4410_v10 = vpop.f32.mrf.mxu1 }
 0x11a   : > { %v1787_v15 = vpop.f32.mrf.mxu0  ;;  %v2171_v16 = vpop.f32.mrf.mxu1 }
 0x11b   : > { %v4053_v15 = vld [vmem:[%s4204_s28 + $0x2e8] ss:$12 sps:$4 sm:$0xff]   ;;  %v4057_v16 = vld [vmem:[%s4204_s28 + $0x2f0] ss:$12 sps:$4 sm:$0xff]  }
 0x11c   : > { %v4416_v17 = vpop.f32.mrf.mxu0  ;;  %1981 = vmatmul.mubr.bf16.gmra.mxu0 %v4031_v11  ;;  %v4418_v18 = vpop.f32.mrf.mxu1  ;;  %3735 = vmatmul.mubr.msk.bf16.gmra.mxu1 %vm1547_vm0, %v4032_v12 }
 0x11d   : > { %1988 = vmatprep.mubr.bf16.mxu0 %v4033_v13  ;;  %3738 = vmatprep.mubr.msk.bf16.mxu1 %vm1547_vm0, %v4035_v14 }
 0x11e   : > { %v1792_v19 = vpop.f32.mrf.mxu0  ;;  %v2176_v20 = vpop.f32.mrf.mxu1 }
 0x11f   : > { %v4060_v19 = vld [vmem:[%s4204_s28 + $0x304] ss:$12 sps:$4 sm:$0xff]   ;;  %v4061_v20 = vld [vmem:[%s4204_s28 + $0x308] ss:$12 sps:$4 sm:$0xff]  }
 0x120   : > { %v4422_v21 = vpop.f32.mrf.mxu0  ;;  %v4424_v22 = vpop.f32.mrf.mxu1 }
 0x122   : > { %v1795_v27 = vpop.f32.mrf.mxu0  ;;  %v2179_v28 = vpop.f32.mrf.mxu1 }
 0x124   : > { %v4430_v29 = vpop.f32.mrf.mxu0  ;;  %1989 = vmatmul.mubr.bf16.gmra.mxu0 %v4036_v23  ;;  %v4432_v30 = vpop.f32.mrf.mxu1  ;;  %3739 = vmatmul.mubr.msk.bf16.gmra.mxu1 %vm1547_vm0, %v4037_v24 }
 0x125   : > { %1996 = vmatprep.mubr.bf16.mxu0 %v4040_v25  ;;  %3742 = vmatprep.mubr.msk.bf16.mxu1 %vm1547_vm0, %v4041_v26 }
 0x126   : > { %v1800_v31 = vpop.f32.mrf.mxu0  ;;  %v2184_v32 = vpop.f32.mrf.mxu1 }
 0x128   : > { %v4436_v33 = vpop.f32.mrf.mxu0  ;;  %v4438_v34 = vpop.f32.mrf.mxu1 }
 0x12a   : > { %v1803_v39 = vpop.f32.mrf.mxu0  ;;  %v2187_v40 = vpop.f32.mrf.mxu1 }
 0x12c   : > { %v4444_v41 = vpop.f32.mrf.mxu0  ;;  %1997 = vmatmul.mubr.bf16.gmra.mxu0 %v4038_v35  ;;  %v4446_v42 = vpop.f32.mrf.mxu1  ;;  %3743 = vmatmul.mubr.msk.bf16.gmra.mxu1 %vm1547_vm0, %v4042_v36  ;;  %v4058_v35 = vld [vmem:[%s4204_s28 + $0x300] ss:$12 sps:$4 sm:$0xff]  }
 0x12d   : > { %2004 = vmatprep.mubr.bf16.mxu0 %v4045_v37  ;;  %3746 = vmatprep.mubr.msk.bf16.mxu1 %vm1547_vm0, %v4046_v38  ;;  %v4062_v36 = vld [vmem:[%s4204_s28 + $0x320] ss:$12 sps:$4 sm:$0xff]   ;;  %v4065_v37 = vld [vmem:[%s4204_s28 + $0x31c] ss:$12 sps:$4 sm:$0xff]   ;;  %v4066_v38 = vld [vmem:[%s4204_s28 + $0x338] ss:$12 sps:$4 sm:$0xff]  }
 0x12e   : > { %v1808_v43 = vpop.f32.mrf.mxu0  ;;  %v2192_v44 = vpop.f32.mrf.mxu1 }
 0x130   : > { %v4450_v45 = vpop.f32.mrf.mxu0  ;;  %v4452_v46 = vpop.f32.mrf.mxu1 }
 0x132   : > { %v1811_v51 = vpop.f32.mrf.mxu0  ;;  %v2195_v52 = vpop.f32.mrf.mxu1 }
 0x133   : > { %v4063_v51 = vld [vmem:[%s4204_s28 + $0x318] ss:$12 sps:$4 sm:$0xff]   ;;  %v4067_v52 = vld [vmem:[%s4204_s28 + $0x350] ss:$12 sps:$4 sm:$0xff]  }
 0x134   : > { %v4458_v53 = vpop.f32.mrf.mxu0  ;;  %2005 = vmatmul.mubr.bf16.gmra.mxu0 %v4043_v47  ;;  %v4460_v54 = vpop.f32.mrf.mxu1  ;;  %3747 = vmatmul.mubr.msk.bf16.gmra.mxu1 %vm1547_vm0, %v4047_v48 }
 0x135   : > { %2012 = vmatprep.mubr.bf16.mxu0 %v4050_v49  ;;  %3750 = vmatprep.mubr.msk.bf16.mxu1 %vm1547_vm0, %v4051_v50 }
 0x136   : > { %v1816_v55 = vpop.f32.mrf.mxu0  ;;  %v2200_v56 = vpop.f32.mrf.mxu1 }
 0x137   : > { %v4070_v55 = vld [vmem:[%s4204_s28 + $0x334] ss:$12 sps:$4 sm:$0xff]  }
 0x138   : > { %v4464_v59 = vpop.f32.mrf.mxu0  ;;  %v4466_v60 = vpop.f32.mrf.mxu1  ;;  %v4071_v56 = vld [vmem:[%s4204_s28 + $0x368] ss:$12 sps:$4 sm:$0xff]  }
 0x13a   : > { %v1819_v3 = vpop.f32.mrf.mxu0  ;;  %v2203_v4 = vpop.f32.mrf.mxu1 }
 0x13c   : > { %v4472_v7 = vpop.f32.mrf.mxu0  ;;  %2013 = vmatmul.mubr.bf16.gmra.mxu0 %v4048_v63  ;;  %v4474_v8 = vpop.f32.mrf.mxu1  ;;  %3751 = vmatmul.mubr.msk.bf16.gmra.mxu1 %vm1547_vm0, %v4052_v0 }
 0x13d   : > { %2020 = vmatprep.mubr.bf16.mxu0 %v4055_v1  ;;  %3754 = vmatprep.mubr.msk.bf16.mxu1 %vm1547_vm0, %v4056_v2 }
 0x13e   : > { %v1824_v11 = vpop.f32.mrf.mxu0  ;;  %v2208_v12 = vpop.f32.mrf.mxu1 }
 0x140   : > { %v4478_v13 = vpop.f32.mrf.mxu0  ;;  %v4480_v14 = vpop.f32.mrf.mxu1 }
 0x141   : > { %5132 = vst [vmem:[#allocation3_spill] sm:$0xff] %v4480_v14 }
 0x142   : > { %v1827_v23 = vpop.f32.mrf.mxu0  ;;  %v2211_v24 = vpop.f32.mrf.mxu1 }
 0x144   : > { %v4486_v25 = vpop.f32.mrf.mxu0  ;;  %2021 = vmatmul.mubr.bf16.gmra.mxu0 %v4053_v15  ;;  %v4488_v26 = vpop.f32.mrf.mxu1  ;;  %3755 = vmatmul.mubr.msk.bf16.gmra.mxu1 %vm1547_vm0, %v4057_v16  ;;  %v4068_v15 = vld [vmem:[%s4204_s28 + $0x330] ss:$12 sps:$4 sm:$0xff]   ;;  %v4072_v16 = vld [vmem:[%s4204_s28 + $0x380] ss:$12 sps:$4 sm:$0xff]  }
 0x145   : > { %2028 = vmatprep.mubr.bf16.mxu0 %v4060_v19  ;;  %3758 = vmatprep.mubr.msk.bf16.mxu1 %vm1547_vm0, %v4061_v20  ;;  %v4075_v19 = vld [vmem:[%s4204_s28 + $0x34c] ss:$12 sps:$4 sm:$0xff]  }
 0x146   : > { %v1832_v27 = vpop.f32.mrf.mxu0  ;;  %v2216_v28 = vpop.f32.mrf.mxu1  ;;  %v4076_v20 = vld [vmem:[%s4204_s28 + $0x398] ss:$12 sps:$4 sm:$0xff]  }
 0x148   : > { %v4492_v31 = vpop.f32.mrf.mxu0  ;;  %v4494_v32 = vpop.f32.mrf.mxu1 }
 0x149   : > { %5133 = vst [vmem:[#allocation4_spill] sm:$0xff] %v4494_v32 }
 0x14a   : > { %v1835_v39 = vpop.f32.mrf.mxu0  ;;  %v2219_v40 = vpop.f32.mrf.mxu1 }
 0x14b   : > { %v4073_v39 = vld [vmem:[%s4204_s28 + $0x348] ss:$12 sps:$4 sm:$0xff]   ;;  %v4077_v40 = vld [vmem:[%s4204_s28 + $0x3b0] ss:$12 sps:$4 sm:$0xff]  }
 0x14c   : > { %v4500_v43 = vpop.f32.mrf.mxu0  ;;  %2029 = vmatmul.mubr.bf16.gmra.mxu0 %v4058_v35  ;;  %v4502_v44 = vpop.f32.mrf.mxu1  ;;  %3759 = vmatmul.mubr.msk.bf16.gmra.mxu1 %vm1547_vm0, %v4062_v36 }
 0x14d   : > { %5134 = vst [vmem:[#allocation5_spill] sm:$0xff] %v4502_v44  ;;  %2036 = vmatprep.mubr.bf16.mxu0 %v4065_v37  ;;  %3762 = vmatprep.mubr.msk.bf16.mxu1 %vm1547_vm0, %v4066_v38  ;;  %v4111_v44 = vld [vmem:[%s4204_s28 + $0x4e8] ss:$12 sps:$4 sm:$0xff]  }
 0x14e   : > { %v1840_v47 = vpop.f32.mrf.mxu0  ;;  %v2224_v48 = vpop.f32.mrf.mxu1 }
 0x14f   : > { %v4080_v47 = vld [vmem:[%s4204_s28 + $0x364] ss:$12 sps:$4 sm:$0xff]   ;;  %v4081_v48 = vld [vmem:[%s4204_s28 + $0x3c8] ss:$12 sps:$4 sm:$0xff]  }
 0x150   : > { %v4506_v49 = vpop.f32.mrf.mxu0  ;;  %v4508_v50 = vpop.f32.mrf.mxu1 }
 0x151   : > { %5135 = vst [vmem:[#allocation6_spill] sm:$0xff] %v4508_v50 }
 0x152   : > { %v1843_v63 = vpop.f32.mrf.mxu0  ;;  %v2227_v0 = vpop.f32.mrf.mxu1 }
 0x154   : > { %v4514_v1 = vpop.f32.mrf.mxu0  ;;  %2037 = vmatmul.mubr.bf16.gmra.mxu0 %v4063_v51  ;;  %v4516_v2 = vpop.f32.mrf.mxu1  ;;  %3763 = vmatmul.mubr.msk.bf16.gmra.mxu1 %vm1547_vm0, %v4067_v52 }
 0x155   : > { %5136 = vst [vmem:[#allocation7_spill] sm:$0xff] %v4516_v2  ;;  %2044 = vmatprep.mubr.bf16.mxu0 %v4070_v55  ;;  %3766 = vmatprep.mubr.msk.bf16.mxu1 %vm1547_vm0, %v4071_v56 }
 0x156   : > { %v1848_v3 = vpop.f32.mrf.mxu0  ;;  %v2232_v4 = vpop.f32.mrf.mxu1 }
 0x158   : > { %v4520_v11 = vpop.f32.mrf.mxu0  ;;  %v4522_v12 = vpop.f32.mrf.mxu1 }
 0x159   : > { %5137 = vst [vmem:[#allocation8_spill] sm:$0xff] %v4522_v12 }
 0x15a   : > { %v1851_v23 = vpop.f32.mrf.mxu0  ;;  %v2235_v24 = vpop.f32.mrf.mxu1 }
 0x15c   : > { %v4528_v27 = vpop.f32.mrf.mxu0  ;;  %2045 = vmatmul.mubr.bf16.gmra.mxu0 %v4068_v15  ;;  %v4530_v28 = vpop.f32.mrf.mxu1  ;;  %3767 = vmatmul.mubr.msk.bf16.gmra.mxu1 %vm1547_vm0, %v4072_v16  ;;  %v4078_v15 = vld [vmem:[%s4204_s28 + $0x360] ss:$12 sps:$4 sm:$0xff]  }
 0x15d   : > { %5138 = vst [vmem:[#allocation9_spill] sm:$0xff] %v4530_v28  ;;  %2052 = vmatprep.mubr.bf16.mxu0 %v4075_v19  ;;  %3770 = vmatprep.mubr.msk.bf16.mxu1 %vm1547_vm0, %v4076_v20  ;;  %v4082_v16 = vld [vmem:[%s4204_s28 + $0x3e0] ss:$12 sps:$4 sm:$0xff]   ;;  %v4085_v19 = vld [vmem:[%s4204_s28 + $0x37c] ss:$12 sps:$4 sm:$0xff]  }
 0x15e   : > { %v1856_v35 = vpop.f32.mrf.mxu0  ;;  %v2240_v36 = vpop.f32.mrf.mxu1  ;;  %v4086_v20 = vld [vmem:[%s4204_s28 + $0x3f8] ss:$12 sps:$4 sm:$0xff]   ;;  %v4098_v28 = vld [vmem:[%s4204_s28 + $0x3c0] ss:$12 sps:$4 sm:$0xff]  }
 0x160   : > { %v4534_v37 = vpop.f32.mrf.mxu0  ;;  %v4536_v38 = vpop.f32.mrf.mxu1 }
 0x161   : > { %5139 = vst [vmem:[#allocation10_spill] sm:$0xff] %v4536_v38 }
 0x162   : > { %v1859_v51 = vpop.f32.mrf.mxu0  ;;  %v2243_v52 = vpop.f32.mrf.mxu1 }
 0x163   : > { %v4083_v51 = vld [vmem:[%s4204_s28 + $0x378] ss:$12 sps:$4 sm:$0xff]   ;;  %v4087_v52 = vld [vmem:[%s4204_s28 + $0x410] ss:$12 sps:$4 sm:$0xff]  }
 0x164   : > { %v4542_v55 = vpop.f32.mrf.mxu0  ;;  %2053 = vmatmul.mubr.bf16.gmra.mxu0 %v4073_v39  ;;  %v4544_v56 = vpop.f32.mrf.mxu1  ;;  %3771 = vmatmul.mubr.msk.bf16.gmra.mxu1 %vm1547_vm0, %v4077_v40 }
 0x165   : > { %5140 = vst [vmem:[#allocation11_spill] sm:$0xff] %v4544_v56  ;;  %2060 = vmatprep.mubr.bf16.mxu0 %v4080_v47  ;;  %3774 = vmatprep.mubr.msk.bf16.mxu1 %vm1547_vm0, %v4081_v48  ;;  %v4102_v56 = vld [vmem:[%s4204_s28 + $0x4a0] ss:$12 sps:$4 sm:$0xff]  }
 0x166   : > { %v1864_v63 = vpop.f32.mrf.mxu0  ;;  %v2248_v0 = vpop.f32.mrf.mxu1 }
 0x167   : > { %v4090_v63 = vld [vmem:[%s4204_s28 + $0x394] ss:$12 sps:$4 sm:$0xff]  }
 0x168   : > { %v4548_v3 = vpop.f32.mrf.mxu0  ;;  %v4550_v4 = vpop.f32.mrf.mxu1  ;;  %v4091_v0 = vld [vmem:[%s4204_s28 + $0x428] ss:$12 sps:$4 sm:$0xff]  }
 0x169   : > { %5141 = vst [vmem:[#allocation12_spill] sm:$0xff] %v4550_v4  ;;  %v4093_v4 = vld [vmem:[%s4204_s28 + $0x3a8] ss:$12 sps:$4 sm:$0xff]  }
 0x16a   : > { %v1867_v23 = vpop.f32.mrf.mxu0  ;;  %v2251_v24 = vpop.f32.mrf.mxu1 }
 0x16c   : > { %v4556_v35 = vpop.f32.mrf.mxu0  ;;  %2061 = vmatmul.mubr.bf16.gmra.mxu0 %v4078_v15  ;;  %v4558_v36 = vpop.f32.mrf.mxu1  ;;  %3775 = vmatmul.mubr.msk.bf16.gmra.mxu1 %vm1547_vm0, %v4082_v16 }
 0x16d   : > { %5142 = vst [vmem:[#allocation13_spill] sm:$0xff] %v4558_v36  ;;  %2068 = vmatprep.mubr.bf16.mxu0 %v4085_v19  ;;  %3778 = vmatprep.mubr.msk.bf16.mxu1 %vm1547_vm0, %v4086_v20 }
 0x16e   : > { %v1872_v39 = vpop.f32.mrf.mxu0  ;;  %v2256_v40 = vpop.f32.mrf.mxu1 }
 0x170   : > { %v4562_v47 = vpop.f32.mrf.mxu0  ;;  %v4564_v48 = vpop.f32.mrf.mxu1 }
 0x171   : > { %5143 = vst [vmem:[#allocation14_spill] sm:$0xff] %v4564_v48  ;;  %v4088_v48 = vld [vmem:[%s4204_s28 + $0x390] ss:$12 sps:$4 sm:$0xff]  }
 0x172   : > { %v1875_v15 = vpop.f32.mrf.mxu0  ;;  %v2259_v23 = vpop.f32.mrf.mxu1 }
 0x173   : > { %v4092_v15 = vld [vmem:[%s4204_s28 + $0x440] ss:$12 sps:$4 sm:$0xff]  }
 0x174   : > { %v4570_v16 = vpop.f32.mrf.mxu0  ;;  %2069 = vmatmul.mubr.bf16.gmra.mxu0 %v4083_v51  ;;  %v4572_v19 = vpop.f32.mrf.mxu1  ;;  %3779 = vmatmul.mubr.msk.bf16.gmra.mxu1 %vm1547_vm0, %v4087_v52  ;;  %v4095_v23 = vld [vmem:[%s4204_s28 + $0x3ac] ss:$12 sps:$4 sm:$0xff]  }
 0x175   : > { %5144 = vst [vmem:[#allocation15_spill] sm:$0xff] %v4572_v19  ;;  %2076 = vmatprep.mubr.bf16.mxu0 %v4090_v63  ;;  %3782 = vmatprep.mubr.msk.bf16.mxu1 %vm1547_vm0, %v4091_v0  ;;  %v4096_v51 = vld [vmem:[%s4204_s28 + $0x458] ss:$12 sps:$4 sm:$0xff]  }
 0x176   : > { %v1880_v20 = vpop.f32.mrf.mxu0  ;;  %v2264_v24 = vpop.f32.mrf.mxu1 }
 0x178   : > { %v4576_v39 = vpop.f32.mrf.mxu0  ;;  %v4578_v40 = vpop.f32.mrf.mxu1 }
 0x179   : > { %5145 = vst [vmem:[#allocation16_spill] sm:$0xff] %v4578_v40 }
 0x17a   : > { %v1883_v36 = vpop.f32.mrf.mxu0  ;;  %v2267_v19 = vpop.f32.mrf.mxu1 }
 0x17b   : > { %v4097_v36 = vld [vmem:[%s4204_s28 + $0x470] ss:$12 sps:$4 sm:$0xff]  }
 0x17c   : > { %v4584_v52 = vpop.f32.mrf.mxu0  ;;  %2077 = vmatmul.mubr.bf16.gmra.mxu0 %v4088_v48  ;;  %v4586_v63 = vpop.f32.mrf.mxu1  ;;  %3783 = vmatmul.mubr.msk.bf16.gmra.mxu1 %vm1547_vm0, %v4092_v15  ;;  %v4100_v19 = vld [vmem:[%s4204_s28 + $0x3c4] ss:$12 sps:$4 sm:$0xff]   ;;  %v4101_v48 = vld [vmem:[%s4204_s28 + $0x488] ss:$12 sps:$4 sm:$0xff]  }
 0x17d   : > { %5146 = vst [vmem:[#allocation17_spill] sm:$0xff] %v4586_v63  ;;  %2084 = vmatprep.mubr.bf16.mxu0 %v4095_v23  ;;  %3786 = vmatprep.mubr.msk.bf16.mxu1 %vm1547_vm0, %v4096_v51 }
 0x17e   : > { %v1888_v0 = vpop.f32.mrf.mxu0  ;;  %v2272_v20 = vpop.f32.mrf.mxu1 }
 0x180   : > { %v4590_v24 = vpop.f32.mrf.mxu0  ;;  %v4592_v40 = vpop.f32.mrf.mxu1 }
 0x181   : > { %5147 = vst [vmem:[#allocation18_spill] sm:$0xff] %v4592_v40 }
 0x182   : > { %v1891_v63 = vpop.f32.mrf.mxu0  ;;  %v2275_v38 = vpop.f32.mrf.mxu1 }
 0x183   : > { %v4105_v63 = vld [vmem:[%s4204_s28 + $0x3dc] ss:$12 sps:$4 sm:$0xff]   ;;  %v4106_v38 = vld [vmem:[%s4204_s28 + $0x4b8] ss:$12 sps:$4 sm:$0xff]  }
 0x184   : > { %v4598_v15 = vpop.f32.mrf.mxu0  ;;  %2085 = vmatmul.mubr.bf16.gmra.mxu0 %v4093_v4  ;;  %v4600_v23 = vpop.f32.mrf.mxu1  ;;  %3787 = vmatmul.mubr.msk.bf16.gmra.mxu1 %vm1547_vm0, %v4097_v36  ;;  %v4615_v4 = vld [vmem:[%s5130_s2] ss:$0 sm:$0xff] }
 0x185   : > { %5148 = vst [vmem:[#allocation19_spill] sm:$0xff] %v4600_v23  ;;  %2092 = vmatprep.mubr.bf16.mxu0 %v4100_v19  ;;  %3790 = vmatprep.mubr.msk.bf16.mxu1 %vm1547_vm0, %v4101_v48  ;;  %v1783_v19 = vadd.f32 %v4615_v4, %v4402_v5  ;;  %v1786_v5 = vadd.f32 %v4615_v4, %v4408_v9 }
 0x186   : > { %v1896_v51 = vpop.f32.mrf.mxu0  ;;  %v2280_v0 = vpop.f32.mrf.mxu1 }
 0x187   : > { %v1775_v0 = vadd.f32 %v4615_v4, %v4388_v57  ;;  %v4103_v57 = vld [vmem:[%s4204_s28 + $0x3d8] ss:$12 sps:$4 sm:$0xff]  }
 0x188   : > { %v4604_v20 = vpop.f32.mrf.mxu0  ;;  %v4606_v40 = vpop.f32.mrf.mxu1 }
 0x189   : > { %5149 = vst [vmem:[#allocation20_spill] sm:$0xff] %v4606_v40 }
 0x18a   : > { %v1899_v23 = vpop.f32.mrf.mxu0  ;;  %v2283_v36 = vpop.f32.mrf.mxu1 }
 0x18c   : > { %v4619_v48 = vpop.f32.mrf.mxu0  ;;  %2093 = vmatmul.mubr.bf16.gmra.mxu0 %v4098_v28  ;;  %v3696_v51 = vpop.f32.mrf.mxu1  ;;  %3791 = vmatmul.mubr.msk.bf16.gmra.mxu1 %vm1547_vm0, %v4102_v56  ;;  %v4107_v56 = vld [vmem:[%s4204_s28 + $0x4d0] ss:$12 sps:$4 sm:$0xff]  }
 0x18d   : > { %v2328_v40 = vadd.f32 %v3696_v51, %v1783_v19  ;;  %2100 = vmatprep.mubr.bf16.mxu0 %v4105_v63  ;;  %3794 = vmatprep.mubr.msk.bf16.mxu1 %vm1547_vm0, %v4106_v38  ;;  %v1778_v63 = vadd.f32 %v4615_v4, %v4394_v61 }
 0x18e   : > { %v1904_v23 = vpop.f32.mrf.mxu0  ;;  %v2319_v36 = vpop.f32.mrf.mxu1 }
 0x18f   : > { %v2320_v50 = vadd.f32 %v2319_v36, %v1775_v0  ;;  %v2832_v19 = vmax.f32 %v2328_v40, 0.0  ;;  %v4110_v23 = vld [vmem:[%s4204_s28 + $0x3f4] ss:$12 sps:$4 sm:$0xff]   ;;  %v1799_v36 = vadd.f32 %v4615_v4, %v4430_v29 }
 0x190   : > { %v4627_v12 = vpop.f32.mrf.mxu0  ;;  %v3697_v28 = vpop.f32.mrf.mxu1 }
 0x191   : > { %v2830_v38 = vmax.f32 %v2320_v50, 0.0  ;;  %v2331_v51 = vadd.f32 %v3697_v28, %v1786_v5  ;;  %v1791_v50 = vadd.f32 %v4615_v4, %v4416_v17 }
 0x192   : > { %v1907_v9 = vpop.f32.mrf.mxu0  ;;  %v2322_v0 = vpop.f32.mrf.mxu1 }
 0x193   : > { %v2958_v2 = vmax.f32 %v2830_v38, %v2832_v19  ;;  %v2323_v32 = vadd.f32 %v2322_v0, %v1778_v63  ;;  %v2833_v40 = vmax.f32 %v2331_v51, 0.0  ;;  %v4112_v38 = vld [vmem:[%s4204_s28 + $0x500] ss:$12 sps:$4 sm:$0xff]   ;;  %v4116_v0 = vld [vmem:[%s4204_s28 + $0x518] ss:$12 sps:$4 sm:$0xff]  }
 0x194   : > { %v4642_v14 = vpop.f32.mrf.mxu0  ;;  %2101 = vmatmul.mubr.bf16.gmra.mxu0 %v4103_v57  ;;  %v3700_v61 = vpop.f32.mrf.mxu1  ;;  %3795 = vmatmul.mubr.msk.bf16.gmra.mxu1 %vm1547_vm0, %v4107_v56  ;;  %v1802_v56 = vadd.f32 %v4615_v4, %v4436_v33  ;;  %v4115_v33 = vld [vmem:[%s4204_s28 + $0x40c] ss:$12 sps:$4 sm:$0xff]  }
 0x195   : > { %3023 = vst.msk [vmem:[#allocation2] sm:$0xff] %vm3022_vm1, %v2958_v2  ;;  %v2831_v29 = vmax.f32 %v2323_v32, 0.0  ;;  %v2344_v5 = vadd.f32 %v3700_v61, %v1799_v36  ;;  %2108 = vmatprep.mubr.bf16.mxu0 %v4110_v23  ;;  %3798 = vmatprep.mubr.msk.bf16.mxu1 %vm1547_vm0, %v4111_v44  ;;  %v4108_v32 = vld [vmem:[%s4204_s28 + $0x3f0] ss:$12 sps:$4 sm:$0xff]   ;;  %v1794_v44 = vadd.f32 %v4615_v4, %v4422_v21 }
 0x196   : > { %v1912_v28 = vpop.f32.mrf.mxu0  ;;  %v2335_v57 = vpop.f32.mrf.mxu1 }
 0x197   : > { %v2959_v63 = vmax.f32 %v2831_v29, %v2833_v40  ;;  %v2336_v19 = vadd.f32 %v2335_v57, %v1791_v50  ;;  %v2836_v51 = vmax.f32 %v2344_v5, 0.0  ;;  %v1815_v50 = vadd.f32 %v4615_v4, %v4458_v53 }
 0x198   : > { %v4656_v17 = vpop.f32.mrf.mxu0  ;;  %v3701_v2 = vpop.f32.mrf.mxu1  ;;  %v1807_v5 = vadd.f32 %v4615_v4, %v4444_v41  ;;  %v4113_v41 = vld [vmem:[%s4204_s28 + $0x408] ss:$12 sps:$4 sm:$0xff]  }
 0x199   : > { %3024 = vst.msk [vmem:[#allocation2 + $0x8] sm:$0xff] %vm3022_vm1, %v2959_v63  ;;  %v2834_v23 = vmax.f32 %v2336_v19, 0.0  ;;  %v2347_v9 = vadd.f32 %v3701_v2, %v1802_v56  ;;  %v1818_v2 = vadd.f32 %v4615_v4, %v4464_v59  ;;  %v4117_v59 = vld [vmem:[%s4204_s28 + $0x530] ss:$12 sps:$4 sm:$0xff]  }
 0x19a   : > { %v1915_v36 = vpop.f32.mrf.mxu0  ;;  %v2338_v61 = vpop.f32.mrf.mxu1 }
 0x19b   : > { %v2960_v40 = vmax.f32 %v2834_v23, %v2836_v51  ;;  %v2339_v29 = vadd.f32 %v2338_v61, %v1794_v44  ;;  %v2837_v57 = vmax.f32 %v2347_v9, 0.0  ;;  %v1810_v44 = vadd.f32 %v4615_v4, %v4450_v45  ;;  %v4121_v45 = vld [vmem:[%s4204_s28 + $0x548] ss:$12 sps:$4 sm:$0xff]  }
 0x19c   : > { %v4667_v28 = vpop.f32.mrf.mxu0  ;;  %2109 = vmatmul.mubr.bf16.gmra.mxu0 %v4108_v32  ;;  %v3704_v21 = vpop.f32.mrf.mxu1  ;;  %3799 = vmatmul.mubr.msk.bf16.gmra.mxu1 %vm1547_vm0, %v4112_v38 }
 0x19d   : > { %3025 = vst.msk [vmem:[#allocation2 + $0x10] sm:$0xff] %vm3022_vm1, %v2960_v40  ;;  %v2835_v56 = vmax.f32 %v2339_v29, 0.0  ;;  %v2360_v63 = vadd.f32 %v3704_v21, %v1815_v50  ;;  %2116 = vmatprep.mubr.bf16.mxu0 %v4115_v33  ;;  %3802 = vmatprep.mubr.msk.bf16.mxu1 %vm1547_vm0, %v4116_v0  ;;  %v4120_v40 = vld [vmem:[%s4204_s28 + $0x424] ss:$12 sps:$4 sm:$0xff]  }
 0x19e   : > { %v1920_v53 = vpop.f32.mrf.mxu0  ;;  %v2351_v19 = vpop.f32.mrf.mxu1 }
 0x19f   : > { %v2961_v32 = vmax.f32 %v2835_v56, %v2837_v57  ;;  %v2352_v38 = vadd.f32 %v2351_v19, %v1807_v5  ;;  %v2840_v36 = vmax.f32 %v2360_v63, 0.0  ;;  %v1831_v5 = vadd.f32 %v4615_v4, %v4486_v25 }
 0x1a0   : > { %v3087_v51 = vld [vmem:[#allocation2] ss:$2 sm:$0xff]  ;;  %v3151_v23 = vld [vmem:[#allocation2 + $0x1] ss:$2 sm:$0xff]  ;;  %v4685_v9 = vpop.f32.mrf.mxu0  ;;  %v3705_v33 = vpop.f32.mrf.mxu1  ;;  %v1823_v63 = vadd.f32 %v4615_v4, %v4472_v7  ;;  %v1826_v7 = vadd.f32 %v4615_v4, %v4478_v13  ;;  %v1847_v13 = vadd.f32 %v4615_v4, %v4514_v1 }
 0x1a1   : > { %v3214_v0 = vmax.f32 %v3087_v51, %v3151_v23  ;;  %3026 = vst.msk [vmem:[#allocation2 + $0x18] sm:$0xff] %vm3022_vm1, %v2961_v32  ;;  %v2838_v61 = vmax.f32 %v2352_v38, 0.0  ;;  %v2363_v50 = vadd.f32 %v3705_v33, %v1818_v2  ;;  %v4118_v33 = vld [vmem:[%s4204_s28 + $0x420] ss:$12 sps:$4 sm:$0xff]  }
 0x1a2   : > { %v1923_v29 = vpop.f32.mrf.mxu0  ;;  %v2354_v21 = vpop.f32.mrf.mxu1 }
 0x1a3   : > { %3246 = vst.msk [vmem:[%s4683_s9] sm:$0xff] %vm3022_vm1, %v3214_v0  ;;  %v2962_v57 = vmax.f32 %v2838_v61, %v2840_v36  ;;  %v2355_v56 = vadd.f32 %v2354_v21, %v1810_v44  ;;  %v2841_v2 = vmax.f32 %v2363_v50, 0.0  ;;  %v4122_v50 = vld [vmem:[%s4204_s28 + $0x560] ss:$12 sps:$4 sm:$0xff]   ;;  %v4125_v21 = vld [vmem:[%s4204_s28 + $0x43c] ss:$12 sps:$4 sm:$0xff]  }
 0x1a4   : > { %v4695_v53 = vpop.f32.mrf.mxu0  ;;  %2117 = vmatmul.mubr.bf16.gmra.mxu0 %v4113_v41  ;;  %v3708_v19 = vpop.f32.mrf.mxu1  ;;  %3803 = vmatmul.mubr.msk.bf16.gmra.mxu1 %vm1547_vm0, %v4117_v59  ;;  %v1834_v41 = vadd.f32 %v4615_v4, %v4492_v31 }
 0x1a5   : > { %3027 = vst.msk [vmem:[#allocation2 + $0x20] sm:$0xff] %vm3022_vm1, %v2962_v57  ;;  %v2839_v32 = vmax.f32 %v2355_v56, 0.0  ;;  %v2376_v25 = vadd.f32 %v3708_v19, %v1831_v5  ;;  %2124 = vmatprep.mubr.bf16.mxu0 %v4120_v40  ;;  %3806 = vmatprep.mubr.msk.bf16.mxu1 %vm1547_vm0, %v4121_v45  ;;  %v4126_v5 = vld [vmem:[%s4204_s28 + $0x578] ss:$12 sps:$4 sm:$0xff]  }
 0x1a6   : > { %v1928_v38 = vpop.f32.mrf.mxu0  ;;  %v2367_v44 = vpop.f32.mrf.mxu1 }
 0x1a7   : > { %v2963_v51 = vmax.f32 %v2839_v32, %v2841_v2  ;;  %v2368_v23 = vadd.f32 %v2367_v44, %v1823_v63  ;;  %v2844_v45 = vmax.f32 %v2376_v25, 0.0  ;;  %v1839_v25 = vadd.f32 %v4615_v4, %v4500_v43 }
 0x1a8   : > { %v3089_v59 = vld [vmem:[#allocation2 + $0x10] ss:$2 sm:$0xff]  ;;  %v3153_v0 = vld [vmem:[#allocation2 + $0x11] ss:$2 sm:$0xff]  ;;  %v4707_v36 = vpop.f32.mrf.mxu0  ;;  %v3709_v61 = vpop.f32.mrf.mxu1  ;;  %v1842_v43 = vadd.f32 %v4615_v4, %v4506_v49  ;;  %v1863_v49 = vadd.f32 %v4615_v4, %v4542_v55 }
 0x1a9   : > { %v3215_v40 = vmax.f32 %v3089_v59, %v3153_v0  ;;  %3028 = vst.msk [vmem:[#allocation2 + $0x28] sm:$0xff] %vm3022_vm1, %v2963_v51  ;;  %v2842_v29 = vmax.f32 %v2368_v23, 0.0  ;;  %v2379_v31 = vadd.f32 %v3709_v61, %v1834_v41  ;;  %v1850_v23 = vadd.f32 %v4615_v4, %v4520_v11  ;;  %v4123_v59 = vld [vmem:[%s4204_s28 + $0x438] ss:$12 sps:$4 sm:$0xff]  }
 0x1aa   : > { %v1931_v57 = vpop.f32.mrf.mxu0  ;;  %v2370_v56 = vpop.f32.mrf.mxu1 }
 0x1ab   : > { %3247 = vst.msk [vmem:[%s4683_s9 + $0x8] sm:$0xff] %vm3022_vm1, %v3215_v40  ;;  %v2964_v19 = vmax.f32 %v2842_v29, %v2844_v45  ;;  %v2371_v63 = vadd.f32 %v2370_v56, %v1826_v7  ;;  %v2845_v38 = vmax.f32 %v2379_v31, 0.0  ;;  %v4127_v45 = vld [vmem:[%s4204_s28 + $0x590] ss:$12 sps:$4 sm:$0xff]   ;;  %v4131_v57 = vld [vmem:[%s4204_s28 + $0x5a8] ss:$12 sps:$4 sm:$0xff]  }
 0x1ac   : > { %v4717_v2 = vpop.f32.mrf.mxu0  ;;  %2125 = vmatmul.mubr.bf16.gmra.mxu0 %v4118_v33  ;;  %v3712_v32 = vpop.f32.mrf.mxu1  ;;  %3807 = vmatmul.mubr.msk.bf16.gmra.mxu1 %vm1547_vm0, %v4122_v50 }
 0x1ad   : > { %3029 = vst.msk [vmem:[#allocation2 + $0x30] sm:$0xff] %vm3022_vm1, %v2964_v19  ;;  %v2843_v44 = vmax.f32 %v2371_v63, 0.0  ;;  %v2392_v1 = vadd.f32 %v3712_v32, %v1847_v13  ;;  %2132 = vmatprep.mubr.bf16.mxu0 %v4125_v21  ;;  %3810 = vmatprep.mubr.msk.bf16.mxu1 %vm1547_vm0, %v4126_v5  ;;  %v4130_v5 = vld [vmem:[%s4204_s28 + $0x454] ss:$12 sps:$4 sm:$0xff]  }
 0x1ae   : > { %v1936_v41 = vpop.f32.mrf.mxu0  ;;  %v2383_v51 = vpop.f32.mrf.mxu1 }
 0x1af   : > { %v2965_v33 = vmax.f32 %v2843_v44, %v2845_v38  ;;  %v2384_v7 = vadd.f32 %v2383_v51, %v1839_v25  ;;  %v2848_v31 = vmax.f32 %v2392_v1, 0.0  ;;  %v1855_v38 = vadd.f32 %v4615_v4, %v4528_v27 }
 0x1b0   : > { %v3091_v0 = vld [vmem:[#allocation2 + $0x20] ss:$2 sm:$0xff]  ;;  %v3155_v61 = vld [vmem:[#allocation2 + $0x21] ss:$2 sm:$0xff]  ;;  %v4729_v50 = vpop.f32.mrf.mxu0  ;;  %v3713_v40 = vpop.f32.mrf.mxu1  ;;  %v1858_v27 = vadd.f32 %v4615_v4, %v4534_v37  ;;  %v1879_v37 = vadd.f32 %v4615_v4, %v4570_v16 }
 0x1b1   : > { %v3216_v29 = vmax.f32 %v3091_v0, %v3155_v61  ;;  %3030 = vst.msk [vmem:[#allocation2 + $0x38] sm:$0xff] %vm3022_vm1, %v2965_v33  ;;  %v2846_v21 = vmax.f32 %v2384_v7, 0.0  ;;  %v2395_v11 = vadd.f32 %v3713_v40, %v1850_v23  ;;  %v1866_v23 = vadd.f32 %v4615_v4, %v4548_v3 }
 0x1b2   : > { %v1939_v56 = vpop.f32.mrf.mxu0  ;;  %v2386_v13 = vpop.f32.mrf.mxu1 }
 0x1b3   : > { %3248 = vst.msk [vmem:[%s4683_s9 + $0x10] sm:$0xff] %vm3022_vm1, %v3216_v29  ;;  %v2966_v19 = vmax.f32 %v2846_v21, %v2848_v31  ;;  %v2387_v63 = vadd.f32 %v2386_v13, %v1842_v43  ;;  %v2849_v44 = vmax.f32 %v2395_v11, 0.0  ;;  %v4135_v11 = vld [vmem:[%s4204_s28 + $0x46c] ss:$12 sps:$4 sm:$0xff]  }
 0x1b4   : > { %v4739_v32 = vpop.f32.mrf.mxu0  ;;  %2133 = vmatmul.mubr.bf16.gmra.mxu0 %v4123_v59  ;;  %v3716_v25 = vpop.f32.mrf.mxu1  ;;  %3811 = vmatmul.mubr.msk.bf16.gmra.mxu1 %vm1547_vm0, %v4127_v45  ;;  %v4128_v59 = vld [vmem:[%s4204_s28 + $0x450] ss:$12 sps:$4 sm:$0xff]   ;;  %v4132_v45 = vld [vmem:[%s4204_s28 + $0x5c0] ss:$12 sps:$4 sm:$0xff]  }
 0x1b5   : > { %3031 = vst.msk [vmem:[#allocation2 + $0x40] sm:$0xff] %vm3022_vm1, %v2966_v19  ;;  %v2847_v1 = vmax.f32 %v2387_v63, 0.0  ;;  %v2408_v55 = vadd.f32 %v3716_v25, %v1863_v49  ;;  %2140 = vmatprep.mubr.bf16.mxu0 %v4130_v5  ;;  %3814 = vmatprep.mubr.msk.bf16.mxu1 %vm1547_vm0, %v4131_v57  ;;  %v4136_v5 = vld [vmem:[%s4204_s28 + $0x5d8] ss:$12 sps:$4 sm:$0xff]   ;;  %v1871_v25 = vadd.f32 %v4615_v4, %v4556_v35 }
 0x1b6   : > { %v1944_v41 = vpop.f32.mrf.mxu0  ;;  %v2399_v51 = vpop.f32.mrf.mxu1  ;;  %v1874_v35 = vadd.f32 %v4615_v4, %v4562_v47 }
 0x1b7   : > { %v2967_v33 = vmax.f32 %v2847_v1, %v2849_v44  ;;  %v2400_v7 = vadd.f32 %v2399_v51, %v1855_v38  ;;  %v2852_v31 = vmax.f32 %v2408_v55, 0.0  ;;  %v1882_v41 = vadd.f32 %v4615_v4, %v4576_v39 }
 0x1b8   : > { %v3093_v43 = vld [vmem:[#allocation2 + $0x30] ss:$2 sm:$0xff]  ;;  %v3157_v0 = vld [vmem:[#allocation2 + $0x31] ss:$2 sm:$0xff]  ;;  %v4751_v61 = vpop.f32.mrf.mxu0  ;;  %v3717_v40 = vpop.f32.mrf.mxu1 }
 0x1b9   : > { %v3217_v29 = vmax.f32 %v3093_v43, %v3157_v0  ;;  %3032 = vst.msk [vmem:[#allocation2 + $0x48] sm:$0xff] %vm3022_vm1, %v2967_v33  ;;  %v2850_v21 = vmax.f32 %v2400_v7, 0.0  ;;  %v2411_v3 = vadd.f32 %v3717_v40, %v1866_v23  ;;  %v4133_v33 = vld [vmem:[%s4204_s28 + $0x468] ss:$12 sps:$4 sm:$0xff]   ;;  %v4137_v0 = vld [vmem:[%s4204_s28 + $0x5f0] ss:$12 sps:$4 sm:$0xff]  }
 0x1ba   : > { %v1947_v57 = vpop.f32.mrf.mxu0  ;;  %v2402_v56 = vpop.f32.mrf.mxu1 }
 0x1bb   : > { %3249 = vst.msk [vmem:[%s4683_s9 + $0x18] sm:$0xff] %vm3022_vm1, %v3217_v29  ;;  %v2968_v13 = vmax.f32 %v2850_v21, %v2852_v31  ;;  %v2403_v49 = vadd.f32 %v2402_v56, %v1858_v27  ;;  %v2853_v38 = vmax.f32 %v2411_v3, 0.0  ;;  %v1895_v3 = vadd.f32 %v4615_v4, %v4598_v15 }
 0x1bc   : > { %v4761_v19 = vpop.f32.mrf.mxu0  ;;  %2141 = vmatmul.mubr.bf16.gmra.mxu0 %v4128_v59  ;;  %v3720_v63 = vpop.f32.mrf.mxu1  ;;  %3815 = vmatmul.mubr.msk.bf16.gmra.mxu1 %vm1547_vm0, %v4132_v45  ;;  %v1887_v56 = vadd.f32 %v4615_v4, %v4584_v52 }
 0x1bd   : > { %3033 = vst.msk [vmem:[#allocation2 + $0x50] sm:$0xff] %vm3022_vm1, %v2968_v13  ;;  %v2851_v44 = vmax.f32 %v2403_v49, 0.0  ;;  %v2424_v16 = vadd.f32 %v3720_v63, %v1879_v37  ;;  %2148 = vmatprep.mubr.bf16.mxu0 %v4135_v11  ;;  %3818 = vmatprep.mubr.msk.bf16.mxu1 %vm1547_vm0, %v4136_v5 }
 0x1be   : > { %v1952_v1 = vpop.f32.mrf.mxu0  ;;  %v2415_v55 = vpop.f32.mrf.mxu1 }
 0x1bf   : > { %v2969_v51 = vmax.f32 %v2851_v44, %v2853_v38  ;;  %v2416_v23 = vadd.f32 %v2415_v55, %v1871_v25  ;;  %v2856_v45 = vmax.f32 %v2424_v16, 0.0  ;;  %v1898_v25 = vadd.f32 %v4615_v4, %v4604_v20 }
 0x1c0   : > { %v3095_v7 = vld [vmem:[#allocation2 + $0x40] ss:$2 sm:$0xff]  ;;  %v3159_v59 = vld [vmem:[#allocation2 + $0x41] ss:$2 sm:$0xff]  ;;  %v4773_v27 = vpop.f32.mrf.mxu0  ;;  %v3721_v43 = vpop.f32.mrf.mxu1  ;;  %v1890_v16 = vadd.f32 %v4615_v4, %v4590_v24  ;;  %v1911_v20 = vadd.f32 %v4615_v4, %v4642_v14  ;;  %v1914_v14 = vadd.f32 %v4615_v4, %v4656_v17  ;;  %v1927_v17 = vadd.f32 %v4615_v4, %v4695_v53 }
 0x1c1   : > { %v3218_v40 = vmax.f32 %v3095_v7, %v3159_v59  ;;  %3034 = vst.msk [vmem:[#allocation2 + $0x58] sm:$0xff] %vm3022_vm1, %v2969_v51  ;;  %v2854_v29 = vmax.f32 %v2416_v23, 0.0  ;;  %v2427_v31 = vadd.f32 %v3721_v43, %v1882_v41  ;;  %v1930_v53 = vadd.f32 %v4615_v4, %v4707_v36 }
 0x1c2   : > { %v1955_v39 = vpop.f32.mrf.mxu0  ;;  %v2418_v21 = vpop.f32.mrf.mxu1  ;;  %v1943_v36 = vadd.f32 %v4615_v4, %v4739_v32  ;;  %v1946_v32 = vadd.f32 %v4615_v4, %v4751_v61 }
 0x1c3   : > { %3250 = vst.msk [vmem:[%s4683_s9 + $0x20] sm:$0xff] %vm3022_vm1, %v3218_v40  ;;  %v2970_v47 = vmax.f32 %v2854_v29, %v2856_v45  ;;  %v2419_v11 = vadd.f32 %v2418_v21, %v1874_v35  ;;  %v2857_v37 = vmax.f32 %v2427_v31, 0.0  ;;  %v1903_v45 = vadd.f32 %v4615_v4, %v4619_v48 }
 0x1c4   : > { %v4781_v5 = vpop.f32.mrf.mxu0  ;;  %2149 = vmatmul.mubr.bf16.gmra.mxu0 %v4133_v33  ;;  %v3724_v57 = vpop.f32.mrf.mxu1  ;;  %3819 = vmatmul.mubr.msk.bf16.gmra.mxu1 %vm1547_vm0, %v4137_v0 }
 0x1c5   : > { %3035 = vst.msk [vmem:[#allocation2 + $0x60] sm:$0xff] %vm3022_vm1, %v2970_v47  ;;  %v2855_v13 = vmax.f32 %v2419_v11, 0.0  ;;  %v2440_v49 = vadd.f32 %v3724_v57, %v1895_v3  ;;  %v1906_v57 = vadd.f32 %v4615_v4, %v4627_v12  ;;  %v1959_v61 = vadd.f32 %v4615_v4, %v4781_v5 }
 0x1c6   : > { %v1960_v63 = vpop.f32.mrf.mxu0  ;;  %v2431_v15 = vpop.f32.mrf.mxu1 }
 0x1c7   : > { %v2971_v38 = vmax.f32 %v2855_v13, %v2857_v37  ;;  %v2432_v44 = vadd.f32 %v2431_v15, %v1887_v56  ;;  %v2860_v23 = vmax.f32 %v2440_v49, 0.0 }
 0x1c8   : > { %v3097_v1 = vld [vmem:[#allocation2 + $0x50] ss:$2 sm:$0xff]  ;;  %v3161_v55 = vld [vmem:[#allocation2 + $0x51] ss:$2 sm:$0xff]  ;;  %v4791_v41 = vpop.f32.mrf.mxu0  ;;  %v3725_v52 = vpop.f32.mrf.mxu1 }
 0x1c9   : > { %v3219_v51 = vmax.f32 %v3097_v1, %v3161_v55  ;;  %3036 = vst.msk [vmem:[#allocation2 + $0x68] sm:$0xff] %vm3022_vm1, %v2971_v38  ;;  %v2858_v33 = vmax.f32 %v2432_v44, 0.0  ;;  %v2443_v35 = vadd.f32 %v3725_v52, %v1898_v25  ;;  %v1919_v52 = vadd.f32 %v4615_v4, %v4667_v28 }
 0x1ca   : > { %v1963_v7 = vpop.f32.mrf.mxu0  ;;  %v2434_v59 = vpop.f32.mrf.mxu1 }
 0x1cb   : > { %3251 = vst.msk [vmem:[%s4683_s9 + $0x28] sm:$0xff] %vm3022_vm1, %v3219_v51  ;;  %v2972_v43 = vmax.f32 %v2858_v33, %v2860_v23  ;;  %v2435_v24 = vadd.f32 %v2434_v59, %v1890_v16  ;;  %v2861_v29 = vmax.f32 %v2443_v35, 0.0 }
 0x1cc   : > { %v4798_v0 = vpop.f32.mrf.mxu0  ;;  %v3728_v40 = vpop.f32.mrf.mxu1 }
 0x1cd   : > { %3037 = vst.msk [vmem:[#allocation2 + $0x70] sm:$0xff] %vm3022_vm1, %v2972_v43  ;;  %v2859_v31 = vmax.f32 %v2435_v24, 0.0  ;;  %v2456_v39 = vadd.f32 %v3728_v40, %v1911_v20  ;;  %v1922_v43 = vadd.f32 %v4615_v4, %v4685_v9 }
 0x1ce   : > { %v1968_v21 = vpop.f32.mrf.mxu0  ;;  %v2447_v3 = vpop.f32.mrf.mxu1 }
 0x1cf   : > { %v2973_v47 = vmax.f32 %v2859_v31, %v2861_v29  ;;  %v2448_v11 = vadd.f32 %v2447_v3, %v1903_v45  ;;  %v2864_v63 = vmax.f32 %v2456_v39, 0.0 }
 0x1d0   : > { %v3099_v56 = vld [vmem:[#allocation2 + $0x60] ss:$2 sm:$0xff]  ;;  %v3163_v37 = vld [vmem:[#allocation2 + $0x61] ss:$2 sm:$0xff]  ;;  %v4807_v13 = vpop.f32.mrf.mxu0  ;;  %v3729_v48 = vpop.f32.mrf.mxu1 }
 0x1d1   : > { %v3220_v49 = vmax.f32 %v3099_v56, %v3163_v37  ;;  %3038 = vst.msk [vmem:[#allocation2 + $0x78] sm:$0xff] %vm3022_vm1, %v2973_v47  ;;  %v2862_v15 = vmax.f32 %v2448_v11, 0.0  ;;  %v2459_v25 = vadd.f32 %v3729_v48, %v1914_v14  ;;  %v1935_v56 = vadd.f32 %v4615_v4, %v4717_v2 }
 0x1d2   : > { %v1971_v38 = vpop.f32.mrf.mxu0  ;;  %v2450_v44 = vpop.f32.mrf.mxu1 }
 0x1d3   : > { %3252 = vst.msk [vmem:[%s4683_s9 + $0x30] sm:$0xff] %vm3022_vm1, %v3220_v49  ;;  %v2974_v16 = vmax.f32 %v2862_v15, %v2864_v63  ;;  %v2451_v12 = vadd.f32 %v2450_v44, %v1906_v57  ;;  %v2865_v51 = vmax.f32 %v2459_v25, 0.0  ;;  %v1938_v44 = vadd.f32 %v4615_v4, %v4729_v50 }
 0x1d4   : > { %v4814_v1 = vpop.f32.mrf.mxu0  ;;  %v3732_v55 = vpop.f32.mrf.mxu1 }
 0x1d5   : > { %3039 = vst.msk [vmem:[#allocation2 + $0x80] sm:$0xff] %vm3022_vm1, %v2974_v16  ;;  %v2863_v23 = vmax.f32 %v2451_v12, 0.0  ;;  %v2472_v33 = vadd.f32 %v3732_v55, %v1927_v17 }
 0x1d6   : > { %v1976_v35 = vpop.f32.mrf.mxu0  ;;  %v2463_v7 = vpop.f32.mrf.mxu1 }
 0x1d7   : > { %v2975_v59 = vmax.f32 %v2863_v23, %v2865_v51  ;;  %v2464_v20 = vadd.f32 %v2463_v7, %v1919_v52  ;;  %v2868_v31 = vmax.f32 %v2472_v33, 0.0 }
 0x1d8   : > { %v3101_v24 = vld [vmem:[#allocation2 + $0x70] ss:$2 sm:$0xff]  ;;  %v3165_v40 = vld [vmem:[#allocation2 + $0x71] ss:$2 sm:$0xff]  ;;  %v4823_v45 = vpop.f32.mrf.mxu0  ;;  %v3733_v28 = vpop.f32.mrf.mxu1 }
 0x1d9   : > { %v3221_v29 = vmax.f32 %v3101_v24, %v3165_v40  ;;  %3040 = vst.msk [vmem:[#allocation2 + $0x88] sm:$0xff] %vm3022_vm1, %v2975_v59  ;;  %v2866_v39 = vmax.f32 %v2464_v20, 0.0  ;;  %v2475_v21 = vadd.f32 %v3733_v28, %v1930_v53  ;;  %v1951_v20 = vadd.f32 %v4615_v4, %v4761_v19 }
 0x1da   : > { %v1979_v3 = vpop.f32.mrf.mxu0  ;;  %v2466_v14 = vpop.f32.mrf.mxu1 }
 0x1db   : > { %3253 = vst.msk [vmem:[%s4683_s9 + $0x38] sm:$0xff] %vm3022_vm1, %v3221_v29  ;;  %v2976_v47 = vmax.f32 %v2866_v39, %v2868_v31  ;;  %v2467_v9 = vadd.f32 %v2466_v14, %v1922_v43  ;;  %v2869_v37 = vmax.f32 %v2475_v21, 0.0  ;;  %v1962_v31 = vadd.f32 %v4615_v4, %v4791_v41 }
 0x1dc   : > { %v4830_v11 = vpop.f32.mrf.mxu0  ;;  %v3736_v57 = vpop.f32.mrf.mxu1  ;;  %v1954_v21 = vadd.f32 %v4615_v4, %v4773_v27  ;;  %v1975_v41 = vadd.f32 %v4615_v4, %v4814_v1  ;;  %v1978_v1 = vadd.f32 %v4615_v4, %v4823_v45 }
 0x1dd   : > { %3041 = vst.msk [vmem:[#allocation2 + $0x90] sm:$0xff] %vm3022_vm1, %v2976_v47  ;;  %v2867_v48 = vmax.f32 %v2467_v9, 0.0  ;;  %v2488_v49 = vadd.f32 %v3736_v57, %v1943_v36 }
 0x1de   : > { %v1984_v63 = vpop.f32.mrf.mxu0  ;;  %v2479_v15 = vpop.f32.mrf.mxu1 }
 0x1df   : > { %v2977_v25 = vmax.f32 %v2867_v48, %v2869_v37  ;;  %v2480_v38 = vadd.f32 %v2479_v15, %v1935_v56  ;;  %v2872_v52 = vmax.f32 %v2488_v49, 0.0 }
 0x1e0   : > { %v3103_v17 = vld [vmem:[#allocation2 + $0x80] ss:$2 sm:$0xff]  ;;  %v3167_v16 = vld [vmem:[#allocation2 + $0x81] ss:$2 sm:$0xff]  ;;  %v4839_v12 = vpop.f32.mrf.mxu0  ;;  %v3737_v2 = vpop.f32.mrf.mxu1 }
 0x1e1   : > { %v3222_v55 = vmax.f32 %v3103_v17, %v3167_v16  ;;  %3042 = vst.msk [vmem:[#allocation2 + $0x98] sm:$0xff] %vm3022_vm1, %v2977_v25  ;;  %v2870_v51 = vmax.f32 %v2480_v38, 0.0  ;;  %v2491_v23 = vadd.f32 %v3737_v2, %v1946_v32  ;;  %v1967_v32 = vadd.f32 %v4615_v4, %v4798_v0 }
 0x1e2   : > { %v1987_v33 = vpop.f32.mrf.mxu0  ;;  %v2482_v35 = vpop.f32.mrf.mxu1 }
 0x1e3   : > { %3254 = vst.msk [vmem:[%s4683_s9 + $0x40] sm:$0xff] %vm3022_vm1, %v3222_v55  ;;  %v2978_v7 = vmax.f32 %v2870_v51, %v2872_v52  ;;  %v2483_v50 = vadd.f32 %v2482_v35, %v1938_v44  ;;  %v2873_v43 = vmax.f32 %v2491_v23, 0.0  ;;  %v1970_v52 = vadd.f32 %v4615_v4, %v4807_v13 }
 0x1e4   : > { %v1990_v53 = vpop.f32.mrf.mxu0  ;;  %v3740_v59 = vpop.f32.mrf.mxu1 }
 0x1e5   : > { %3043 = vst.msk [vmem:[#allocation2 + $0xa0] sm:$0xff] %vm3022_vm1, %v2978_v7  ;;  %v2871_v24 = vmax.f32 %v2483_v50, 0.0  ;;  %v2504_v40 = vadd.f32 %v3740_v59, %v1959_v61  ;;  %v1991_v45 = vadd.f32 %v4615_v4, %v1990_v53  ;;  %v1986_v53 = vadd.f32 %v4615_v4, %v4839_v12 }
 0x1e6   : > { %v1992_v28 = vpop.f32.mrf.mxu0  ;;  %v2495_v29 = vpop.f32.mrf.mxu1 }
 0x1e7   : > { %v2979_v5 = vmax.f32 %v2871_v24, %v2873_v43  ;;  %v2496_v39 = vadd.f32 %v2495_v29, %v1951_v20  ;;  %v2876_v9 = vmax.f32 %v2504_v40, 0.0  ;;  %v1983_v28 = vadd.f32 %v4615_v4, %v4830_v11 }
 0x1e8   : > { %v3105_v3 = vld [vmem:[#allocation2 + $0x90] ss:$2 sm:$0xff]  ;;  %v3169_v14 = vld [vmem:[#allocation2 + $0x91] ss:$2 sm:$0xff]  ;;  %v1993_v36 = vpop.f32.mrf.mxu0  ;;  %v3741_v19 = vpop.f32.mrf.mxu1 }
 0x1e9   : > { %v3223_v47 = vmax.f32 %v3105_v3, %v3169_v14  ;;  %3044 = vst.msk [vmem:[#allocation2 + $0xa8] sm:$0xff] %vm3022_vm1, %v2979_v5  ;;  %v2874_v57 = vmax.f32 %v2496_v39, 0.0  ;;  %v2507_v56 = vadd.f32 %v3741_v19, %v1962_v31  ;;  %v1994_v3 = vadd.f32 %v4615_v4, %v1993_v36 }
 0x1ea   : > { %v1995_v37 = vpop.f32.mrf.mxu0  ;;  %v2498_v48 = vpop.f32.mrf.mxu1 }
 0x1eb   : > { %3255 = vst.msk [vmem:[%s4683_s9 + $0x48] sm:$0xff] %vm3022_vm1, %v3223_v47  ;;  %v2980_v49 = vmax.f32 %v2874_v57, %v2876_v9  ;;  %v2499_v63 = vadd.f32 %v2498_v48, %v1954_v21  ;;  %v2877_v25 = vmax.f32 %v2507_v56, 0.0 }
 0x1ec   : > { %v1998_v27 = vpop.f32.mrf.mxu0  ;;  %v3744_v15 = vpop.f32.mrf.mxu1 }
 0x1ed   : > { %3045 = vst.msk [vmem:[#allocation2 + $0xb0] sm:$0xff] %vm3022_vm1, %v2980_v49  ;;  %v2875_v38 = vmax.f32 %v2499_v63, 0.0  ;;  %v2520_v44 = vadd.f32 %v3744_v15, %v1975_v41 }
 0x1ee   : > { %v2000_v17 = vpop.f32.mrf.mxu0  ;;  %v2511_v16 = vpop.f32.mrf.mxu1 }
 0x1ef   : > { %v2981_v2 = vmax.f32 %v2875_v38, %v2877_v25  ;;  %v2512_v55 = vadd.f32 %v2511_v16, %v1967_v32  ;;  %v2880_v61 = vmax.f32 %v2520_v44, 0.0  ;;  %v1999_v38 = vadd.f32 %v4615_v4, %v1998_v27 }
 0x1f0   : > { %v3107_v51 = vld [vmem:[#allocation2 + $0xa0] ss:$2 sm:$0xff]  ;;  %v3171_v23 = vld [vmem:[#allocation2 + $0xa1] ss:$2 sm:$0xff]  ;;  %v2001_v33 = vpop.f32.mrf.mxu0  ;;  %v3745_v0 = vpop.f32.mrf.mxu1 }
 0x1f1   : > { %v3224_v35 = vmax.f32 %v3107_v51, %v3171_v23  ;;  %3046 = vst.msk [vmem:[#allocation2 + $0xb8] sm:$0xff] %vm3022_vm1, %v2981_v2  ;;  %v2878_v7 = vmax.f32 %v2512_v55, 0.0  ;;  %v2523_v50 = vadd.f32 %v3745_v0, %v1978_v1  ;;  %v2002_v23 = vadd.f32 %v4615_v4, %v2001_v33 }
 0x1f2   : > { %v2003_v59 = vpop.f32.mrf.mxu0  ;;  %v2514_v20 = vpop.f32.mrf.mxu1 }
 0x1f3   : > { %3256 = vst.msk [vmem:[%s4683_s9 + $0x50] sm:$0xff] %vm3022_vm1, %v3224_v35  ;;  %v2982_v43 = vmax.f32 %v2878_v7, %v2880_v61  ;;  %v2515_v24 = vadd.f32 %v2514_v20, %v1970_v52  ;;  %v2881_v29 = vmax.f32 %v2523_v50, 0.0 }
 0x1f4   : > { %v2006_v40 = vpop.f32.mrf.mxu0  ;;  %v3748_v13 = vpop.f32.mrf.mxu1 }
 0x1f5   : > { %3047 = vst.msk [vmem:[#allocation2 + $0xc0] sm:$0xff] %vm3022_vm1, %v2982_v43  ;;  %v2879_v31 = vmax.f32 %v2515_v24, 0.0  ;;  %v2536_v5 = vadd.f32 %v3748_v13, %v1991_v45  ;;  %v2007_v36 = vadd.f32 %v4615_v4, %v2006_v40 }
 0x1f6   : > { %v2008_v39 = vpop.f32.mrf.mxu0  ;;  %v2527_v21 = vpop.f32.mrf.mxu1 }
 0x1f7   : > { %v2983_v14 = vmax.f32 %v2879_v31, %v2881_v29  ;;  %v2528_v19 = vadd.f32 %v2527_v21, %v1983_v28  ;;  %v2884_v37 = vmax.f32 %v2536_v5, 0.0 }
 0x1f8   : > { %v3109_v47 = vld [vmem:[#allocation2 + $0xb0] ss:$2 sm:$0xff]  ;;  %v3173_v9 = vld [vmem:[#allocation2 + $0xb1] ss:$2 sm:$0xff]  ;;  %v2009_v57 = vpop.f32.mrf.mxu0  ;;  %v3749_v56 = vpop.f32.mrf.mxu1 }
 0x1f9   : > { %v3225_v11 = vmax.f32 %v3109_v47, %v3173_v9  ;;  %3048 = vst.msk [vmem:[#allocation2 + $0xc8] sm:$0xff] %vm3022_vm1, %v2983_v14  ;;  %v2882_v48 = vmax.f32 %v2528_v19, 0.0  ;;  %v2539_v41 = vadd.f32 %v3749_v56, %v1994_v3  ;;  %v2010_v55 = vadd.f32 %v4615_v4, %v2009_v57 }
 0x1fa   : > { %v2011_v49 = vpop.f32.mrf.mxu0  ;;  %v2530_v63 = vpop.f32.mrf.mxu1 }
 0x1fb   : > { %3257 = vst.msk [vmem:[%s4683_s9 + $0x58] sm:$0xff] %vm3022_vm1, %v3225_v11  ;;  %v2984_v15 = vmax.f32 %v2882_v48, %v2884_v37  ;;  %v2531_v32 = vadd.f32 %v2530_v63, %v1986_v53  ;;  %v2885_v44 = vmax.f32 %v2539_v41, 0.0 }
 0x1fc   : > { %v2014_v25 = vpop.f32.mrf.mxu0  ;;  %v3752_v12 = vpop.f32.mrf.mxu1 }
 0x1fd   : > { %3049 = vst.msk [vmem:[#allocation2 + $0xd0] sm:$0xff] %vm3022_vm1, %v2984_v15  ;;  %v2883_v17 = vmax.f32 %v2531_v32, 0.0  ;;  %v2552_v16 = vadd.f32 %v3752_v12, %v2007_v36  ;;  %v2015_v33 = vadd.f32 %v4615_v4, %v2014_v25 }
 0x1fe   : > { %v2016_v1 = vpop.f32.mrf.mxu0  ;;  %v2543_v2 = vpop.f32.mrf.mxu1 }
 0x1ff   : > { %v2985_v52 = vmax.f32 %v2883_v17, %v2885_v44  ;;  %v2544_v51 = vadd.f32 %v2543_v2, %v1999_v38  ;;  %v2888_v27 = vmax.f32 %v2552_v16, 0.0 }
 0x200   : > { %v3111_v0 = vld [vmem:[#allocation2 + $0xc0] ss:$2 sm:$0xff]  ;;  %v3175_v35 = vld [vmem:[#allocation2 + $0xc1] ss:$2 sm:$0xff]  ;;  %v2017_v61 = vpop.f32.mrf.mxu0  ;;  %v3753_v7 = vpop.f32.mrf.mxu1 }
 0x201   : > { %v3226_v50 = vmax.f32 %v3111_v0, %v3175_v35  ;;  %3050 = vst.msk [vmem:[#allocation2 + $0xd8] sm:$0xff] %vm3022_vm1, %v2985_v52  ;;  %v2886_v59 = vmax.f32 %v2544_v51, 0.0  ;;  %v2555_v20 = vadd.f32 %v3753_v7, %v2010_v55  ;;  %v2018_v9 = vadd.f32 %v4615_v4, %v2017_v61 }
 0x202   : > { %v2019_v45 = vpop.f32.mrf.mxu0  ;;  %v2546_v43 = vpop.f32.mrf.mxu1 }
 0x203   : > { %3258 = vst.msk [vmem:[%s4683_s9 + $0x60] sm:$0xff] %vm3022_vm1, %v3226_v50  ;;  %v2986_v24 = vmax.f32 %v2886_v59, %v2888_v27  ;;  %v2547_v40 = vadd.f32 %v2546_v43, %v2002_v23  ;;  %v2889_v29 = vmax.f32 %v2555_v20, 0.0  ;;  %v4902_v59 = vld [vmem:[%s5130_s2] ss:$0 sm:$0xff] }
 0x204   : > { %v2022_v13 = vpop.f32.mrf.mxu0  ;;  %v3756_v28 = vpop.f32.mrf.mxu1 }
 0x205   : > { %3051 = vst.msk [vmem:[#allocation2 + $0xe0] sm:$0xff] %vm3022_vm1, %v2986_v24  ;;  %v2887_v31 = vmax.f32 %v2547_v40, 0.0  ;;  %v2023_v5 = vadd.f32 %v4615_v4, %v2022_v13 }
 0x206   : > { %v2024_v39 = vpop.f32.mrf.mxu0  ;;  %v2559_v21 = vpop.f32.mrf.mxu1 }
 0x207   : > { %v2987_v3 = vmax.f32 %v2887_v31, %v2889_v29  ;;  %v2568_v14 = vadd.f32 %v3756_v28, %v2023_v5  ;;  %v2560_v19 = vadd.f32 %v2559_v21, %v2015_v33 }
 0x208   : > { %v3113_v53 = vld [vmem:[#allocation2 + $0xd0] ss:$2 sm:$0xff]  ;;  %v3177_v47 = vld [vmem:[#allocation2 + $0xd1] ss:$2 sm:$0xff]  ;;  %v2025_v57 = vpop.f32.mrf.mxu0  ;;  %v3757_v56 = vpop.f32.mrf.mxu1 }
 0x209   : > { %v3227_v11 = vmax.f32 %v3113_v53, %v3177_v47  ;;  %3052 = vst.msk [vmem:[#allocation2 + $0xe8] sm:$0xff] %vm3022_vm1, %v2987_v3  ;;  %v2892_v37 = vmax.f32 %v2568_v14, 0.0  ;;  %v2890_v48 = vmax.f32 %v2560_v19, 0.0  ;;  %v2026_v41 = vadd.f32 %v4615_v4, %v2025_v57 }
 0x20a   : > { %v2027_v49 = vpop.f32.mrf.mxu0  ;;  %v2562_v63 = vpop.f32.mrf.mxu1 }
 0x20b   : > { %3259 = vst.msk [vmem:[%s4683_s9 + $0x68] sm:$0xff] %vm3022_vm1, %v3227_v11  ;;  %v2988_v36 = vmax.f32 %v2890_v48, %v2892_v37  ;;  %v2571_v15 = vadd.f32 %v3757_v56, %v2026_v41  ;;  %v2563_v32 = vadd.f32 %v2562_v63, %v2018_v9 }
 0x20c   : > { %v2030_v25 = vpop.f32.mrf.mxu0  ;;  %v3760_v12 = vpop.f32.mrf.mxu1 }
 0x20d   : > { %3053 = vst.msk [vmem:[#allocation2 + $0xf0] sm:$0xff] %vm3022_vm1, %v2988_v36  ;;  %v2893_v38 = vmax.f32 %v2571_v15, 0.0  ;;  %v2891_v44 = vmax.f32 %v2563_v32, 0.0  ;;  %v2031_v52 = vadd.f32 %v4615_v4, %v2030_v25 }
 0x20e   : > { %v2032_v17 = vpop.f32.mrf.mxu0  ;;  %v2575_v16 = vpop.f32.mrf.mxu1 }
 0x20f   : > { %v2989_v1 = vmax.f32 %v2891_v44, %v2893_v38  ;;  %v2576_v7 = vadd.f32 %v2575_v16, %v2031_v52 }
 0x210   : > { %v3115_v2 = vld [vmem:[#allocation2 + $0xe0] ss:$2 sm:$0xff]  ;;  %v3179_v55 = vld [vmem:[#allocation2 + $0xe1] ss:$2 sm:$0xff]  ;;  %v2033_v51 = vpop.f32.mrf.mxu0  ;;  %v3761_v23 = vpop.f32.mrf.mxu1 }
 0x211   : > { %v3228_v0 = vmax.f32 %v3115_v2, %v3179_v55  ;;  %3054 = vst.msk [vmem:[#allocation2 + $0xf8] sm:$0xff] %vm3022_vm1, %v2989_v1  ;;  %v2034_v20 = vadd.f32 %v4902_v59, %v2033_v51  ;;  %v2894_v28 = vmax.f32 %v2576_v7, 0.0 }
 0x212   : > { %v2035_v35 = vpop.f32.mrf.mxu0  ;;  %v2578_v61 = vpop.f32.mrf.mxu1 }
 0x213   : > { %3260 = vst.msk [vmem:[%s4683_s9 + $0x70] sm:$0xff] %vm3022_vm1, %v3228_v0  ;;  %v2579_v5 = vadd.f32 %v2578_v61, %v2034_v20 }
 0x214   : > { %v2038_v50 = vpop.f32.mrf.mxu0  ;;  %v3764_v27 = vpop.f32.mrf.mxu1 }
 0x215   : > { %v2039_v4 = vadd.f32 %v4902_v59, %v2038_v50  ;;  %v2895_v57 = vmax.f32 %v2579_v5, 0.0 }
 0x216   : > { %v2040_v45 = vpop.f32.mrf.mxu0  ;;  %v2591_v43 = vpop.f32.mrf.mxu1 }
 0x217   : > { %v2584_v24 = vadd.f32 %v3760_v12, %v2039_v4 }
 0x218   : > { %v3117_v40 = vld [vmem:[#allocation2 + $0xf0] ss:$2 sm:$0xff]  ;;  %v3181_v13 = vld [vmem:[#allocation2 + $0xf1] ss:$2 sm:$0xff]  ;;  %v2041_v33 = vpop.f32.mrf.mxu0  ;;  %v3765_v29 = vpop.f32.mrf.mxu1 }
 0x219   : > { %v3229_v31 = vmax.f32 %v3117_v40, %v3181_v13  ;;  %v2896_v39 = vmax.f32 %v2584_v24, 0.0  ;;  %v2042_v21 = vadd.f32 %v4902_v59, %v2041_v33 }
 0x21a   : > { %v2043_v3 = vpop.f32.mrf.mxu0  ;;  %v2594_v14 = vpop.f32.mrf.mxu1 }
 0x21b   : > { %3261 = vst.msk [vmem:[%s4683_s9 + $0x78] sm:$0xff] %vm3022_vm1, %v3229_v31  ;;  %v2990_v19 = vmax.f32 %v2894_v28, %v2896_v39  ;;  %v2587_v53 = vadd.f32 %v3761_v23, %v2042_v21 }
 0x21c   : > { %v2046_v47 = vpop.f32.mrf.mxu0  ;;  %v3768_v9 = vpop.f32.mrf.mxu1 }
 0x21d   : > { %3055 = vst.msk [vmem:[#allocation2 + $0x100] sm:$0xff] %vm3022_vm1, %v2990_v19  ;;  %v2897_v56 = vmax.f32 %v2587_v53, 0.0  ;;  %v2047_v41 = vadd.f32 %v4902_v59, %v2046_v47 }
 0x21e   : > { %v2048_v11 = vpop.f32.mrf.mxu0  ;;  %v2607_v37 = vpop.f32.mrf.mxu1 }
 0x21f   : > { %v2991_v48 = vmax.f32 %v2895_v57, %v2897_v56  ;;  %v2592_v32 = vadd.f32 %v2591_v43, %v2047_v41 }
 0x220   : > { %v2049_v49 = vpop.f32.mrf.mxu0  ;;  %v3769_v63 = vpop.f32.mrf.mxu1 }
 0x221   : > { %3056 = vst.msk [vmem:[#allocation2 + $0x108] sm:$0xff] %vm3022_vm1, %v2991_v48  ;;  %v2050_v38 = vadd.f32 %v4902_v59, %v2049_v49  ;;  %v2898_v52 = vmax.f32 %v2592_v32, 0.0 }
 0x222   : > { %v2051_v36 = vpop.f32.mrf.mxu0  ;;  %v2610_v15 = vpop.f32.mrf.mxu1 }
 0x223   : > { %v2595_v35 = vadd.f32 %v2594_v14, %v2050_v38 }
 0x224   : > { %v2054_v25 = vpop.f32.mrf.mxu0  ;;  %v4912_v12 = vpop.f32.mrf.mxu1 }
 0x225   : > { %v2055_v44 = vadd.f32 %v4902_v59, %v2054_v25  ;;  %v2899_v24 = vmax.f32 %v2595_v35, 0.0 }
 0x226   : > { %v2056_v17 = vpop.f32.mrf.mxu0  ;;  %v4916_v16 = vpop.f32.mrf.mxu1 }
 0x227   : > { %v2600_v1 = vadd.f32 %v3764_v27, %v2055_v44 }
 0x228   : > { %v3119_v2 = vld [vmem:[#allocation2 + $0x100] ss:$2 sm:$0xff]  ;;  %v3183_v55 = vld [vmem:[#allocation2 + $0x101] ss:$2 sm:$0xff]  ;;  %v2057_v51 = vpop.f32.mrf.mxu0  ;;  %v4918_v23 = vpop.f32.mrf.mxu1 }
 0x229   : > { %v3230_v0 = vmax.f32 %v3119_v2, %v3183_v55  ;;  %v2900_v61 = vmax.f32 %v2600_v1, 0.0  ;;  %v2058_v7 = vadd.f32 %v4902_v59, %v2057_v51 }
 0x22a   : > { %v2059_v50 = vpop.f32.mrf.mxu0  ;;  %v4921_v20 = vpop.f32.mrf.mxu1 }
 0x22b   : > { %3262 = vst.msk [vmem:[%s4683_s9 + $0x80] sm:$0xff] %vm3022_vm1, %v3230_v0  ;;  %v2992_v4 = vmax.f32 %v2898_v52, %v2900_v61  ;;  %v2603_v45 = vadd.f32 %v3765_v29, %v2058_v7 }
 0x22c   : > { %v2062_v43 = vpop.f32.mrf.mxu0  ;;  %v4925_v27 = vpop.f32.mrf.mxu1 }
 0x22d   : > { %3057 = vst.msk [vmem:[#allocation2 + $0x110] sm:$0xff] %vm3022_vm1, %v2992_v4  ;;  %v2901_v40 = vmax.f32 %v2603_v45, 0.0  ;;  %v2063_v31 = vadd.f32 %v4902_v59, %v2062_v43 }
 0x22e   : > { %v2064_v13 = vpop.f32.mrf.mxu0  ;;  %v4928_v28 = vpop.f32.mrf.mxu1 }
 0x22f   : > { %v2993_v33 = vmax.f32 %v2899_v24, %v2901_v40  ;;  %v2608_v3 = vadd.f32 %v2607_v37, %v2063_v31 }
 0x230   : > { %v2065_v5 = vpop.f32.mrf.mxu0  ;;  %v4931_v39 = vpop.f32.mrf.mxu1 }
 0x231   : > { %3058 = vst.msk [vmem:[#allocation2 + $0x118] sm:$0xff] %vm3022_vm1, %v2993_v33  ;;  %v2066_v53 = vadd.f32 %v4902_v59, %v2065_v5  ;;  %v2902_v49 = vmax.f32 %v2608_v3, 0.0 }
 0x232   : > { %v2067_v21 = vpop.f32.mrf.mxu0  ;;  %v4934_v29 = vpop.f32.mrf.mxu1 }
 0x233   : > { %v2611_v37 = vadd.f32 %v2610_v15, %v2066_v53 }
 0x234   : > { %v2070_v14 = vpop.f32.mrf.mxu0  ;;  %v4936_v19 = vpop.f32.mrf.mxu1 }
 0x235   : > { %v2071_v47 = vadd.f32 %v4902_v59, %v2070_v14  ;;  %v2903_v51 = vmax.f32 %v2611_v37, 0.0 }
 0x236   : > { %v2072_v57 = vpop.f32.mrf.mxu0  ;;  %v4940_v56 = vpop.f32.mrf.mxu1 }
 0x237   : > { %v2616_v11 = vadd.f32 %v3768_v9, %v2071_v47 }
 0x238   : > { %v3121_v48 = vld [vmem:[#allocation2 + $0x110] ss:$2 sm:$0xff]  ;;  %v3185_v41 = vld [vmem:[#allocation2 + $0x111] ss:$2 sm:$0xff]  ;;  %v2073_v36 = vpop.f32.mrf.mxu0  ;;  %v4942_v32 = vpop.f32.mrf.mxu1 }
 0x239   : > { %v3231_v25 = vmax.f32 %v3121_v48, %v3185_v41  ;;  %v2904_v38 = vmax.f32 %v2616_v11, 0.0  ;;  %v2074_v44 = vadd.f32 %v4902_v59, %v2073_v36 }
 0x23a   : > { %v2075_v17 = vpop.f32.mrf.mxu0  ;;  %v4945_v1 = vpop.f32.mrf.mxu1 }
 0x23b   : > { %3263 = vst.msk [vmem:[%s4683_s9 + $0x88] sm:$0xff] %vm3022_vm1, %v3231_v25  ;;  %v2994_v2 = vmax.f32 %v2902_v49, %v2904_v38  ;;  %v2619_v55 = vadd.f32 %v3769_v63, %v2074_v44  ;;  %v2167_v25 = vadd.f32 %v4902_v59, %v4404_v6  ;;  %v2159_v17 = vadd.f32 %v4902_v59, %v4390_v58 }
 0x23c   : > { %v2078_v52 = vpop.f32.mrf.mxu0  ;;  %v4949_v9 = vpop.f32.mrf.mxu1  ;;  %v2170_v6 = vadd.f32 %v4902_v59, %v4410_v10 }
 0x23d   : > { %3059 = vst.msk [vmem:[#allocation2 + $0x120] sm:$0xff] %vm3022_vm1, %v2994_v2  ;;  %v2905_v0 = vmax.f32 %v2619_v55, 0.0  ;;  %v2079_v7 = vadd.f32 %v4902_v59, %v2078_v52 }
 0x23e   : > { %v2080_v35 = vpop.f32.mrf.mxu0  ;;  %v4952_v61 = vpop.f32.mrf.mxu1 }
 0x23f   : > { %v2995_v15 = vmax.f32 %v2903_v51, %v2905_v0  ;;  %v2624_v43 = vadd.f32 %v4916_v16, %v2079_v7 }
 0x240   : > { %v2081_v50 = vpop.f32.mrf.mxu0  ;;  %v4955_v4 = vpop.f32.mrf.mxu1 }
 0x241   : > { %3060 = vst.msk [vmem:[#allocation2 + $0x128] sm:$0xff] %vm3022_vm1, %v2995_v15  ;;  %v2082_v13 = vadd.f32 %v4902_v59, %v2081_v50  ;;  %v2906_v53 = vmax.f32 %v2624_v43, 0.0  ;;  %v2162_v50 = vadd.f32 %v4902_v59, %v4396_v62 }
 0x242   : > { %v2083_v45 = vpop.f32.mrf.mxu0  ;;  %v4958_v63 = vpop.f32.mrf.mxu1 }
 0x243   : > { %v2627_v11 = vadd.f32 %v4921_v20, %v2082_v13 }
 0x244   : > { %v2086_v24 = vpop.f32.mrf.mxu0  ;;  %v4961_v40 = vpop.f32.mrf.mxu1 }
 0x245   : > { %v2087_v33 = vadd.f32 %v4902_v59, %v2086_v24  ;;  %v2907_v20 = vmax.f32 %v2627_v11, 0.0 }
 0x246   : > { %v2088_v31 = vpop.f32.mrf.mxu0  ;;  %v4965_v5 = vpop.f32.mrf.mxu1 }
 0x247   : > { %v2632_v21 = vadd.f32 %v4912_v12, %v2087_v33  ;;  %v2183_v33 = vadd.f32 %v4902_v59, %v4432_v30 }
 0x248   : > { %v3123_v3 = vld [vmem:[#allocation2 + $0x120] ss:$2 sm:$0xff]  ;;  %v3187_v14 = vld [vmem:[#allocation2 + $0x121] ss:$2 sm:$0xff]  ;;  %v2089_v47 = vpop.f32.mrf.mxu0  ;;  %v4968_v57 = vpop.f32.mrf.mxu1 }
 0x249   : > { %v3232_v16 = vmax.f32 %v3123_v3, %v3187_v14  ;;  %v2908_v48 = vmax.f32 %v2632_v21, 0.0  ;;  %v2090_v41 = vadd.f32 %v4902_v59, %v2089_v47  ;;  %v2175_v21 = vadd.f32 %v4902_v59, %v4418_v18 }
 0x24a   : > { %v2091_v49 = vpop.f32.mrf.mxu0  ;;  %v4972_v36 = vpop.f32.mrf.mxu1 }
 0x24b   : > { %3264 = vst.msk [vmem:[%s4683_s9 + $0x90] sm:$0xff] %vm3022_vm1, %v3232_v16  ;;  %v2996_v12 = vmax.f32 %v2906_v53, %v2908_v48  ;;  %v2635_v37 = vadd.f32 %v4918_v23, %v2090_v41  ;;  %v2178_v49 = vadd.f32 %v4902_v59, %v4424_v22 }
 0x24c   : > { %v2094_v38 = vpop.f32.mrf.mxu0  ;;  %v3792_v44 = vpop.f32.mrf.mxu1 }
 0x24d   : > { %3061 = vst.msk [vmem:[#allocation2 + $0x130] sm:$0xff] %vm3022_vm1, %v2996_v12  ;;  %v2909_v2 = vmax.f32 %v2635_v37, 0.0  ;;  %v2712_v55 = vadd.f32 %v3792_v44, %v2167_v25  ;;  %v2095_v15 = vadd.f32 %v4902_v59, %v2094_v38  ;;  %v2186_v12 = vadd.f32 %v4902_v59, %v4438_v34 }
 0x24e   : > { %v2096_v52 = vpop.f32.mrf.mxu0  ;;  %v2703_v51 = vpop.f32.mrf.mxu1 }
 0x24f   : > { %v2997_v0 = vmax.f32 %v2907_v20, %v2909_v2  ;;  %v2704_v35 = vadd.f32 %v2703_v51, %v2159_v17  ;;  %v2928_v58 = vmax.f32 %v2712_v55, 0.0  ;;  %v2640_v3 = vadd.f32 %v4928_v28, %v2095_v15 }
 0x250   : > { %v2097_v23 = vpop.f32.mrf.mxu0  ;;  %v3793_v7 = vpop.f32.mrf.mxu1 }
 0x251   : > { %3062 = vst.msk [vmem:[#allocation2 + $0x138] sm:$0xff] %vm3022_vm1, %v2997_v0  ;;  %v2926_v45 = vmax.f32 %v2704_v35, 0.0  ;;  %v2715_v43 = vadd.f32 %v3793_v7, %v2170_v6  ;;  %v2098_v14 = vadd.f32 %v4902_v59, %v2097_v23  ;;  %v2910_v44 = vmax.f32 %v2640_v3, 0.0 }
 0x252   : > { %v2099_v24 = vpop.f32.mrf.mxu0  ;;  %v2706_v13 = vpop.f32.mrf.mxu1  ;;  %v2199_v7 = vadd.f32 %v4902_v59, %v4460_v54  ;;  %v2202_v54 = vadd.f32 %v4902_v59, %v4466_v60 }
 0x253   : > { %v3006_v10 = vmax.f32 %v2926_v45, %v2928_v58  ;;  %v2707_v31 = vadd.f32 %v2706_v13, %v2162_v50  ;;  %v2929_v47 = vmax.f32 %v2715_v43, 0.0  ;;  %v2643_v17 = vadd.f32 %v4934_v29, %v2098_v14 }
 0x254   : > { %v2102_v62 = vpop.f32.mrf.mxu0  ;;  %v3796_v53 = vpop.f32.mrf.mxu1 }
 0x255   : > { %3071 = vst.msk [vmem:[#allocation2 + $0x180] sm:$0xff] %vm3022_vm1, %v3006_v10  ;;  %v2927_v16 = vmax.f32 %v2707_v31, 0.0  ;;  %v2103_v11 = vadd.f32 %v4902_v59, %v2102_v62  ;;  %v2728_v48 = vadd.f32 %v3796_v53, %v2183_v33  ;;  %v2911_v45 = vmax.f32 %v2643_v17, 0.0 }
 0x256   : > { %v2104_v41 = vpop.f32.mrf.mxu0  ;;  %v2719_v30 = vpop.f32.mrf.mxu1  ;;  %v2191_v33 = vadd.f32 %v4902_v59, %v4446_v42 }
 0x257   : > { %v3007_v25 = vmax.f32 %v2927_v16, %v2929_v47  ;;  %v2648_v18 = vadd.f32 %v4925_v27, %v2103_v11  ;;  %v2720_v28 = vadd.f32 %v2719_v30, %v2175_v21  ;;  %v2932_v20 = vmax.f32 %v2728_v48, 0.0 }
 0x258   : > { %v3125_v37 = vld [vmem:[#allocation2 + $0x130] ss:$2 sm:$0xff]  ;;  %v3189_v38 = vld [vmem:[#allocation2 + $0x131] ss:$2 sm:$0xff]  ;;  %v2105_v2 = vpop.f32.mrf.mxu0  ;;  %v3797_v55 = vpop.f32.mrf.mxu1  ;;  %v2194_v48 = vadd.f32 %v4902_v59, %v4452_v46  ;;  %v2207_v46 = vadd.f32 %v4902_v59, %v4474_v8 }
 0x259   : > { %v3233_v52 = vmax.f32 %v3125_v37, %v3189_v38  ;;  %3072 = vst.msk [vmem:[#allocation2 + $0x188] sm:$0xff] %vm3022_vm1, %v3007_v25  ;;  %v2912_v22 = vmax.f32 %v2648_v18, 0.0  ;;  %v2930_v51 = vmax.f32 %v2720_v28, 0.0  ;;  %v2106_v27 = vadd.f32 %v4902_v59, %v2105_v2 }
 0x25a   : > { %v2731_v6 = vadd.f32 %v3797_v55, %v2186_v12  ;;  %v2107_v0 = vpop.f32.mrf.mxu0  ;;  %v2722_v35 = vpop.f32.mrf.mxu1  ;;  %v2215_v28 = vadd.f32 %v4902_v59, %v4488_v26 }
 0x25b   : > { %3265 = vst.msk [vmem:[%s4683_s9 + $0x98] sm:$0xff] %vm3022_vm1, %v3233_v52  ;;  %v2998_v34 = vmax.f32 %v2910_v44, %v2912_v22  ;;  %v3008_v15 = vmax.f32 %v2930_v51, %v2932_v20  ;;  %v2651_v23 = vadd.f32 %v4931_v39, %v2106_v27  ;;  %v2723_v29 = vadd.f32 %v2722_v35, %v2178_v49  ;;  %v5150_v0 = vld [vmem:[#allocation3_spill] sm:$0xff] }
 0x25c   : > { %v2110_v50 = vpop.f32.mrf.mxu0  ;;  %v3800_v58 = vpop.f32.mrf.mxu1  ;;  %v2933_v24 = vmax.f32 %v2731_v6, 0.0  ;;  %v2210_v35 = vadd.f32 %v4902_v59, %v5150_v0  ;;  %v5156_v0 = vld [vmem:[#allocation11_spill] sm:$0xff] }
 0x25d   : > { %3063 = vst.msk [vmem:[#allocation2 + $0x140] sm:$0xff] %vm3022_vm1, %v2998_v34  ;;  %3073 = vst.msk [vmem:[#allocation2 + $0x190] sm:$0xff] %vm3022_vm1, %v3008_v15  ;;  %v2913_v43 = vmax.f32 %v2651_v23, 0.0  ;;  %v2931_v13 = vmax.f32 %v2723_v29, 0.0  ;;  %v2111_v10 = vadd.f32 %v4902_v59, %v2110_v50  ;;  %v2744_v39 = vadd.f32 %v3800_v58, %v2199_v7  ;;  %v5151_v34 = vld [vmem:[#allocation4_spill] sm:$0xff] }
 0x25e   : > { %v2112_v31 = vpop.f32.mrf.mxu0  ;;  %v2735_v21 = vpop.f32.mrf.mxu1  ;;  %v2218_v15 = vadd.f32 %v4902_v59, %v5151_v34 }
 0x25f   : > { %v2999_v3 = vmax.f32 %v2911_v45, %v2913_v43  ;;  %v3009_v14 = vmax.f32 %v2931_v13, %v2933_v24  ;;  %v2736_v47 = vadd.f32 %v2735_v21, %v2191_v33  ;;  %v2656_v30 = vadd.f32 %v4940_v56, %v2111_v10 }
 0x260   : > { %v3135_v62 = vld [vmem:[#allocation2 + $0x180] ss:$2 sm:$0xff]  ;;  %v3199_v53 = vld [vmem:[#allocation2 + $0x181] ss:$2 sm:$0xff]  ;;  %v2113_v16 = vpop.f32.mrf.mxu0  ;;  %v3801_v11 = vpop.f32.mrf.mxu1  ;;  %v2936_v60 = vmax.f32 %v2744_v39, 0.0 }
 0x261   : > { %v3238_v42 = vmax.f32 %v3135_v62, %v3199_v53  ;;  %3064 = vst.msk [vmem:[#allocation2 + $0x148] sm:$0xff] %vm3022_vm1, %v2999_v3  ;;  %3074 = vst.msk [vmem:[#allocation2 + $0x198] sm:$0xff] %vm3022_vm1, %v3009_v14  ;;  %v2747_v41 = vadd.f32 %v3801_v11, %v2202_v54  ;;  %v2934_v49 = vmax.f32 %v2736_v47, 0.0  ;;  %v2114_v38 = vadd.f32 %v4902_v59, %v2113_v16  ;;  %v5152_v62 = vld [vmem:[#allocation7_spill] sm:$0xff] }
 0x262   : > { %v2115_v25 = vpop.f32.mrf.mxu0  ;;  %v2738_v18 = vpop.f32.mrf.mxu1  ;;  %v2914_v52 = vmax.f32 %v2656_v30, 0.0  ;;  %v2231_v53 = vadd.f32 %v4902_v59, %v5152_v62  ;;  %v5153_v30 = vld [vmem:[#allocation5_spill] sm:$0xff] }
 0x263   : > { %3270 = vst.msk [vmem:[%s4683_s9 + $0xc0] sm:$0xff] %vm3022_vm1, %v3238_v42  ;;  %v2739_v12 = vadd.f32 %v2738_v18, %v2194_v48  ;;  %v3010_v37 = vmax.f32 %v2934_v49, %v2936_v60  ;;  %v2937_v20 = vmax.f32 %v2747_v41, 0.0  ;;  %v2659_v50 = vadd.f32 %v4945_v1, %v2114_v38 }
 0x264   : > { %v2118_v44 = vpop.f32.mrf.mxu0  ;;  %v3804_v17 = vpop.f32.mrf.mxu1  ;;  %v2223_v60 = vadd.f32 %v4902_v59, %v5153_v30 }
 0x265   : > { %v2935_v56 = vmax.f32 %v2739_v12, 0.0  ;;  %v2119_v2 = vadd.f32 %v4902_v59, %v2118_v44  ;;  %v2760_v55 = vadd.f32 %v3804_v17, %v2215_v28  ;;  %3075 = vst.msk [vmem:[#allocation2 + $0x1a0] sm:$0xff] %vm3022_vm1, %v3010_v37  ;;  %v2915_v11 = vmax.f32 %v2659_v50, 0.0  ;;  %v5154_v28 = vld [vmem:[#allocation8_spill] sm:$0xff] }
 0x266   : > { %v2120_v26 = vpop.f32.mrf.mxu0  ;;  %v2751_v22 = vpop.f32.mrf.mxu1  ;;  %v2234_v12 = vadd.f32 %v4902_v59, %v5154_v28 }
 0x267   : > { %v3011_v51 = vmax.f32 %v2935_v56, %v2937_v20  ;;  %v2664_v27 = vadd.f32 %v4936_v19, %v2119_v2  ;;  %v2940_v6 = vmax.f32 %v2760_v55, 0.0  ;;  %v2752_v8 = vadd.f32 %v2751_v22, %v2207_v46  ;;  %v5155_v2 = vld [vmem:[#allocation6_spill] sm:$0xff] }
 0x268   : > { %v3127_v23 = vld [vmem:[#allocation2 + $0x140] ss:$2 sm:$0xff]  ;;  %v3191_v29 = vld [vmem:[#allocation2 + $0x141] ss:$2 sm:$0xff]  ;;  %v3137_v7 = vld [vmem:[#allocation2 + $0x190] ss:$2 sm:$0xff]  ;;  %v2121_v58 = vpop.f32.mrf.mxu0  ;;  %v3805_v45 = vpop.f32.mrf.mxu1  ;;  %v2226_v55 = vadd.f32 %v4902_v59, %v5155_v2 }
 0x269   : > { %v3234_v43 = vmax.f32 %v3127_v23, %v3191_v29  ;;  %v3201_v24 = vld [vmem:[#allocation2 + $0x191] ss:$2 sm:$0xff]  ;;  %3076 = vst.msk [vmem:[#allocation2 + $0x1a8] sm:$0xff] %vm3022_vm1, %v3011_v51  ;;  %v2916_v19 = vmax.f32 %v2664_v27, 0.0  ;;  %v2938_v13 = vmax.f32 %v2752_v8, 0.0  ;;  %v2122_v33 = vadd.f32 %v4902_v59, %v2121_v58 }
 0x26a   : > { %v3239_v10 = vmax.f32 %v3137_v7, %v3201_v24  ;;  %v2763_v39 = vadd.f32 %v3805_v45, %v2218_v15  ;;  %v2123_v31 = vpop.f32.mrf.mxu0  ;;  %v2754_v21 = vpop.f32.mrf.mxu1  ;;  %v5157_v15 = vld [vmem:[#allocation9_spill] sm:$0xff] }
 0x26b   : > { %3266 = vst.msk [vmem:[%s4683_s9 + $0xa0] sm:$0xff] %vm3022_vm1, %v3234_v43  ;;  %v3000_v54 = vmax.f32 %v2914_v52, %v2916_v19  ;;  %v3012_v3 = vmax.f32 %v2938_v13, %v2940_v6  ;;  %v2667_v1 = vadd.f32 %v4942_v32, %v2122_v33  ;;  %v2755_v14 = vadd.f32 %v2754_v21, %v2210_v35 }
 0x26c   : > { %3271 = vst.msk [vmem:[%s4683_s9 + $0xc8] sm:$0xff] %vm3022_vm1, %v3239_v10  ;;  %v2126_v47 = vpop.f32.mrf.mxu0  ;;  %v3808_v16 = vpop.f32.mrf.mxu1  ;;  %v2941_v42 = vmax.f32 %v2763_v39, 0.0  ;;  %v2247_v35 = vadd.f32 %v4902_v59, %v5156_v0  ;;  %v2239_v23 = vadd.f32 %v4902_v59, %v5157_v15 }
 0x26d   : > { %3065 = vst.msk [vmem:[#allocation2 + $0x150] sm:$0xff] %vm3022_vm1, %v3000_v54  ;;  %3077 = vst.msk [vmem:[#allocation2 + $0x1b0] sm:$0xff] %vm3022_vm1, %v3012_v3  ;;  %v2917_v48 = vmax.f32 %v2667_v1, 0.0  ;;  %v2939_v41 = vmax.f32 %v2755_v14, 0.0  ;;  %v2127_v32 = vadd.f32 %v4902_v59, %v2126_v47  ;;  %v2776_v49 = vadd.f32 %v3808_v16, %v2231_v53  ;;  %v5158_v54 = vld [vmem:[#allocation10_spill] sm:$0xff]  ;;  %v5159_v1 = vld [vmem:[#allocation12_spill] sm:$0xff] }
 0x26e   : > { %v2128_v25 = vpop.f32.mrf.mxu0  ;;  %v2767_v18 = vpop.f32.mrf.mxu1  ;;  %v2242_v3 = vadd.f32 %v4902_v59, %v5158_v54  ;;  %v2250_v14 = vadd.f32 %v4902_v59, %v5159_v1 }
 0x26f   : > { %v3001_v46 = vmax.f32 %v2915_v11, %v2917_v48  ;;  %v3013_v37 = vmax.f32 %v2939_v41, %v2941_v42  ;;  %v2768_v17 = vadd.f32 %v2767_v18, %v2223_v60  ;;  %v2672_v22 = vadd.f32 %v4952_v61, %v2127_v32 }
 0x270   : > { %v3139_v38 = vld [vmem:[#allocation2 + $0x1a0] ss:$2 sm:$0xff]  ;;  %v3203_v44 = vld [vmem:[#allocation2 + $0x1a1] ss:$2 sm:$0xff]  ;;  %v2129_v20 = vpop.f32.mrf.mxu0  ;;  %v3809_v56 = vpop.f32.mrf.mxu1  ;;  %v2944_v51 = vmax.f32 %v2776_v49, 0.0 }
 0x271   : > { %v3240_v52 = vmax.f32 %v3139_v38, %v3203_v44  ;;  %3066 = vst.msk [vmem:[#allocation2 + $0x158] sm:$0xff] %vm3022_vm1, %v3001_v46  ;;  %3078 = vst.msk [vmem:[#allocation2 + $0x1b8] sm:$0xff] %vm3022_vm1, %v3013_v37  ;;  %v2779_v26 = vadd.f32 %v3809_v56, %v2234_v12  ;;  %v2942_v27 = vmax.f32 %v2768_v17, 0.0  ;;  %v2130_v7 = vadd.f32 %v4902_v59, %v2129_v20  ;;  %v5160_v37 = vld [vmem:[#allocation15_spill] sm:$0xff] }
 0x272   : > { %v2131_v6 = vpop.f32.mrf.mxu0  ;;  %v2770_v8 = vpop.f32.mrf.mxu1  ;;  %v2918_v19 = vmax.f32 %v2672_v22, 0.0  ;;  %v2263_v38 = vadd.f32 %v4902_v59, %v5160_v37 }
 0x273   : > { %3272 = vst.msk [vmem:[%s4683_s9 + $0xd0] sm:$0xff] %vm3022_vm1, %v3240_v52  ;;  %v2771_v34 = vadd.f32 %v2770_v8, %v2226_v55  ;;  %v3014_v29 = vmax.f32 %v2942_v27, %v2944_v51  ;;  %v2945_v45 = vmax.f32 %v2779_v26, 0.0  ;;  %v2675_v16 = vadd.f32 %v4958_v63, %v2130_v7  ;;  %v5161_v52 = vld [vmem:[#allocation13_spill] sm:$0xff]  ;;  %v5162_v6 = vld [vmem:[#allocation16_spill] sm:$0xff] }
 0x274   : > { %v2134_v50 = vpop.f32.mrf.mxu0  ;;  %v3812_v58 = vpop.f32.mrf.mxu1  ;;  %v2255_v26 = vadd.f32 %v4902_v59, %v5161_v52  ;;  %v2266_v8 = vadd.f32 %v4902_v59, %v5162_v6 }
 0x275   : > { %v2943_v61 = vmax.f32 %v2771_v34, 0.0  ;;  %v2135_v43 = vadd.f32 %v4902_v59, %v2134_v50  ;;  %v2792_v24 = vadd.f32 %v3812_v58, %v2247_v35  ;;  %3079 = vst.msk [vmem:[#allocation2 + $0x1c0] sm:$0xff] %vm3022_vm1, %v3014_v29  ;;  %v2919_v20 = vmax.f32 %v2675_v16, 0.0  ;;  %v5163_v50 = vld [vmem:[#allocation14_spill] sm:$0xff] }
 0x276   : > { %v2136_v13 = vpop.f32.mrf.mxu0  ;;  %v2783_v33 = vpop.f32.mrf.mxu1  ;;  %v2258_v58 = vadd.f32 %v4902_v59, %v5163_v50 }
 0x277   : > { %v3015_v10 = vmax.f32 %v2943_v61, %v2945_v45  ;;  %v2680_v39 = vadd.f32 %v4949_v9, %v2135_v43  ;;  %v2948_v31 = vmax.f32 %v2792_v24, 0.0  ;;  %v2784_v21 = vadd.f32 %v2783_v33, %v2239_v23 }
 0x278   : > { %v3129_v62 = vld [vmem:[#allocation2 + $0x150] ss:$2 sm:$0xff]  ;;  %v3193_v53 = vld [vmem:[#allocation2 + $0x151] ss:$2 sm:$0xff]  ;;  %v2137_v11 = vpop.f32.mrf.mxu0  ;;  %v3813_v48 = vpop.f32.mrf.mxu1 }
 0x279   : > { %v3141_v47 = vld [vmem:[#allocation2 + $0x1b0] ss:$2 sm:$0xff]  ;;  %v3235_v42 = vmax.f32 %v3129_v62, %v3193_v53  ;;  %v3205_v41 = vld [vmem:[#allocation2 + $0x1b1] ss:$2 sm:$0xff]  ;;  %3080 = vst.msk [vmem:[#allocation2 + $0x1c8] sm:$0xff] %vm3022_vm1, %v3015_v10  ;;  %v2920_v9 = vmax.f32 %v2680_v39, 0.0  ;;  %v2138_v60 = vadd.f32 %v4902_v59, %v2137_v11  ;;  %v2795_v49 = vadd.f32 %v3813_v48, %v2250_v14 }
 0x27a   : > { %v2946_v30 = vmax.f32 %v2784_v21, 0.0  ;;  %v3241_v32 = vmax.f32 %v3141_v47, %v3205_v41  ;;  %v2139_v25 = vpop.f32.mrf.mxu0  ;;  %v2786_v18 = vpop.f32.mrf.mxu1  ;;  %v5164_v10 = vld [vmem:[#allocation19_spill] sm:$0xff]  ;;  %v5165_v21 = vld [vmem:[#allocation17_spill] sm:$0xff] }
 0x27b   : > { %3267 = vst.msk [vmem:[%s4683_s9 + $0xa8] sm:$0xff] %vm3022_vm1, %v3235_v42  ;;  %v3002_v28 = vmax.f32 %v2918_v19, %v2920_v9  ;;  %v2683_v63 = vadd.f32 %v4955_v4, %v2138_v60  ;;  %v2787_v46 = vadd.f32 %v2786_v18, %v2242_v3  ;;  %v2949_v2 = vmax.f32 %v2795_v49, 0.0  ;;  %v5167_v25 = vld [vmem:[#allocation20_spill] sm:$0xff] }
 0x27c   : > { %v3016_v12 = vmax.f32 %v2946_v30, %v2948_v31  ;;  %3273 = vst.msk [vmem:[%s4683_s9 + $0xd8] sm:$0xff] %vm3022_vm1, %v3241_v32  ;;  %v2142_v44 = vpop.f32.mrf.mxu0  ;;  %v3816_v17 = vpop.f32.mrf.mxu1  ;;  %v2279_v39 = vadd.f32 %v4902_v59, %v5164_v10  ;;  %v2271_v54 = vadd.f32 %v4902_v59, %v5165_v21  ;;  %v5166_v32 = vld [vmem:[#allocation18_spill] sm:$0xff]  ;;  %v2282_v18 = vadd.f32 %v4902_v59, %v5167_v25 }
 0x27d   : > { %3067 = vst.msk [vmem:[#allocation2 + $0x160] sm:$0xff] %vm3022_vm1, %v3002_v28  ;;  %v2921_v56 = vmax.f32 %v2683_v63, 0.0  ;;  %v2947_v55 = vmax.f32 %v2787_v46, 0.0  ;;  %v2143_v4 = vadd.f32 %v4902_v59, %v2142_v44  ;;  %v2808_v22 = vadd.f32 %v3816_v17, %v2263_v38 }
 0x27e   : > { %3081 = vst.msk [vmem:[#allocation2 + $0x1d0] sm:$0xff] %vm3022_vm1, %v3016_v12  ;;  %v2144_v51 = vpop.f32.mrf.mxu0  ;;  %v2799_v27 = vpop.f32.mrf.mxu1  ;;  %v2274_v49 = vadd.f32 %v4902_v59, %v5166_v32 }
 0x27f   : > { %v3003_v0 = vmax.f32 %v2919_v20, %v2921_v56  ;;  %v3017_v35 = vmax.f32 %v2947_v55, %v2949_v2  ;;  %v2800_v23 = vadd.f32 %v2799_v27, %v2255_v26  ;;  %v2688_v43 = vadd.f32 %v4965_v5, %v2143_v4 }
 0x280   : > { %v3143_v34 = vld [vmem:[#allocation2 + $0x1c0] ss:$2 sm:$0xff]  ;;  %v3207_v15 = vld [vmem:[#allocation2 + $0x1c1] ss:$2 sm:$0xff]  ;;  %v2145_v29 = vpop.f32.mrf.mxu0  ;;  %v3817_v7 = vpop.f32.mrf.mxu1  ;;  %v2952_v24 = vmax.f32 %v2808_v22, 0.0 }
 0x281   : > { %v3242_v45 = vmax.f32 %v3143_v34, %v3207_v15  ;;  %3068 = vst.msk [vmem:[#allocation2 + $0x168] sm:$0xff] %vm3022_vm1, %v3003_v0  ;;  %3082 = vst.msk [vmem:[#allocation2 + $0x1d8] sm:$0xff] %vm3022_vm1, %v3017_v35  ;;  %v2811_v61 = vadd.f32 %v3817_v7, %v2266_v8  ;;  %v2950_v19 = vmax.f32 %v2800_v23, 0.0  ;;  %v2146_v1 = vadd.f32 %v4902_v59, %v2145_v29 }
 0x282   : > { %v2147_v13 = vpop.f32.mrf.mxu0  ;;  %v2802_v33 = vpop.f32.mrf.mxu1  ;;  %v2922_v11 = vmax.f32 %v2688_v43, 0.0 }
 0x283   : > { %3274 = vst.msk [vmem:[%s4683_s9 + $0xe0] sm:$0xff] %vm3022_vm1, %v3242_v45  ;;  %v2803_v31 = vadd.f32 %v2802_v33, %v2258_v58  ;;  %v3018_v3 = vmax.f32 %v2950_v19, %v2952_v24  ;;  %v2953_v53 = vmax.f32 %v2811_v61, 0.0  ;;  %v2691_v46 = vadd.f32 %v4972_v36, %v2146_v1 }
 0x284   : > { %v2150_v14 = vpop.f32.mrf.mxu0  ;;  %v3820_v62 = vpop.f32.mrf.mxu1 }
 0x285   : > { %v2951_v5 = vmax.f32 %v2803_v31, 0.0  ;;  %v2151_v47 = vadd.f32 %v4902_v59, %v2150_v14  ;;  %v2824_v16 = vadd.f32 %v3820_v62, %v2279_v39  ;;  %3083 = vst.msk [vmem:[#allocation2 + $0x1e0] sm:$0xff] %vm3022_vm1, %v3018_v3  ;;  %v2923_v27 = vmax.f32 %v2691_v46, 0.0 }
 0x286   : > { %v2152_v48 = vpop.f32.mrf.mxu0  ;;  %v2815_v42 = vpop.f32.mrf.mxu1 }
 0x287   : > { %v3019_v41 = vmax.f32 %v2951_v5, %v2953_v53  ;;  %v2696_v9 = vadd.f32 %v4961_v40, %v2151_v47  ;;  %v2956_v30 = vmax.f32 %v2824_v16, 0.0  ;;  %v2816_v60 = vadd.f32 %v2815_v42, %v2271_v54 }
 0x288   : > { %v3131_v28 = vld [vmem:[#allocation2 + $0x160] ss:$2 sm:$0xff]  ;;  %v3195_v12 = vld [vmem:[#allocation2 + $0x161] ss:$2 sm:$0xff]  ;;  %v3145_v63 = vld [vmem:[#allocation2 + $0x1d0] ss:$2 sm:$0xff]  ;;  %v2153_v37 = vpop.f32.mrf.mxu0  ;;  %v3821_v38 = vpop.f32.mrf.mxu1 }
 0x289   : > { %v3236_v44 = vmax.f32 %v3131_v28, %v3195_v12  ;;  %v3209_v17 = vld [vmem:[#allocation2 + $0x1d1] ss:$2 sm:$0xff]  ;;  %3084 = vst.msk [vmem:[#allocation2 + $0x1e8] sm:$0xff] %vm3022_vm1, %v3019_v41  ;;  %v2924_v40 = vmax.f32 %v2696_v9, 0.0  ;;  %v2954_v20 = vmax.f32 %v2816_v60, 0.0  ;;  %v2154_v56 = vadd.f32 %v4902_v59, %v2153_v37 }
 0x28a   : > { %v3243_v2 = vmax.f32 %v3145_v63, %v3209_v17  ;;  %v2827_v55 = vadd.f32 %v3821_v38, %v2282_v18  ;;  %v2155_v52 = vpop.f32.mrf.mxu0  ;;  %v2818_v26 = vpop.f32.mrf.mxu1 }
 0x28b   : > { %3268 = vst.msk [vmem:[%s4683_s9 + $0xb0] sm:$0xff] %vm3022_vm1, %v3236_v44  ;;  %v3004_v4 = vmax.f32 %v2922_v11, %v2924_v40  ;;  %v3020_v22 = vmax.f32 %v2954_v20, %v2956_v30  ;;  %v2699_v36 = vadd.f32 %v4968_v57, %v2154_v56  ;;  %v2819_v51 = vadd.f32 %v2818_v26, %v2274_v49 }
 0x28c   : > { %3275 = vst.msk [vmem:[%s4683_s9 + $0xe8] sm:$0xff] %vm3022_vm1, %v3243_v2  ;;  %v2957_v6 = vmax.f32 %v2827_v55, 0.0 }
 0x28d   : > { %3069 = vst.msk [vmem:[#allocation2 + $0x170] sm:$0xff] %vm3022_vm1, %v3004_v4  ;;  %3085 = vst.msk [vmem:[#allocation2 + $0x1f0] sm:$0xff] %vm3022_vm1, %v3020_v22  ;;  %v2925_v59 = vmax.f32 %v2699_v36, 0.0  ;;  %v2955_v8 = vmax.f32 %v2819_v51, 0.0 }
 0x28f   : > { %v3005_v0 = vmax.f32 %v2923_v27, %v2925_v59  ;;  %v3021_v35 = vmax.f32 %v2955_v8, %v2957_v6 }
 0x290   : > { %v3147_v34 = vld [vmem:[#allocation2 + $0x1e0] ss:$2 sm:$0xff]  ;;  %v3211_v15 = vld [vmem:[#allocation2 + $0x1e1] ss:$2 sm:$0xff] }
 0x291   : > { %v3244_v23 = vmax.f32 %v3147_v34, %v3211_v15  ;;  %3070 = vst.msk [vmem:[#allocation2 + $0x178] sm:$0xff] %vm3022_vm1, %v3005_v0  ;;  %3086 = vst.msk [vmem:[#allocation2 + $0x1f8] sm:$0xff] %vm3022_vm1, %v3021_v35 }
 0x293   : > { %3276 = vst.msk [vmem:[%s4683_s9 + $0xf0] sm:$0xff] %vm3022_vm1, %v3244_v23 }
 0x298   : > { %v3133_v57 = vld [vmem:[#allocation2 + $0x170] ss:$2 sm:$0xff]  ;;  %v3197_v29 = vld [vmem:[#allocation2 + $0x171] ss:$2 sm:$0xff] }
 0x299   : > { %v3149_v7 = vld [vmem:[#allocation2 + $0x1f0] ss:$2 sm:$0xff]  ;;  %v3237_v50 = vmax.f32 %v3133_v57, %v3197_v29  ;;  %v3213_v58 = vld [vmem:[#allocation2 + $0x1f1] ss:$2 sm:$0xff] }
 0x29a   : > { %v3245_v45 = vmax.f32 %v3149_v7, %v3213_v58 }
 0x29b   : > { %3269 = vst.msk [vmem:[%s4683_s9 + $0xb8] sm:$0xff] %vm3022_vm1, %v3237_v50 }
 0x29c   : > { %3277 = vst.msk [vmem:[%s4683_s9 + $0xf8] sm:$0xff] %vm3022_vm1, %v3245_v45 }
 0x29d PF: > { %s13_s12 = sadd.s32 1, %s4145_s12  }
 0x29e   : > { %p10_p5 = scmp.ge.s32.totalorder %s13_s12, 4  }
 0x2a0   :  { %12 = sbr.rel (!%p10_p5) target bundleno = 1 (0x1), region = 125 }

// kernel: cifar_cnn_forward.6
= control target key start
LH: loop header
LB: loop body
LE: loop exit
PB: predicated region body
PF: predicated region fallthrough
CT: control target
= control target key end

     0   :  { %s2351_s12 = smov 0   ;;  %s2874_s0 = inlined_call_operand.vmem [shape: bf16[512,576], index: 0, kind: input, shape index: {}]   ;;  %s2875_s1 = inlined_call_operand.vmem [shape: bf16[576,128], index: 1, kind: input, shape index: {}]   ;;  %s2876_s2 = inlined_call_operand.vmem [shape: f32[1,128], index: 2, kind: input, shape index: {}]   ;;  %s2877_s3 = inlined_call_operand.vmem [shape: f32[8,4,4,128], index: 3, kind: output, shape index: {}]  }
   0x1 LB: > { %s1720_s13 = sadd.s32 4294967295, %s2329_s12   ;;  %p1724_p0 = scmp.ge.s32.totalorder %s2329_s12, 1  ;;  %s2329_s12 = sphi %s2351_s12, %s13_s12  }
   0x2   : > { %p139_p1 = scmp.lt.s32.totalorder %s2329_s12, 3 }
   0x4   : > { %p140_p2 = pnand %p1724_p0, %p139_p1 }
   0x6   : > { %143 = sbr.rel (%p140_p2) target bundleno = 416 (0x1a0), region = 32 }
   0xb   : > { %v2175_v0 = vld [vmem:[%s2875_s1 + $0x78] sm:$0xff]   ;;  %s1725_s16 = sshll.u32 %s1720_s13, 5  ;;  %v2177_v2 = vld [vmem:[%s2875_s1 + $0x70] sm:$0xff]   ;;  %v2179_v4 = vld [vmem:[%s2875_s1 + $0x68] sm:$0xff]   ;;  %vm971_vm0 = vcmask 523264   ;;  %s1727_s19 = sshll.u32 %s1720_s13, 2 }
   0xc   : > { %v2176_v1 = vld [vmem:[%s2875_s1 + $0x38] sm:$0xff]   ;;  %1866 = vmatprep.subr.bf16.mxu0 %v2175_v0  ;;  %2150 = vmatprep.subr.bf16.mxu1 %v2175_v0  ;;  %p166_p3 = scmp.lt.s32.totalorder %s1725_s16, 63  ;;  %v2178_v3 = vld [vmem:[%s2875_s1 + $0x30] sm:$0xff]   ;;  %v2180_v5 = vld [vmem:[%s2875_s1 + $0x28] sm:$0xff]   ;;  %p173_p4 = scmp.lt.s32.totalorder %s1727_s19, 7 }
   0xd   : > { %1867 = vmatpush3.bf16.msra.mxu0 %v2176_v1  ;;  %2158 = vmatpush3.bf16.msra.mxu1 %v2176_v1  ;;  %v2181_v6 = vld [vmem:[%s2875_s1 + $0x60] sm:$0xff]   ;;  %v2183_v8 = vld [vmem:[%s2875_s1 + $0x58] sm:$0xff]   ;;  %v2185_v10 = vld [vmem:[%s2875_s1 + $0x50] sm:$0xff]  }
   0xe   : > { %1868 = vmatprep.subr.bf16.mxu0 %v2177_v2  ;;  %2151 = vmatprep.subr.bf16.mxu1 %v2177_v2  ;;  %s2923_s16 = smov (!%p166_p3, %s1725_s16), 63  ;;  %v2182_v7 = vld [vmem:[%s2875_s1 + $0x20] sm:$0xff]   ;;  %v2184_v9 = vld [vmem:[%s2875_s1 + $0x18] sm:$0xff]   ;;  %v2186_v13 = vld [vmem:[%s2875_s1 + $0x10] sm:$0xff]   ;;  %s2925_s19 = smov (!%p173_p4, %s1727_s19), 7 }
   0xf   : > { %s2166_s29 = smul.u32 20, %s2923_s16  ;;  %v2187_v14 = vld [vmem:[%s2875_s1 + $0x48] sm:$0xff]   ;;  %v2189_v16 = vld [vmem:[%s2875_s1 + $0x40] sm:$0xff]   ;;  %v2197_v18 = vld [vmem:[%s2875_s1 + $0xf8] sm:$0xff]   ;;  %s1865_s13 = sshll.u32 %s2925_s19, 4 }
  0x10   : > { %v2188_v15 = vld [vmem:[%s2875_s1 + $0x8] sm:$0xff]   ;;  %v2190_v17 = vld [vmem:[%s2875_s1] sm:$0xff]   ;;  %v2200_v19 = vld [vmem:[%s2875_s1 + $0x118] sm:$0xff]   ;;  %s2770_s22 = scalar_lea.vmem %s2877_s3, %s1865_s13 }
  0x11   : > { %1869 = vmatpush3.bf16.msra.mxu0 %v2178_v3  ;;  %2159 = vmatpush3.bf16.msra.mxu1 %v2178_v3  ;;  %s2391_s9 = scalar_lea.vmem %s2874_s0, %s2166_s29  ;;  %v2198_v22 = vld [vmem:[%s2875_s1 + $0xb8] sm:$0xff]   ;;  %v2199_v23 = vld [vmem:[%s2875_s1 + $0xf0] sm:$0xff]   ;;  %v2208_v28 = vld [vmem:[%s2875_s1 + $0xe8] sm:$0xff]  }
  0x12   : > { %1870 = vmatprep.subr.bf16.mxu0 %v2179_v4  ;;  %2152 = vmatprep.subr.bf16.mxu1 %v2179_v4  ;;  %v2193_v11 = vld [vmem:[%s2391_s9 + $0x4] ss:$20 sps:$4 sm:$0xff]   ;;  %v2191_v20 = vld [vmem:[%s2391_s9] ss:$20 sps:$4 sm:$0xff]   ;;  %v2206_v27 = vld [vmem:[%s2391_s9 + $0x28] ss:$20 sps:$4 sm:$0xff]  }
  0x13   : > { %v2196_v12 = vld [vmem:[%s2391_s9 + $0x1e4] ss:$20 sps:$4 sm:$0xff]   ;;  %1052 = vmatprep.mubr.bf16.mxu0 %v2193_v11  ;;  %v2194_v21 = vld [vmem:[%s2391_s9 + $0x1e0] ss:$20 sps:$4 sm:$0xff]   ;;  %v2207_v29 = vld [vmem:[%s2391_s9 + $0x208] ss:$20 sps:$4 sm:$0xff]  }
  0x14   : > { %1148 = vmatprep.mubr.bf16.mxu1 %v2196_v12  ;;  %v2202_v24 = vld [vmem:[%s2391_s9 + $0x2c] ss:$20 sps:$4 sm:$0xff]   ;;  %v2201_v26 = vld [vmem:[%s2875_s1 + $0xb0] sm:$0xff]   ;;  %v2218_v37 = vld [vmem:[%s2875_s1 + $0xd8] sm:$0xff]  }
  0x15   : > { %1871 = vmatpush3.bf16.msra.mxu0 %v2180_v5  ;;  %2160 = vmatpush3.bf16.msra.mxu1 %v2180_v5  ;;  %v2204_v25 = vld [vmem:[%s2391_s9 + $0x20c] ss:$20 sps:$4 sm:$0xff]   ;;  %v2212_v32 = vld [vmem:[%s2391_s9 + $0x54] ss:$20 sps:$4 sm:$0xff]   ;;  %v2216_v36 = vld [vmem:[%s2391_s9 + $0x50] ss:$20 sps:$4 sm:$0xff]  }
  0x16   : > { %1872 = vmatprep.subr.bf16.mxu0 %v2181_v6  ;;  %2153 = vmatprep.subr.bf16.mxu1 %v2181_v6  ;;  %v2209_v30 = vld [vmem:[%s2875_s1 + $0xa8] sm:$0xff]   ;;  %v2210_v31 = vld [vmem:[%s2875_s1 + $0xe0] sm:$0xff]   ;;  %v2231_v35 = vld [vmem:[%s2875_s1 + $0x110] sm:$0xff]  }
  0x17   : > { %v2214_v33 = vld [vmem:[%s2391_s9 + $0x234] ss:$20 sps:$4 sm:$0xff]   ;;  %v2211_v34 = vld [vmem:[%s2875_s1 + $0xa0] sm:$0xff]   ;;  %v2219_v39 = vld [vmem:[%s2875_s1 + $0x98] sm:$0xff]  }
  0x18   : > { %v2217_v38 = vld [vmem:[%s2391_s9 + $0x230] ss:$20 sps:$4 sm:$0xff]   ;;  %v2226_v44 = vld [vmem:[%s2391_s9 + $0x78] ss:$20 sps:$4 sm:$0xff]   ;;  %v2235_v53 = vld [vmem:[%s2391_s9 + $0x8] ss:$20 sps:$4 sm:$0xff]  }
  0x19   : > { %1873 = vmatpush3.bf16.msra.mxu0 %v2182_v7  ;;  %2161 = vmatpush3.bf16.msra.mxu1 %v2182_v7  ;;  %v2220_v40 = vld [vmem:[%s2875_s1 + $0xd0] sm:$0xff]   ;;  %v2227_v45 = vld [vmem:[%s2391_s9 + $0x258] ss:$20 sps:$4 sm:$0xff]   ;;  %v2230_v49 = vld [vmem:[%s2875_s1 + $0xc0] sm:$0xff]  }
  0x1a   : > { %1874 = vmatprep.subr.bf16.mxu0 %v2183_v8  ;;  %2154 = vmatprep.subr.bf16.mxu1 %v2183_v8  ;;  %v2222_v41 = vld [vmem:[%s2391_s9 + $0x7c] ss:$20 sps:$4 sm:$0xff]   ;;  %v2228_v46 = vld [vmem:[%s2875_s1 + $0xc8] sm:$0xff]   ;;  %v2233_v50 = vld [vmem:[%s2391_s9 + $0xa4] ss:$20 sps:$4 sm:$0xff]  }
  0x1b   : > { %v2224_v42 = vld [vmem:[%s2391_s9 + $0x25c] ss:$20 sps:$4 sm:$0xff]   ;;  %v2251_v47 = vld [vmem:[%s2875_s1 + $0x108] sm:$0xff]   ;;  %v2232_v52 = vld [vmem:[%s2875_s1 + $0x80] sm:$0xff]  }
  0x1c   : > { %v2221_v43 = vld [vmem:[%s2875_s1 + $0x90] sm:$0xff]   ;;  %v2229_v48 = vld [vmem:[%s2875_s1 + $0x88] sm:$0xff]   ;;  %v2270_v56 = vld [vmem:[%s2875_s1 + $0x100] sm:$0xff]  }
  0x1d   : > { %1875 = vmatpush3.bf16.msra.mxu0 %v2184_v9  ;;  %2162 = vmatpush3.bf16.msra.mxu1 %v2184_v9  ;;  %v2237_v51 = vld [vmem:[%s2391_s9 + $0xc] ss:$20 sps:$4 sm:$0xff]   ;;  %v2241_v57 = vld [vmem:[%s2391_s9 + $0x34] ss:$20 sps:$4 sm:$0xff]   ;;  %v2244_v59 = vld [vmem:[%s2391_s9 + $0x30] ss:$20 sps:$4 sm:$0xff]  }
  0x1e   : > { %1876 = vmatprep.subr.bf16.mxu0 %v2185_v10  ;;  %2155 = vmatprep.subr.bf16.mxu1 %v2185_v10  ;;  %v2238_v54 = vld [vmem:[%s2391_s9 + $0xa0] ss:$20 sps:$4 sm:$0xff]   ;;  %v2243_v58 = vld [vmem:[%s2391_s9 + $0xc8] ss:$20 sps:$4 sm:$0xff]   ;;  %v2249_v62 = vld [vmem:[%s2391_s9 + $0xf0] ss:$20 sps:$4 sm:$0xff]  }
  0x1f   : > { %v2239_v55 = vld [vmem:[%s2391_s9 + $0xcc] ss:$20 sps:$4 sm:$0xff]   ;;  %v2245_v60 = vld [vmem:[%s2391_s9 + $0xf4] ss:$20 sps:$4 sm:$0xff]   ;;  %v2247_v61 = vld [vmem:[%s2391_s9 + $0x5c] ss:$20 sps:$4 sm:$0xff]  }
  0x20   : > { %v2250_v63 = vld [vmem:[%s2391_s9 + $0x58] ss:$20 sps:$4 sm:$0xff]   ;;  %v2252_v0 = vld [vmem:[%s2391_s9 + $0x11c] ss:$20 sps:$4 sm:$0xff]   ;;  %v2257_v3 = vld [vmem:[%s2391_s9 + $0x80] ss:$20 sps:$4 sm:$0xff]  }
  0x21   : > { %1877 = vmatpush3.bf16.msra.mxu0 %v2186_v13  ;;  %2163 = vmatpush3.bf16.msra.mxu1 %v2186_v13  ;;  %v2254_v1 = vld [vmem:[%s2391_s9 + $0x84] ss:$20 sps:$4 sm:$0xff]   ;;  %v2260_v5 = vld [vmem:[%s2391_s9 + $0xac] ss:$20 sps:$4 sm:$0xff]   ;;  %v2263_v7 = vld [vmem:[%s2391_s9 + $0xa8] ss:$20 sps:$4 sm:$0xff]  }
  0x22   : > { %1878 = vmatprep.subr.bf16.mxu0 %v2187_v14  ;;  %2156 = vmatprep.subr.bf16.mxu1 %v2187_v14  ;;  %v2256_v2 = vld [vmem:[%s2391_s9 + $0x118] ss:$20 sps:$4 sm:$0xff]   ;;  %v2262_v6 = vld [vmem:[%s2391_s9 + $0x140] ss:$20 sps:$4 sm:$0xff]   ;;  %v2268_v10 = vld [vmem:[%s2391_s9 + $0x168] ss:$20 sps:$4 sm:$0xff]  }
  0x23   : > { %v2258_v4 = vld [vmem:[%s2391_s9 + $0x144] ss:$20 sps:$4 sm:$0xff]   ;;  %v2264_v8 = vld [vmem:[%s2391_s9 + $0x16c] ss:$20 sps:$4 sm:$0xff]   ;;  %v2266_v9 = vld [vmem:[%s2391_s9 + $0xd4] ss:$20 sps:$4 sm:$0xff]  }
  0x24   : > { %v2269_v11 = vld [vmem:[%s2391_s9 + $0xd0] ss:$20 sps:$4 sm:$0xff]   ;;  %v2271_v12 = vld [vmem:[%s2391_s9 + $0x194] ss:$20 sps:$4 sm:$0xff]  }
  0x25   : > { %1879 = vmatpush3.bf16.msra.mxu0 %v2188_v15  ;;  %2164 = vmatpush3.bf16.msra.mxu1 %v2188_v15  ;;  %v2273_v13 = vld [vmem:[%s2391_s9 + $0xfc] ss:$20 sps:$4 sm:$0xff]   ;;  %v2276_v15 = vld [vmem:[%s2391_s9 + $0xf8] ss:$20 sps:$4 sm:$0xff]  }
  0x26   : > { %1880 = vmatprep.subr.bf16.mxu0 %v2189_v16  ;;  %2157 = vmatprep.subr.bf16.mxu1 %v2189_v16  ;;  %v2275_v14 = vld [vmem:[%s2391_s9 + $0x190] ss:$20 sps:$4 sm:$0xff]  }
  0x27   : > { %v2277_v16 = vld [vmem:[%s2391_s9 + $0x1bc] ss:$20 sps:$4 sm:$0xff]  }
  0x29   : > { %1881 = vmatpush3.bf16.msra.mxu0 %v2190_v17  ;;  %2165 = vmatpush3.bf16.msra.mxu1 %v2190_v17  ;;  %v2279_v17 = vld [vmem:[%s2391_s9 + $0x124] ss:$20 sps:$4 sm:$0xff]  }
  0x2a   : > { %1978 = vmatprep.subr.bf16.mxu1 %v2197_v18  ;;  %2110 = vmatprep.subr.bf16.mxu0 %v2200_v19  ;;  %v2281_v18 = vld [vmem:[%s2391_s9 + $0x1b8] ss:$20 sps:$4 sm:$0xff]  }
  0x2c   : > { %1053 = vmatmul.mubr.bf16.vlgmr.msra.gmra.mxu0 %v2191_v20  ;;  %1149 = vmatmul.mubr.bf16.vlgmr.msra.gmra.mxu1 %v2194_v21  ;;  %v2283_v20 = vld [vmem:[%s2391_s9 + $0x14c] ss:$20 sps:$4 sm:$0xff]   ;;  %v2285_v21 = vld [vmem:[%s2391_s9 + $0x10] ss:$20 sps:$4 sm:$0xff]  }
  0x2d   : > { %1979 = vmatpush3.bf16.msra.mxu1 %v2198_v22  ;;  %2111 = vmatpush3.bf16.msra.mxu0 %v2200_v19  ;;  %v2282_v19 = vld [vmem:[%s2391_s9 + $0x120] ss:$20 sps:$4 sm:$0xff]   ;;  %v2286_v22 = vld [vmem:[%s2391_s9 + $0x148] ss:$20 sps:$4 sm:$0xff]  }
  0x2e   : > { %1980 = vmatprep.subr.bf16.mxu1 %v2199_v23  ;;  %1060 = vmatprep.mubr.bf16.mxu0 %v2202_v24  ;;  %v2287_v23 = vld [vmem:[%s2391_s9 + $0x38] ss:$20 sps:$4 sm:$0xff]   ;;  %v2288_v24 = vld [vmem:[%s2391_s9 + $0x174] ss:$20 sps:$4 sm:$0xff]  }
  0x2f   : > { %1156 = vmatprep.mubr.bf16.mxu1 %v2204_v25  ;;  %2112 = vmatprep.subr.bf16.mxu0 %v2231_v35  ;;  %v2290_v25 = vld [vmem:[%s2391_s9 + $0x60] ss:$20 sps:$4 sm:$0xff]  }
  0x31   : > { %1981 = vmatpush3.bf16.msra.mxu1 %v2201_v26  ;;  %2113 = vmatpush3.bf16.msra.mxu0 %v2231_v35  ;;  %v2291_v26 = vld [vmem:[%s2391_s9 + $0x170] ss:$20 sps:$4 sm:$0xff]   ;;  %v2302_v35 = vld [vmem:[%s2391_s9 + $0x128] ss:$20 sps:$4 sm:$0xff]  }
  0x32   : > { %1982 = vmatprep.subr.bf16.mxu1 %v2208_v28  ;;  %2114 = vmatprep.subr.bf16.mxu0 %v2251_v47  ;;  %v2293_v28 = vld [vmem:[%s2391_s9 + $0x19c] ss:$20 sps:$4 sm:$0xff]  }
  0x34   : > { %1061 = vmatmul.mubr.bf16.gmra.mxu0 %v2206_v27  ;;  %1157 = vmatmul.mubr.bf16.gmra.mxu1 %v2207_v29  ;;  %v2292_v27 = vld [vmem:[%s2391_s9 + $0x88] ss:$20 sps:$4 sm:$0xff]   ;;  %v2295_v29 = vld [vmem:[%s2391_s9 + $0xb0] ss:$20 sps:$4 sm:$0xff]  }
  0x35   : > { %1983 = vmatpush3.bf16.msra.mxu1 %v2209_v30  ;;  %1068 = vmatprep.mubr.bf16.mxu0 %v2212_v32  ;;  %v2296_v30 = vld [vmem:[%s2391_s9 + $0x198] ss:$20 sps:$4 sm:$0xff]  }
  0x36   : > { %1984 = vmatprep.subr.bf16.mxu1 %v2210_v31  ;;  %1164 = vmatprep.mubr.bf16.mxu1 %v2214_v33  ;;  %v2297_v31 = vld [vmem:[%s2391_s9 + $0xd8] ss:$20 sps:$4 sm:$0xff]   ;;  %v2300_v33 = vld [vmem:[%s2391_s9 + $0x100] ss:$20 sps:$4 sm:$0xff]  }
  0x37   : > { %2115 = vmatpush3.bf16.msra.mxu0 %v2251_v47  ;;  %v2298_v32 = vld [vmem:[%s2391_s9 + $0x1c4] ss:$20 sps:$4 sm:$0xff]  }
  0x38   : > { %2116 = vmatprep.subr.bf16.mxu0 %v2270_v56  ;;  %v2317_v47 = vld [vmem:[%s2391_s9 + $0x218] ss:$20 sps:$4 sm:$0xff]  }
  0x39   : > { %1985 = vmatpush3.bf16.msra.mxu1 %v2211_v34  ;;  %v2301_v34 = vld [vmem:[%s2391_s9 + $0x1c0] ss:$20 sps:$4 sm:$0xff]  }
  0x3a   : > { %1986 = vmatprep.subr.bf16.mxu1 %v2218_v37  ;;  %v2305_v37 = vld [vmem:[%s2391_s9 + $0x150] ss:$20 sps:$4 sm:$0xff]  }
  0x3b   : > { %2117 = vmatpush3.bf16.msra.mxu0 %v2270_v56 }
  0x3c   : > { %1069 = vmatmul.mubr.bf16.gmra.mxu0 %v2216_v36  ;;  %1165 = vmatmul.mubr.bf16.gmra.mxu1 %v2217_v38  ;;  %v2303_v36 = vld [vmem:[%s2391_s9 + $0x1ec] ss:$20 sps:$4 sm:$0xff]   ;;  %v2306_v38 = vld [vmem:[%s2391_s9 + $0x1e8] ss:$20 sps:$4 sm:$0xff]  }
  0x3d   : > { %1987 = vmatpush3.bf16.msra.mxu1 %v2219_v39  ;;  %1076 = vmatprep.mubr.bf16.mxu0 %v2222_v41  ;;  %v2307_v39 = vld [vmem:[%s2391_s9 + $0x178] ss:$20 sps:$4 sm:$0xff]   ;;  %v2310_v41 = vld [vmem:[%s2391_s9 + $0x1a0] ss:$20 sps:$4 sm:$0xff]  }
  0x3e   : > { %1988 = vmatprep.subr.bf16.mxu1 %v2220_v40  ;;  %1172 = vmatprep.mubr.bf16.mxu1 %v2224_v42  ;;  %v2308_v40 = vld [vmem:[%s2391_s9 + $0x214] ss:$20 sps:$4 sm:$0xff]   ;;  %v2311_v42 = vld [vmem:[%s2391_s9 + $0x210] ss:$20 sps:$4 sm:$0xff]  }
  0x41   : > { %1989 = vmatpush3.bf16.msra.mxu1 %v2221_v43  ;;  %v2312_v43 = vld [vmem:[%s2391_s9 + $0x1c8] ss:$20 sps:$4 sm:$0xff]  }
  0x42   : > { %1990 = vmatprep.subr.bf16.mxu1 %v2228_v46  ;;  %v2316_v46 = vld [vmem:[%s2391_s9 + $0x238] ss:$20 sps:$4 sm:$0xff]  }
  0x44   : > { %1077 = vmatmul.mubr.bf16.gmra.mxu0 %v2226_v44  ;;  %1173 = vmatmul.mubr.bf16.gmra.mxu1 %v2227_v45  ;;  %v2313_v44 = vld [vmem:[%s2391_s9 + $0x23c] ss:$20 sps:$4 sm:$0xff]  }
  0x45   : > { %1991 = vmatpush3.bf16.msra.mxu1 %v2229_v48  ;;  %1084 = vmatprep.mubr.bf16.mxu0 %v2233_v50  ;;  %v2315_v45 = vld [vmem:[%s2391_s9 + $0x1f0] ss:$20 sps:$4 sm:$0xff]   ;;  %v2321_v50 = vld [vmem:[%s2391_s9 + $0x260] ss:$20 sps:$4 sm:$0xff]  }
  0x46   : > { %1992 = vmatprep.subr.bf16.mxu1 %v2230_v49  ;;  %1213 = vmatprep.mubr.bf16.mxu1 %v2237_v51  ;;  %v2318_v48 = vld [vmem:[%s2391_s9 + $0x264] ss:$20 sps:$4 sm:$0xff]   ;;  %v2320_v49 = vld [vmem:[%s2391_s9 + $0x240] ss:$20 sps:$4 sm:$0xff]   ;;  %v2322_v51 = vld [vmem:[%s2391_s9 + $0x268] ss:$20 sps:$4 sm:$0xff]  }
  0x49   : > { %1993 = vmatpush3.bf16.msra.mxu1 %v2232_v52 }
  0x4c   : > { %1085 = vmatmul.mubr.bf16.gmra.mxu0 %v2238_v54  ;;  %1214 = vmatmul.mubr.bf16.vlgmr.msra.gmra.mxu1 %v2235_v53 }
  0x4d   : > { %1092 = vmatprep.mubr.bf16.mxu0 %v2239_v55  ;;  %1221 = vmatprep.mubr.bf16.mxu1 %v2241_v57 }
  0x54   : > { %1093 = vmatmul.mubr.bf16.gmra.mxu0 %v2243_v58  ;;  %1222 = vmatmul.mubr.bf16.gmra.mxu1 %v2244_v59 }
  0x55   : > { %1100 = vmatprep.mubr.bf16.mxu0 %v2245_v60  ;;  %1229 = vmatprep.mubr.bf16.mxu1 %v2247_v61 }
  0x5c   : > { %1101 = vmatmul.mubr.bf16.gmra.mxu0 %v2249_v62  ;;  %1230 = vmatmul.mubr.bf16.gmra.mxu1 %v2250_v63 }
  0x5d   : > { %1108 = vmatprep.mubr.bf16.mxu0 %v2252_v0  ;;  %1237 = vmatprep.mubr.bf16.mxu1 %v2254_v1 }
  0x64   : > { %1109 = vmatmul.mubr.bf16.gmra.mxu0 %v2256_v2  ;;  %1238 = vmatmul.mubr.bf16.gmra.mxu1 %v2257_v3 }
  0x65   : > { %1116 = vmatprep.mubr.bf16.mxu0 %v2258_v4  ;;  %1245 = vmatprep.mubr.bf16.mxu1 %v2260_v5 }
  0x6c   : > { %1117 = vmatmul.mubr.bf16.gmra.mxu0 %v2262_v6  ;;  %1246 = vmatmul.mubr.bf16.gmra.mxu1 %v2263_v7 }
  0x6d   : > { %1124 = vmatprep.mubr.bf16.mxu0 %v2264_v8  ;;  %1253 = vmatprep.mubr.bf16.mxu1 %v2266_v9 }
  0x74   : > { %1125 = vmatmul.mubr.bf16.gmra.mxu0 %v2268_v10  ;;  %1254 = vmatmul.mubr.bf16.gmra.mxu1 %v2269_v11 }
  0x75   : > { %1132 = vmatprep.mubr.bf16.mxu0 %v2271_v12  ;;  %1261 = vmatprep.mubr.bf16.mxu1 %v2273_v13 }
  0x7c   : > { %1133 = vmatmul.mubr.bf16.gmra.mxu0 %v2275_v14  ;;  %1262 = vmatmul.mubr.bf16.gmra.mxu1 %v2276_v15 }
  0x7d   : > { %1140 = vmatprep.mubr.bf16.mxu0 %v2277_v16  ;;  %1269 = vmatprep.mubr.bf16.mxu1 %v2279_v17 }
  0x84   : > { %1141 = vmatmul.mubr.bf16.gmra.mxu0 %v2281_v18  ;;  %1270 = vmatmul.mubr.bf16.gmra.mxu1 %v2282_v19 }
  0x85   : > { %1277 = vmatprep.mubr.bf16.mxu1 %v2283_v20  ;;  %2118 = vmatprep.mubr.msk.bf16.mxu0 %vm971_vm0, %v2285_v21 }
  0x8c   : > { %1278 = vmatmul.mubr.bf16.gmra.mxu1 %v2286_v22  ;;  %2119 = vmatmul.mubr.msk.bf16.vlgmr.msra.gmra.mxu0 %vm971_vm0, %v2287_v23 }
  0x8d   : > { %1285 = vmatprep.mubr.bf16.mxu1 %v2288_v24  ;;  %2122 = vmatprep.mubr.msk.bf16.mxu0 %vm971_vm0, %v2290_v25 }
  0x94   : > { %1286 = vmatmul.mubr.bf16.gmra.mxu1 %v2291_v26  ;;  %2123 = vmatmul.mubr.msk.bf16.gmra.mxu0 %vm971_vm0, %v2292_v27 }
  0x95   : > { %1293 = vmatprep.mubr.bf16.mxu1 %v2293_v28  ;;  %2126 = vmatprep.mubr.msk.bf16.mxu0 %vm971_vm0, %v2295_v29 }
  0x9c   : > { %1294 = vmatmul.mubr.bf16.gmra.mxu1 %v2296_v30  ;;  %2127 = vmatmul.mubr.msk.bf16.gmra.mxu0 %vm971_vm0, %v2297_v31 }
  0x9d   : > { %1301 = vmatprep.mubr.bf16.mxu1 %v2298_v32  ;;  %2130 = vmatprep.mubr.msk.bf16.mxu0 %vm971_vm0, %v2300_v33 }
  0xa4   : > { %1302 = vmatmul.mubr.bf16.gmra.mxu1 %v2301_v34  ;;  %2131 = vmatmul.mubr.msk.bf16.gmra.mxu0 %vm971_vm0, %v2302_v35 }
  0xa5   : > { %1309 = vmatprep.mubr.bf16.mxu1 %v2303_v36  ;;  %2134 = vmatprep.mubr.msk.bf16.mxu0 %vm971_vm0, %v2305_v37 }
  0xac   : > { %1310 = vmatmul.mubr.bf16.gmra.mxu1 %v2306_v38  ;;  %2135 = vmatmul.mubr.msk.bf16.gmra.mxu0 %vm971_vm0, %v2307_v39  ;;  %v2603_v38 = vld [vmem:[%s2876_s2] ss:$0 sm:$0xff] }
  0xad   : > { %1317 = vmatprep.mubr.bf16.mxu1 %v2308_v40  ;;  %2138 = vmatprep.mubr.msk.bf16.mxu0 %vm971_vm0, %v2310_v41 }
  0xb4   : > { %1318 = vmatmul.mubr.bf16.gmra.mxu1 %v2311_v42  ;;  %2139 = vmatmul.mubr.msk.bf16.gmra.mxu0 %vm971_vm0, %v2312_v43 }
  0xb5   : > { %1325 = vmatprep.mubr.bf16.mxu1 %v2313_v44  ;;  %2142 = vmatprep.mubr.msk.bf16.mxu0 %vm971_vm0, %v2315_v45 }
  0xbc   : > { %1326 = vmatmul.mubr.bf16.gmra.mxu1 %v2316_v46  ;;  %2143 = vmatmul.mubr.msk.bf16.gmra.mxu0 %vm971_vm0, %v2317_v47 }
  0xbd   : > { %1333 = vmatprep.mubr.bf16.mxu1 %v2318_v48  ;;  %2146 = vmatprep.mubr.msk.bf16.mxu0 %vm971_vm0, %v2320_v49 }
  0xc4   : > { %1334 = vmatmul.mubr.bf16.gmra.mxu1 %v2321_v50  ;;  %2147 = vmatmul.mubr.msk.bf16.gmra.mxu0 %vm971_vm0, %v2322_v51 }
  0xec   : > { %v1882_v52 = vpop.f32.mrf.mxu0  ;;  %v1954_v53 = vpop.f32.mrf.mxu1 }
  0xee   : > { %v1883_v54 = vpop.f32.mrf.mxu0  ;;  %v1955_v55 = vpop.f32.mrf.mxu1 }
  0xef   : > { %v1884_v56 = vadd.f32 %v1883_v54, %v1882_v52  ;;  %v2570_v57 = vadd.f32 %v1955_v55, %v1954_v53 }
  0xf0   : > { %v1885_v58 = vpop.f32.mrf.mxu0  ;;  %v1957_v59 = vpop.f32.mrf.mxu1 }
  0xf1   : > { %2878 = vst [vmem:[#allocation3_spill] sm:$0xff] %v2570_v57  ;;  %v1055_v41 = vadd.f32 %v1884_v56, %v2603_v38 }
  0xf2   : > { %v1886_v60 = vpop.f32.mrf.mxu0  ;;  %v1958_v61 = vpop.f32.mrf.mxu1 }
  0xf3   : > { %v2572_v62 = vadd.f32 %v1886_v60, %v1885_v58  ;;  %v2574_v63 = vadd.f32 %v1958_v61, %v1957_v59 }
  0xf4   : > { %v1888_v0 = vpop.f32.mrf.mxu0  ;;  %v1960_v1 = vpop.f32.mrf.mxu1 }
  0xf5   : > { %2879 = vst [vmem:[#allocation4_spill] sm:$0xff] %v2574_v63 }
  0xf6   : > { %v1889_v2 = vpop.f32.mrf.mxu0  ;;  %v1961_v3 = vpop.f32.mrf.mxu1 }
  0xf7   : > { %v2576_v4 = vadd.f32 %v1889_v2, %v1888_v0  ;;  %v2578_v5 = vadd.f32 %v1961_v3, %v1960_v1 }
  0xf8   : > { %v1891_v6 = vpop.f32.mrf.mxu0  ;;  %v1963_v7 = vpop.f32.mrf.mxu1 }
  0xf9   : > { %2880 = vst [vmem:[#allocation5_spill] sm:$0xff] %v2578_v5 }
  0xfa   : > { %v1892_v8 = vpop.f32.mrf.mxu0  ;;  %v1964_v9 = vpop.f32.mrf.mxu1 }
  0xfb   : > { %v2580_v10 = vadd.f32 %v1892_v8, %v1891_v6  ;;  %v2582_v11 = vadd.f32 %v1964_v9, %v1963_v7 }
  0xfc   : > { %v1894_v12 = vpop.f32.mrf.mxu0  ;;  %v1966_v13 = vpop.f32.mrf.mxu1 }
  0xfd   : > { %2881 = vst [vmem:[#allocation6_spill] sm:$0xff] %v2582_v11 }
  0xfe   : > { %v1895_v14 = vpop.f32.mrf.mxu0  ;;  %v1967_v15 = vpop.f32.mrf.mxu1 }
  0xff   : > { %v2584_v16 = vadd.f32 %v1895_v14, %v1894_v12  ;;  %v2586_v17 = vadd.f32 %v1967_v15, %v1966_v13 }
 0x100   : > { %v1897_v18 = vpop.f32.mrf.mxu0  ;;  %v1969_v19 = vpop.f32.mrf.mxu1 }
 0x101   : > { %2882 = vst [vmem:[#allocation7_spill] sm:$0xff] %v2586_v17 }
 0x102   : > { %v1898_v20 = vpop.f32.mrf.mxu0  ;;  %v1970_v21 = vpop.f32.mrf.mxu1 }
 0x103   : > { %v2588_v22 = vadd.f32 %v1898_v20, %v1897_v18  ;;  %v2590_v23 = vadd.f32 %v1970_v21, %v1969_v19 }
 0x104   : > { %v1900_v24 = vpop.f32.mrf.mxu0  ;;  %v1972_v25 = vpop.f32.mrf.mxu1 }
 0x105   : > { %2883 = vst [vmem:[#allocation8_spill] sm:$0xff] %v2590_v23 }
 0x106   : > { %v1901_v26 = vpop.f32.mrf.mxu0  ;;  %v1973_v27 = vpop.f32.mrf.mxu1 }
 0x107   : > { %v2592_v28 = vadd.f32 %v1901_v26, %v1900_v24  ;;  %v2594_v29 = vadd.f32 %v1973_v27, %v1972_v25 }
 0x108   : > { %v1903_v30 = vpop.f32.mrf.mxu0  ;;  %v1975_v31 = vpop.f32.mrf.mxu1 }
 0x109   : > { %2884 = vst [vmem:[#allocation9_spill] sm:$0xff] %v2594_v29 }
 0x10a   : > { %v1904_v32 = vpop.f32.mrf.mxu0  ;;  %v1976_v33 = vpop.f32.mrf.mxu1 }
 0x10b   : > { %v2596_v34 = vadd.f32 %v1904_v32, %v1903_v30  ;;  %v2598_v35 = vadd.f32 %v1976_v33, %v1975_v31 }
 0x10c   : > { %v1906_v36 = vpop.f32.mrf.mxu0  ;;  %v1994_v37 = vpop.f32.mrf.mxu1 }
 0x10d   : > { %2885 = vst [vmem:[#allocation10_spill] sm:$0xff] %v2598_v35 }
 0x10e   : > { %v1907_v39 = vpop.f32.mrf.mxu0  ;;  %v1995_v40 = vpop.f32.mrf.mxu1 }
 0x10f   : > { %v2606_v42 = vadd.f32 %v1907_v39, %v1906_v36  ;;  %v1996_v43 = vadd.f32 %v1995_v40, %v1994_v37 }
 0x110   : > { %v1909_v44 = vpop.f32.mrf.mxu0  ;;  %v2608_v45 = vpop.f32.mrf.mxu1 }
 0x111   : > { %v2610_v46 = vadd.f32 %v1996_v43, %v1055_v41 }
 0x112   : > { %v1910_v47 = vpop.f32.mrf.mxu0  ;;  %v2612_v48 = vpop.f32.mrf.mxu1 }
 0x113   : > { %v2614_v49 = vadd.f32 %v1910_v47, %v1909_v44 }
 0x114   : > { %v1912_v50 = vpop.f32.mrf.mxu0  ;;  %v2000_v51 = vpop.f32.mrf.mxu1 }
 0x116   : > { %v1913_v52 = vpop.f32.mrf.mxu0  ;;  %v2001_v53 = vpop.f32.mrf.mxu1 }
 0x117   : > { %v2616_v54 = vadd.f32 %v1913_v52, %v1912_v50  ;;  %v2002_v5 = vadd.f32 %v2001_v53, %v2000_v51 }
 0x118   : > { %v1915_v55 = vpop.f32.mrf.mxu0  ;;  %v2003_v56 = vpop.f32.mrf.mxu1 }
 0x11a   : > { %v1916_v58 = vpop.f32.mrf.mxu0  ;;  %v2004_v59 = vpop.f32.mrf.mxu1 }
 0x11b   : > { %v2618_v60 = vadd.f32 %v1916_v58, %v1915_v55 }
 0x11c   : > { %v1918_v61 = vpop.f32.mrf.mxu0  ;;  %v2620_v0 = vpop.f32.mrf.mxu1 }
 0x11e   : > { %v1919_v1 = vpop.f32.mrf.mxu0  ;;  %v2622_v2 = vpop.f32.mrf.mxu1 }
 0x11f   : > { %v2624_v3 = vadd.f32 %v1919_v1, %v1918_v61 }
 0x120   : > { %v1921_v6 = vpop.f32.mrf.mxu0  ;;  %v2626_v7 = vpop.f32.mrf.mxu1 }
 0x122   : > { %v1922_v8 = vpop.f32.mrf.mxu0  ;;  %v2628_v9 = vpop.f32.mrf.mxu1 }
 0x123   : > { %v2630_v12 = vadd.f32 %v1922_v8, %v1921_v6 }
 0x124   : > { %v2632_v13 = vpop.f32.mrf.mxu0  ;;  %v2012_v14 = vpop.f32.mrf.mxu1 }
 0x126   : > { %v2634_v15 = vpop.f32.mrf.mxu0  ;;  %v2013_v18 = vpop.f32.mrf.mxu1 }
 0x128   : > { %v2636_v19 = vpop.f32.mrf.mxu0  ;;  %v2015_v20 = vpop.f32.mrf.mxu1 }
 0x12a   : > { %v2638_v21 = vpop.f32.mrf.mxu0  ;;  %v2016_v24 = vpop.f32.mrf.mxu1 }
 0x12c   : > { %v2640_v25 = vpop.f32.mrf.mxu0  ;;  %v2642_v26 = vpop.f32.mrf.mxu1 }
 0x12e   : > { %v2644_v27 = vpop.f32.mrf.mxu0  ;;  %v2646_v30 = vpop.f32.mrf.mxu1 }
 0x12f   : > { %2886 = vst [vmem:[#allocation11_spill] sm:$0xff] %v2644_v27 }
 0x130   : > { %v2648_v31 = vpop.f32.mrf.mxu0  ;;  %v2650_v32 = vpop.f32.mrf.mxu1 }
 0x131   : > { %2887 = vst [vmem:[#allocation12_spill] sm:$0xff] %v2648_v31 }
 0x132   : > { %v2652_v33 = vpop.f32.mrf.mxu0  ;;  %v2654_v36 = vpop.f32.mrf.mxu1 }
 0x133   : > { %2888 = vst [vmem:[#allocation13_spill] sm:$0xff] %v2652_v33 }
 0x134   : > { %v2656_v37 = vpop.f32.mrf.mxu0  ;;  %v2658_v39 = vpop.f32.mrf.mxu1 }
 0x136   : > { %v2660_v40 = vpop.f32.mrf.mxu0  ;;  %v2662_v41 = vpop.f32.mrf.mxu1 }
 0x138   : > { %v2664_v43 = vpop.f32.mrf.mxu0  ;;  %v2666_v44 = vpop.f32.mrf.mxu1 }
 0x139   : > { %2889 = vst [vmem:[#allocation14_spill] sm:$0xff] %v2664_v43 }
 0x13a   : > { %v2668_v47 = vpop.f32.mrf.mxu0  ;;  %v2670_v50 = vpop.f32.mrf.mxu1 }
 0x13b   : > { %2890 = vst [vmem:[#allocation15_spill] sm:$0xff] %v2668_v47 }
 0x13c   : > { %v2672_v52 = vpop.f32.mrf.mxu0  ;;  %v2674_v55 = vpop.f32.mrf.mxu1 }
 0x13d   : > { %2891 = vst [vmem:[#allocation16_spill] sm:$0xff] %v2672_v52  ;;  %v2005_v52 = vadd.f32 %v2004_v59, %v2003_v56  ;;  %v2014_v59 = vadd.f32 %v2013_v18, %v2012_v14  ;;  %v1071_v14 = vadd.f32 %v2584_v16, %v2603_v38 }
 0x13e   : > { %v2676_v58 = vpop.f32.mrf.mxu0  ;;  %v2678_v61 = vpop.f32.mrf.mxu1 }
 0x13f   : > { %2892 = vst [vmem:[#allocation17_spill] sm:$0xff] %v2676_v58 }
 0x140   : > { %v2680_v1 = vpop.f32.mrf.mxu0  ;;  %v2682_v6 = vpop.f32.mrf.mxu1 }
 0x141   : > { %2893 = vst [vmem:[#allocation18_spill] sm:$0xff] %v2680_v1 }
 0x142   : > { %v2684_v8 = vpop.f32.mrf.mxu0  ;;  %v2686_v35 = vpop.f32.mrf.mxu1 }
 0x143   : > { %2894 = vst [vmem:[#allocation19_spill] sm:$0xff] %v2684_v8  ;;  %v1063_v8 = vadd.f32 %v2576_v4, %v2603_v38 }
 0x144   : > { %v2688_v29 = vpop.f32.mrf.mxu0  ;;  %v2690_v23 = vpop.f32.mrf.mxu1 }
 0x145   : > { %2895 = vst [vmem:[#allocation20_spill] sm:$0xff] %v2688_v29  ;;  %v1224_v31 = vadd.f32 %v2002_v5, %v1063_v8  ;;  %v1079_v5 = vadd.f32 %v2592_v28, %v2603_v38  ;;  %v2011_v28 = vadd.f32 %v2628_v9, %v2626_v7  ;;  %v2026_v8 = vadd.f32 %v2662_v41, %v2658_v39 }
 0x146   : > { %v2692_v17 = vpop.f32.mrf.mxu0  ;;  %v2694_v63 = vpop.f32.mrf.mxu1  ;;  %v1087_v41 = vadd.f32 %v2606_v42, %v2603_v38 }
 0x147   : > { %2896 = vst [vmem:[#allocation21_spill] sm:$0xff] %v2692_v17  ;;  %v1066_v17 = vadd.f32 %v2580_v10, %v2603_v38 }
 0x148   : > { %v2696_v11 = vpop.f32.mrf.mxu0  ;;  %v2698_v57 = vpop.f32.mrf.mxu1 }
 0x149   : > { %2897 = vst [vmem:[#allocation22_spill] sm:$0xff] %v2696_v11  ;;  %v1999_v11 = vadd.f32 %v2612_v48, %v2608_v45  ;;  %v1227_v43 = vadd.f32 %v2005_v52, %v1066_v17  ;;  %v2008_v45 = vadd.f32 %v2622_v2, %v2620_v0  ;;  %v2017_v17 = vadd.f32 %v2016_v24, %v2015_v20 }
 0x14a   : > { %v2700_v1 = vpop.f32.mrf.mxu0  ;;  %v2702_v58 = vpop.f32.mrf.mxu1  ;;  %v1240_v20 = vadd.f32 %v2014_v59, %v1079_v5  ;;  %v1095_v59 = vadd.f32 %v2616_v54, %v2603_v38  ;;  %v2023_v54 = vadd.f32 %v2654_v36, %v2650_v32 }
 0x14b   : > { %2898 = vst [vmem:[#allocation23_spill] sm:$0xff] %v2700_v1  ;;  %v1058_v1 = vadd.f32 %v2572_v62, %v2603_v38  ;;  %v1232_v7 = vadd.f32 %v2008_v45, %v1071_v14 }
 0x14c   : > { %v2706_v29 = vpop.f32.mrf.mxu1  ;;  %v2120_v33 = vpop.f32.mrf.mxu0 }
 0x14d   : > { %2899 = vst [vmem:[#allocation24_spill] sm:$0xff] %v2706_v29  ;;  %v1385_v47 = vadd.f32 %v2120_v33, %v1224_v31  ;;  %v1219_v27 = vadd.f32 %v1999_v11, %v1058_v1  ;;  %v1082_v11 = vadd.f32 %v2596_v34, %v2603_v38 }
 0x14e   : > { %v2712_v51 = vpop.f32.mrf.mxu1  ;;  %v1376_v53 = vpop.f32.mrf.mxu0 }
 0x14f   : > { %v1377_v10 = vadd.f32 %v1376_v53, %v2610_v46  ;;  %v1505_v31 = vmax.f32 %v1385_v47, 0.0  ;;  %v1243_v9 = vadd.f32 %v2017_v17, %v1082_v11 }
 0x150   : > { %v2716_v4 = vpop.f32.mrf.mxu1  ;;  %v2121_v56 = vpop.f32.mrf.mxu0 }
 0x151   : > { %v1388_v29 = vadd.f32 %v2121_v56, %v1227_v43  ;;  %v1503_v2 = vmax.f32 %v1377_v10, 0.0  ;;  %v2020_v10 = vadd.f32 %v2646_v30, %v2642_v26 }
 0x152   : > { %v2725_v48 = vpop.f32.mrf.mxu1  ;;  %v1379_v62 = vpop.f32.mrf.mxu0 }
 0x153   : > { %v1506_v33 = vmax.f32 %v1388_v29, 0.0  ;;  %v1380_v52 = vadd.f32 %v1379_v62, %v1219_v27  ;;  %v1074_v29 = vadd.f32 %v2588_v22, %v2603_v38  ;;  %v2029_v62 = vadd.f32 %v2670_v50, %v2666_v44 }
 0x154   : > { %v2733_v46 = vpop.f32.mrf.mxu1  ;;  %v2124_v0 = vpop.f32.mrf.mxu0  ;;  %v1256_v44 = vadd.f32 %v2026_v8, %v1095_v59  ;;  %v1090_v50 = vadd.f32 %v2614_v49, %v2603_v38  ;;  %v1248_v36 = vadd.f32 %v2020_v10, %v1087_v41 }
 0x155   : > { %v1536_v18 = vmax.f32 %v1505_v31, %v1506_v33  ;;  %v1504_v43 = vmax.f32 %v1380_v52, 0.0  ;;  %v1401_v34 = vadd.f32 %v2124_v0, %v1240_v20  ;;  %v1235_v56 = vadd.f32 %v2011_v28, %v1074_v29 }
 0x156   : > { %v2737_v24 = vpop.f32.mrf.mxu1  ;;  %v1392_v27 = vpop.f32.mrf.mxu0  ;;  %v1098_v33 = vadd.f32 %v2618_v60, %v2603_v38  ;;  %v1926_v28 = vadd.f32 %v2634_v15, %v2632_v13  ;;  %v1929_v13 = vadd.f32 %v2638_v21, %v2636_v19  ;;  %v2032_v19 = vadd.f32 %v2678_v61, %v2674_v55 }
 0x157   : > { %1552 = vst [vmem:[#allocation2 + $0x8] sm:$0xff] %v1536_v18  ;;  %v1535_v16 = vmax.f32 %v1503_v2, %v1504_v43  ;;  %v1393_v22 = vadd.f32 %v1392_v27, %v1232_v7  ;;  %v1509_v17 = vmax.f32 %v1401_v34, 0.0  ;;  %v2038_v34 = vadd.f32 %v2694_v63, %v2690_v23 }
 0x158   : > { %v2742_v47 = vpop.f32.mrf.mxu1  ;;  %v2125_v1 = vpop.f32.mrf.mxu0  ;;  %v1259_v49 = vadd.f32 %v2029_v62, %v1098_v33  ;;  %v1111_v8 = vadd.f32 %v1926_v28, %v2603_v38  ;;  %v1103_v23 = vadd.f32 %v2624_v3, %v2603_v38  ;;  %v1114_v10 = vadd.f32 %v1929_v13, %v2603_v38  ;;  %v2902_v28 = vld [vmem:[#allocation15_spill] sm:$0xff]  ;;  %v2904_v13 = vld [vmem:[#allocation13_spill] sm:$0xff] }
 0x159   : > { %1551 = vst [vmem:[#allocation2] sm:$0xff] %v1535_v16  ;;  %v1404_v53 = vadd.f32 %v2125_v1, %v1243_v9  ;;  %v1507_v52 = vmax.f32 %v1393_v22, 0.0  ;;  %v1251_v16 = vadd.f32 %v2023_v54, %v1090_v50  ;;  %v2901_v50 = vld [vmem:[#allocation14_spill] sm:$0xff] }
 0x15a   : > { %v2750_v5 = vpop.f32.mrf.mxu1  ;;  %v1395_v45 = vpop.f32.mrf.mxu0  ;;  %v1264_v54 = vadd.f32 %v2032_v19, %v1103_v23  ;;  %v2047_v19 = vadd.f32 %v2725_v48, %v2716_v4  ;;  %v2907_v23 = vld [vmem:[#allocation21_spill] sm:$0xff] }
 0x15b   : > { %v1510_v31 = vmax.f32 %v1404_v53, 0.0  ;;  %v1396_v39 = vadd.f32 %v1395_v45, %v1235_v56  ;;  %v2041_v53 = vadd.f32 %v2702_v58, %v2698_v57  ;;  %v2035_v45 = vadd.f32 %v2686_v35, %v2682_v6 }
 0x15c   : > { %v2761_v26 = vpop.f32.mrf.mxu1  ;;  %v2128_v30 = vpop.f32.mrf.mxu0  ;;  %v1106_v57 = vadd.f32 %v2630_v12, %v2603_v38  ;;  %v1938_v58 = vadd.f32 %v2660_v40, %v2656_v37  ;;  %v1941_v12 = vadd.f32 %v2902_v28, %v2901_v50 }
 0x15d   : > { %v1538_v14 = vmax.f32 %v1509_v17, %v1510_v31  ;;  %v1508_v11 = vmax.f32 %v1396_v39, 0.0  ;;  %v1417_v43 = vadd.f32 %v2128_v30, %v1256_v44  ;;  %v1272_v39 = vadd.f32 %v2038_v34, %v1111_v8 }
 0x15e   : > { %v1569_v42 = vld [vmem:[#allocation2 + $0x8] ss:$2 sm:$0xf]  ;;  %v1601_v60 = vld [vmem:[#allocation2 + $0x9] ss:$2 sm:$0xf]  ;;  %v2772_v32 = vpop.f32.mrf.mxu1  ;;  %v1408_v0 = vpop.f32.mrf.mxu0  ;;  %v1130_v8 = vadd.f32 %v1941_v12, %v2603_v38 }
 0x15f   : > { %v1631_v2 = vmax.f32 %v1569_v42, %v1601_v60  ;;  %1554 = vst [vmem:[#allocation2 + $0x18] sm:$0xff] %v1538_v14  ;;  %v1537_v18 = vmax.f32 %v1507_v52, %v1508_v11  ;;  %v1409_v9 = vadd.f32 %v1408_v0, %v1248_v36  ;;  %v1513_v56 = vmax.f32 %v1417_v43, 0.0  ;;  %v2900_v11 = vld [vmem:[#allocation11_spill] sm:$0xff] }
 0x160   : > { %v1567_v15 = vld [vmem:[#allocation2] ss:$2 sm:$0xf]  ;;  %v1599_v20 = vld [vmem:[#allocation2 + $0x1] ss:$2 sm:$0xf]  ;;  %v2776_v29 = vpop.f32.mrf.mxu1  ;;  %v2129_v27 = vpop.f32.mrf.mxu0  ;;  %v1275_v14 = vadd.f32 %v2041_v53, %v1114_v10  ;;  %v1932_v44 = vadd.f32 %v2900_v11, %v2640_v25  ;;  %v1267_v36 = vadd.f32 %v2035_v45, %v1106_v57  ;;  %v2050_v0 = vadd.f32 %v2737_v24, %v2733_v46 }
 0x161   : > { %1647 = vst [vmem:[%s2770_s22 + $0x4] sm:$0xf] %v1631_v2  ;;  %v1630_v7 = vmax.f32 %v1567_v15, %v1599_v20  ;;  %1553 = vst [vmem:[#allocation2 + $0x10] sm:$0xff] %v1537_v18  ;;  %v1420_v1 = vadd.f32 %v2129_v27, %v1259_v49  ;;  %v1511_v61 = vmax.f32 %v1409_v9, 0.0  ;;  %v2903_v49 = vld [vmem:[#allocation12_spill] sm:$0xff]  ;;  %v1127_v15 = vadd.f32 %v1938_v58, %v2603_v38 }
 0x162   : > { %v2784_v21 = vpop.f32.mrf.mxu1  ;;  %v1411_v22 = vpop.f32.mrf.mxu0  ;;  %v1935_v25 = vadd.f32 %v2904_v13, %v2903_v49  ;;  %v2905_v20 = vld [vmem:[#allocation24_spill] sm:$0xff] }
 0x163   : > { %1646 = vst [vmem:[%s2770_s22] sm:$0xf] %v1630_v7  ;;  %v1514_v59 = vmax.f32 %v1420_v1, 0.0  ;;  %v1412_v63 = vadd.f32 %v1411_v22, %v1251_v16  ;;  %v2044_v27 = vadd.f32 %v2712_v51, %v2905_v20  ;;  %v2053_v7 = vadd.f32 %v2750_v5, %v2742_v47  ;;  %v2906_v5 = vld [vmem:[#allocation20_spill] sm:$0xff] }
 0x164   : > { %v2794_v62 = vpop.f32.mrf.mxu1  ;;  %v2132_v55 = vpop.f32.mrf.mxu0  ;;  %v1119_v1 = vadd.f32 %v1932_v44, %v2603_v38  ;;  %v1122_v47 = vadd.f32 %v1935_v25, %v2603_v38  ;;  %v1950_v10 = vadd.f32 %v2907_v23, %v2906_v5  ;;  %v2908_v58 = vld [vmem:[#allocation16_spill] sm:$0xff]  ;;  %v2059_v20 = vadd.f32 %v2784_v21, %v2776_v29 }
 0x165   : > { %v1540_v17 = vmax.f32 %v1513_v56, %v1514_v59  ;;  %v1512_v31 = vmax.f32 %v1412_v63, 0.0  ;;  %v1433_v52 = vadd.f32 %v2132_v55, %v1272_v39  ;;  %v1288_v63 = vadd.f32 %v2050_v0, %v1127_v15 }
 0x166   : > { %v1573_v41 = vld [vmem:[#allocation2 + $0x18] ss:$2 sm:$0xf]  ;;  %v1605_v3 = vld [vmem:[#allocation2 + $0x19] ss:$2 sm:$0xf]  ;;  %v2061_v33 = vpop.f32.mrf.mxu1  ;;  %v1424_v30 = vpop.f32.mrf.mxu0  ;;  %v1291_v57 = vadd.f32 %v2053_v7, %v1130_v8  ;;  %v1283_v44 = vadd.f32 %v2047_v19, %v1122_v47  ;;  %v1143_v0 = vadd.f32 %v1950_v10, %v2603_v38 }
 0x167   : > { %v1633_v35 = vmax.f32 %v1573_v41, %v1605_v3  ;;  %1556 = vst [vmem:[#allocation2 + $0x28] sm:$0xff] %v1540_v17  ;;  %v1539_v6 = vmax.f32 %v1511_v61, %v1512_v31  ;;  %v1425_v18 = vadd.f32 %v1424_v30, %v1264_v54  ;;  %v1517_v46 = vmax.f32 %v1433_v52, 0.0  ;;  %v2909_v41 = vld [vmem:[#allocation17_spill] sm:$0xff]  ;;  %v2910_v54 = vld [vmem:[#allocation22_spill] sm:$0xff]  ;;  %v2911_v30 = vld [vmem:[#allocation23_spill] sm:$0xff] }
 0x168   : > { %v1571_v42 = vld [vmem:[#allocation2 + $0x10] ss:$2 sm:$0xf]  ;;  %v1603_v60 = vld [vmem:[#allocation2 + $0x11] ss:$2 sm:$0xf]  ;;  %v2063_v37 = vpop.f32.mrf.mxu1  ;;  %v2133_v40 = vpop.f32.mrf.mxu0  ;;  %v1280_v17 = vadd.f32 %v2044_v27, %v1119_v1  ;;  %v1944_v3 = vadd.f32 %v2909_v41, %v2908_v58  ;;  %v2062_v28 = vadd.f32 %v2061_v33, %v2794_v62 }
 0x169   : > { %1649 = vst [vmem:[%s2770_s22 + $0xc] sm:$0xf] %v1633_v35  ;;  %v1632_v2 = vmax.f32 %v1571_v42, %v1603_v60  ;;  %1555 = vst [vmem:[#allocation2 + $0x20] sm:$0xff] %v1539_v6  ;;  %v1436_v43 = vadd.f32 %v2133_v40, %v1275_v14  ;;  %v1515_v51 = vmax.f32 %v1425_v18, 0.0  ;;  %v1953_v35 = vadd.f32 %v2911_v30, %v2910_v54  ;;  %v2912_v60 = vld [vmem:[#allocation18_spill] sm:$0xff]  ;;  %v2913_v40 = vld [vmem:[#allocation19_spill] sm:$0xff] }
 0x16a   : > { %v2064_v16 = vpop.f32.mrf.mxu1  ;;  %v1427_v34 = vpop.f32.mrf.mxu0  ;;  %v1135_v62 = vadd.f32 %v1944_v3, %v2603_v38  ;;  %v2915_v3 = vld [vmem:[#allocation3_spill] sm:$0xff]  ;;  %v2916_v30 = vld [vmem:[#allocation6_spill] sm:$0xff] }
 0x16b   : > { %1648 = vst [vmem:[%s2770_s22 + $0x8] sm:$0xf] %v1632_v2  ;;  %v1518_v24 = vmax.f32 %v1436_v43, 0.0  ;;  %v1428_v9 = vadd.f32 %v1427_v34, %v1267_v36  ;;  %v1947_v36 = vadd.f32 %v2913_v40, %v2912_v60  ;;  %v2056_v2 = vadd.f32 %v2772_v32, %v2761_v26 }
 0x16c   : > { %v2819_v22 = vpop.f32.mrf.mxu1  ;;  %v2136_v53 = vpop.f32.mrf.mxu0  ;;  %v2065_v49 = vadd.f32 %v2064_v16, %v2063_v37  ;;  %v1146_v33 = vadd.f32 %v1953_v35, %v2603_v38  ;;  %v1304_v26 = vadd.f32 %v2062_v28, %v1143_v0  ;;  %v1151_v54 = vadd.f32 %v2915_v3, %v2603_v38 }
 0x16d   : > { %v1542_v56 = vmax.f32 %v1517_v46, %v1518_v24  ;;  %v1516_v59 = vmax.f32 %v1428_v9, 0.0  ;;  %v1449_v39 = vadd.f32 %v2136_v53, %v1288_v63  ;;  %v1138_v32 = vadd.f32 %v1947_v36, %v2603_v38 }
 0x16e   : > { %v1577_v45 = vld [vmem:[#allocation2 + $0x28] ss:$2 sm:$0xf]  ;;  %v1609_v55 = vld [vmem:[#allocation2 + $0x29] ss:$2 sm:$0xf]  ;;  %v2824_v61 = vpop.f32.mrf.mxu1  ;;  %v1440_v31 = vpop.f32.mrf.mxu0  ;;  %v1296_v1 = vadd.f32 %v2056_v2, %v1135_v62  ;;  %v1162_v35 = vadd.f32 %v2916_v30, %v2603_v38 }
 0x16f   : > { %v1635_v4 = vmax.f32 %v1577_v45, %v1609_v55  ;;  %1558 = vst [vmem:[#allocation2 + $0x38] sm:$0xff] %v1542_v56  ;;  %v1541_v48 = vmax.f32 %v1515_v51, %v1516_v59  ;;  %v1441_v12 = vadd.f32 %v1440_v31, %v1280_v17  ;;  %v1521_v13 = vmax.f32 %v1449_v39, 0.0  ;;  %v2914_v55 = vld [vmem:[#allocation5_spill] sm:$0xff] }
 0x170   : > { %v1575_v6 = vld [vmem:[#allocation2 + $0x20] ss:$2 sm:$0xf]  ;;  %v1607_v52 = vld [vmem:[#allocation2 + $0x21] ss:$2 sm:$0xf]  ;;  %v2069_v14 = vpop.f32.mrf.mxu1  ;;  %v2137_v11 = vpop.f32.mrf.mxu0  ;;  %v1307_v56 = vadd.f32 %v2065_v49, %v1146_v33  ;;  %v1299_v47 = vadd.f32 %v2059_v20, %v1138_v32  ;;  %v1159_v17 = vadd.f32 %v2914_v55, %v2603_v38  ;;  %v2068_v31 = vadd.f32 %v2824_v61, %v2819_v22 }
 0x171   : > { %1651 = vst [vmem:[%s2770_s22 + $0x14] sm:$0xf] %v1635_v4  ;;  %v1634_v50 = vmax.f32 %v1575_v6, %v1607_v52  ;;  %1557 = vst [vmem:[#allocation2 + $0x30] sm:$0xff] %v1541_v48  ;;  %v1452_v42 = vadd.f32 %v2137_v11, %v1291_v57  ;;  %v1519_v7 = vmax.f32 %v1441_v12, 0.0  ;;  %v2917_v61 = vld [vmem:[#allocation4_spill] sm:$0xff] }
 0x172   : > { %v2070_v18 = vpop.f32.mrf.mxu1  ;;  %v1443_v43 = vpop.f32.mrf.mxu0  ;;  %v1154_v12 = vadd.f32 %v2917_v61, %v2603_v38  ;;  %v1312_v36 = vadd.f32 %v2068_v31, %v1151_v54 }
 0x173   : > { %1650 = vst [vmem:[%s2770_s22 + $0x10] sm:$0xf] %v1634_v50  ;;  %v1522_v25 = vmax.f32 %v1452_v42, 0.0  ;;  %v1444_v15 = vadd.f32 %v1443_v43, %v1283_v44  ;;  %v2071_v6 = vadd.f32 %v2070_v18, %v2069_v14 }
 0x174   : > { %v2072_v27 = vpop.f32.mrf.mxu1  ;;  %v2140_v34 = vpop.f32.mrf.mxu0 }
 0x175   : > { %v1544_v46 = vmax.f32 %v1521_v13, %v1522_v25  ;;  %v1520_v24 = vmax.f32 %v1444_v15, 0.0  ;;  %v1465_v51 = vadd.f32 %v2140_v34, %v1304_v26 }
 0x176   : > { %v1581_v37 = vld [vmem:[#allocation2 + $0x38] ss:$2 sm:$0xf]  ;;  %v1613_v16 = vld [vmem:[#allocation2 + $0x39] ss:$2 sm:$0xf]  ;;  %v2073_v9 = vpop.f32.mrf.mxu1  ;;  %v1456_v8 = vpop.f32.mrf.mxu0 }
 0x177   : > { %v1637_v19 = vmax.f32 %v1581_v37, %v1613_v16  ;;  %1560 = vst [vmem:[#allocation2 + $0x48] sm:$0xff] %v1544_v46  ;;  %v1543_v53 = vmax.f32 %v1519_v7, %v1520_v24  ;;  %v2074_v23 = vadd.f32 %v2073_v9, %v2072_v27  ;;  %v1457_v10 = vadd.f32 %v1456_v8, %v1296_v1  ;;  %v2918_v37 = vld [vmem:[#allocation7_spill] sm:$0xff] }
 0x178   : > { %v1579_v29 = vld [vmem:[#allocation2 + $0x30] ss:$2 sm:$0xf]  ;;  %v1611_v21 = vld [vmem:[#allocation2 + $0x31] ss:$2 sm:$0xf]  ;;  %v2075_v59 = vpop.f32.mrf.mxu1  ;;  %v2141_v63 = vpop.f32.mrf.mxu0  ;;  %v1315_v27 = vadd.f32 %v2071_v6, %v1154_v12  ;;  %v1167_v16 = vadd.f32 %v2918_v37, %v2603_v38 }
 0x179   : > { %1653 = vst [vmem:[%s2770_s22 + $0x1c] sm:$0xf] %v1637_v19  ;;  %v1636_v5 = vmax.f32 %v1579_v29, %v1611_v21  ;;  %1559 = vst [vmem:[#allocation2 + $0x40] sm:$0xff] %v1543_v53  ;;  %v1468_v45 = vadd.f32 %v2141_v63, %v1307_v56  ;;  %v1525_v39 = vmax.f32 %v1465_v51, 0.0  ;;  %v1523_v44 = vmax.f32 %v1457_v10, 0.0  ;;  %v2919_v56 = vld [vmem:[#allocation8_spill] sm:$0xff] }
 0x17a   : > { %v2076_v4 = vpop.f32.mrf.mxu1  ;;  %v1459_v48 = vpop.f32.mrf.mxu0  ;;  %v1320_v22 = vadd.f32 %v2074_v23, %v1159_v17  ;;  %v1170_v29 = vadd.f32 %v2919_v56, %v2603_v38  ;;  %v2920_v21 = vld [vmem:[#allocation9_spill] sm:$0xff] }
 0x17b   : > { %1652 = vst [vmem:[%s2770_s22 + $0x18] sm:$0xf] %v1636_v5  ;;  %v1526_v57 = vmax.f32 %v1468_v45, 0.0  ;;  %v2077_v58 = vadd.f32 %v2076_v4, %v2075_v59  ;;  %v1460_v41 = vadd.f32 %v1459_v48, %v1299_v47  ;;  %v1175_v59 = vadd.f32 %v2920_v21, %v2603_v38 }
 0x17c   : > { %v2078_v52 = vpop.f32.mrf.mxu1  ;;  %v2144_v11 = vpop.f32.mrf.mxu0 }
 0x17d   : > { %v1546_v50 = vmax.f32 %v1525_v39, %v1526_v57  ;;  %v1524_v28 = vmax.f32 %v1460_v41, 0.0  ;;  %v1481_v14 = vadd.f32 %v2144_v11, %v1320_v22  ;;  %v1323_v18 = vadd.f32 %v2077_v58, %v1162_v35  ;;  %v2921_v35 = vld [vmem:[#allocation10_spill] sm:$0xff] }
 0x17e   : > { %v1585_v42 = vld [vmem:[#allocation2 + $0x48] ss:$2 sm:$0xf]  ;;  %v1617_v60 = vld [vmem:[#allocation2 + $0x49] ss:$2 sm:$0xf]  ;;  %v2079_v40 = vpop.f32.mrf.mxu1  ;;  %v1472_v0 = vpop.f32.mrf.mxu0  ;;  %v1178_v6 = vadd.f32 %v2921_v35, %v2603_v38 }
 0x17f   : > { %v1639_v2 = vmax.f32 %v1585_v42, %v1617_v60  ;;  %1562 = vst [vmem:[#allocation2 + $0x58] sm:$0xff] %v1546_v50  ;;  %v1545_v43 = vmax.f32 %v1523_v44, %v1524_v28  ;;  %v1473_v33 = vadd.f32 %v1472_v0, %v1312_v36  ;;  %v1529_v46 = vmax.f32 %v1481_v14, 0.0 }
 0x180   : > { %v1583_v49 = vld [vmem:[#allocation2 + $0x40] ss:$2 sm:$0xf]  ;;  %v1615_v13 = vld [vmem:[#allocation2 + $0x41] ss:$2 sm:$0xf]  ;;  %v2081_v25 = vpop.f32.mrf.mxu1  ;;  %v2145_v15 = vpop.f32.mrf.mxu0  ;;  %v2080_v24 = vadd.f32 %v2079_v40, %v2078_v52 }
 0x181   : > { %1655 = vst [vmem:[%s2770_s22 + $0x24] sm:$0xf] %v1639_v2  ;;  %v1638_v62 = vmax.f32 %v1583_v49, %v1615_v13  ;;  %1561 = vst [vmem:[#allocation2 + $0x50] sm:$0xff] %v1545_v43  ;;  %v1484_v20 = vadd.f32 %v2145_v15, %v1323_v18  ;;  %v1527_v8 = vmax.f32 %v1473_v33, 0.0 }
 0x182   : > { %v2082_v34 = vpop.f32.mrf.mxu1  ;;  %v1475_v7 = vpop.f32.mrf.mxu0  ;;  %v1328_v17 = vadd.f32 %v2080_v24, %v1167_v16 }
 0x183   : > { %1654 = vst [vmem:[%s2770_s22 + $0x20] sm:$0xf] %v1638_v62  ;;  %v1530_v26 = vmax.f32 %v1484_v20, 0.0  ;;  %v1476_v32 = vadd.f32 %v1475_v7, %v1315_v27  ;;  %v2083_v53 = vadd.f32 %v2082_v34, %v2081_v25 }
 0x184   : > { %v2084_v9 = vpop.f32.mrf.mxu1  ;;  %v2148_v1 = vpop.f32.mrf.mxu0 }
 0x185   : > { %v1548_v19 = vmax.f32 %v1529_v46, %v1530_v26  ;;  %v1528_v51 = vmax.f32 %v1476_v32, 0.0  ;;  %v1331_v3 = vadd.f32 %v2083_v53, %v1170_v29 }
 0x186   : > { %v1589_v63 = vld [vmem:[#allocation2 + $0x58] ss:$2 sm:$0xf]  ;;  %v1621_v47 = vld [vmem:[#allocation2 + $0x59] ss:$2 sm:$0xf]  ;;  %v2085_v5 = vpop.f32.mrf.mxu1  ;;  %v1488_v23 = vpop.f32.mrf.mxu0 }
 0x187   : > { %v1641_v10 = vmax.f32 %v1589_v63, %v1621_v47  ;;  %1564 = vst [vmem:[#allocation2 + $0x68] sm:$0xff] %v1548_v19  ;;  %v1547_v45 = vmax.f32 %v1527_v8, %v1528_v51  ;;  %v2086_v55 = vadd.f32 %v2085_v5, %v2084_v9  ;;  %v1489_v41 = vadd.f32 %v1488_v23, %v1328_v17 }
 0x188   : > { %v1587_v31 = vld [vmem:[#allocation2 + $0x50] ss:$2 sm:$0xf]  ;;  %v1619_v4 = vld [vmem:[#allocation2 + $0x51] ss:$2 sm:$0xf]  ;;  %v2087_v48 = vpop.f32.mrf.mxu1  ;;  %v2149_v39 = vpop.f32.mrf.mxu0 }
 0x189   : > { %1657 = vst [vmem:[%s2770_s22 + $0x2c] sm:$0xf] %v1641_v10  ;;  %v1640_v57 = vmax.f32 %v1587_v31, %v1619_v4  ;;  %1563 = vst [vmem:[#allocation2 + $0x60] sm:$0xff] %v1547_v45  ;;  %v1336_v58 = vadd.f32 %v2086_v55, %v1175_v59  ;;  %v1531_v50 = vmax.f32 %v1489_v41, 0.0 }
 0x18a   : > { %v2088_v54 = vpop.f32.mrf.mxu1  ;;  %v1491_v30 = vpop.f32.mrf.mxu0 }
 0x18b   : > { %1656 = vst [vmem:[%s2770_s22 + $0x28] sm:$0xf] %v1640_v57  ;;  %v2089_v52 = vadd.f32 %v2088_v54, %v2087_v48  ;;  %v1492_v11 = vadd.f32 %v1491_v30, %v1331_v3  ;;  %v1497_v44 = vadd.f32 %v2148_v1, %v1336_v58 }
 0x18d   : > { %v1339_v28 = vadd.f32 %v2089_v52, %v1178_v6  ;;  %v1532_v22 = vmax.f32 %v1492_v11, 0.0  ;;  %v1533_v38 = vmax.f32 %v1497_v44, 0.0 }
 0x18e   : > { %v1593_v61 = vld [vmem:[#allocation2 + $0x68] ss:$2 sm:$0xf]  ;;  %v1625_v12 = vld [vmem:[#allocation2 + $0x69] ss:$2 sm:$0xf] }
 0x18f   : > { %v1643_v42 = vmax.f32 %v1593_v61, %v1625_v12  ;;  %v1500_v60 = vadd.f32 %v2149_v39, %v1339_v28  ;;  %v1549_v40 = vmax.f32 %v1531_v50, %v1532_v22 }
 0x190   : > { %v1591_v36 = vld [vmem:[#allocation2 + $0x60] ss:$2 sm:$0xf]  ;;  %v1623_v0 = vld [vmem:[#allocation2 + $0x61] ss:$2 sm:$0xf] }
 0x191   : > { %1659 = vst [vmem:[%s2770_s22 + $0x34] sm:$0xf] %v1643_v42  ;;  %v1642_v2 = vmax.f32 %v1591_v36, %v1623_v0  ;;  %v1534_v43 = vmax.f32 %v1500_v60, 0.0  ;;  %1565 = vst [vmem:[#allocation2 + $0x70] sm:$0xff] %v1549_v40 }
 0x193   : > { %1658 = vst [vmem:[%s2770_s22 + $0x30] sm:$0xf] %v1642_v2  ;;  %v1550_v14 = vmax.f32 %v1533_v38, %v1534_v43 }
 0x195   : > { %1566 = vst [vmem:[#allocation2 + $0x78] sm:$0xff] %v1550_v14 }
 0x198   : > { %v1595_v18 = vld [vmem:[#allocation2 + $0x70] ss:$2 sm:$0xf]  ;;  %v1627_v49 = vld [vmem:[#allocation2 + $0x71] ss:$2 sm:$0xf] }
 0x199   : > { %v1644_v13 = vmax.f32 %v1595_v18, %v1627_v49 }
 0x19b   : > { %1660 = vst [vmem:[%s2770_s22 + $0x38] sm:$0xf] %v1644_v13 }
 0x19c   : > { %v1597_v25 = vld [vmem:[#allocation2 + $0x78] ss:$2 sm:$0xf]  ;;  %v1629_v15 = vld [vmem:[#allocation2 + $0x79] ss:$2 sm:$0xf] }
 0x19d   : > { %v1645_v62 = vmax.f32 %v1597_v25, %v1629_v15 }
 0x19f   : > { %1661 = vst [vmem:[%s2770_s22 + $0x3c] sm:$0xf] %v1645_v62 }
 0x1a0 PF: > { %s13_s12 = sadd.s32 1, %s2329_s12  }
 0x1a1   : > { %p10_p5 = scmp.ge.s32.totalorder %s13_s12, 4  }
 0x1a3   :  { %12 = sbr.rel (!%p10_p5) target bundleno = 1 (0x1), region = 93 }

// kernel: cifar_cnn_forward.7
= control target key start
LH: loop header
LB: loop body
LE: loop exit
PB: predicated region body
PF: predicated region fallthrough
CT: control target
= control target key end

     0   :  { %s3746_s0 = inlined_call_operand.vmem [shape: f32[8,2048], index: 0, kind: input, shape index: {}]   ;;  %s3747_s1 = inlined_call_operand.vmem [shape: bf16[2048,256], index: 1, kind: input, shape index: {}]   ;;  %s3748_s2 = inlined_call_operand.vmem [shape: f32[1,256], index: 2, kind: input, shape index: {}]   ;;  %s3749_s3 = inlined_call_operand.vmem [shape: bf16[256,128], index: 3, kind: input, shape index: {}]   ;;  %s3750_s4 = inlined_call_operand.vmem [shape: f32[1,128], index: 4, kind: input, shape index: {}]   ;;  %s3751_s5 = inlined_call_operand.hbm [shape: f32[8,128], index: 5, kind: output, shape index: {}]  }
   0x1   :  { %v2420_v0 = vld [vmem:[%s3747_s1 + $0x74] ss:$8 sps:$4 sm:$0xff]   ;;  %v2424_v2 = vld [vmem:[%s3747_s1 + $0x70] ss:$8 sps:$4 sm:$0xff]   ;;  %v2426_v4 = vld [vmem:[%s3747_s1 + $0x64] ss:$8 sps:$4 sm:$0xff]  }
   0x2   :  { %v2422_v1 = vld [vmem:[%s3747_s1 + $0x174] ss:$8 sps:$4 sm:$0xff]   ;;  %1602 = vmatprep.subr.bf16.mxu0 %v2420_v0  ;;  %v2425_v3 = vld [vmem:[%s3747_s1 + $0x170] ss:$8 sps:$4 sm:$0xff]   ;;  %v2428_v5 = vld [vmem:[%s3747_s1 + $0x164] ss:$8 sps:$4 sm:$0xff]  }
   0x3   :  { %1643 = vmatprep.subr.bf16.mxu1 %v2422_v1  ;;  %1603 = vmatpush1.bf16.msra.mxu0 %v2424_v2  ;;  %v2430_v6 = vld [vmem:[%s3747_s1 + $0x60] ss:$8 sps:$4 sm:$0xff]   ;;  %v2432_v8 = vld [vmem:[%s3747_s1 + $0x54] ss:$8 sps:$4 sm:$0xff]   ;;  %v2436_v10 = vld [vmem:[%s3747_s1 + $0x50] ss:$8 sps:$4 sm:$0xff]  }
   0x4   :  { %1644 = vmatpush1.bf16.msra.mxu1 %v2425_v3  ;;  %1604 = vmatprep.subr.bf16.mxu0 %v2426_v4  ;;  %v2431_v7 = vld [vmem:[%s3747_s1 + $0x160] ss:$8 sps:$4 sm:$0xff]   ;;  %v2434_v9 = vld [vmem:[%s3747_s1 + $0x154] ss:$8 sps:$4 sm:$0xff]   ;;  %v2437_v11 = vld [vmem:[%s3747_s1 + $0x150] ss:$8 sps:$4 sm:$0xff]  }
   0x5   :  { %1645 = vmatprep.subr.bf16.mxu1 %v2428_v5  ;;  %v2438_v12 = vld [vmem:[%s3747_s1 + $0x44] ss:$8 sps:$4 sm:$0xff]   ;;  %v2442_v14 = vld [vmem:[%s3747_s1 + $0x40] ss:$8 sps:$4 sm:$0xff]   ;;  %v2444_v16 = vld [vmem:[%s3747_s1 + $0x34] ss:$8 sps:$4 sm:$0xff]  }
   0x6   :  { %v2440_v13 = vld [vmem:[%s3747_s1 + $0x144] ss:$8 sps:$4 sm:$0xff]   ;;  %v2443_v15 = vld [vmem:[%s3747_s1 + $0x140] ss:$8 sps:$4 sm:$0xff]   ;;  %v2446_v17 = vld [vmem:[%s3747_s1 + $0x134] ss:$8 sps:$4 sm:$0xff]  }
   0x7   :  { %1605 = vmatpush1.bf16.msra.mxu0 %v2430_v6  ;;  %v2448_v18 = vld [vmem:[%s3747_s1 + $0x30] ss:$8 sps:$4 sm:$0xff]   ;;  %v2450_v20 = vld [vmem:[%s3747_s1 + $0x24] ss:$8 sps:$4 sm:$0xff]   ;;  %v2454_v22 = vld [vmem:[%s3747_s1 + $0x20] ss:$8 sps:$4 sm:$0xff]  }
   0x8   :  { %1646 = vmatpush1.bf16.msra.mxu1 %v2431_v7  ;;  %1606 = vmatprep.subr.bf16.mxu0 %v2432_v8  ;;  %v2449_v19 = vld [vmem:[%s3747_s1 + $0x130] ss:$8 sps:$4 sm:$0xff]   ;;  %v2452_v21 = vld [vmem:[%s3747_s1 + $0x124] ss:$8 sps:$4 sm:$0xff]   ;;  %v2455_v23 = vld [vmem:[%s3747_s1 + $0x120] ss:$8 sps:$4 sm:$0xff]  }
   0x9   :  { %1647 = vmatprep.subr.bf16.mxu1 %v2434_v9  ;;  %v2456_v24 = vld [vmem:[%s3747_s1 + $0x14] ss:$8 sps:$4 sm:$0xff]   ;;  %v2460_v26 = vld [vmem:[%s3747_s1 + $0x10] ss:$8 sps:$4 sm:$0xff]   ;;  %v2462_v28 = vld [vmem:[%s3747_s1 + $0x4] ss:$8 sps:$4 sm:$0xff]  }
   0xa   :  { %v2458_v25 = vld [vmem:[%s3747_s1 + $0x114] ss:$8 sps:$4 sm:$0xff]   ;;  %v2461_v27 = vld [vmem:[%s3747_s1 + $0x110] ss:$8 sps:$4 sm:$0xff]   ;;  %v2464_v29 = vld [vmem:[%s3747_s1 + $0x104] ss:$8 sps:$4 sm:$0xff]  }
   0xb   :  { %1607 = vmatpush1.bf16.msra.mxu0 %v2436_v10  ;;  %v2466_v30 = vld [vmem:[%s3747_s1] ss:$8 sps:$4 sm:$0xff]   ;;  %v2468_v32 = vld [vmem:[%s3747_s1 + $0xf4] ss:$8 sps:$4 sm:$0xff]   ;;  %v2472_v34 = vld [vmem:[%s3747_s1 + $0xf0] ss:$8 sps:$4 sm:$0xff]  }
   0xc   :  { %1648 = vmatpush1.bf16.msra.mxu1 %v2437_v11  ;;  %1608 = vmatprep.subr.bf16.mxu0 %v2438_v12  ;;  %v2467_v31 = vld [vmem:[%s3747_s1 + $0x100] ss:$8 sps:$4 sm:$0xff]   ;;  %v2470_v33 = vld [vmem:[%s3747_s1 + $0x1f4] ss:$8 sps:$4 sm:$0xff]   ;;  %v2473_v35 = vld [vmem:[%s3747_s1 + $0x1f0] ss:$8 sps:$4 sm:$0xff]  }
   0xd   :  { %1649 = vmatprep.subr.bf16.mxu1 %v2440_v13  ;;  %v2474_v36 = vld [vmem:[%s3747_s1 + $0xe4] ss:$8 sps:$4 sm:$0xff]   ;;  %v2478_v38 = vld [vmem:[%s3747_s1 + $0xe0] ss:$8 sps:$4 sm:$0xff]   ;;  %v2480_v40 = vld [vmem:[%s3747_s1 + $0xd4] ss:$8 sps:$4 sm:$0xff]  }
   0xe   :  { %v2476_v37 = vld [vmem:[%s3747_s1 + $0x1e4] ss:$8 sps:$4 sm:$0xff]   ;;  %v2479_v39 = vld [vmem:[%s3747_s1 + $0x1e0] ss:$8 sps:$4 sm:$0xff]   ;;  %v2482_v41 = vld [vmem:[%s3747_s1 + $0x1d4] ss:$8 sps:$4 sm:$0xff]  }
   0xf   :  { %1609 = vmatpush1.bf16.msra.mxu0 %v2442_v14  ;;  %v2484_v42 = vld [vmem:[%s3747_s1 + $0xd0] ss:$8 sps:$4 sm:$0xff]   ;;  %v2486_v44 = vld [vmem:[%s3747_s1 + $0xc4] ss:$8 sps:$4 sm:$0xff]   ;;  %v2490_v47 = vld [vmem:[%s3747_s1 + $0xc0] ss:$8 sps:$4 sm:$0xff]  }
  0x10   :  { %1650 = vmatpush1.bf16.msra.mxu1 %v2443_v15  ;;  %1610 = vmatprep.subr.bf16.mxu0 %v2444_v16  ;;  %v2485_v43 = vld [vmem:[%s3747_s1 + $0x1d0] ss:$8 sps:$4 sm:$0xff]   ;;  %v2488_v45 = vld [vmem:[%s3747_s1 + $0x1c4] ss:$8 sps:$4 sm:$0xff]   ;;  %v2491_v48 = vld [vmem:[%s3747_s1 + $0x1c0] ss:$8 sps:$4 sm:$0xff]  }
  0x11   :  { %1651 = vmatprep.subr.bf16.mxu1 %v2446_v17  ;;  %v23_v46 = vld [vmem:[%s3746_s0 + $0x8] sm:$0xff]  ;;  %v25_v50 = vld [vmem:[%s3746_s0 + $0x18] sm:$0xff]  ;;  %v22_v4 = vld [vmem:[%s3746_s0] sm:$0xff] }
  0x12   :  { %v39_v49 = vpack.c.bf16 %v23_v46, %v23_v46  ;;  %v2492_v51 = vld [vmem:[%s3747_s1 + $0xb4] ss:$8 sps:$4 sm:$0xff]   ;;  %v41_v52 = vpack.c.bf16 %v25_v50, %v25_v50  ;;  %v2496_v54 = vld [vmem:[%s3747_s1 + $0xb0] ss:$8 sps:$4 sm:$0xff]   ;;  %v2498_v56 = vld [vmem:[%s3747_s1 + $0xa4] ss:$8 sps:$4 sm:$0xff]   ;;  %v38_v8 = vpack.c.bf16 %v22_v4, %v22_v4 }
  0x13   :  { %1611 = vmatpush1.bf16.msra.mxu0 %v2448_v18  ;;  %v2494_v53 = vld [vmem:[%s3747_s1 + $0x1b4] ss:$8 sps:$4 sm:$0xff]   ;;  %v2497_v55 = vld [vmem:[%s3747_s1 + $0x1b0] ss:$8 sps:$4 sm:$0xff]   ;;  %v2500_v57 = vld [vmem:[%s3747_s1 + $0x1a4] ss:$8 sps:$4 sm:$0xff]  }
  0x14   :  { %1652 = vmatpush1.bf16.msra.mxu1 %v2449_v19  ;;  %1612 = vmatprep.subr.bf16.mxu0 %v2450_v20  ;;  %v2502_v58 = vld [vmem:[%s3747_s1 + $0xa0] ss:$8 sps:$4 sm:$0xff]   ;;  %v2504_v60 = vld [vmem:[%s3747_s1 + $0x94] ss:$8 sps:$4 sm:$0xff]   ;;  %v2508_v62 = vld [vmem:[%s3747_s1 + $0x90] ss:$8 sps:$4 sm:$0xff]  }
  0x15   :  { %1653 = vmatprep.subr.bf16.mxu1 %v2452_v21  ;;  %1634 = vmatprep.mubr.bf16.mxu0 %v39_v49  ;;  %v2503_v59 = vld [vmem:[%s3747_s1 + $0x1a0] ss:$8 sps:$4 sm:$0xff]   ;;  %v2506_v61 = vld [vmem:[%s3747_s1 + $0x194] ss:$8 sps:$4 sm:$0xff]   ;;  %v2509_v63 = vld [vmem:[%s3747_s1 + $0x190] ss:$8 sps:$4 sm:$0xff]  }
  0x16   :  { %1675 = vmatprep.mubr.bf16.mxu1 %v41_v52  ;;  %v2510_v0 = vld [vmem:[%s3747_s1 + $0x84] ss:$8 sps:$4 sm:$0xff]   ;;  %v2514_v2 = vld [vmem:[%s3747_s1 + $0x80] ss:$8 sps:$4 sm:$0xff]   ;;  %v24_v5 = vld [vmem:[%s3746_s0 + $0x10] sm:$0xff] }
  0x17   :  { %1613 = vmatpush1.bf16.msra.mxu0 %v2454_v22  ;;  %v2512_v1 = vld [vmem:[%s3747_s1 + $0x184] ss:$8 sps:$4 sm:$0xff]   ;;  %v2515_v3 = vld [vmem:[%s3747_s1 + $0x180] ss:$8 sps:$4 sm:$0xff]   ;;  %v2518_v6 = vld [vmem:[%s3747_s1 + $0x274] ss:$8 sps:$4 sm:$0xff]   ;;  %v40_v9 = vpack.c.bf16 %v24_v5, %v24_v5 }
  0x18   :  { %1654 = vmatpush1.bf16.msra.mxu1 %v2455_v23  ;;  %1614 = vmatprep.subr.bf16.mxu0 %v2456_v24  ;;  %v2521_v7 = vld [vmem:[%s3747_s1 + $0x374] ss:$8 sps:$4 sm:$0xff]   ;;  %v2516_v10 = vld [vmem:[%s3747_s1 + $0x270] ss:$8 sps:$4 sm:$0xff]   ;;  %v2524_v12 = vld [vmem:[%s3747_s1 + $0x264] ss:$8 sps:$4 sm:$0xff]  }
  0x19   :  { %1655 = vmatprep.subr.bf16.mxu1 %v2458_v25  ;;  %v2519_v11 = vld [vmem:[%s3747_s1 + $0x370] ss:$8 sps:$4 sm:$0xff]   ;;  %v2527_v13 = vld [vmem:[%s3747_s1 + $0x364] ss:$8 sps:$4 sm:$0xff]   ;;  %v2522_v14 = vld [vmem:[%s3747_s1 + $0x260] ss:$8 sps:$4 sm:$0xff]  }
  0x1a   :  { %v2525_v15 = vld [vmem:[%s3747_s1 + $0x360] ss:$8 sps:$4 sm:$0xff]   ;;  %v2530_v16 = vld [vmem:[%s3747_s1 + $0x254] ss:$8 sps:$4 sm:$0xff]   ;;  %v2528_v18 = vld [vmem:[%s3747_s1 + $0x250] ss:$8 sps:$4 sm:$0xff]  }
  0x1b   :  { %1615 = vmatpush1.bf16.msra.mxu0 %v2460_v26  ;;  %v2533_v17 = vld [vmem:[%s3747_s1 + $0x354] ss:$8 sps:$4 sm:$0xff]   ;;  %v2531_v19 = vld [vmem:[%s3747_s1 + $0x350] ss:$8 sps:$4 sm:$0xff]   ;;  %v2536_v20 = vld [vmem:[%s3747_s1 + $0x244] ss:$8 sps:$4 sm:$0xff]  }
  0x1c   :  { %1656 = vmatpush1.bf16.msra.mxu1 %v2461_v27  ;;  %1616 = vmatprep.subr.bf16.mxu0 %v2462_v28  ;;  %v2539_v21 = vld [vmem:[%s3747_s1 + $0x344] ss:$8 sps:$4 sm:$0xff]   ;;  %v2534_v22 = vld [vmem:[%s3747_s1 + $0x240] ss:$8 sps:$4 sm:$0xff]   ;;  %v2542_v24 = vld [vmem:[%s3747_s1 + $0x234] ss:$8 sps:$4 sm:$0xff]  }
  0x1d   :  { %1657 = vmatprep.subr.bf16.mxu1 %v2464_v29  ;;  %v2537_v23 = vld [vmem:[%s3747_s1 + $0x340] ss:$8 sps:$4 sm:$0xff]   ;;  %v2545_v25 = vld [vmem:[%s3747_s1 + $0x334] ss:$8 sps:$4 sm:$0xff]   ;;  %v2540_v26 = vld [vmem:[%s3747_s1 + $0x230] ss:$8 sps:$4 sm:$0xff]  }
  0x1e   :  { %v2543_v27 = vld [vmem:[%s3747_s1 + $0x330] ss:$8 sps:$4 sm:$0xff]   ;;  %v2548_v28 = vld [vmem:[%s3747_s1 + $0x224] ss:$8 sps:$4 sm:$0xff]   ;;  %v2570_v50 = vld [vmem:[%s3747_s1 + $0x2e0] ss:$8 sps:$4 sm:$0xff]  }
  0x1f   :  { %1617 = vmatpush1.bf16.msra.mxu0 %v2466_v30  ;;  %v2551_v29 = vld [vmem:[%s3747_s1 + $0x324] ss:$8 sps:$4 sm:$0xff]   ;;  %v2546_v30 = vld [vmem:[%s3747_s1 + $0x220] ss:$8 sps:$4 sm:$0xff]   ;;  %v2564_v46 = vld [vmem:[%s3747_s1 + $0x2f0] ss:$8 sps:$4 sm:$0xff]  }
  0x20   :  { %1658 = vmatpush1.bf16.msra.mxu1 %v2467_v31  ;;  %1618 = vmatprep.subr.bf16.mxu0 %v2468_v32  ;;  %v2549_v31 = vld [vmem:[%s3747_s1 + $0x320] ss:$8 sps:$4 sm:$0xff]   ;;  %v2554_v32 = vld [vmem:[%s3747_s1 + $0x214] ss:$8 sps:$4 sm:$0xff]   ;;  %v2575_v49 = vld [vmem:[%s3747_s1 + $0x3e4] ss:$8 sps:$4 sm:$0xff]  }
  0x21   :  { %1659 = vmatprep.subr.bf16.mxu1 %v2470_v33  ;;  %v2557_v33 = vld [vmem:[%s3747_s1 + $0x314] ss:$8 sps:$4 sm:$0xff]  }
  0x22   :  { %v2578_v52 = vld [vmem:[%s3747_s1 + $0x2d4] ss:$8 sps:$4 sm:$0xff]  }
  0x23   :  { %1619 = vmatpush2.bf16.msra.mxu0 %v2472_v34  ;;  %v27_v34 = vld [vmem:[%s3746_s0 + $0x28] sm:$0xff]  ;;  %v2602_v4 = vld [vmem:[%s3747_s1 + $0x294] ss:$8 sps:$4 sm:$0xff]  }
  0x24   :  { %1660 = vmatpush2.bf16.msra.mxu1 %v2473_v35  ;;  %1620 = vmatprep.subr.bf16.mxu0 %v2474_v36  ;;  %v2552_v35 = vld [vmem:[%s3747_s1 + $0x210] ss:$8 sps:$4 sm:$0xff]   ;;  %v2605_v5 = vld [vmem:[%s3747_s1 + $0x394] ss:$8 sps:$4 sm:$0xff]  }
  0x25   :  { %1661 = vmatprep.subr.bf16.mxu1 %v2476_v37  ;;  %v2555_v36 = vld [vmem:[%s3747_s1 + $0x310] ss:$8 sps:$4 sm:$0xff]   ;;  %v43_v37 = vpack.c.bf16 %v27_v34, %v27_v34  ;;  %v2630_v34 = vld [vmem:[%s3747_s1 + $0x440] ss:$8 sps:$4 sm:$0xff]  }
  0x27   :  { %1621 = vmatpush2.bf16.msra.mxu0 %v2478_v38  ;;  %v29_v38 = vld [vmem:[%s3746_s0 + $0x38] sm:$0xff] }
  0x28   :  { %1662 = vmatpush2.bf16.msra.mxu1 %v2479_v39  ;;  %1622 = vmatprep.subr.bf16.mxu0 %v2480_v40  ;;  %v2560_v39 = vld [vmem:[%s3747_s1 + $0x204] ss:$8 sps:$4 sm:$0xff]   ;;  %v45_v40 = vpack.c.bf16 %v29_v38, %v29_v38  ;;  %v2636_v38 = vld [vmem:[%s3747_s1 + $0x430] ss:$8 sps:$4 sm:$0xff]  }
  0x29   :  { %1663 = vmatprep.subr.bf16.mxu1 %v2482_v41  ;;  %v2563_v41 = vld [vmem:[%s3747_s1 + $0x304] ss:$8 sps:$4 sm:$0xff]  }
  0x2b   :  { %1623 = vmatpush2.bf16.msra.mxu0 %v2484_v42  ;;  %v2558_v42 = vld [vmem:[%s3747_s1 + $0x200] ss:$8 sps:$4 sm:$0xff]  }
  0x2c   :  { %1664 = vmatpush2.bf16.msra.mxu1 %v2485_v43  ;;  %1624 = vmatprep.subr.bf16.mxu0 %v2486_v44  ;;  %v2561_v43 = vld [vmem:[%s3747_s1 + $0x300] ss:$8 sps:$4 sm:$0xff]   ;;  %v2566_v44 = vld [vmem:[%s3747_s1 + $0x2f4] ss:$8 sps:$4 sm:$0xff]  }
  0x2d   :  { %1665 = vmatprep.subr.bf16.mxu1 %v2488_v45  ;;  %v2569_v45 = vld [vmem:[%s3747_s1 + $0x3f4] ss:$8 sps:$4 sm:$0xff]  }
  0x2f   :  { %1625 = vmatpush2.bf16.msra.mxu0 %v2490_v47  ;;  %v2567_v47 = vld [vmem:[%s3747_s1 + $0x3f0] ss:$8 sps:$4 sm:$0xff]  }
  0x30   :  { %1666 = vmatpush2.bf16.msra.mxu1 %v2491_v48  ;;  %1626 = vmatprep.subr.bf16.mxu0 %v2492_v51  ;;  %v2572_v48 = vld [vmem:[%s3747_s1 + $0x2e4] ss:$8 sps:$4 sm:$0xff]   ;;  %v2573_v51 = vld [vmem:[%s3747_s1 + $0x3e0] ss:$8 sps:$4 sm:$0xff]  }
  0x31   :  { %1667 = vmatprep.subr.bf16.mxu1 %v2494_v53  ;;  %v2581_v53 = vld [vmem:[%s3747_s1 + $0x3d4] ss:$8 sps:$4 sm:$0xff]  }
  0x33   :  { %1627 = vmatpush2.bf16.msra.mxu0 %v2496_v54  ;;  %v2576_v54 = vld [vmem:[%s3747_s1 + $0x2d0] ss:$8 sps:$4 sm:$0xff]  }
  0x34   :  { %1668 = vmatpush2.bf16.msra.mxu1 %v2497_v55  ;;  %1628 = vmatprep.subr.bf16.mxu0 %v2498_v56  ;;  %v2579_v55 = vld [vmem:[%s3747_s1 + $0x3d0] ss:$8 sps:$4 sm:$0xff]   ;;  %v2584_v56 = vld [vmem:[%s3747_s1 + $0x2c4] ss:$8 sps:$4 sm:$0xff]  }
  0x35   :  { %1669 = vmatprep.subr.bf16.mxu1 %v2500_v57  ;;  %v2587_v57 = vld [vmem:[%s3747_s1 + $0x3c4] ss:$8 sps:$4 sm:$0xff]  }
  0x37   :  { %1629 = vmatpush2.bf16.msra.mxu0 %v2502_v58  ;;  %v2582_v58 = vld [vmem:[%s3747_s1 + $0x2c0] ss:$8 sps:$4 sm:$0xff]  }
  0x38   :  { %1670 = vmatpush2.bf16.msra.mxu1 %v2503_v59  ;;  %1630 = vmatprep.subr.bf16.mxu0 %v2504_v60  ;;  %v2585_v59 = vld [vmem:[%s3747_s1 + $0x3c0] ss:$8 sps:$4 sm:$0xff]   ;;  %v2590_v60 = vld [vmem:[%s3747_s1 + $0x2b4] ss:$8 sps:$4 sm:$0xff]  }
  0x39   :  { %1671 = vmatprep.subr.bf16.mxu1 %v2506_v61  ;;  %v2593_v61 = vld [vmem:[%s3747_s1 + $0x3b4] ss:$8 sps:$4 sm:$0xff]  }
  0x3b   :  { %1631 = vmatpush2.bf16.msra.mxu0 %v2508_v62  ;;  %v2588_v62 = vld [vmem:[%s3747_s1 + $0x2b0] ss:$8 sps:$4 sm:$0xff]  }
  0x3c   :  { %1672 = vmatpush2.bf16.msra.mxu1 %v2509_v63  ;;  %1632 = vmatprep.subr.bf16.mxu0 %v2510_v0  ;;  %v2591_v63 = vld [vmem:[%s3747_s1 + $0x3b0] ss:$8 sps:$4 sm:$0xff]   ;;  %v2596_v0 = vld [vmem:[%s3747_s1 + $0x2a4] ss:$8 sps:$4 sm:$0xff]  }
  0x3d   :  { %1673 = vmatprep.subr.bf16.mxu1 %v2512_v1  ;;  %v2599_v1 = vld [vmem:[%s3747_s1 + $0x3a4] ss:$8 sps:$4 sm:$0xff]  }
  0x3f   :  { %1633 = vmatpush2.bf16.msra.mxu0 %v2514_v2  ;;  %v2594_v2 = vld [vmem:[%s3747_s1 + $0x2a0] ss:$8 sps:$4 sm:$0xff]  }
  0x40   :  { %1674 = vmatpush2.bf16.msra.mxu1 %v2515_v3  ;;  %1684 = vmatprep.subr.bf16.mxu0 %v2518_v6  ;;  %v2597_v3 = vld [vmem:[%s3747_s1 + $0x3a0] ss:$8 sps:$4 sm:$0xff]   ;;  %v2600_v6 = vld [vmem:[%s3747_s1 + $0x290] ss:$8 sps:$4 sm:$0xff]  }
  0x41   :  { %1725 = vmatprep.subr.bf16.mxu1 %v2521_v7  ;;  %v2603_v7 = vld [vmem:[%s3747_s1 + $0x390] ss:$8 sps:$4 sm:$0xff]  }
  0x42   :  { %1635 = vmatmul.mubr.bf16.vlgmr.msra.gmra.mxu0 %v38_v8  ;;  %v2608_v8 = vld [vmem:[%s3747_s1 + $0x284] ss:$8 sps:$4 sm:$0xff]  }
  0x43   :  { %1676 = vmatmul.mubr.bf16.vlgmr.msra.gmra.mxu1 %v40_v9  ;;  %1685 = vmatpush1.bf16.msra.mxu0 %v2516_v10  ;;  %v2611_v9 = vld [vmem:[%s3747_s1 + $0x384] ss:$8 sps:$4 sm:$0xff]   ;;  %v2606_v10 = vld [vmem:[%s3747_s1 + $0x280] ss:$8 sps:$4 sm:$0xff]  }
  0x44   :  { %1726 = vmatpush1.bf16.msra.mxu1 %v2519_v11  ;;  %1686 = vmatprep.subr.bf16.mxu0 %v2524_v12  ;;  %v2609_v11 = vld [vmem:[%s3747_s1 + $0x380] ss:$8 sps:$4 sm:$0xff]  }
  0x45   :  { %1727 = vmatprep.subr.bf16.mxu1 %v2527_v13  ;;  %1716 = vmatprep.mubr.bf16.mxu0 %v43_v37  ;;  %v26_v12 = vld [vmem:[%s3746_s0 + $0x20] sm:$0xff]  ;;  %v28_v13 = vld [vmem:[%s3746_s0 + $0x30] sm:$0xff] }
  0x46   :  { %1757 = vmatprep.mubr.bf16.mxu1 %v45_v40  ;;  %v2641_v37 = vld [vmem:[%s3747_s1 + $0x534] ss:$8 sps:$4 sm:$0xff]   ;;  %v2644_v40 = vld [vmem:[%s3747_s1 + $0x424] ss:$8 sps:$4 sm:$0xff]  }
  0x47   :  { %1687 = vmatpush1.bf16.msra.mxu0 %v2522_v14  ;;  %v2614_v14 = vld [vmem:[%s3747_s1 + $0x474] ss:$8 sps:$4 sm:$0xff]  }
  0x48   :  { %1728 = vmatpush1.bf16.msra.mxu1 %v2525_v15  ;;  %1688 = vmatprep.subr.bf16.mxu0 %v2530_v16  ;;  %v2617_v15 = vld [vmem:[%s3747_s1 + $0x574] ss:$8 sps:$4 sm:$0xff]   ;;  %v42_v16 = vpack.c.bf16 %v26_v12, %v26_v12 }
  0x49   :  { %1729 = vmatprep.subr.bf16.mxu1 %v2533_v17  ;;  %v44_v17 = vpack.c.bf16 %v28_v13, %v28_v13  ;;  %v2698_v12 = vld [vmem:[%s3747_s1 + $0x494] ss:$8 sps:$4 sm:$0xff]  }
  0x4a   :  { %v2701_v13 = vld [vmem:[%s3747_s1 + $0x594] ss:$8 sps:$4 sm:$0xff]  }
  0x4b   :  { %1689 = vmatpush1.bf16.msra.mxu0 %v2528_v18  ;;  %v2612_v18 = vld [vmem:[%s3747_s1 + $0x470] ss:$8 sps:$4 sm:$0xff]  }
  0x4c   :  { %1730 = vmatpush1.bf16.msra.mxu1 %v2531_v19  ;;  %1690 = vmatprep.subr.bf16.mxu0 %v2536_v20  ;;  %v2615_v19 = vld [vmem:[%s3747_s1 + $0x570] ss:$8 sps:$4 sm:$0xff]   ;;  %v2620_v20 = vld [vmem:[%s3747_s1 + $0x464] ss:$8 sps:$4 sm:$0xff]  }
  0x4d   :  { %1731 = vmatprep.subr.bf16.mxu1 %v2539_v21  ;;  %v2623_v21 = vld [vmem:[%s3747_s1 + $0x564] ss:$8 sps:$4 sm:$0xff]  }
  0x4f   :  { %1691 = vmatpush1.bf16.msra.mxu0 %v2534_v22  ;;  %v31_v22 = vld [vmem:[%s3746_s0 + $0x48] sm:$0xff] }
  0x50   :  { %1732 = vmatpush1.bf16.msra.mxu1 %v2537_v23  ;;  %1692 = vmatprep.subr.bf16.mxu0 %v2542_v24  ;;  %v2618_v23 = vld [vmem:[%s3747_s1 + $0x460] ss:$8 sps:$4 sm:$0xff]  }
  0x51   :  { %1733 = vmatprep.subr.bf16.mxu1 %v2545_v25  ;;  %v2621_v24 = vld [vmem:[%s3747_s1 + $0x560] ss:$8 sps:$4 sm:$0xff]   ;;  %v47_v25 = vpack.c.bf16 %v31_v22, %v31_v22 }
  0x53   :  { %1693 = vmatpush1.bf16.msra.mxu0 %v2540_v26  ;;  %v33_v26 = vld [vmem:[%s3746_s0 + $0x58] sm:$0xff] }
  0x54   :  { %1734 = vmatpush1.bf16.msra.mxu1 %v2543_v27  ;;  %1694 = vmatprep.subr.bf16.mxu0 %v2548_v28  ;;  %v2626_v27 = vld [vmem:[%s3747_s1 + $0x454] ss:$8 sps:$4 sm:$0xff]   ;;  %v49_v28 = vpack.c.bf16 %v33_v26, %v33_v26 }
  0x55   :  { %1735 = vmatprep.subr.bf16.mxu1 %v2551_v29  ;;  %v2629_v29 = vld [vmem:[%s3747_s1 + $0x554] ss:$8 sps:$4 sm:$0xff]  }
  0x57   :  { %1695 = vmatpush1.bf16.msra.mxu0 %v2546_v30  ;;  %v2624_v30 = vld [vmem:[%s3747_s1 + $0x450] ss:$8 sps:$4 sm:$0xff]  }
  0x58   :  { %1736 = vmatpush1.bf16.msra.mxu1 %v2549_v31  ;;  %1696 = vmatprep.subr.bf16.mxu0 %v2554_v32  ;;  %v2627_v31 = vld [vmem:[%s3747_s1 + $0x550] ss:$8 sps:$4 sm:$0xff]   ;;  %v2632_v32 = vld [vmem:[%s3747_s1 + $0x444] ss:$8 sps:$4 sm:$0xff]  }
  0x59   :  { %1737 = vmatprep.subr.bf16.mxu1 %v2557_v33  ;;  %v2635_v33 = vld [vmem:[%s3747_s1 + $0x544] ss:$8 sps:$4 sm:$0xff]  }
  0x5b   :  { %1697 = vmatpush1.bf16.msra.mxu0 %v2552_v35  ;;  %v2633_v35 = vld [vmem:[%s3747_s1 + $0x540] ss:$8 sps:$4 sm:$0xff]  }
  0x5c   :  { %1738 = vmatpush1.bf16.msra.mxu1 %v2555_v36  ;;  %1698 = vmatprep.subr.bf16.mxu0 %v2560_v39  ;;  %v2638_v36 = vld [vmem:[%s3747_s1 + $0x434] ss:$8 sps:$4 sm:$0xff]   ;;  %v2639_v39 = vld [vmem:[%s3747_s1 + $0x530] ss:$8 sps:$4 sm:$0xff]  }
  0x5d   :  { %1739 = vmatprep.subr.bf16.mxu1 %v2563_v41  ;;  %v2647_v41 = vld [vmem:[%s3747_s1 + $0x524] ss:$8 sps:$4 sm:$0xff]  }
  0x5f   :  { %1699 = vmatpush1.bf16.msra.mxu0 %v2558_v42  ;;  %v2642_v42 = vld [vmem:[%s3747_s1 + $0x420] ss:$8 sps:$4 sm:$0xff]  }
  0x60   :  { %1740 = vmatpush1.bf16.msra.mxu1 %v2561_v43  ;;  %1700 = vmatprep.subr.bf16.mxu0 %v2566_v44  ;;  %v2645_v43 = vld [vmem:[%s3747_s1 + $0x520] ss:$8 sps:$4 sm:$0xff]   ;;  %v2650_v44 = vld [vmem:[%s3747_s1 + $0x414] ss:$8 sps:$4 sm:$0xff]  }
  0x61   :  { %1741 = vmatprep.subr.bf16.mxu1 %v2569_v45  ;;  %v2653_v45 = vld [vmem:[%s3747_s1 + $0x514] ss:$8 sps:$4 sm:$0xff]  }
  0x63   :  { %1701 = vmatpush2.bf16.msra.mxu0 %v2564_v46  ;;  %v2648_v46 = vld [vmem:[%s3747_s1 + $0x410] ss:$8 sps:$4 sm:$0xff]  }
  0x64   :  { %1742 = vmatpush2.bf16.msra.mxu1 %v2567_v47  ;;  %1702 = vmatprep.subr.bf16.mxu0 %v2572_v48  ;;  %v2651_v47 = vld [vmem:[%s3747_s1 + $0x510] ss:$8 sps:$4 sm:$0xff]   ;;  %v2656_v48 = vld [vmem:[%s3747_s1 + $0x404] ss:$8 sps:$4 sm:$0xff]  }
  0x65   :  { %1743 = vmatprep.subr.bf16.mxu1 %v2575_v49  ;;  %v2659_v49 = vld [vmem:[%s3747_s1 + $0x504] ss:$8 sps:$4 sm:$0xff]  }
  0x67   :  { %1703 = vmatpush2.bf16.msra.mxu0 %v2570_v50  ;;  %v2654_v50 = vld [vmem:[%s3747_s1 + $0x400] ss:$8 sps:$4 sm:$0xff]  }
  0x68   :  { %1744 = vmatpush2.bf16.msra.mxu1 %v2573_v51  ;;  %1704 = vmatprep.subr.bf16.mxu0 %v2578_v52  ;;  %v2657_v51 = vld [vmem:[%s3747_s1 + $0x500] ss:$8 sps:$4 sm:$0xff]   ;;  %v2662_v52 = vld [vmem:[%s3747_s1 + $0x4f4] ss:$8 sps:$4 sm:$0xff]  }
  0x69   :  { %1745 = vmatprep.subr.bf16.mxu1 %v2581_v53  ;;  %v2665_v53 = vld [vmem:[%s3747_s1 + $0x5f4] ss:$8 sps:$4 sm:$0xff]  }
  0x6b   :  { %1705 = vmatpush2.bf16.msra.mxu0 %v2576_v54  ;;  %v2660_v54 = vld [vmem:[%s3747_s1 + $0x4f0] ss:$8 sps:$4 sm:$0xff]  }
  0x6c   :  { %1746 = vmatpush2.bf16.msra.mxu1 %v2579_v55  ;;  %1706 = vmatprep.subr.bf16.mxu0 %v2584_v56  ;;  %v2663_v55 = vld [vmem:[%s3747_s1 + $0x5f0] ss:$8 sps:$4 sm:$0xff]   ;;  %v2668_v56 = vld [vmem:[%s3747_s1 + $0x4e4] ss:$8 sps:$4 sm:$0xff]  }
  0x6d   :  { %1747 = vmatprep.subr.bf16.mxu1 %v2587_v57  ;;  %v2671_v57 = vld [vmem:[%s3747_s1 + $0x5e4] ss:$8 sps:$4 sm:$0xff]  }
  0x6f   :  { %1707 = vmatpush2.bf16.msra.mxu0 %v2582_v58  ;;  %v2666_v58 = vld [vmem:[%s3747_s1 + $0x4e0] ss:$8 sps:$4 sm:$0xff]  }
  0x70   :  { %1748 = vmatpush2.bf16.msra.mxu1 %v2585_v59  ;;  %1708 = vmatprep.subr.bf16.mxu0 %v2590_v60  ;;  %v2669_v59 = vld [vmem:[%s3747_s1 + $0x5e0] ss:$8 sps:$4 sm:$0xff]   ;;  %v2674_v60 = vld [vmem:[%s3747_s1 + $0x4d4] ss:$8 sps:$4 sm:$0xff]  }
  0x71   :  { %1749 = vmatprep.subr.bf16.mxu1 %v2593_v61  ;;  %v2677_v61 = vld [vmem:[%s3747_s1 + $0x5d4] ss:$8 sps:$4 sm:$0xff]  }
  0x73   :  { %1709 = vmatpush2.bf16.msra.mxu0 %v2588_v62  ;;  %v2672_v62 = vld [vmem:[%s3747_s1 + $0x4d0] ss:$8 sps:$4 sm:$0xff]  }
  0x74   :  { %1750 = vmatpush2.bf16.msra.mxu1 %v2591_v63  ;;  %1710 = vmatprep.subr.bf16.mxu0 %v2596_v0  ;;  %v2675_v63 = vld [vmem:[%s3747_s1 + $0x5d0] ss:$8 sps:$4 sm:$0xff]   ;;  %v2680_v0 = vld [vmem:[%s3747_s1 + $0x4c4] ss:$8 sps:$4 sm:$0xff]  }
  0x75   :  { %1751 = vmatprep.subr.bf16.mxu1 %v2599_v1  ;;  %v2683_v1 = vld [vmem:[%s3747_s1 + $0x5c4] ss:$8 sps:$4 sm:$0xff]  }
  0x77   :  { %1711 = vmatpush2.bf16.msra.mxu0 %v2594_v2  ;;  %v2678_v2 = vld [vmem:[%s3747_s1 + $0x4c0] ss:$8 sps:$4 sm:$0xff]  }
  0x78   :  { %1752 = vmatpush2.bf16.msra.mxu1 %v2597_v3  ;;  %1712 = vmatprep.subr.bf16.mxu0 %v2602_v4  ;;  %v2681_v3 = vld [vmem:[%s3747_s1 + $0x5c0] ss:$8 sps:$4 sm:$0xff]   ;;  %v2686_v4 = vld [vmem:[%s3747_s1 + $0x4b4] ss:$8 sps:$4 sm:$0xff]  }
  0x79   :  { %1753 = vmatprep.subr.bf16.mxu1 %v2605_v5  ;;  %v2689_v5 = vld [vmem:[%s3747_s1 + $0x5b4] ss:$8 sps:$4 sm:$0xff]  }
  0x7b   :  { %1713 = vmatpush2.bf16.msra.mxu0 %v2600_v6  ;;  %v2684_v6 = vld [vmem:[%s3747_s1 + $0x4b0] ss:$8 sps:$4 sm:$0xff]  }
  0x7c   :  { %1754 = vmatpush2.bf16.msra.mxu1 %v2603_v7  ;;  %1714 = vmatprep.subr.bf16.mxu0 %v2608_v8  ;;  %v2687_v7 = vld [vmem:[%s3747_s1 + $0x5b0] ss:$8 sps:$4 sm:$0xff]   ;;  %v2692_v8 = vld [vmem:[%s3747_s1 + $0x4a4] ss:$8 sps:$4 sm:$0xff]  }
  0x7d   :  { %1755 = vmatprep.subr.bf16.mxu1 %v2611_v9  ;;  %v2695_v9 = vld [vmem:[%s3747_s1 + $0x5a4] ss:$8 sps:$4 sm:$0xff]  }
  0x7f   :  { %1715 = vmatpush2.bf16.msra.mxu0 %v2606_v10  ;;  %v2690_v10 = vld [vmem:[%s3747_s1 + $0x4a0] ss:$8 sps:$4 sm:$0xff]  }
  0x80   :  { %1756 = vmatpush2.bf16.msra.mxu1 %v2609_v11  ;;  %1766 = vmatprep.subr.bf16.mxu0 %v2614_v14  ;;  %v2693_v11 = vld [vmem:[%s3747_s1 + $0x5a0] ss:$8 sps:$4 sm:$0xff]   ;;  %v2696_v14 = vld [vmem:[%s3747_s1 + $0x490] ss:$8 sps:$4 sm:$0xff]  }
  0x81   :  { %1807 = vmatprep.subr.bf16.mxu1 %v2617_v15  ;;  %v2699_v15 = vld [vmem:[%s3747_s1 + $0x590] ss:$8 sps:$4 sm:$0xff]  }
  0x82   :  { %1717 = vmatmul.mubr.bf16.vlgmr.msra.gmra.mxu0 %v42_v16  ;;  %v2704_v16 = vld [vmem:[%s3747_s1 + $0x484] ss:$8 sps:$4 sm:$0xff]  }
  0x83   :  { %1758 = vmatmul.mubr.bf16.vlgmr.msra.gmra.mxu1 %v44_v17  ;;  %1767 = vmatpush1.bf16.msra.mxu0 %v2612_v18  ;;  %v2707_v17 = vld [vmem:[%s3747_s1 + $0x584] ss:$8 sps:$4 sm:$0xff]   ;;  %v2702_v18 = vld [vmem:[%s3747_s1 + $0x480] ss:$8 sps:$4 sm:$0xff]  }
  0x84   :  { %1808 = vmatpush1.bf16.msra.mxu1 %v2615_v19  ;;  %1768 = vmatprep.subr.bf16.mxu0 %v2620_v20 }
  0x85   :  { %1809 = vmatprep.subr.bf16.mxu1 %v2623_v21  ;;  %1798 = vmatprep.mubr.bf16.mxu0 %v47_v25 }
  0x86   :  { %1839 = vmatprep.mubr.bf16.mxu1 %v49_v28 }
  0x87   :  { %1769 = vmatpush1.bf16.msra.mxu0 %v2618_v23 }
  0x88   :  { %1810 = vmatpush1.bf16.msra.mxu1 %v2621_v24  ;;  %1770 = vmatprep.subr.bf16.mxu0 %v2626_v27 }
  0x89   :  { %1811 = vmatprep.subr.bf16.mxu1 %v2629_v29 }
  0x8b   :  { %1771 = vmatpush1.bf16.msra.mxu0 %v2624_v30 }
  0x8c   :  { %1812 = vmatpush1.bf16.msra.mxu1 %v2627_v31  ;;  %1772 = vmatprep.subr.bf16.mxu0 %v2632_v32 }
  0x8d   :  { %1813 = vmatprep.subr.bf16.mxu1 %v2635_v33 }
  0x8f   :  { %1773 = vmatpush1.bf16.msra.mxu0 %v2630_v34 }
  0x90   :  { %1814 = vmatpush1.bf16.msra.mxu1 %v2633_v35  ;;  %1774 = vmatprep.subr.bf16.mxu0 %v2638_v36 }
  0x91   :  { %1815 = vmatprep.subr.bf16.mxu1 %v2641_v37 }
  0x93   :  { %1775 = vmatpush1.bf16.msra.mxu0 %v2636_v38 }
  0x94   :  { %1816 = vmatpush1.bf16.msra.mxu1 %v2639_v39  ;;  %1776 = vmatprep.subr.bf16.mxu0 %v2644_v40 }
  0x95   :  { %1817 = vmatprep.subr.bf16.mxu1 %v2647_v41 }
  0x97   :  { %1777 = vmatpush1.bf16.msra.mxu0 %v2642_v42 }
  0x98   :  { %1818 = vmatpush1.bf16.msra.mxu1 %v2645_v43  ;;  %1778 = vmatprep.subr.bf16.mxu0 %v2650_v44 }
  0x99   :  { %1819 = vmatprep.subr.bf16.mxu1 %v2653_v45 }
  0x9b   :  { %1779 = vmatpush1.bf16.msra.mxu0 %v2648_v46 }
  0x9c   :  { %1820 = vmatpush1.bf16.msra.mxu1 %v2651_v47  ;;  %1780 = vmatprep.subr.bf16.mxu0 %v2656_v48 }
  0x9d   :  { %1821 = vmatprep.subr.bf16.mxu1 %v2659_v49 }
  0x9f   :  { %1781 = vmatpush1.bf16.msra.mxu0 %v2654_v50 }
  0xa0   :  { %1822 = vmatpush1.bf16.msra.mxu1 %v2657_v51  ;;  %1782 = vmatprep.subr.bf16.mxu0 %v2662_v52 }
  0xa1   :  { %1823 = vmatprep.subr.bf16.mxu1 %v2665_v53 }
  0xa3   :  { %1783 = vmatpush2.bf16.msra.mxu0 %v2660_v54 }
  0xa4   :  { %1824 = vmatpush2.bf16.msra.mxu1 %v2663_v55  ;;  %1784 = vmatprep.subr.bf16.mxu0 %v2668_v56 }
  0xa5   :  { %1825 = vmatprep.subr.bf16.mxu1 %v2671_v57 }
  0xa7   :  { %1785 = vmatpush2.bf16.msra.mxu0 %v2666_v58 }
  0xa8   :  { %1826 = vmatpush2.bf16.msra.mxu1 %v2669_v59  ;;  %1786 = vmatprep.subr.bf16.mxu0 %v2674_v60 }
  0xa9   :  { %1827 = vmatprep.subr.bf16.mxu1 %v2677_v61 }
  0xab   :  { %1787 = vmatpush2.bf16.msra.mxu0 %v2672_v62 }
  0xac   :  { %1828 = vmatpush2.bf16.msra.mxu1 %v2675_v63  ;;  %1788 = vmatprep.subr.bf16.mxu0 %v2680_v0 }
  0xad   :  { %1829 = vmatprep.subr.bf16.mxu1 %v2683_v1 }
  0xaf   :  { %1789 = vmatpush2.bf16.msra.mxu0 %v2678_v2 }
  0xb0   :  { %1830 = vmatpush2.bf16.msra.mxu1 %v2681_v3  ;;  %1790 = vmatprep.subr.bf16.mxu0 %v2686_v4 }
  0xb1   :  { %1831 = vmatprep.subr.bf16.mxu1 %v2689_v5 }
  0xb3   :  { %1791 = vmatpush2.bf16.msra.mxu0 %v2684_v6 }
  0xb4   :  { %1832 = vmatpush2.bf16.msra.mxu1 %v2687_v7  ;;  %1792 = vmatprep.subr.bf16.mxu0 %v2692_v8 }
  0xb5   :  { %1833 = vmatprep.subr.bf16.mxu1 %v2695_v9 }
  0xb7   :  { %1793 = vmatpush2.bf16.msra.mxu0 %v2690_v10 }
  0xb8   :  { %1834 = vmatpush2.bf16.msra.mxu1 %v2693_v11  ;;  %1794 = vmatprep.subr.bf16.mxu0 %v2698_v12 }
  0xb9   :  { %1835 = vmatprep.subr.bf16.mxu1 %v2701_v13 }
  0xba   :  { %10 = vsyncpa [#allocation3], 0  ;;  %v2705_v19 = vld [vmem:[%s3747_s1 + $0x580] ss:$8 sps:$4 sm:$0xff]   ;;  %v32_v21 = vld [vmem:[%s3746_s0 + $0x50] sm:$0xff]  ;;  %s2842_s16 = smov [#allocation2]  }
  0xbb   :  { %1795 = vmatpush2.bf16.msra.mxu0 %v2696_v14  ;;  %v30_v20 = vld [vmem:[%s3746_s0 + $0x40] sm:$0xff]  ;;  %v2710_v22 = vld [vmem:[%s3747_s1 + $0x674] ss:$8 sps:$4 sm:$0xff]   ;;  %v48_v25 = vpack.c.bf16 %v32_v21, %v32_v21  ;;  %v35_v26 = vld [vmem:[%s3746_s0 + $0x68] sm:$0xff]  ;;  %s2116_s17 = sshll.u32 %s2842_s16, 4  ;;  %s2117_s17 = int_to_ptr.vmem [resolvable:$true] %s2116_s17 }
  0xbc   :  { %1836 = vmatpush2.bf16.msra.mxu1 %v2699_v15  ;;  %1796 = vmatprep.subr.bf16.mxu0 %v2704_v16  ;;  %v2713_v23 = vld [vmem:[%s3747_s1 + $0x774] ss:$8 sps:$4 sm:$0xff]   ;;  %v46_v24 = vpack.c.bf16 %v30_v20, %v30_v20  ;;  %v2708_v28 = vld [vmem:[%s3747_s1 + $0x670] ss:$8 sps:$4 sm:$0xff]   ;;  %v2716_v30 = vld [vmem:[%s3747_s1 + $0x664] ss:$8 sps:$4 sm:$0xff]   ;;  %v51_v32 = vpack.c.bf16 %v35_v26, %v35_v26  ;;  %v312_v20 = vlaneseq  ;;  %p2825_p1 = scmp.lt.s32.totalorder %s2117_s17, %s2117_s17 }
  0xbd   :  { %1837 = vmatprep.subr.bf16.mxu1 %v2707_v17  ;;  %v37_v27 = vld [vmem:[%s3746_s0 + $0x78] sm:$0xff]  ;;  %v2719_v31 = vld [vmem:[%s3747_s1 + $0x764] ss:$8 sps:$4 sm:$0xff]   ;;  %v2714_v34 = vld [vmem:[%s3747_s1 + $0x660] ss:$8 sps:$4 sm:$0xff]   ;;  %s2820_s18 = scalar_lea.vmem %s2117_s17, 128 }
  0xbe   :  { %v2711_v29 = vld [vmem:[%s3747_s1 + $0x770] ss:$8 sps:$4 sm:$0xff]   ;;  %v53_v33 = vpack.c.bf16 %v37_v27, %v37_v27  ;;  %v2717_v35 = vld [vmem:[%s3747_s1 + $0x760] ss:$8 sps:$4 sm:$0xff]   ;;  %v2722_v36 = vld [vmem:[%s3747_s1 + $0x654] ss:$8 sps:$4 sm:$0xff]   ;;  %p2821_p0 = scmp.ne.s32.totalorder %s2117_s17, %s2820_s18  ;;  %p2826_p2 = scmp.lt.s32.totalorder %s2820_s18, %s2820_s18 }
  0xbf   :  { %1797 = vmatpush2.bf16.msra.mxu0 %v2702_v18  ;;  %v2725_v37 = vld [vmem:[%s3747_s1 + $0x754] ss:$8 sps:$4 sm:$0xff]   ;;  %v2720_v38 = vld [vmem:[%s3747_s1 + $0x650] ss:$8 sps:$4 sm:$0xff]   ;;  %v2728_v40 = vld [vmem:[%s3747_s1 + $0x644] ss:$8 sps:$4 sm:$0xff]  }
  0xc0   :  { %1838 = vmatpush2.bf16.msra.mxu1 %v2705_v19  ;;  %1848 = vmatprep.subr.bf16.mxu0 %v2710_v22  ;;  %v2723_v39 = vld [vmem:[%s3747_s1 + $0x750] ss:$8 sps:$4 sm:$0xff]   ;;  %v2731_v41 = vld [vmem:[%s3747_s1 + $0x744] ss:$8 sps:$4 sm:$0xff]   ;;  %v2726_v42 = vld [vmem:[%s3747_s1 + $0x640] ss:$8 sps:$4 sm:$0xff]   ;;  %p2827_p3 = por %p2826_p2, %p2825_p1 }
  0xc1   :  { %1889 = vmatprep.subr.bf16.mxu1 %v2713_v23  ;;  %v2729_v43 = vld [vmem:[%s3747_s1 + $0x740] ss:$8 sps:$4 sm:$0xff]   ;;  %v2734_v44 = vld [vmem:[%s3747_s1 + $0x634] ss:$8 sps:$4 sm:$0xff]   ;;  %v2732_v46 = vld [vmem:[%s3747_s1 + $0x630] ss:$8 sps:$4 sm:$0xff]  }
  0xc2   :  { %1799 = vmatmul.mubr.bf16.vlgmr.msra.gmra.mxu0 %v46_v24  ;;  %v2737_v45 = vld [vmem:[%s3747_s1 + $0x734] ss:$8 sps:$4 sm:$0xff]   ;;  %v2735_v47 = vld [vmem:[%s3747_s1 + $0x730] ss:$8 sps:$4 sm:$0xff]   ;;  %v2740_v48 = vld [vmem:[%s3747_s1 + $0x624] ss:$8 sps:$4 sm:$0xff]   ;;  %p2828_p4 = pnand %p2827_p3, %p2821_p0 }
  0xc3   :  { %1840 = vmatmul.mubr.bf16.vlgmr.msra.gmra.mxu1 %v48_v25  ;;  %1849 = vmatpush1.bf16.msra.mxu0 %v2708_v28  ;;  %v2743_v49 = vld [vmem:[%s3747_s1 + $0x724] ss:$8 sps:$4 sm:$0xff]   ;;  %v2738_v50 = vld [vmem:[%s3747_s1 + $0x620] ss:$8 sps:$4 sm:$0xff]   ;;  %v2746_v52 = vld [vmem:[%s3747_s1 + $0x614] ss:$8 sps:$4 sm:$0xff]  }
  0xc4   :  { %1890 = vmatpush1.bf16.msra.mxu1 %v2711_v29  ;;  %1850 = vmatprep.subr.bf16.mxu0 %v2716_v30  ;;  %v2741_v51 = vld [vmem:[%s3747_s1 + $0x720] ss:$8 sps:$4 sm:$0xff]   ;;  %v2749_v53 = vld [vmem:[%s3747_s1 + $0x714] ss:$8 sps:$4 sm:$0xff]   ;;  %v2744_v54 = vld [vmem:[%s3747_s1 + $0x610] ss:$8 sps:$4 sm:$0xff]  }
  0xc5   :  { %1891 = vmatprep.subr.bf16.mxu1 %v2719_v31  ;;  %1880 = vmatprep.mubr.bf16.mxu0 %v51_v32  ;;  %v2747_v55 = vld [vmem:[%s3747_s1 + $0x710] ss:$8 sps:$4 sm:$0xff]   ;;  %v2752_v56 = vld [vmem:[%s3747_s1 + $0x604] ss:$8 sps:$4 sm:$0xff]   ;;  %v2750_v58 = vld [vmem:[%s3747_s1 + $0x600] ss:$8 sps:$4 sm:$0xff]  }
  0xc6   :  { %1921 = vmatprep.mubr.bf16.mxu1 %v53_v33  ;;  %v2755_v57 = vld [vmem:[%s3747_s1 + $0x704] ss:$8 sps:$4 sm:$0xff]   ;;  %v2753_v59 = vld [vmem:[%s3747_s1 + $0x700] ss:$8 sps:$4 sm:$0xff]   ;;  %v2758_v60 = vld [vmem:[%s3747_s1 + $0x6f4] ss:$8 sps:$4 sm:$0xff]  }
  0xc7   :  { %1851 = vmatpush1.bf16.msra.mxu0 %v2714_v34  ;;  %v2761_v61 = vld [vmem:[%s3747_s1 + $0x7f4] ss:$8 sps:$4 sm:$0xff]   ;;  %v2756_v62 = vld [vmem:[%s3747_s1 + $0x6f0] ss:$8 sps:$4 sm:$0xff]   ;;  %v2764_v0 = vld [vmem:[%s3747_s1 + $0x6e4] ss:$8 sps:$4 sm:$0xff]  }
  0xc8   :  { %1892 = vmatpush1.bf16.msra.mxu1 %v2717_v35  ;;  %1852 = vmatprep.subr.bf16.mxu0 %v2722_v36  ;;  %v2759_v63 = vld [vmem:[%s3747_s1 + $0x7f0] ss:$8 sps:$4 sm:$0xff]   ;;  %v2767_v1 = vld [vmem:[%s3747_s1 + $0x7e4] ss:$8 sps:$4 sm:$0xff]   ;;  %v2762_v2 = vld [vmem:[%s3747_s1 + $0x6e0] ss:$8 sps:$4 sm:$0xff]  }
  0xc9   :  { %1893 = vmatprep.subr.bf16.mxu1 %v2725_v37  ;;  %v2765_v3 = vld [vmem:[%s3747_s1 + $0x7e0] ss:$8 sps:$4 sm:$0xff]   ;;  %v2770_v4 = vld [vmem:[%s3747_s1 + $0x6d4] ss:$8 sps:$4 sm:$0xff]   ;;  %v2768_v6 = vld [vmem:[%s3747_s1 + $0x6d0] ss:$8 sps:$4 sm:$0xff]  }
  0xca   :  { %v2773_v5 = vld [vmem:[%s3747_s1 + $0x7d4] ss:$8 sps:$4 sm:$0xff]   ;;  %v2771_v7 = vld [vmem:[%s3747_s1 + $0x7d0] ss:$8 sps:$4 sm:$0xff]   ;;  %v2776_v8 = vld [vmem:[%s3747_s1 + $0x6c4] ss:$8 sps:$4 sm:$0xff]  }
  0xcb   :  { %1853 = vmatpush1.bf16.msra.mxu0 %v2720_v38  ;;  %v2779_v9 = vld [vmem:[%s3747_s1 + $0x7c4] ss:$8 sps:$4 sm:$0xff]   ;;  %v2774_v10 = vld [vmem:[%s3747_s1 + $0x6c0] ss:$8 sps:$4 sm:$0xff]   ;;  %v2782_v12 = vld [vmem:[%s3747_s1 + $0x6b4] ss:$8 sps:$4 sm:$0xff]  }
  0xcc   :  { %1894 = vmatpush1.bf16.msra.mxu1 %v2723_v39  ;;  %1854 = vmatprep.subr.bf16.mxu0 %v2728_v40  ;;  %v2777_v11 = vld [vmem:[%s3747_s1 + $0x7c0] ss:$8 sps:$4 sm:$0xff]   ;;  %v2785_v13 = vld [vmem:[%s3747_s1 + $0x7b4] ss:$8 sps:$4 sm:$0xff]   ;;  %v2780_v14 = vld [vmem:[%s3747_s1 + $0x6b0] ss:$8 sps:$4 sm:$0xff]  }
  0xcd   :  { %1895 = vmatprep.subr.bf16.mxu1 %v2731_v41  ;;  %v2783_v15 = vld [vmem:[%s3747_s1 + $0x7b0] ss:$8 sps:$4 sm:$0xff]   ;;  %v2788_v16 = vld [vmem:[%s3747_s1 + $0x6a4] ss:$8 sps:$4 sm:$0xff]   ;;  %v2786_v18 = vld [vmem:[%s3747_s1 + $0x6a0] ss:$8 sps:$4 sm:$0xff]  }
  0xce   :  { %v2791_v17 = vld [vmem:[%s3747_s1 + $0x7a4] ss:$8 sps:$4 sm:$0xff]   ;;  %v2789_v19 = vld [vmem:[%s3747_s1 + $0x7a0] ss:$8 sps:$4 sm:$0xff]   ;;  %v2794_v21 = vld [vmem:[%s3747_s1 + $0x694] ss:$8 sps:$4 sm:$0xff]  }
  0xcf   :  { %1855 = vmatpush1.bf16.msra.mxu0 %v2726_v42  ;;  %v2797_v22 = vld [vmem:[%s3747_s1 + $0x794] ss:$8 sps:$4 sm:$0xff]   ;;  %v2792_v23 = vld [vmem:[%s3747_s1 + $0x690] ss:$8 sps:$4 sm:$0xff]   ;;  %v313_v25 = vshrl.u32 %v312_v20, 7  ;;  %v34_v31 = vld [vmem:[%s3746_s0 + $0x60] sm:$0xff] }
  0xd0   :  { %1896 = vmatpush1.bf16.msra.mxu1 %v2729_v43  ;;  %1856 = vmatprep.subr.bf16.mxu0 %v2734_v44  ;;  %v2795_v24 = vld [vmem:[%s3747_s1 + $0x790] ss:$8 sps:$4 sm:$0xff]   ;;  %v2800_v26 = vld [vmem:[%s3747_s1 + $0x684] ss:$8 sps:$4 sm:$0xff]   ;;  %v2798_v28 = vld [vmem:[%s3747_s1 + $0x680] ss:$8 sps:$4 sm:$0xff]   ;;  %v50_v35 = vpack.c.bf16 %v34_v31, %v34_v31 }
  0xd1   :  { %1897 = vmatprep.subr.bf16.mxu1 %v2737_v45  ;;  %v2803_v27 = vld [vmem:[%s3747_s1 + $0x784] ss:$8 sps:$4 sm:$0xff]   ;;  %v2801_v29 = vld [vmem:[%s3747_s1 + $0x780] ss:$8 sps:$4 sm:$0xff]   ;;  %v314_v30 = vsub.s32 0, %v313_v25  ;;  %v36_v32 = vld [vmem:[%s3746_s0 + $0x70] sm:$0xff] }
  0xd2   :  { %v310_v33 = vld [vmem:[%s3748_s2] sm:$0x3]  ;;  %v318_v34 = vsub.s32 1, %v313_v25  ;;  %v52_v36 = vpack.c.bf16 %v36_v32, %v36_v32 }
  0xd3   :  { %1857 = vmatpush1.bf16.msra.mxu0 %v2732_v46  ;;  %v315_v37 = vrot.slane %v310_v33, %v314_v30 }
  0xd4   :  { %1898 = vmatpush1.bf16.msra.mxu1 %v2735_v47  ;;  %1858 = vmatprep.subr.bf16.mxu0 %v2740_v48  ;;  %v319_v38 = vrot.slane %v310_v33, %v318_v34 }
  0xd5   :  { %1899 = vmatprep.subr.bf16.mxu1 %v2743_v49 }
  0xd7   :  { %1859 = vmatpush1.bf16.msra.mxu0 %v2738_v50 }
  0xd8   :  { %1900 = vmatpush1.bf16.msra.mxu1 %v2741_v51  ;;  %1860 = vmatprep.subr.bf16.mxu0 %v2746_v52  ;;  %v2804_v51 = vld [vmem:[%s3749_s3 + $0x78] sm:$0xff]  }
  0xd9   :  { %1901 = vmatprep.subr.bf16.mxu1 %v2749_v53  ;;  %v2805_v52 = vld [vmem:[%s3749_s3 + $0x38] sm:$0xff]   ;;  %v2806_v53 = vld [vmem:[%s3749_s3 + $0x70] sm:$0xff]  }
  0xdb   :  { %1861 = vmatpush1.bf16.msra.mxu0 %v2744_v54  ;;  %v2807_v54 = vld [vmem:[%s3749_s3 + $0x30] sm:$0xff]  }
  0xdc   :  { %1902 = vmatpush1.bf16.msra.mxu1 %v2747_v55  ;;  %1862 = vmatprep.subr.bf16.mxu0 %v2752_v56  ;;  %v2808_v55 = vld [vmem:[%s3749_s3 + $0x68] sm:$0xff]  }
  0xdd   :  { %1903 = vmatprep.subr.bf16.mxu1 %v2755_v57  ;;  %v2809_v56 = vld [vmem:[%s3749_s3 + $0x28] sm:$0xff]   ;;  %v2810_v57 = vld [vmem:[%s3749_s3 + $0x60] sm:$0xff]  }
  0xdf   :  { %1863 = vmatpush1.bf16.msra.mxu0 %v2750_v58  ;;  %v2811_v58 = vld [vmem:[%s3749_s3 + $0x20] sm:$0xff]  }
  0xe0   :  { %1904 = vmatpush1.bf16.msra.mxu1 %v2753_v59  ;;  %1864 = vmatprep.subr.bf16.mxu0 %v2758_v60  ;;  %v2812_v59 = vld [vmem:[%s3749_s3 + $0x58] sm:$0xff]  }
  0xe1   :  { %1905 = vmatprep.subr.bf16.mxu1 %v2761_v61  ;;  %v2813_v60 = vld [vmem:[%s3749_s3 + $0x18] sm:$0xff]   ;;  %v2814_v61 = vld [vmem:[%s3749_s3 + $0x50] sm:$0xff]  }
  0xe3   :  { %1865 = vmatpush2.bf16.msra.mxu0 %v2756_v62  ;;  %v2815_v62 = vld [vmem:[%s3749_s3 + $0x10] sm:$0xff]  }
  0xe4   :  { %1906 = vmatpush2.bf16.msra.mxu1 %v2759_v63  ;;  %1866 = vmatprep.subr.bf16.mxu0 %v2764_v0 }
  0xe5   :  { %1907 = vmatprep.subr.bf16.mxu1 %v2767_v1 }
  0xe7   :  { %1867 = vmatpush2.bf16.msra.mxu0 %v2762_v2 }
  0xe8   :  { %1908 = vmatpush2.bf16.msra.mxu1 %v2765_v3  ;;  %1868 = vmatprep.subr.bf16.mxu0 %v2770_v4  ;;  %v2816_v4 = vld [vmem:[%s3749_s3 + $0x48] sm:$0xff]  }
  0xe9   :  { %1909 = vmatprep.subr.bf16.mxu1 %v2773_v5 }
  0xeb   :  { %1869 = vmatpush2.bf16.msra.mxu0 %v2768_v6 }
  0xec   :  { %1910 = vmatpush2.bf16.msra.mxu1 %v2771_v7  ;;  %1870 = vmatprep.subr.bf16.mxu0 %v2776_v8  ;;  %v2817_v7 = vld [vmem:[%s3749_s3 + $0x8] sm:$0xff]  }
  0xed   :  { %1911 = vmatprep.subr.bf16.mxu1 %v2779_v9 }
  0xef   :  { %1871 = vmatpush2.bf16.msra.mxu0 %v2774_v10 }
  0xf0   :  { %1912 = vmatpush2.bf16.msra.mxu1 %v2777_v11  ;;  %1872 = vmatprep.subr.bf16.mxu0 %v2782_v12 }
  0xf1   :  { %1913 = vmatprep.subr.bf16.mxu1 %v2785_v13  ;;  %v2818_v13 = vld [vmem:[%s3749_s3 + $0x40] sm:$0xff]  }
  0xf3   :  { %1873 = vmatpush2.bf16.msra.mxu0 %v2780_v14  ;;  %v2819_v14 = vld [vmem:[%s3749_s3] sm:$0xff]  }
  0xf4   :  { %1914 = vmatpush2.bf16.msra.mxu1 %v2783_v15  ;;  %1874 = vmatprep.subr.bf16.mxu0 %v2788_v16 }
  0xf5   :  { %1915 = vmatprep.subr.bf16.mxu1 %v2791_v17 }
  0xf7   :  { %1875 = vmatpush2.bf16.msra.mxu0 %v2786_v18 }
  0xf8   :  { %1916 = vmatpush2.bf16.msra.mxu1 %v2789_v19  ;;  %1876 = vmatprep.subr.bf16.mxu0 %v2794_v21 }
  0xf9   :  { %1917 = vmatprep.subr.bf16.mxu1 %v2797_v22 }
  0xfb   :  { %1877 = vmatpush2.bf16.msra.mxu0 %v2792_v23 }
  0xfc   :  { %1918 = vmatpush2.bf16.msra.mxu1 %v2795_v24  ;;  %1878 = vmatprep.subr.bf16.mxu0 %v2800_v26 }
  0xfd   :  { %1919 = vmatprep.subr.bf16.mxu1 %v2803_v27 }
  0xff   :  { %1879 = vmatpush2.bf16.msra.mxu0 %v2798_v28 }
 0x100   :  { %1920 = vmatpush2.bf16.msra.mxu1 %v2801_v29  ;;  %2397 = vmatprep.subr.bf16.mxu0 %v2804_v51 }
 0x102   :  { %v1636_v39 = vpop.f32.mrf.mxu0  ;;  %1881 = vmatmul.mubr.bf16.vlgmr.msra.gmra.mxu0 %v50_v35 }
 0x103   :  { %v1677_v40 = vpop.f32.mrf.mxu1  ;;  %1922 = vmatmul.mubr.bf16.vlgmr.msra.gmra.mxu1 %v52_v36  ;;  %v1637_v41 = vadd.f32 %v1636_v39, %v315_v37  ;;  %2398 = vmatpush3.bf16.msra.mxu0 %v2805_v52 }
 0x104   :  { %v1638_v42 = vpop.f32.mrf.mxu0  ;;  %2399 = vmatprep.subr.bf16.mxu0 %v2806_v53 }
 0x105   :  { %v1679_v43 = vpop.f32.mrf.mxu1  ;;  %v1678_v44 = vadd.f32 %v1677_v40, %v1637_v41  ;;  %v1639_v45 = vadd.f32 %v1638_v42, %v319_v38 }
 0x106   :  { %v1640_v46 = vpop.f32.mrf.mxu0 }
 0x107   :  { %v1681_v47 = vpop.f32.mrf.mxu1  ;;  %v1680_v48 = vadd.f32 %v1679_v43, %v1639_v45  ;;  %2400 = vmatpush3.bf16.msra.mxu0 %v2807_v54  ;;  %v2380_v45 = vld [vmem:[%s3750_s4] ss:$0 sm:$0xff] }
 0x108   :  { %v1641_v49 = vpop.f32.mrf.mxu0  ;;  %2401 = vmatprep.subr.bf16.mxu0 %v2808_v55 }
 0x109   :  { %v1682_v50 = vpop.f32.mrf.mxu1 }
 0x10b   :  { %2402 = vmatpush3.bf16.msra.mxu0 %v2809_v56 }
 0x10c   :  { %2403 = vmatprep.subr.bf16.mxu0 %v2810_v57 }
 0x10f   :  { %2404 = vmatpush3.bf16.msra.mxu0 %v2811_v58 }
 0x110   :  { %2405 = vmatprep.subr.bf16.mxu0 %v2812_v59 }
 0x113   :  { %2406 = vmatpush3.bf16.msra.mxu0 %v2813_v60 }
 0x114   :  { %2407 = vmatprep.subr.bf16.mxu0 %v2814_v61 }
 0x117   :  { %2408 = vmatpush3.bf16.msra.mxu0 %v2815_v62 }
 0x118   :  { %2409 = vmatprep.subr.bf16.mxu0 %v2816_v4 }
 0x11b   :  { %2410 = vmatpush3.bf16.msra.mxu0 %v2817_v7 }
 0x11c   :  { %2411 = vmatprep.subr.bf16.mxu0 %v2818_v13 }
 0x11f   :  { %2412 = vmatpush3.bf16.msra.mxu0 %v2819_v14 }
 0x142   :  { %v1718_v63 = vpop.f32.mrf.mxu0 }
 0x143   :  { %v1759_v0 = vpop.f32.mrf.mxu1  ;;  %v1719_v1 = vadd.f32 %v1718_v63, %v1678_v44 }
 0x144   :  { %v1720_v2 = vpop.f32.mrf.mxu0 }
 0x145   :  { %v1761_v3 = vpop.f32.mrf.mxu1  ;;  %v1760_v5 = vadd.f32 %v1759_v0, %v1719_v1  ;;  %v1721_v6 = vadd.f32 %v1720_v2, %v1680_v48 }
 0x146   :  { %v1722_v8 = vpop.f32.mrf.mxu0 }
 0x147   :  { %v1763_v9 = vpop.f32.mrf.mxu1  ;;  %v1762_v10 = vadd.f32 %v1761_v3, %v1721_v6 }
 0x148   :  { %v1723_v11 = vpop.f32.mrf.mxu0 }
 0x149   :  { %v1764_v12 = vpop.f32.mrf.mxu1 }
 0x182   :  { %v1800_v15 = vpop.f32.mrf.mxu0 }
 0x183   :  { %v1841_v16 = vpop.f32.mrf.mxu1  ;;  %v1801_v17 = vadd.f32 %v1800_v15, %v1760_v5 }
 0x184   :  { %v1802_v18 = vpop.f32.mrf.mxu0 }
 0x185   :  { %v1843_v19 = vpop.f32.mrf.mxu1  ;;  %v1842_v20 = vadd.f32 %v1841_v16, %v1801_v17  ;;  %v1803_v25 = vadd.f32 %v1802_v18, %v1762_v10 }
 0x186   :  { %v1804_v21 = vpop.f32.mrf.mxu0 }
 0x187   :  { %v1845_v22 = vpop.f32.mrf.mxu1  ;;  %v1844_v28 = vadd.f32 %v1843_v19, %v1803_v25 }
 0x188   :  { %v1805_v23 = vpop.f32.mrf.mxu0 }
 0x189   :  { %v1846_v24 = vpop.f32.mrf.mxu1 }
 0x1c2   :  { %v1882_v26 = vpop.f32.mrf.mxu0 }
 0x1c3   :  { %v1923_v27 = vpop.f32.mrf.mxu1  ;;  %v1883_v29 = vadd.f32 %v1882_v26, %v1842_v20 }
 0x1c4   :  { %v1884_v30 = vpop.f32.mrf.mxu0 }
 0x1c5   :  { %v1925_v31 = vpop.f32.mrf.mxu1  ;;  %v1924_v32 = vadd.f32 %v1923_v27, %v1883_v29  ;;  %v1885_v33 = vadd.f32 %v1884_v30, %v1844_v28 }
 0x1c6   :  { %v1886_v34 = vpop.f32.mrf.mxu0 }
 0x1c7   :  { %v1927_v35 = vpop.f32.mrf.mxu1  ;;  %v1926_v36 = vadd.f32 %v1925_v31, %v1885_v33  ;;  %v1930_v37 = vmax.f32 %v1924_v32, 0.0 }
 0x1c8   :  { %v1887_v38 = vpop.f32.mrf.mxu0 }
 0x1c9   :  { %v1928_v39 = vpop.f32.mrf.mxu1  ;;  %v1931_v40 = vmax.f32 %v1926_v36, 0.0  ;;  %v1932_v42 = vpack.c.bf16 %v1930_v37, %v1930_v37 }
 0x1cb   :  { %v1933_v41 = vpack.c.bf16 %v1931_v40, %v1931_v40 }
 0x1cd   :  { %2101 = vmatprep.mubr.bf16.mxu0 %v1933_v41 }
 0x1ce   :  { %2102 = vmatmul.mubr.bf16.vlgmr.msra.gmra.mxu0 %v1932_v42 }
 0x28e   :  { %v2413_v43 = vpop.f32.mrf.mxu0 }
 0x290   :  { %v2414_v44 = vpop.f32.mrf.mxu0 }
 0x291   :  { %v2415_v46 = vadd.f32 %v2414_v44, %v2413_v43 }
 0x292   :  { %v2416_v47 = vpop.f32.mrf.mxu0 }
 0x293   :  { %v2104_v48 = vadd.f32 %v2415_v46, %v2380_v45 }
 0x294   :  { %v2417_v49 = vpop.f32.mrf.mxu0 }
 0x295   :  { %2109 = vst [vmem:[#allocation2] sm:$0xff] %v2104_v48 }
 0x296   :  { %2831 = shalt.err (!%p2828_p4)
}
 0x297   :  { %2119 = dma.vmem_to_hbm [thread:$0]  %s2117_s17, 128, %s3751_s5, [#allocation3]  }
 0x298   :  { %2840 = dma.done.wait [#allocation3], 128  }
 0x299   :  { %2841 = vsyncadd [#allocation3], 4294967168 }
 0x29a   :  { %2123 = vsyncpa [#allocation3], 1 }

</bundles_post_ra>
